<compile_context>
chip_gen: v7x
topology: tpu7x:2x2x1
jax: 0.10.0
libtpu: 0.0.40
codegen_flags: <defaults>
</compile_context>

<pallas_src>
import functools
import math

import jax
import jax.numpy as jnp
from jax import lax
from jax.experimental import pallas as pl
from jax.experimental.pallas import tpu as pltpu

# ---------------- config (small but BERT-consistent: Linear(768, num_tags)) ----
VOCAB = 100
H = 768
N_HEADS = 12
D_HEAD = 64
FFN = 3072
NUM_TAGS = 5
TAGS_PAD = 128          # classifier head pre-padded to one full lane tile
MAX_POS = 16
LN_EPS = 1e-12


def _round_up(x, m):
    return (x + m - 1) // m * m


# ------------------------------ linear kernel ----------------------------------
# Single K block: the whole (M, K) activation and a (K, tn) weight slab per grid
# step; bias (+ tanh-GELU) fused in the epilogue.  M = B*S is tiny, so there is
# nothing to gain from a K grid axis -- it only added per-step overhead and
# accumulator zero/readback traffic.
def _linear_kernel(x_ref, w_ref, b_ref, o_ref, *, activation):
    out = jnp.dot(x_ref[...], w_ref[...], preferred_element_type=jnp.float32)
    out = out + b_ref[...]
    if activation == "gelu":
        # TODO(synk): HF BERT uses erf-based GELU; tanh approximation kept (EUP-friendly).
        out = 0.5 * out * (1.0 + jnp.tanh(
            0.7978845608028654 * (out + 0.044715 * out * out * out)))
    o_ref[...] = out.astype(o_ref.dtype)


def pallas_linear(x, w, b, activation=None, out_dtype=jnp.bfloat16):
    """x: (M, K) bf16, w: (K, N) bf16 (pre-padded), b: (1, N) f32."""
    M, K = x.shape
    Kw, N = w.shape
    assert K == Kw
    Mp = _round_up(M, 8)
    if Mp != M:
        x = jnp.pad(x, ((0, Mp - M), (0, 0)))
    if N % 256 == 0:
        tn = 256            # 256-wide N blocks fill the v6e/v7x MXU columns
    elif N % 128 == 0:
        tn = 128
    else:
        raise ValueError("output dim must be pre-padded to a multiple of 128")
    out = pl.pallas_call(
        functools.partial(_linear_kernel, activation=activation),
        out_shape=jax.ShapeDtypeStruct((Mp, N), out_dtype),
        grid=(N // tn,),
        in_specs=[pl.BlockSpec((Mp, K), lambda j: (0, 0)),
                  pl.BlockSpec((K, tn), lambda j: (0, j)),
                  pl.BlockSpec((1, tn), lambda j: (0, j))],
        out_specs=pl.BlockSpec((Mp, tn), lambda j: (0, j)),
        compiler_params=pltpu.CompilerParams(
            dimension_semantics=("parallel",)),
    )(x, w, b)
    return out[:M] if Mp != M else out


# --------------- linear + bias + residual + LayerNorm fused kernel --------------
# Used for the attention-output projection and the second FFN matmul.  The whole
# H=768 output row is one block so mean/var reduce over the full feature dim.
def _linear_res_ln_kernel(x_ref, w_ref, b_ref, res_ref, g_ref, beta_ref, o_ref):
    out = jnp.dot(x_ref[...], w_ref[...], preferred_element_type=jnp.float32)
    out = out + b_ref[...] + res_ref[...].astype(jnp.float32)
    mean = jnp.mean(out, axis=-1, keepdims=True)
    var = jnp.mean(jnp.square(out - mean), axis=-1, keepdims=True)
    y = (out - mean) * lax.rsqrt(var + LN_EPS)
    o_ref[...] = (y * g_ref[...] + beta_ref[...]).astype(o_ref.dtype)


def pallas_linear_res_ln(x, w, b, res, g, beta, out_dtype=jnp.bfloat16):
    M, _ = x.shape
    _, N = w.shape
    Mp = _round_up(M, 8)
    if Mp != M:
        x = jnp.pad(x, ((0, Mp - M), (0, 0)))
        res = jnp.pad(res, ((0, Mp - M), (0, 0)))
    out = pl.pallas_call(
        _linear_res_ln_kernel,
        out_shape=jax.ShapeDtypeStruct((Mp, N), out_dtype),
    )(x, w, b, res, g, beta)
    return out[:M] if Mp != M else out


# ----------------------------- layernorm kernel ---------------------------------
# Only used standalone for the embedding LayerNorm (no preceding matmul to fuse into).
def _layernorm_kernel(x_ref, g_ref, b_ref, o_ref):
    x = x_ref[...].astype(jnp.float32)
    mean = jnp.mean(x, axis=-1, keepdims=True)
    var = jnp.mean(jnp.square(x - mean), axis=-1, keepdims=True)
    y = (x - mean) * lax.rsqrt(var + LN_EPS)
    o_ref[...] = (y * g_ref[...] + b_ref[...]).astype(o_ref.dtype)


def pallas_layernorm(x, g, b, out_dtype=jnp.bfloat16):
    M, Hd = x.shape
    Mp = _round_up(M, 8)
    if Mp != M:
        x = jnp.pad(x, ((0, Mp - M), (0, 0)))
    out = pl.pallas_call(
        _layernorm_kernel,
        out_shape=jax.ShapeDtypeStruct((Mp, Hd), out_dtype),
    )(x, g, b)
    return out[:M] if Mp != M else out


# ----------------------------- attention kernel --------------------------------
# One grid step per batch element; all 12 heads computed inside the step from the
# fused QKV buffer (static lane slices), context written back lane-dense (S, 768).
def _attn_kernel(qkv_ref, mask_ref, o_ref, *, scale):
    qkv = qkv_ref[0]                                   # (S, 3H) bf16, loaded once
    mask = mask_ref[0]                                 # (1, S)  f32 additive bias
    ctx = []
    for h in range(N_HEADS):                           # static unroll
        lo = h * D_HEAD
        q = qkv[:, lo:lo + D_HEAD]                     # (S, dH) bf16
        k = qkv[:, H + lo:H + lo + D_HEAD]
        v = qkv[:, 2 * H + lo:2 * H + lo + D_HEAD]
        s = lax.dot_general(q, k, (((1,), (1,)), ((), ())),
                            preferred_element_type=jnp.float32) * scale
        s = s + mask
        s = s - jnp.max(s, axis=-1, keepdims=True)
        p = jnp.exp(s)
        p = p * pl.reciprocal(jnp.sum(p, axis=-1, keepdims=True), approx=True)
        ctx.append(jnp.dot(p.astype(v.dtype), v,
                           preferred_element_type=jnp.float32))
    o_ref[0] = jnp.concatenate(ctx, axis=-1).astype(o_ref.dtype)   # (S, H)


def pallas_attention(qkv, mask_bias):
    # qkv: (B, S, 3H) bf16; mask_bias: (B, 1, S) f32 -> context (B, S, H) bf16
    B, S, _ = qkv.shape
    scale = 1.0 / math.sqrt(D_HEAD)
    return pl.pallas_call(
        functools.partial(_attn_kernel, scale=scale),
        out_shape=jax.ShapeDtypeStruct((B, S, H), jnp.bfloat16),
        grid=(B,),
        in_specs=[pl.BlockSpec((1, S, 3 * H), lambda i: (i, 0, 0)),
                  pl.BlockSpec((1, 1, S), lambda i: (i, 0, 0))],
        out_specs=pl.BlockSpec((1, S, H), lambda i: (i, 0, 0)),
        compiler_params=pltpu.CompilerParams(
            dimension_semantics=("parallel",)),   # shards B over v7x's 2 TCs
    )(qkv, mask_bias)


# ---------------------------- CRF Viterbi decode kernel --------------------------
# Max-plus DP + backpointer backtrack.  Negligible work (S-1 steps over a (B, T)
# state), so kept structurally as-is; tie-break picks the smallest tag index.
def _viterbi_kernel(em_ref, start_ref, end_ref, transT_ref, o_ref,
                    score_ref, hist_ref, cur_ref):
    Sp, B, T = em_ref.shape

    # init: score[b, tag] = start[tag] + emissions[0, b, tag]
    score_ref[...] = em_ref[0] + start_ref[...]

    @pl.loop(1, Sp)
    def _(t):
        score = score_ref[...]                                   # (B, T)
        # vals[b, next, prev] = score[b, prev] + transitions[prev, next]
        vals = score[:, None, :] + transT_ref[...][None, :, :]   # (B, T, T)
        best = jnp.max(vals, axis=-1)                            # (B, T)
        idx = lax.broadcasted_iota(jnp.int32, vals.shape, 2)
        bp = jnp.min(jnp.where(vals >= best[..., None], idx, T), axis=-1)
        hist_ref[t] = bp.astype(jnp.int32)
        score_ref[...] = best + em_ref[t]

    final = score_ref[...] + end_ref[...]                        # (B, T)
    m = jnp.max(final, axis=-1, keepdims=True)
    ids = lax.broadcasted_iota(jnp.int32, final.shape, 1)
    last = jnp.min(jnp.where(final >= m, ids, T), axis=-1, keepdims=True)  # (B, 1)
    cur_ref[...] = last.astype(jnp.int32)
    o_ref[Sp - 1] = last.astype(jnp.int32)

    @pl.loop(1, Sp)
    def _(i):
        t = Sp - i
        cur = cur_ref[...]                                       # (B, 1)
        hist_t = hist_ref[t]                                     # (B, T)
        onehot = lax.broadcasted_iota(jnp.int32, hist_t.shape, 1) == cur
        prev = jnp.sum(jnp.where(onehot, hist_t, 0), axis=-1, keepdims=True)
        o_ref[t - 1] = prev.astype(jnp.int32)
        cur_ref[...] = prev.astype(jnp.int32)


def pallas_crf_decode(emissions, start, end, trans):
    # emissions: (B, Sp, T) -> best tag sequence (B, Sp) int32.
    # NOTE: wrapper transposes act on a ~(2,7,5) array (a few hundred bytes) -- negligible.
    B, Sp, T = emissions.shape
    em = jnp.transpose(emissions, (1, 0, 2)).astype(jnp.float32)   # (Sp, B, T)
    out = pl.pallas_call(
        _viterbi_kernel,
        out_shape=jax.ShapeDtypeStruct((Sp, B, 1), jnp.int32),
        scratch_shapes=[pltpu.VMEM((B, T), jnp.float32),
                        pltpu.VMEM((Sp, B, T), jnp.int32),
                        pltpu.VMEM((B, 1), jnp.int32)],
    )(em, start.reshape(1, T), end.reshape(1, T), trans.T)
    return jnp.transpose(out[:, :, 0], (1, 0))                     # (B, Sp)


# ------------------------ synthetic BERT token classifier -----------------------
def bert_model_forward(params, sentence, masks):
    B, S = sentence.shape
    emb = jnp.take(params["tok_emb"], sentence, axis=0) + params["pos_emb"][:S][None]
    x = pallas_layernorm(emb.reshape(B * S, H), params["ln_emb_g"],
                         params["ln_emb_b"])                         # (B*S, H) bf16

    # self-attention: fused QKV projection, heads sliced inside the attention kernel
    qkv = pallas_linear(x, params["w_qkv"], params["b_qkv"])         # (B*S, 3H) bf16
    mask_bias = ((1.0 - masks.astype(jnp.float32)) * -1e9).reshape(B, 1, S)
    ctx = pallas_attention(qkv.reshape(B, S, 3 * H), mask_bias)      # (B, S, H) bf16
    # attention-output projection + residual add + LayerNorm fused
    x = pallas_linear_res_ln(ctx.reshape(B * S, H), params["w_o"], params["b_o"],
                             x, params["ln1_g"], params["ln1_b"])    # (B*S, H) bf16

    # feed-forward; second matmul fused with residual add + LayerNorm
    h = pallas_linear(x, params["w_ff1"], params["b_ff1"], activation="gelu")
    x = pallas_linear_res_ln(h, params["w_ff2"], params["b_ff2"],
                             x, params["ln2_g"], params["ln2_b"])

    # token-classification head (the stand-in model's own logits, like
    # BertForTokenClassification -> output.logits); head pre-padded to 128 lanes
    logits = pallas_linear(x, params["w_cls"], params["b_cls"],
                           out_dtype=jnp.float32)                    # (B*S, TAGS_PAD)
    return logits[:, :NUM_TAGS].reshape(B, S, NUM_TAGS)


def bert_ner_forward(params, sentence, masks=None, labels=None, prediction_masks=None):
    if masks is None:
        masks = jnp.ones(sentence.shape, jnp.float32)
    hidden_states = bert_model_forward(params, sentence, masks)      # (B, S, T)
    assert labels is None  # TODO(synk): training (CRF NLL) branch not implemented
    hidden = hidden_states[:, 1:]                                    # drop index 0 on dim 1
    # Reference decode branch calls self.CRF.decode(hidden) without a mask -> decode all.
    pred = pallas_crf_decode(hidden, params["crf_start"],
                             params["crf_end"], params["crf_trans"])
    return pred                                                      # (B, S-1) int32


# ------------------------------- parameter init ----------------------------------
# Weights are produced kernel-ready ONCE at init: bf16, (1, N) biases, classifier
# head padded to 128 columns.  No per-forward jnp.pad / dtype-cast HBM copies.
def init_params(key):
    ks = jax.random.split(key, 16)
    norm = lambda k, shape: 0.02 * jax.random.normal(k, shape, jnp.float32)
    unif = lambda k, shape: jax.random.uniform(k, shape, jnp.float32, -0.1, 0.1)
    w_cls = jnp.zeros((H, TAGS_PAD), jnp.float32).at[:, :NUM_TAGS].set(
        norm(ks[6], (H, NUM_TAGS)))
    return dict(
        tok_emb=norm(ks[0], (VOCAB, H)),
        pos_emb=norm(ks[1], (MAX_POS, H)),
        ln_emb_g=jnp.ones((1, H), jnp.float32), ln_emb_b=jnp.zeros((1, H), jnp.float32),
        w_qkv=norm(ks[2], (H, 3 * H)).astype(jnp.bfloat16),
        b_qkv=jnp.zeros((1, 3 * H), jnp.float32),
        w_o=norm(ks[3], (H, H)).astype(jnp.bfloat16),
        b_o=jnp.zeros((1, H), jnp.float32),
        ln1_g=jnp.ones((1, H), jnp.float32), ln1_b=jnp.zeros((1, H), jnp.float32),
        w_ff1=norm(ks[4], (H, FFN)).astype(jnp.bfloat16),
        b_ff1=jnp.zeros((1, FFN), jnp.float32),
        w_ff2=norm(ks[5], (FFN, H)).astype(jnp.bfloat16),
        b_ff2=jnp.zeros((1, H), jnp.float32),
        ln2_g=jnp.ones((1, H), jnp.float32), ln2_b=jnp.zeros((1, H), jnp.float32),
        w_cls=w_cls.astype(jnp.bfloat16),
        b_cls=jnp.zeros((1, TAGS_PAD), jnp.float32),
        # hidden2tags = nn.Linear(768, num_tags): defined in __init__ but unused in forward
        hidden2tags_w=norm(ks[7], (768, NUM_TAGS)),
        hidden2tags_b=jnp.zeros((NUM_TAGS,), jnp.float32),
        # CRF parameters (torchcrf: uniform(-0.1, 0.1))
        crf_start=unif(ks[8], (NUM_TAGS,)),
        crf_end=unif(ks[9], (NUM_TAGS,)),
        crf_trans=unif(ks[10], (NUM_TAGS, NUM_TAGS)),
    )


if __name__ == "__main__":
    B, S = 2, 8
    params = init_params(jax.random.PRNGKey(0))
    sentence = jax.random.randint(jax.random.PRNGKey(1), (B, S), 0, VOCAB, jnp.int32)
    masks = jnp.ones((B, S), jnp.float32)

    fwd = jax.jit(bert_ner_forward)
    pred = fwd(params, sentence, masks)            # (B, S-1) int32 tag ids
    jax.block_until_ready(pred)
    assert pred.shape == (B, S - 1) and pred.dtype == jnp.int32
    print("KERNEL_OK")
</pallas_src>

<mosaic_0001>
module attributes {stable_mosaic.version = 11 : i64} {
  func.func @_layernorm_kernel(%arg0: memref<16x768xf32, #tpu.memory_space<vmem>>, %arg1: memref<1x768xf32, #tpu.memory_space<vmem>>, %arg2: memref<1x768xf32, #tpu.memory_space<vmem>>, %arg3: memref<16x768xbf16, #tpu.memory_space<vmem>>) attributes {dimension_semantics = [], scalar_prefetch = 0 : i64, scratch_operands = 0 : i64, tpu.core_type = #tpu.core_type<tc>} {
    %c0 = arith.constant 0 : index
    %c0_0 = arith.constant 0 : index
    %0 = vector.load %arg0[%c0, %c0_0] : memref<16x768xf32, #tpu.memory_space<vmem>>, vector<16x768xf32>
    %cst = arith.constant dense<0.000000e+00> : vector<16xf32>
    %1 = vector.multi_reduction <add>, %0, %cst [1] : vector<16x768xf32> to vector<16xf32>
    %2 = vector.shape_cast %1 : vector<16xf32> to vector<16x1xf32>
    %cst_1 = arith.constant 7.680000e+02 : f32
    %3 = vector.broadcast %cst_1 : f32 to vector<16x1xf32>
    %4 = arith.divf %2, %3 : vector<16x1xf32>
    %5 = vector.broadcast %4 : vector<16x1xf32> to vector<16x768xf32>
    %6 = arith.subf %0, %5 : vector<16x768xf32>
    %7 = arith.mulf %6, %6 : vector<16x768xf32>
    %cst_2 = arith.constant dense<0.000000e+00> : vector<16xf32>
    %8 = vector.multi_reduction <add>, %7, %cst_2 [1] : vector<16x768xf32> to vector<16xf32>
    %9 = vector.shape_cast %8 : vector<16xf32> to vector<16x1xf32>
    %cst_3 = arith.constant 7.680000e+02 : f32
    %10 = vector.broadcast %cst_3 : f32 to vector<16x1xf32>
    %11 = arith.divf %9, %10 : vector<16x1xf32>
    %12 = vector.broadcast %4 : vector<16x1xf32> to vector<16x768xf32>
    %13 = arith.subf %0, %12 : vector<16x768xf32>
    %cst_4 = arith.constant 9.99999996E-13 : f32
    %14 = vector.broadcast %cst_4 : f32 to vector<16x1xf32>
    %15 = arith.addf %11, %14 : vector<16x1xf32>
    %16 = math.rsqrt %15 : vector<16x1xf32>
    %17 = vector.broadcast %16 : vector<16x1xf32> to vector<16x768xf32>
    %18 = arith.mulf %13, %17 : vector<16x768xf32>
    %c0_5 = arith.constant 0 : index
    %c0_6 = arith.constant 0 : index
    %19 = vector.load %arg1[%c0_5, %c0_6] : memref<1x768xf32, #tpu.memory_space<vmem>>, vector<1x768xf32>
    %20 = vector.broadcast %19 : vector<1x768xf32> to vector<16x768xf32>
    %21 = arith.mulf %18, %20 : vector<16x768xf32>
    %c0_7 = arith.constant 0 : index
    %c0_8 = arith.constant 0 : index
    %22 = vector.load %arg2[%c0_7, %c0_8] : memref<1x768xf32, #tpu.memory_space<vmem>>, vector<1x768xf32>
    %23 = vector.broadcast %22 : vector<1x768xf32> to vector<16x768xf32>
    %24 = arith.addf %21, %23 : vector<16x768xf32>
    %25 = arith.truncf %24 : vector<16x768xf32> to vector<16x768xbf16>
    %c0_9 = arith.constant 0 : index
    %c0_10 = arith.constant 0 : index
    %26 = vector.load %arg3[%c0_9, %c0_10] : memref<16x768xbf16, #tpu.memory_space<vmem>>, vector<16x768xbf16>
    tpu.vector_store %arg3[%c0_9, %c0_10], %25 {strides = array<i32>} : memref<16x768xbf16, #tpu.memory_space<vmem>>, vector<16x768xbf16>,
    return
  }
}

module attributes {stable_mosaic.version = 11 : i64} {
  func.func @_attn_kernel(%arg0: i32, %arg1: memref<1x8x2304xbf16, #tpu.memory_space<vmem>>, %arg2: memref<1x1x8xf32, #tpu.memory_space<vmem>>, %arg3: memref<1x8x768xbf16, #tpu.memory_space<vmem>>) attributes {dimension_semantics = [#tpu.dimension_semantics<parallel>], iteration_bounds = array<i64: 2>, scalar_prefetch = 0 : i64, scratch_operands = 0 : i64, tpu.core_type = #tpu.core_type<tc>, window_params = [{transform_indices = @transform_0, window_bounds = array<i64: 1, 8, 2304>}, {transform_indices = @transform_1, window_bounds = array<i64: 1, 1, 8>}, {transform_indices = @transform_2, window_bounds = array<i64: 1, 8, 768>}]} {
    %c0 = arith.constant 0 : index
    %c0_0 = arith.constant 0 : index
    %c0_1 = arith.constant 0 : index
    %0 = vector.load %arg1[%c0, %c0_0, %c0_1] : memref<1x8x2304xbf16, #tpu.memory_space<vmem>>, vector<1x8x2304xbf16>
    %1 = vector.shape_cast %0 : vector<1x8x2304xbf16> to vector<8x2304xbf16>
    %c0_2 = arith.constant 0 : index
    %c0_3 = arith.constant 0 : index
    %c0_4 = arith.constant 0 : index
    %2 = vector.load %arg2[%c0_2, %c0_3, %c0_4] : memref<1x1x8xf32, #tpu.memory_space<vmem>>, vector<1x1x8xf32>
    %3 = vector.shape_cast %2 : vector<1x1x8xf32> to vector<1x8xf32>
    %4 = vector.extract_strided_slice %1 {offsets = [0, 0], sizes = [8, 64], strides = [1, 1]} : vector<8x2304xbf16> to vector<8x64xbf16>
    %5 = vector.extract_strided_slice %1 {offsets = [0, 768], sizes = [8, 64], strides = [1, 1]} : vector<8x2304xbf16> to vector<8x64xbf16>
    %6 = vector.extract_strided_slice %1 {offsets = [0, 1536], sizes = [8, 64], strides = [1, 1]} : vector<8x2304xbf16> to vector<8x64xbf16>
    %cst = arith.constant dense<0.000000e+00> : vector<8x8xf32>
    %7 = tpu.matmul %4, %5, %cst {dimension_numbers = #tpu.dot_dimension_numbers<[1], [1], [0], [0], [0, 0, 1, 0], [], []>} : vector<8x64xbf16>, vector<8x64xbf16>, vector<8x8xf32> -> vector<8x8xf32>
    %cst_5 = arith.constant 1.250000e-01 : f32
    %8 = vector.broadcast %cst_5 : f32 to vector<8x8xf32>
    %9 = arith.mulf %7, %8 : vector<8x8xf32>
    %10 = vector.broadcast %3 : vector<1x8xf32> to vector<8x8xf32>
    %11 = arith.addf %9, %10 : vector<8x8xf32>
    %cst_6 = arith.constant dense<0xFF800000> : vector<8xf32>
    %12 = vector.multi_reduction <maximumf>, %11, %cst_6 [1] : vector<8x8xf32> to vector<8xf32>
    %13 = vector.shape_cast %12 : vector<8xf32> to vector<8x1xf32>
    %14 = vector.broadcast %13 : vector<8x1xf32> to vector<8x8xf32>
    %15 = arith.subf %11, %14 : vector<8x8xf32>
    %16 = math.exp %15 : vector<8x8xf32>
    %cst_7 = arith.constant dense<0.000000e+00> : vector<8xf32>
    %17 = vector.multi_reduction <add>, %16, %cst_7 [1] : vector<8x8xf32> to vector<8xf32>
    %18 = vector.shape_cast %17 : vector<8xf32> to vector<8x1xf32>
    %19 = tpu.reciprocal %18 {approx = true} : vector<8x1xf32> -> vector<8x1xf32>
    %20 = vector.broadcast %19 : vector<8x1xf32> to vector<8x8xf32>
    %21 = arith.mulf %16, %20 : vector<8x8xf32>
    %22 = arith.truncf %21 : vector<8x8xf32> to vector<8x8xbf16>
    %cst_8 = arith.constant dense<0.000000e+00> : vector<8x64xf32>
    %23 = tpu.matmul %22, %6, %cst_8 {dimension_numbers = #tpu.dot_dimension_numbers<[1], [0], [0], [1], [0, 0, 1, 1], [], []>} : vector<8x8xbf16>, vector<8x64xbf16>, vector<8x64xf32> -> vector<8x64xf32>
    %24 = vector.extract_strided_slice %1 {offsets = [0, 64], sizes = [8, 64], strides = [1, 1]} : vector<8x2304xbf16> to vector<8x64xbf16>
    %25 = vector.extract_strided_slice %1 {offsets = [0, 832], sizes = [8, 64], strides = [1, 1]} : vector<8x2304xbf16> to vector<8x64xbf16>
    %26 = vector.extract_strided_slice %1 {offsets = [0, 1600], sizes = [8, 64], strides = [1, 1]} : vector<8x2304xbf16> to vector<8x64xbf16>
    %cst_9 = arith.constant dense<0.000000e+00> : vector<8x8xf32>
    %27 = tpu.matmul %24, %25, %cst_9 {dimension_numbers = #tpu.dot_dimension_numbers<[1], [1], [0], [0], [0, 0, 1, 0], [], []>} : vector<8x64xbf16>, vector<8x64xbf16>, vector<8x8xf32> -> vector<8x8xf32>
    %cst_10 = arith.constant 1.250000e-01 : f32
    %28 = vector.broadcast %cst_10 : f32 to vector<8x8xf32>
    %29 = arith.mulf %27, %28 : vector<8x8xf32>
    %30 = vector.broadcast %3 : vector<1x8xf32> to vector<8x8xf32>
    %31 = arith.addf %29, %30 : vector<8x8xf32>
    %cst_11 = arith.constant dense<0xFF800000> : vector<8xf32>
    %32 = vector.multi_reduction <maximumf>, %31, %cst_11 [1] : vector<8x8xf32> to vector<8xf32>
    %33 = vector.shape_cast %32 : vector<8xf32> to vector<8x1xf32>
    %34 = vector.broadcast %33 : vector<8x1xf32> to vector<8x8xf32>
    %35 = arith.subf %31, %34 : vector<8x8xf32>
    %36 = math.exp %35 : vector<8x8xf32>
    %cst_12 = arith.constant dense<0.000000e+00> : vector<8xf32>
    %37 = vector.multi_reduction <add>, %36, %cst_12 [1] : vector<8x8xf32> to vector<8xf32>
    %38 = vector.shape_cast %37 : vector<8xf32> to vector<8x1xf32>
    %39 = tpu.reciprocal %38 {approx = true} : vector<8x1xf32> -> vector<8x1xf32>
    %40 = vector.broadcast %39 : vector<8x1xf32> to vector<8x8xf32>
    %41 = arith.mulf %36, %40 : vector<8x8xf32>
    %42 = arith.truncf %41 : vector<8x8xf32> to vector<8x8xbf16>
    %cst_13 = arith.constant dense<0.000000e+00> : vector<8x64xf32>
    %43 = tpu.matmul %42, %26, %cst_13 {dimension_numbers = #tpu.dot_dimension_numbers<[1], [0], [0], [1], [0, 0, 1, 1], [], []>} : vector<8x8xbf16>, vector<8x64xbf16>, vector<8x64xf32> -> vector<8x64xf32>
    %44 = vector.extract_strided_slice %1 {offsets = [0, 128], sizes = [8, 64], strides = [1, 1]} : vector<8x2304xbf16> to vector<8x64xbf16>
    %45 = vector.extract_strided_slice %1 {offsets = [0, 896], sizes = [8, 64], strides = [1, 1]} : vector<8x2304xbf16> to vector<8x64xbf16>
    %46 = vector.extract_strided_slice %1 {offsets = [0, 1664], sizes = [8, 64], strides = [1, 1]} : vector<8x2304xbf16> to vector<8x64xbf16>
    %cst_14 = arith.constant dense<0.000000e+00> : vector<8x8xf32>
    %47 = tpu.matmul %44, %45, %cst_14 {dimension_numbers = #tpu.dot_dimension_numbers<[1], [1], [0], [0], [0, 0, 1, 0], [], []>} : vector<8x64xbf16>, vector<8x64xbf16>, vector<8x8xf32> -> vector<8x8xf32>
    %cst_15 = arith.constant 1.250000e-01 : f32
    %48 = vector.broadcast %cst_15 : f32 to vector<8x8xf32>
    %49 = arith.mulf %47, %48 : vector<8x8xf32>
    %50 = vector.broadcast %3 : vector<1x8xf32> to vector<8x8xf32>
    %51 = arith.addf %49, %50 : vector<8x8xf32>
    %cst_16 = arith.constant dense<0xFF800000> : vector<8xf32>
    %52 = vector.multi_reduction <maximumf>, %51, %cst_16 [1] : vector<8x8xf32> to vector<8xf32>
    %53 = vector.shape_cast %52 : vector<8xf32> to vector<8x1xf32>
    %54 = vector.broadcast %53 : vector<8x1xf32> to vector<8x8xf32>
    %55 = arith.subf %51, %54 : vector<8x8xf32>
    %56 = math.exp %55 : vector<8x8xf32>
    %cst_17 = arith.constant dense<0.000000e+00> : vector<8xf32>
    %57 = vector.multi_reduction <add>, %56, %cst_17 [1] : vector<8x8xf32> to vector<8xf32>
    %58 = vector.shape_cast %57 : vector<8xf32> to vector<8x1xf32>
    %59 = tpu.reciprocal %58 {approx = true} : vector<8x1xf32> -> vector<8x1xf32>
    %60 = vector.broadcast %59 : vector<8x1xf32> to vector<8x8xf32>
    %61 = arith.mulf %56, %60 : vector<8x8xf32>
    %62 = arith.truncf %61 : vector<8x8xf32> to vector<8x8xbf16>
    %cst_18 = arith.constant dense<0.000000e+00> : vector<8x64xf32>
    %63 = tpu.matmul %62, %46, %cst_18 {dimension_numbers = #tpu.dot_dimension_numbers<[1], [0], [0], [1], [0, 0, 1, 1], [], []>} : vector<8x8xbf16>, vector<8x64xbf16>, vector<8x64xf32> -> vector<8x64xf32>
    %64 = vector.extract_strided_slice %1 {offsets = [0, 192], sizes = [8, 64], strides = [1, 1]} : vector<8x2304xbf16> to vector<8x64xbf16>
    %65 = vector.extract_strided_slice %1 {offsets = [0, 960], sizes = [8, 64], strides = [1, 1]} : vector<8x2304xbf16> to vector<8x64xbf16>
    %66 = vector.extract_strided_slice %1 {offsets = [0, 1728], sizes = [8, 64], strides = [1, 1]} : vector<8x2304xbf16> to vector<8x64xbf16>
    %cst_19 = arith.constant dense<0.000000e+00> : vector<8x8xf32>
    %67 = tpu.matmul %64, %65, %cst_19 {dimension_numbers = #tpu.dot_dimension_numbers<[1], [1], [0], [0], [0, 0, 1, 0], [], []>} : vector<8x64xbf16>, vector<8x64xbf16>, vector<8x8xf32> -> vector<8x8xf32>
    %cst_20 = arith.constant 1.250000e-01 : f32
    %68 = vector.broadcast %cst_20 : f32 to vector<8x8xf32>
    %69 = arith.mulf %67, %68 : vector<8x8xf32>
    %70 = vector.broadcast %3 : vector<1x8xf32> to vector<8x8xf32>
    %71 = arith.addf %69, %70 : vector<8x8xf32>
    %cst_21 = arith.constant dense<0xFF800000> : vector<8xf32>
    %72 = vector.multi_reduction <maximumf>, %71, %cst_21 [1] : vector<8x8xf32> to vector<8xf32>
    %73 = vector.shape_cast %72 : vector<8xf32> to vector<8x1xf32>
    %74 = vector.broadcast %73 : vector<8x1xf32> to vector<8x8xf32>
    %75 = arith.subf %71, %74 : vector<8x8xf32>
    %76 = math.exp %75 : vector<8x8xf32>
    %cst_22 = arith.constant dense<0.000000e+00> : vector<8xf32>
    %77 = vector.multi_reduction <add>, %76, %cst_22 [1] : vector<8x8xf32> to vector<8xf32>
    %78 = vector.shape_cast %77 : vector<8xf32> to vector<8x1xf32>
    %79 = tpu.reciprocal %78 {approx = true} : vector<8x1xf32> -> vector<8x1xf32>
    %80 = vector.broadcast %79 : vector<8x1xf32> to vector<8x8xf32>
    %81 = arith.mulf %76, %80 : vector<8x8xf32>
    %82 = arith.truncf %81 : vector<8x8xf32> to vector<8x8xbf16>
    %cst_23 = arith.constant dense<0.000000e+00> : vector<8x64xf32>
    %83 = tpu.matmul %82, %66, %cst_23 {dimension_numbers = #tpu.dot_dimension_numbers<[1], [0], [0], [1], [0, 0, 1, 1], [], []>} : vector<8x8xbf16>, vector<8x64xbf16>, vector<8x64xf32> -> vector<8x64xf32>
    %84 = vector.extract_strided_slice %1 {offsets = [0, 256], sizes = [8, 64], strides = [1, 1]} : vector<8x2304xbf16> to vector<8x64xbf16>
    %85 = vector.extract_strided_slice %1 {offsets = [0, 1024], sizes = [8, 64], strides = [1, 1]} : vector<8x2304xbf16> to vector<8x64xbf16>
    %86 = vector.extract_strided_slice %1 {offsets = [0, 1792], sizes = [8, 64], strides = [1, 1]} : vector<8x2304xbf16> to vector<8x64xbf16>
    %cst_24 = arith.constant dense<0.000000e+00> : vector<8x8xf32>
    %87 = tpu.matmul %84, %85, %cst_24 {dimension_numbers = #tpu.dot_dimension_numbers<[1], [1], [0], [0], [0, 0, 1, 0], [], []>} : vector<8x64xbf16>, vector<8x64xbf16>, vector<8x8xf32> -> vector<8x8xf32>
    %cst_25 = arith.constant 1.250000e-01 : f32
    %88 = vector.broadcast %cst_25 : f32 to vector<8x8xf32>
    %89 = arith.mulf %87, %88 : vector<8x8xf32>
    %90 = vector.broadcast %3 : vector<1x8xf32> to vector<8x8xf32>
    %91 = arith.addf %89, %90 : vector<8x8xf32>
    %cst_26 = arith.constant dense<0xFF800000> : vector<8xf32>
    %92 = vector.multi_reduction <maximumf>, %91, %cst_26 [1] : vector<8x8xf32> to vector<8xf32>
    %93 = vector.shape_cast %92 : vector<8xf32> to vector<8x1xf32>
    %94 = vector.broadcast %93 : vector<8x1xf32> to vector<8x8xf32>
    %95 = arith.subf %91, %94 : vector<8x8xf32>
    %96 = math.exp %95 : vector<8x8xf32>
    %cst_27 = arith.constant dense<0.000000e+00> : vector<8xf32>
    %97 = vector.multi_reduction <add>, %96, %cst_27 [1] : vector<8x8xf32> to vector<8xf32>
    %98 = vector.shape_cast %97 : vector<8xf32> to vector<8x1xf32>
    %99 = tpu.reciprocal %98 {approx = true} : vector<8x1xf32> -> vector<8x1xf32>
    %100 = vector.broadcast %99 : vector<8x1xf32> to vector<8x8xf32>
    %101 = arith.mulf %96, %100 : vector<8x8xf32>
    %102 = arith.truncf %101 : vector<8x8xf32> to vector<8x8xbf16>
    %cst_28 = arith.constant dense<0.000000e+00> : vector<8x64xf32>
    %103 = tpu.matmul %102, %86, %cst_28 {dimension_numbers = #tpu.dot_dimension_numbers<[1], [0], [0], [1], [0, 0, 1, 1], [], []>} : vector<8x8xbf16>, vector<8x64xbf16>, vector<8x64xf32> -> vector<8x64xf32>
    %104 = vector.extract_strided_slice %1 {offsets = [0, 320], sizes = [8, 64], strides = [1, 1]} : vector<8x2304xbf16> to vector<8x64xbf16>
    %105 = vector.extract_strided_slice %1 {offsets = [0, 1088], sizes = [8, 64], strides = [1, 1]} : vector<8x2304xbf16> to vector<8x64xbf16>
    %106 = vector.extract_strided_slice %1 {offsets = [0, 1856], sizes = [8, 64], strides = [1, 1]} : vector<8x2304xbf16> to vector<8x64xbf16>
    %cst_29 = arith.constant dense<0.000000e+00> : vector<8x8xf32>
    %107 = tpu.matmul %104, %105, %cst_29 {dimension_numbers = #tpu.dot_dimension_numbers<[1], [1], [0], [0], [0, 0, 1, 0], [], []>} : vector<8x64xbf16>, vector<8x64xbf16>, vector<8x8xf32> -> vector<8x8xf32>
    %cst_30 = arith.constant 1.250000e-01 : f32
    %108 = vector.broadcast %cst_30 : f32 to vector<8x8xf32>
    %109 = arith.mulf %107, %108 : vector<8x8xf32>
    %110 = vector.broadcast %3 : vector<1x8xf32> to vector<8x8xf32>
    %111 = arith.addf %109, %110 : vector<8x8xf32>
    %cst_31 = arith.constant dense<0xFF800000> : vector<8xf32>
    %112 = vector.multi_reduction <maximumf>, %111, %cst_31 [1] : vector<8x8xf32> to vector<8xf32>
    %113 = vector.shape_cast %112 : vector<8xf32> to vector<8x1xf32>
    %114 = vector.broadcast %113 : vector<8x1xf32> to vector<8x8xf32>
    %115 = arith.subf %111, %114 : vector<8x8xf32>
    %116 = math.exp %115 : vector<8x8xf32>
    %cst_32 = arith.constant dense<0.000000e+00> : vector<8xf32>
    %117 = vector.multi_reduction <add>, %116, %cst_32 [1] : vector<8x8xf32> to vector<8xf32>
    %118 = vector.shape_cast %117 : vector<8xf32> to vector<8x1xf32>
    %119 = tpu.reciprocal %118 {approx = true} : vector<8x1xf32> -> vector<8x1xf32>
    %120 = vector.broadcast %119 : vector<8x1xf32> to vector<8x8xf32>
    %121 = arith.mulf %116, %120 : vector<8x8xf32>
    %122 = arith.truncf %121 : vector<8x8xf32> to vector<8x8xbf16>
    %cst_33 = arith.constant dense<0.000000e+00> : vector<8x64xf32>
    %123 = tpu.matmul %122, %106, %cst_33 {dimension_numbers = #tpu.dot_dimension_numbers<[1], [0], [0], [1], [0, 0, 1, 1], [], []>} : vector<8x8xbf16>, vector<8x64xbf16>, vector<8x64xf32> -> vector<8x64xf32>
    %124 = vector.extract_strided_slice %1 {offsets = [0, 384], sizes = [8, 64], strides = [1, 1]} : vector<8x2304xbf16> to vector<8x64xbf16>
    %125 = vector.extract_strided_slice %1 {offsets = [0, 1152], sizes = [8, 64], strides = [1, 1]} : vector<8x2304xbf16> to vector<8x64xbf16>
    %126 = vector.extract_strided_slice %1 {offsets = [0, 1920], sizes = [8, 64], strides = [1, 1]} : vector<8x2304xbf16> to vector<8x64xbf16>
    %cst_34 = arith.constant dense<0.000000e+00> : vector<8x8xf32>
    %127 = tpu.matmul %124, %125, %cst_34 {dimension_numbers = #tpu.dot_dimension_numbers<[1], [1], [0], [0], [0, 0, 1, 0], [], []>} : vector<8x64xbf16>, vector<8x64xbf16>, vector<8x8xf32> -> vector<8x8xf32>
    %cst_35 = arith.constant 1.250000e-01 : f32
    %128 = vector.broadcast %cst_35 : f32 to vector<8x8xf32>
    %129 = arith.mulf %127, %128 : vector<8x8xf32>
    %130 = vector.broadcast %3 : vector<1x8xf32> to vector<8x8xf32>
    %131 = arith.addf %129, %130 : vector<8x8xf32>
    %cst_36 = arith.constant dense<0xFF800000> : vector<8xf32>
    %132 = vector.multi_reduction <maximumf>, %131, %cst_36 [1] : vector<8x8xf32> to vector<8xf32>
    %133 = vector.shape_cast %132 : vector<8xf32> to vector<8x1xf32>
    %134 = vector.broadcast %133 : vector<8x1xf32> to vector<8x8xf32>
    %135 = arith.subf %131, %134 : vector<8x8xf32>
    %136 = math.exp %135 : vector<8x8xf32>
    %cst_37 = arith.constant dense<0.000000e+00> : vector<8xf32>
    %137 = vector.multi_reduction <add>, %136, %cst_37 [1] : vector<8x8xf32> to vector<8xf32>
    %138 = vector.shape_cast %137 : vector<8xf32> to vector<8x1xf32>
    %139 = tpu.reciprocal %138 {approx = true} : vector<8x1xf32> -> vector<8x1xf32>
    %140 = vector.broadcast %139 : vector<8x1xf32> to vector<8x8xf32>
    %141 = arith.mulf %136, %140 : vector<8x8xf32>
    %142 = arith.truncf %141 : vector<8x8xf32> to vector<8x8xbf16>
    %cst_38 = arith.constant dense<0.000000e+00> : vector<8x64xf32>
    %143 = tpu.matmul %142, %126, %cst_38 {dimension_numbers = #tpu.dot_dimension_numbers<[1], [0], [0], [1], [0, 0, 1, 1], [], []>} : vector<8x8xbf16>, vector<8x64xbf16>, vector<8x64xf32> -> vector<8x64xf32>
    %144 = vector.extract_strided_slice %1 {offsets = [0, 448], sizes = [8, 64], strides = [1, 1]} : vector<8x2304xbf16> to vector<8x64xbf16>
    %145 = vector.extract_strided_slice %1 {offsets = [0, 1216], sizes = [8, 64], strides = [1, 1]} : vector<8x2304xbf16> to vector<8x64xbf16>
    %146 = vector.extract_strided_slice %1 {offsets = [0, 1984], sizes = [8, 64], strides = [1, 1]} : vector<8x2304xbf16> to vector<8x64xbf16>
    %cst_39 = arith.constant dense<0.000000e+00> : vector<8x8xf32>
    %147 = tpu.matmul %144, %145, %cst_39 {dimension_numbers = #tpu.dot_dimension_numbers<[1], [1], [0], [0], [0, 0, 1, 0], [], []>} : vector<8x64xbf16>, vector<8x64xbf16>, vector<8x8xf32> -> vector<8x8xf32>
    %cst_40 = arith.constant 1.250000e-01 : f32
    %148 = vector.broadcast %cst_40 : f32 to vector<8x8xf32>
    %149 = arith.mulf %147, %148 : vector<8x8xf32>
    %150 = vector.broadcast %3 : vector<1x8xf32> to vector<8x8xf32>
    %151 = arith.addf %149, %150 : vector<8x8xf32>
    %cst_41 = arith.constant dense<0xFF800000> : vector<8xf32>
    %152 = vector.multi_reduction <maximumf>, %151, %cst_41 [1] : vector<8x8xf32> to vector<8xf32>
    %153 = vector.shape_cast %152 : vector<8xf32> to vector<8x1xf32>
    %154 = vector.broadcast %153 : vector<8x1xf32> to vector<8x8xf32>
    %155 = arith.subf %151, %154 : vector<8x8xf32>
    %156 = math.exp %155 : vector<8x8xf32>
    %cst_42 = arith.constant dense<0.000000e+00> : vector<8xf32>
    %157 = vector.multi_reduction <add>, %156, %cst_42 [1] : vector<8x8xf32> to vector<8xf32>
    %158 = vector.shape_cast %157 : vector<8xf32> to vector<8x1xf32>
    %159 = tpu.reciprocal %158 {approx = true} : vector<8x1xf32> -> vector<8x1xf32>
    %160 = vector.broadcast %159 : vector<8x1xf32> to vector<8x8xf32>
    %161 = arith.mulf %156, %160 : vector<8x8xf32>
    %162 = arith.truncf %161 : vector<8x8xf32> to vector<8x8xbf16>
    %cst_43 = arith.constant dense<0.000000e+00> : vector<8x64xf32>
    %163 = tpu.matmul %162, %146, %cst_43 {dimension_numbers = #tpu.dot_dimension_numbers<[1], [0], [0], [1], [0, 0, 1, 1], [], []>} : vector<8x8xbf16>, vector<8x64xbf16>, vector<8x64xf32> -> vector<8x64xf32>
    %164 = vector.extract_strided_slice %1 {offsets = [0, 512], sizes = [8, 64], strides = [1, 1]} : vector<8x2304xbf16> to vector<8x64xbf16>
    %165 = vector.extract_strided_slice %1 {offsets = [0, 1280], sizes = [8, 64], strides = [1, 1]} : vector<8x2304xbf16> to vector<8x64xbf16>
    %166 = vector.extract_strided_slice %1 {offsets = [0, 2048], sizes = [8, 64], strides = [1, 1]} : vector<8x2304xbf16> to vector<8x64xbf16>
    %cst_44 = arith.constant dense<0.000000e+00> : vector<8x8xf32>
    %167 = tpu.matmul %164, %165, %cst_44 {dimension_numbers = #tpu.dot_dimension_numbers<[1], [1], [0], [0], [0, 0, 1, 0], [], []>} : vector<8x64xbf16>, vector<8x64xbf16>, vector<8x8xf32> -> vector<8x8xf32>
    %cst_45 = arith.constant 1.250000e-01 : f32
    %168 = vector.broadcast %cst_45 : f32 to vector<8x8xf32>
    %169 = arith.mulf %167, %168 : vector<8x8xf32>
    %170 = vector.broadcast %3 : vector<1x8xf32> to vector<8x8xf32>
    %171 = arith.addf %169, %170 : vector<8x8xf32>
    %cst_46 = arith.constant dense<0xFF800000> : vector<8xf32>
    %172 = vector.multi_reduction <maximumf>, %171, %cst_46 [1] : vector<8x8xf32> to vector<8xf32>
    %173 = vector.shape_cast %172 : vector<8xf32> to vector<8x1xf32>
    %174 = vector.broadcast %173 : vector<8x1xf32> to vector<8x8xf32>
    %175 = arith.subf %171, %174 : vector<8x8xf32>
    %176 = math.exp %175 : vector<8x8xf32>
    %cst_47 = arith.constant dense<0.000000e+00> : vector<8xf32>
    %177 = vector.multi_reduction <add>, %176, %cst_47 [1] : vector<8x8xf32> to vector<8xf32>
    %178 = vector.shape_cast %177 : vector<8xf32> to vector<8x1xf32>
    %179 = tpu.reciprocal %178 {approx = true} : vector<8x1xf32> -> vector<8x1xf32>
    %180 = vector.broadcast %179 : vector<8x1xf32> to vector<8x8xf32>
    %181 = arith.mulf %176, %180 : vector<8x8xf32>
    %182 = arith.truncf %181 : vector<8x8xf32> to vector<8x8xbf16>
    %cst_48 = arith.constant dense<0.000000e+00> : vector<8x64xf32>
    %183 = tpu.matmul %182, %166, %cst_48 {dimension_numbers = #tpu.dot_dimension_numbers<[1], [0], [0], [1], [0, 0, 1, 1], [], []>} : vector<8x8xbf16>, vector<8x64xbf16>, vector<8x64xf32> -> vector<8x64xf32>
    %184 = vector.extract_strided_slice %1 {offsets = [0, 576], sizes = [8, 64], strides = [1, 1]} : vector<8x2304xbf16> to vector<8x64xbf16>
    %185 = vector.extract_strided_slice %1 {offsets = [0, 1344], sizes = [8, 64], strides = [1, 1]} : vector<8x2304xbf16> to vector<8x64xbf16>
    %186 = vector.extract_strided_slice %1 {offsets = [0, 2112], sizes = [8, 64], strides = [1, 1]} : vector<8x2304xbf16> to vector<8x64xbf16>
    %cst_49 = arith.constant dense<0.000000e+00> : vector<8x8xf32>
    %187 = tpu.matmul %184, %185, %cst_49 {dimension_numbers = #tpu.dot_dimension_numbers<[1], [1], [0], [0], [0, 0, 1, 0], [], []>} : vector<8x64xbf16>, vector<8x64xbf16>, vector<8x8xf32> -> vector<8x8xf32>
    %cst_50 = arith.constant 1.250000e-01 : f32
    %188 = vector.broadcast %cst_50 : f32 to vector<8x8xf32>
    %189 = arith.mulf %187, %188 : vector<8x8xf32>
    %190 = vector.broadcast %3 : vector<1x8xf32> to vector<8x8xf32>
    %191 = arith.addf %189, %190 : vector<8x8xf32>
    %cst_51 = arith.constant dense<0xFF800000> : vector<8xf32>
    %192 = vector.multi_reduction <maximumf>, %191, %cst_51 [1] : vector<8x8xf32> to vector<8xf32>
    %193 = vector.shape_cast %192 : vector<8xf32> to vector<8x1xf32>
    %194 = vector.broadcast %193 : vector<8x1xf32> to vector<8x8xf32>
    %195 = arith.subf %191, %194 : vector<8x8xf32>
    %196 = math.exp %195 : vector<8x8xf32>
    %cst_52 = arith.constant dense<0.000000e+00> : vector<8xf32>
    %197 = vector.multi_reduction <add>, %196, %cst_52 [1] : vector<8x8xf32> to vector<8xf32>
    %198 = vector.shape_cast %197 : vector<8xf32> to vector<8x1xf32>
    %199 = tpu.reciprocal %198 {approx = true} : vector<8x1xf32> -> vector<8x1xf32>
    %200 = vector.broadcast %199 : vector<8x1xf32> to vector<8x8xf32>
    %201 = arith.mulf %196, %200 : vector<8x8xf32>
    %202 = arith.truncf %201 : vector<8x8xf32> to vector<8x8xbf16>
    %cst_53 = arith.constant dense<0.000000e+00> : vector<8x64xf32>
    %203 = tpu.matmul %202, %186, %cst_53 {dimension_numbers = #tpu.dot_dimension_numbers<[1], [0], [0], [1], [0, 0, 1, 1], [], []>} : vector<8x8xbf16>, vector<8x64xbf16>, vector<8x64xf32> -> vector<8x64xf32>
    %204 = vector.extract_strided_slice %1 {offsets = [0, 640], sizes = [8, 64], strides = [1, 1]} : vector<8x2304xbf16> to vector<8x64xbf16>
    %205 = vector.extract_strided_slice %1 {offsets = [0, 1408], sizes = [8, 64], strides = [1, 1]} : vector<8x2304xbf16> to vector<8x64xbf16>
    %206 = vector.extract_strided_slice %1 {offsets = [0, 2176], sizes = [8, 64], strides = [1, 1]} : vector<8x2304xbf16> to vector<8x64xbf16>
    %cst_54 = arith.constant dense<0.000000e+00> : vector<8x8xf32>
    %207 = tpu.matmul %204, %205, %cst_54 {dimension_numbers = #tpu.dot_dimension_numbers<[1], [1], [0], [0], [0, 0, 1, 0], [], []>} : vector<8x64xbf16>, vector<8x64xbf16>, vector<8x8xf32> -> vector<8x8xf32>
    %cst_55 = arith.constant 1.250000e-01 : f32
    %208 = vector.broadcast %cst_55 : f32 to vector<8x8xf32>
    %209 = arith.mulf %207, %208 : vector<8x8xf32>
    %210 = vector.broadcast %3 : vector<1x8xf32> to vector<8x8xf32>
    %211 = arith.addf %209, %210 : vector<8x8xf32>
    %cst_56 = arith.constant dense<0xFF800000> : vector<8xf32>
    %212 = vector.multi_reduction <maximumf>, %211, %cst_56 [1] : vector<8x8xf32> to vector<8xf32>
    %213 = vector.shape_cast %212 : vector<8xf32> to vector<8x1xf32>
    %214 = vector.broadcast %213 : vector<8x1xf32> to vector<8x8xf32>
    %215 = arith.subf %211, %214 : vector<8x8xf32>
    %216 = math.exp %215 : vector<8x8xf32>
    %cst_57 = arith.constant dense<0.000000e+00> : vector<8xf32>
    %217 = vector.multi_reduction <add>, %216, %cst_57 [1] : vector<8x8xf32> to vector<8xf32>
    %218 = vector.shape_cast %217 : vector<8xf32> to vector<8x1xf32>
    %219 = tpu.reciprocal %218 {approx = true} : vector<8x1xf32> -> vector<8x1xf32>
    %220 = vector.broadcast %219 : vector<8x1xf32> to vector<8x8xf32>
    %221 = arith.mulf %216, %220 : vector<8x8xf32>
    %222 = arith.truncf %221 : vector<8x8xf32> to vector<8x8xbf16>
    %cst_58 = arith.constant dense<0.000000e+00> : vector<8x64xf32>
    %223 = tpu.matmul %222, %206, %cst_58 {dimension_numbers = #tpu.dot_dimension_numbers<[1], [0], [0], [1], [0, 0, 1, 1], [], []>} : vector<8x8xbf16>, vector<8x64xbf16>, vector<8x64xf32> -> vector<8x64xf32>
    %224 = vector.extract_strided_slice %1 {offsets = [0, 704], sizes = [8, 64], strides = [1, 1]} : vector<8x2304xbf16> to vector<8x64xbf16>
    %225 = vector.extract_strided_slice %1 {offsets = [0, 1472], sizes = [8, 64], strides = [1, 1]} : vector<8x2304xbf16> to vector<8x64xbf16>
    %226 = vector.extract_strided_slice %1 {offsets = [0, 2240], sizes = [8, 64], strides = [1, 1]} : vector<8x2304xbf16> to vector<8x64xbf16>
    %cst_59 = arith.constant dense<0.000000e+00> : vector<8x8xf32>
    %227 = tpu.matmul %224, %225, %cst_59 {dimension_numbers = #tpu.dot_dimension_numbers<[1], [1], [0], [0], [0, 0, 1, 0], [], []>} : vector<8x64xbf16>, vector<8x64xbf16>, vector<8x8xf32> -> vector<8x8xf32>
    %cst_60 = arith.constant 1.250000e-01 : f32
    %228 = vector.broadcast %cst_60 : f32 to vector<8x8xf32>
    %229 = arith.mulf %227, %228 : vector<8x8xf32>
    %230 = vector.broadcast %3 : vector<1x8xf32> to vector<8x8xf32>
    %231 = arith.addf %229, %230 : vector<8x8xf32>
    %cst_61 = arith.constant dense<0xFF800000> : vector<8xf32>
    %232 = vector.multi_reduction <maximumf>, %231, %cst_61 [1] : vector<8x8xf32> to vector<8xf32>
    %233 = vector.shape_cast %232 : vector<8xf32> to vector<8x1xf32>
    %234 = vector.broadcast %233 : vector<8x1xf32> to vector<8x8xf32>
    %235 = arith.subf %231, %234 : vector<8x8xf32>
    %236 = math.exp %235 : vector<8x8xf32>
    %cst_62 = arith.constant dense<0.000000e+00> : vector<8xf32>
    %237 = vector.multi_reduction <add>, %236, %cst_62 [1] : vector<8x8xf32> to vector<8xf32>
    %238 = vector.shape_cast %237 : vector<8xf32> to vector<8x1xf32>
    %239 = tpu.reciprocal %238 {approx = true} : vector<8x1xf32> -> vector<8x1xf32>
    %240 = vector.broadcast %239 : vector<8x1xf32> to vector<8x8xf32>
    %241 = arith.mulf %236, %240 : vector<8x8xf32>
    %242 = arith.truncf %241 : vector<8x8xf32> to vector<8x8xbf16>
    %cst_63 = arith.constant dense<0.000000e+00> : vector<8x64xf32>
    %243 = tpu.matmul %242, %226, %cst_63 {dimension_numbers = #tpu.dot_dimension_numbers<[1], [0], [0], [1], [0, 0, 1, 1], [], []>} : vector<8x8xbf16>, vector<8x64xbf16>, vector<8x64xf32> -> vector<8x64xf32>
    %244 = tpu.concatenate %23, %43, %63, %83, %103, %123, %143, %163, %183, %203, %223, %243 in 1 : vector<8x64xf32>, vector<8x64xf32>, vector<8x64xf32>, vector<8x64xf32>, vector<8x64xf32>, vector<8x64xf32>, vector<8x64xf32>, vector<8x64xf32>, vector<8x64xf32>, vector<8x64xf32>, vector<8x64xf32>, vector<8x64xf32> -> vector<8x768xf32>
    %245 = arith.truncf %244 : vector<8x768xf32> to vector<8x768xbf16>
    %c0_64 = arith.constant 0 : index
    %c0_65 = arith.constant 0 : index
    %c0_66 = arith.constant 0 : index
    %246 = vector.load %arg3[%c0_64, %c0_65, %c0_66] : memref<1x8x768xbf16, #tpu.memory_space<vmem>>, vector<1x8x768xbf16>
    %247 = vector.shape_cast %246 : vector<1x8x768xbf16> to vector<8x768xbf16>
    %248 = vector.shape_cast %245 : vector<8x768xbf16> to vector<1x8x768xbf16>
    tpu.vector_store %arg3[%c0_64, %c0_65, %c0_66], %248 {strides = array<i32>} : memref<1x8x768xbf16, #tpu.memory_space<vmem>>, vector<1x8x768xbf16>,
    return
  }
  func.func @transform_0(%arg0: i32) -> (i32, i32, i32) {
    %c0_i32 = arith.constant 0 : i32
    %c0_i32_0 = arith.constant 0 : i32
    %c0_i32_1 = arith.constant 0 : i32
    return %arg0, %c0_i32, %c0_i32_0 : i32, i32, i32
  }
  func.func @transform_1(%arg0: i32) -> (i32, i32, i32) {
    %c0_i32 = arith.constant 0 : i32
    %c0_i32_0 = arith.constant 0 : i32
    %c0_i32_1 = arith.constant 0 : i32
    return %arg0, %c0_i32, %c0_i32_0 : i32, i32, i32
  }
  func.func @transform_2(%arg0: i32) -> (i32, i32, i32) {
    %c0_i32 = arith.constant 0 : i32
    %c0_i32_0 = arith.constant 0 : i32
    %c0_i32_1 = arith.constant 0 : i32
    return %arg0, %c0_i32, %c0_i32_0 : i32, i32, i32
  }
}

module attributes {stable_mosaic.version = 11 : i64} {
  func.func @_linear_kernel(%arg0: i32, %arg1: memref<16x768xbf16, #tpu.memory_space<vmem>>, %arg2: memref<768x256xbf16, #tpu.memory_space<vmem>>, %arg3: memref<1x256xf32, #tpu.memory_space<vmem>>, %arg4: memref<16x256xbf16, #tpu.memory_space<vmem>>) attributes {dimension_semantics = [#tpu.dimension_semantics<parallel>], iteration_bounds = array<i64: 9>, scalar_prefetch = 0 : i64, scratch_operands = 0 : i64, tpu.core_type = #tpu.core_type<tc>, window_params = [{pipeline_mode = #tpu.pipeline_mode<synchronous>, transform_indices = @transform_0, window_bounds = array<i64: 16, 768>}, {transform_indices = @transform_1, window_bounds = array<i64: 768, 256>}, {transform_indices = @transform_2, window_bounds = array<i64: 1, 256>}, {transform_indices = @transform_3, window_bounds = array<i64: 16, 256>}]} {
    %c0 = arith.constant 0 : index
    %c0_0 = arith.constant 0 : index
    %0 = vector.load %arg1[%c0, %c0_0] : memref<16x768xbf16, #tpu.memory_space<vmem>>, vector<16x768xbf16>
    %c0_1 = arith.constant 0 : index
    %c0_2 = arith.constant 0 : index
    %1 = vector.load %arg2[%c0_1, %c0_2] : memref<768x256xbf16, #tpu.memory_space<vmem>>, vector<768x256xbf16>
    %cst = arith.constant dense<0.000000e+00> : vector<16x256xf32>
    %2 = tpu.matmul %0, %1, %cst {dimension_numbers = #tpu.dot_dimension_numbers<[1], [0], [0], [1], [0, 0, 1, 1], [], []>} : vector<16x768xbf16>, vector<768x256xbf16>, vector<16x256xf32> -> vector<16x256xf32>
    %c0_3 = arith.constant 0 : index
    %c0_4 = arith.constant 0 : index
    %3 = vector.load %arg3[%c0_3, %c0_4] : memref<1x256xf32, #tpu.memory_space<vmem>>, vector<1x256xf32>
    %4 = vector.broadcast %3 : vector<1x256xf32> to vector<16x256xf32>
    %5 = arith.addf %2, %4 : vector<16x256xf32>
    %6 = arith.truncf %5 : vector<16x256xf32> to vector<16x256xbf16>
    %c0_5 = arith.constant 0 : index
    %c0_6 = arith.constant 0 : index
    %7 = vector.load %arg4[%c0_5, %c0_6] : memref<16x256xbf16, #tpu.memory_space<vmem>>, vector<16x256xbf16>
    tpu.vector_store %arg4[%c0_5, %c0_6], %6 {strides = array<i32>} : memref<16x256xbf16, #tpu.memory_space<vmem>>, vector<16x256xbf16>,
    return
  }
  func.func @transform_0(%arg0: i32) -> (i32, i32) {
    %c0_i32 = arith.constant 0 : i32
    %c0_i32_0 = arith.constant 0 : i32
    %c0_i32_1 = arith.constant 0 : i32
    return %c0_i32, %c0_i32_0 : i32, i32
  }
  func.func @transform_1(%arg0: i32) -> (i32, i32) {
    %c0_i32 = arith.constant 0 : i32
    %c0_i32_0 = arith.constant 0 : i32
    return %c0_i32, %arg0 : i32, i32
  }
  func.func @transform_2(%arg0: i32) -> (i32, i32) {
    %c0_i32 = arith.constant 0 : i32
    %c0_i32_0 = arith.constant 0 : i32
    return %c0_i32, %arg0 : i32, i32
  }
  func.func @transform_3(%arg0: i32) -> (i32, i32) {
    %c0_i32 = arith.constant 0 : i32
    %c0_i32_0 = arith.constant 0 : i32
    return %c0_i32, %arg0 : i32, i32
  }
}

module attributes {stable_mosaic.version = 11 : i64} {
  func.func @_linear_res_ln_kernel(%arg0: memref<16x768xbf16, #tpu.memory_space<vmem>>, %arg1: memref<768x768xbf16, #tpu.memory_space<vmem>>, %arg2: memref<1x768xf32, #tpu.memory_space<vmem>>, %arg3: memref<16x768xbf16, #tpu.memory_space<vmem>>, %arg4: memref<1x768xf32, #tpu.memory_space<vmem>>, %arg5: memref<1x768xf32, #tpu.memory_space<vmem>>, %arg6: memref<16x768xbf16, #tpu.memory_space<vmem>>) attributes {dimension_semantics = [], scalar_prefetch = 0 : i64, scratch_operands = 0 : i64, tpu.core_type = #tpu.core_type<tc>} {
    %c0 = arith.constant 0 : index
    %c0_0 = arith.constant 0 : index
    %0 = vector.load %arg0[%c0, %c0_0] : memref<16x768xbf16, #tpu.memory_space<vmem>>, vector<16x768xbf16>
    %c0_1 = arith.constant 0 : index
    %c0_2 = arith.constant 0 : index
    %1 = vector.load %arg1[%c0_1, %c0_2] : memref<768x768xbf16, #tpu.memory_space<vmem>>, vector<768x768xbf16>
    %cst = arith.constant dense<0.000000e+00> : vector<16x768xf32>
    %2 = tpu.matmul %0, %1, %cst {dimension_numbers = #tpu.dot_dimension_numbers<[1], [0], [0], [1], [0, 0, 1, 1], [], []>} : vector<16x768xbf16>, vector<768x768xbf16>, vector<16x768xf32> -> vector<16x768xf32>
    %c0_3 = arith.constant 0 : index
    %c0_4 = arith.constant 0 : index
    %3 = vector.load %arg2[%c0_3, %c0_4] : memref<1x768xf32, #tpu.memory_space<vmem>>, vector<1x768xf32>
    %4 = vector.broadcast %3 : vector<1x768xf32> to vector<16x768xf32>
    %5 = arith.addf %2, %4 : vector<16x768xf32>
    %c0_5 = arith.constant 0 : index
    %c0_6 = arith.constant 0 : index
    %6 = vector.load %arg3[%c0_5, %c0_6] : memref<16x768xbf16, #tpu.memory_space<vmem>>, vector<16x768xbf16>
    %7 = arith.extf %6 : vector<16x768xbf16> to vector<16x768xf32>
    %8 = arith.addf %5, %7 : vector<16x768xf32>
    %cst_7 = arith.constant dense<0.000000e+00> : vector<16xf32>
    %9 = vector.multi_reduction <add>, %8, %cst_7 [1] : vector<16x768xf32> to vector<16xf32>
    %10 = vector.shape_cast %9 : vector<16xf32> to vector<16x1xf32>
    %cst_8 = arith.constant 7.680000e+02 : f32
    %11 = vector.broadcast %cst_8 : f32 to vector<16x1xf32>
    %12 = arith.divf %10, %11 : vector<16x1xf32>
    %13 = vector.broadcast %12 : vector<16x1xf32> to vector<16x768xf32>
    %14 = arith.subf %8, %13 : vector<16x768xf32>
    %15 = arith.mulf %14, %14 : vector<16x768xf32>
    %cst_9 = arith.constant dense<0.000000e+00> : vector<16xf32>
    %16 = vector.multi_reduction <add>, %15, %cst_9 [1] : vector<16x768xf32> to vector<16xf32>
    %17 = vector.shape_cast %16 : vector<16xf32> to vector<16x1xf32>
    %cst_10 = arith.constant 7.680000e+02 : f32
    %18 = vector.broadcast %cst_10 : f32 to vector<16x1xf32>
    %19 = arith.divf %17, %18 : vector<16x1xf32>
    %20 = vector.broadcast %12 : vector<16x1xf32> to vector<16x768xf32>
    %21 = arith.subf %8, %20 : vector<16x768xf32>
    %cst_11 = arith.constant 9.99999996E-13 : f32
    %22 = vector.broadcast %cst_11 : f32 to vector<16x1xf32>
    %23 = arith.addf %19, %22 : vector<16x1xf32>
    %24 = math.rsqrt %23 : vector<16x1xf32>
    %25 = vector.broadcast %24 : vector<16x1xf32> to vector<16x768xf32>
    %26 = arith.mulf %21, %25 : vector<16x768xf32>
    %c0_12 = arith.constant 0 : index
    %c0_13 = arith.constant 0 : index
    %27 = vector.load %arg4[%c0_12, %c0_13] : memref<1x768xf32, #tpu.memory_space<vmem>>, vector<1x768xf32>
    %28 = vector.broadcast %27 : vector<1x768xf32> to vector<16x768xf32>
    %29 = arith.mulf %26, %28 : vector<16x768xf32>
    %c0_14 = arith.constant 0 : index
    %c0_15 = arith.constant 0 : index
    %30 = vector.load %arg5[%c0_14, %c0_15] : memref<1x768xf32, #tpu.memory_space<vmem>>, vector<1x768xf32>
    %31 = vector.broadcast %30 : vector<1x768xf32> to vector<16x768xf32>
    %32 = arith.addf %29, %31 : vector<16x768xf32>
    %33 = arith.truncf %32 : vector<16x768xf32> to vector<16x768xbf16>
    %c0_16 = arith.constant 0 : index
    %c0_17 = arith.constant 0 : index
    %34 = vector.load %arg6[%c0_16, %c0_17] : memref<16x768xbf16, #tpu.memory_space<vmem>>, vector<16x768xbf16>
    tpu.vector_store %arg6[%c0_16, %c0_17], %33 {strides = array<i32>} : memref<16x768xbf16, #tpu.memory_space<vmem>>, vector<16x768xbf16>,
    return
  }
}

module attributes {stable_mosaic.version = 11 : i64} {
  func.func @_linear_kernel(%arg0: i32, %arg1: memref<16x768xbf16, #tpu.memory_space<vmem>>, %arg2: memref<768x256xbf16, #tpu.memory_space<vmem>>, %arg3: memref<1x256xf32, #tpu.memory_space<vmem>>, %arg4: memref<16x256xbf16, #tpu.memory_space<vmem>>) attributes {dimension_semantics = [#tpu.dimension_semantics<parallel>], iteration_bounds = array<i64: 12>, scalar_prefetch = 0 : i64, scratch_operands = 0 : i64, tpu.core_type = #tpu.core_type<tc>, window_params = [{pipeline_mode = #tpu.pipeline_mode<synchronous>, transform_indices = @transform_0, window_bounds = array<i64: 16, 768>}, {transform_indices = @transform_1, window_bounds = array<i64: 768, 256>}, {transform_indices = @transform_2, window_bounds = array<i64: 1, 256>}, {transform_indices = @transform_3, window_bounds = array<i64: 16, 256>}]} {
    %c0 = arith.constant 0 : index
    %c0_0 = arith.constant 0 : index
    %0 = vector.load %arg1[%c0, %c0_0] : memref<16x768xbf16, #tpu.memory_space<vmem>>, vector<16x768xbf16>
    %c0_1 = arith.constant 0 : index
    %c0_2 = arith.constant 0 : index
    %1 = vector.load %arg2[%c0_1, %c0_2] : memref<768x256xbf16, #tpu.memory_space<vmem>>, vector<768x256xbf16>
    %cst = arith.constant dense<0.000000e+00> : vector<16x256xf32>
    %2 = tpu.matmul %0, %1, %cst {dimension_numbers = #tpu.dot_dimension_numbers<[1], [0], [0], [1], [0, 0, 1, 1], [], []>} : vector<16x768xbf16>, vector<768x256xbf16>, vector<16x256xf32> -> vector<16x256xf32>
    %c0_3 = arith.constant 0 : index
    %c0_4 = arith.constant 0 : index
    %3 = vector.load %arg3[%c0_3, %c0_4] : memref<1x256xf32, #tpu.memory_space<vmem>>, vector<1x256xf32>
    %4 = vector.broadcast %3 : vector<1x256xf32> to vector<16x256xf32>
    %5 = arith.addf %2, %4 : vector<16x256xf32>
    %cst_5 = arith.constant 5.000000e-01 : f32
    %6 = vector.broadcast %cst_5 : f32 to vector<16x256xf32>
    %7 = arith.mulf %6, %5 : vector<16x256xf32>
    %cst_6 = arith.constant 4.471500e-02 : f32
    %8 = vector.broadcast %cst_6 : f32 to vector<16x256xf32>
    %9 = arith.mulf %8, %5 : vector<16x256xf32>
    %10 = arith.mulf %9, %5 : vector<16x256xf32>
    %11 = arith.mulf %10, %5 : vector<16x256xf32>
    %12 = arith.addf %5, %11 : vector<16x256xf32>
    %cst_7 = arith.constant 0.797884583 : f32
    %13 = vector.broadcast %cst_7 : f32 to vector<16x256xf32>
    %14 = arith.mulf %13, %12 : vector<16x256xf32>
    %15 = math.tanh %14 : vector<16x256xf32>
    %cst_8 = arith.constant 1.000000e+00 : f32
    %16 = vector.broadcast %cst_8 : f32 to vector<16x256xf32>
    %17 = arith.addf %16, %15 : vector<16x256xf32>
    %18 = arith.mulf %7, %17 : vector<16x256xf32>
    %19 = arith.truncf %18 : vector<16x256xf32> to vector<16x256xbf16>
    %c0_9 = arith.constant 0 : index
    %c0_10 = arith.constant 0 : index
    %20 = vector.load %arg4[%c0_9, %c0_10] : memref<16x256xbf16, #tpu.memory_space<vmem>>, vector<16x256xbf16>
    tpu.vector_store %arg4[%c0_9, %c0_10], %19 {strides = array<i32>} : memref<16x256xbf16, #tpu.memory_space<vmem>>, vector<16x256xbf16>,
    return
  }
  func.func @transform_0(%arg0: i32) -> (i32, i32) {
    %c0_i32 = arith.constant 0 : i32
    %c0_i32_0 = arith.constant 0 : i32
    %c0_i32_1 = arith.constant 0 : i32
    return %c0_i32, %c0_i32_0 : i32, i32
  }
  func.func @transform_1(%arg0: i32) -> (i32, i32) {
    %c0_i32 = arith.constant 0 : i32
    %c0_i32_0 = arith.constant 0 : i32
    return %c0_i32, %arg0 : i32, i32
  }
  func.func @transform_2(%arg0: i32) -> (i32, i32) {
    %c0_i32 = arith.constant 0 : i32
    %c0_i32_0 = arith.constant 0 : i32
    return %c0_i32, %arg0 : i32, i32
  }
  func.func @transform_3(%arg0: i32) -> (i32, i32) {
    %c0_i32 = arith.constant 0 : i32
    %c0_i32_0 = arith.constant 0 : i32
    return %c0_i32, %arg0 : i32, i32
  }
}

module attributes {stable_mosaic.version = 11 : i64} {
  func.func @_linear_res_ln_kernel(%arg0: memref<16x3072xbf16, #tpu.memory_space<vmem>>, %arg1: memref<3072x768xbf16, #tpu.memory_space<vmem>>, %arg2: memref<1x768xf32, #tpu.memory_space<vmem>>, %arg3: memref<16x768xbf16, #tpu.memory_space<vmem>>, %arg4: memref<1x768xf32, #tpu.memory_space<vmem>>, %arg5: memref<1x768xf32, #tpu.memory_space<vmem>>, %arg6: memref<16x768xbf16, #tpu.memory_space<vmem>>) attributes {dimension_semantics = [], scalar_prefetch = 0 : i64, scratch_operands = 0 : i64, tpu.core_type = #tpu.core_type<tc>} {
    %c0 = arith.constant 0 : index
    %c0_0 = arith.constant 0 : index
    %0 = vector.load %arg0[%c0, %c0_0] : memref<16x3072xbf16, #tpu.memory_space<vmem>>, vector<16x3072xbf16>
    %c0_1 = arith.constant 0 : index
    %c0_2 = arith.constant 0 : index
    %1 = vector.load %arg1[%c0_1, %c0_2] : memref<3072x768xbf16, #tpu.memory_space<vmem>>, vector<3072x768xbf16>
    %cst = arith.constant dense<0.000000e+00> : vector<16x768xf32>
    %2 = tpu.matmul %0, %1, %cst {dimension_numbers = #tpu.dot_dimension_numbers<[1], [0], [0], [1], [0, 0, 1, 1], [], []>} : vector<16x3072xbf16>, vector<3072x768xbf16>, vector<16x768xf32> -> vector<16x768xf32>
    %c0_3 = arith.constant 0 : index
    %c0_4 = arith.constant 0 : index
    %3 = vector.load %arg2[%c0_3, %c0_4] : memref<1x768xf32, #tpu.memory_space<vmem>>, vector<1x768xf32>
    %4 = vector.broadcast %3 : vector<1x768xf32> to vector<16x768xf32>
    %5 = arith.addf %2, %4 : vector<16x768xf32>
    %c0_5 = arith.constant 0 : index
    %c0_6 = arith.constant 0 : index
    %6 = vector.load %arg3[%c0_5, %c0_6] : memref<16x768xbf16, #tpu.memory_space<vmem>>, vector<16x768xbf16>
    %7 = arith.extf %6 : vector<16x768xbf16> to vector<16x768xf32>
    %8 = arith.addf %5, %7 : vector<16x768xf32>
    %cst_7 = arith.constant dense<0.000000e+00> : vector<16xf32>
    %9 = vector.multi_reduction <add>, %8, %cst_7 [1] : vector<16x768xf32> to vector<16xf32>
    %10 = vector.shape_cast %9 : vector<16xf32> to vector<16x1xf32>
    %cst_8 = arith.constant 7.680000e+02 : f32
    %11 = vector.broadcast %cst_8 : f32 to vector<16x1xf32>
    %12 = arith.divf %10, %11 : vector<16x1xf32>
    %13 = vector.broadcast %12 : vector<16x1xf32> to vector<16x768xf32>
    %14 = arith.subf %8, %13 : vector<16x768xf32>
    %15 = arith.mulf %14, %14 : vector<16x768xf32>
    %cst_9 = arith.constant dense<0.000000e+00> : vector<16xf32>
    %16 = vector.multi_reduction <add>, %15, %cst_9 [1] : vector<16x768xf32> to vector<16xf32>
    %17 = vector.shape_cast %16 : vector<16xf32> to vector<16x1xf32>
    %cst_10 = arith.constant 7.680000e+02 : f32
    %18 = vector.broadcast %cst_10 : f32 to vector<16x1xf32>
    %19 = arith.divf %17, %18 : vector<16x1xf32>
    %20 = vector.broadcast %12 : vector<16x1xf32> to vector<16x768xf32>
    %21 = arith.subf %8, %20 : vector<16x768xf32>
    %cst_11 = arith.constant 9.99999996E-13 : f32
    %22 = vector.broadcast %cst_11 : f32 to vector<16x1xf32>
    %23 = arith.addf %19, %22 : vector<16x1xf32>
    %24 = math.rsqrt %23 : vector<16x1xf32>
    %25 = vector.broadcast %24 : vector<16x1xf32> to vector<16x768xf32>
    %26 = arith.mulf %21, %25 : vector<16x768xf32>
    %c0_12 = arith.constant 0 : index
    %c0_13 = arith.constant 0 : index
    %27 = vector.load %arg4[%c0_12, %c0_13] : memref<1x768xf32, #tpu.memory_space<vmem>>, vector<1x768xf32>
    %28 = vector.broadcast %27 : vector<1x768xf32> to vector<16x768xf32>
    %29 = arith.mulf %26, %28 : vector<16x768xf32>
    %c0_14 = arith.constant 0 : index
    %c0_15 = arith.constant 0 : index
    %30 = vector.load %arg5[%c0_14, %c0_15] : memref<1x768xf32, #tpu.memory_space<vmem>>, vector<1x768xf32>
    %31 = vector.broadcast %30 : vector<1x768xf32> to vector<16x768xf32>
    %32 = arith.addf %29, %31 : vector<16x768xf32>
    %33 = arith.truncf %32 : vector<16x768xf32> to vector<16x768xbf16>
    %c0_16 = arith.constant 0 : index
    %c0_17 = arith.constant 0 : index
    %34 = vector.load %arg6[%c0_16, %c0_17] : memref<16x768xbf16, #tpu.memory_space<vmem>>, vector<16x768xbf16>
    tpu.vector_store %arg6[%c0_16, %c0_17], %33 {strides = array<i32>} : memref<16x768xbf16, #tpu.memory_space<vmem>>, vector<16x768xbf16>,
    return
  }
}

module attributes {stable_mosaic.version = 11 : i64} {
  func.func @_linear_kernel(%arg0: i32, %arg1: memref<16x768xbf16, #tpu.memory_space<vmem>>, %arg2: memref<768x128xbf16, #tpu.memory_space<vmem>>, %arg3: memref<1x128xf32, #tpu.memory_space<vmem>>, %arg4: memref<16x128xf32, #tpu.memory_space<vmem>>) attributes {dimension_semantics = [#tpu.dimension_semantics<parallel>], iteration_bounds = array<i64: 1>, scalar_prefetch = 0 : i64, scratch_operands = 0 : i64, tpu.core_type = #tpu.core_type<tc>, window_params = [{pipeline_mode = #tpu.pipeline_mode<synchronous>, transform_indices = @transform_0, window_bounds = array<i64: 16, 768>}, {transform_indices = @transform_1, window_bounds = array<i64: 768, 128>}, {transform_indices = @transform_2, window_bounds = array<i64: 1, 128>}, {transform_indices = @transform_3, window_bounds = array<i64: 16, 128>}]} {
    %c0 = arith.constant 0 : index
    %c0_0 = arith.constant 0 : index
    %0 = vector.load %arg1[%c0, %c0_0] : memref<16x768xbf16, #tpu.memory_space<vmem>>, vector<16x768xbf16>
    %c0_1 = arith.constant 0 : index
    %c0_2 = arith.constant 0 : index
    %1 = vector.load %arg2[%c0_1, %c0_2] : memref<768x128xbf16, #tpu.memory_space<vmem>>, vector<768x128xbf16>
    %cst = arith.constant dense<0.000000e+00> : vector<16x128xf32>
    %2 = tpu.matmul %0, %1, %cst {dimension_numbers = #tpu.dot_dimension_numbers<[1], [0], [0], [1], [0, 0, 1, 1], [], []>} : vector<16x768xbf16>, vector<768x128xbf16>, vector<16x128xf32> -> vector<16x128xf32>
    %c0_3 = arith.constant 0 : index
    %c0_4 = arith.constant 0 : index
    %3 = vector.load %arg3[%c0_3, %c0_4] : memref<1x128xf32, #tpu.memory_space<vmem>>, vector<1x128xf32>
    %4 = vector.broadcast %3 : vector<1x128xf32> to vector<16x128xf32>
    %5 = arith.addf %2, %4 : vector<16x128xf32>
    %c0_5 = arith.constant 0 : index
    %c0_6 = arith.constant 0 : index
    %6 = vector.load %arg4[%c0_5, %c0_6] : memref<16x128xf32, #tpu.memory_space<vmem>>, vector<16x128xf32>
    tpu.vector_store %arg4[%c0_5, %c0_6], %5 {strides = array<i32>} : memref<16x128xf32, #tpu.memory_space<vmem>>, vector<16x128xf32>,
    return
  }
  func.func @transform_0(%arg0: i32) -> (i32, i32) {
    %c0_i32 = arith.constant 0 : i32
    %c0_i32_0 = arith.constant 0 : i32
    %c0_i32_1 = arith.constant 0 : i32
    return %c0_i32, %c0_i32_0 : i32, i32
  }
  func.func @transform_1(%arg0: i32) -> (i32, i32) {
    %c0_i32 = arith.constant 0 : i32
    %c0_i32_0 = arith.constant 0 : i32
    return %c0_i32, %arg0 : i32, i32
  }
  func.func @transform_2(%arg0: i32) -> (i32, i32) {
    %c0_i32 = arith.constant 0 : i32
    %c0_i32_0 = arith.constant 0 : i32
    return %c0_i32, %arg0 : i32, i32
  }
  func.func @transform_3(%arg0: i32) -> (i32, i32) {
    %c0_i32 = arith.constant 0 : i32
    %c0_i32_0 = arith.constant 0 : i32
    return %c0_i32, %arg0 : i32, i32
  }
}

module attributes {stable_mosaic.version = 11 : i64} {
  func.func @_viterbi_kernel(%arg0: memref<7x2x5xf32, #tpu.memory_space<vmem>>, %arg1: memref<1x5xf32, #tpu.memory_space<vmem>>, %arg2: memref<1x5xf32, #tpu.memory_space<vmem>>, %arg3: memref<5x5xf32, #tpu.memory_space<vmem>>, %arg4: memref<7x2x1xi32, #tpu.memory_space<vmem>>, %arg5: memref<2x5xf32, #tpu.memory_space<vmem>>, %arg6: memref<7x2x5xi32, #tpu.memory_space<vmem>>, %arg7: memref<2x1xi32, #tpu.memory_space<vmem>>) attributes {dimension_semantics = [], scalar_prefetch = 0 : i64, scratch_operands = 3 : i64, tpu.core_type = #tpu.core_type<tc>} {
    %c0 = arith.constant 0 : index
    %c0_0 = arith.constant 0 : index
    %c0_1 = arith.constant 0 : index
    %0 = vector.load %arg0[%c0, %c0_0, %c0_1] : memref<7x2x5xf32, #tpu.memory_space<vmem>>, vector<1x2x5xf32>
    %1 = vector.shape_cast %0 : vector<1x2x5xf32> to vector<2x5xf32>
    %c0_2 = arith.constant 0 : index
    %c0_3 = arith.constant 0 : index
    %2 = vector.load %arg1[%c0_2, %c0_3] : memref<1x5xf32, #tpu.memory_space<vmem>>, vector<1x5xf32>
    %3 = vector.broadcast %2 : vector<1x5xf32> to vector<2x5xf32>
    %4 = arith.addf %1, %3 : vector<2x5xf32>
    %c0_4 = arith.constant 0 : index
    %c0_5 = arith.constant 0 : index
    %5 = vector.load %arg5[%c0_4, %c0_5] : memref<2x5xf32, #tpu.memory_space<vmem>>, vector<2x5xf32>
    tpu.vector_store %arg5[%c0_4, %c0_5], %4 {strides = array<i32>} : memref<2x5xf32, #tpu.memory_space<vmem>>, vector<2x5xf32>,
    %c0_i32 = arith.constant 0 : i32
    %c6_i32 = arith.constant 6 : i32
    %6 = arith.addi %c0_i32, %c6_i32 : i32
    %c1_i32 = arith.constant 1 : i32
    scf.for %arg8 = %c0_i32 to %6 step %c1_i32  : i32 {
      %c1_i32_20 = arith.constant 1 : i32
      %25 = arith.muli %arg8, %c1_i32_20 : i32
      %c1_i32_21 = arith.constant 1 : i32
      %26 = arith.addi %c1_i32_21, %25 : i32
      %c0_22 = arith.constant 0 : index
      %c0_23 = arith.constant 0 : index
      %27 = vector.load %arg5[%c0_22, %c0_23] : memref<2x5xf32, #tpu.memory_space<vmem>>, vector<2x5xf32>
      %28 = vector.shape_cast %27 : vector<2x5xf32> to vector<2x1x5xf32>
      %c0_24 = arith.constant 0 : index
      %c0_25 = arith.constant 0 : index
      %29 = vector.load %arg3[%c0_24, %c0_25] : memref<5x5xf32, #tpu.memory_space<vmem>>, vector<5x5xf32>
      %30 = vector.shape_cast %29 : vector<5x5xf32> to vector<1x5x5xf32>
      %31 = vector.broadcast %28 : vector<2x1x5xf32> to vector<2x5x5xf32>
      %32 = vector.broadcast %30 : vector<1x5x5xf32> to vector<2x5x5xf32>
      %33 = arith.addf %31, %32 : vector<2x5x5xf32>
      %cst_26 = arith.constant dense<0xFF800000> : vector<2x5xf32>
      %34 = vector.multi_reduction <maximumf>, %33, %cst_26 [2] : vector<2x5x5xf32> to vector<2x5xf32>
      %35 = tpu.iota {dimensions = array<i32: 2>} : vector<2x5x5xi32>
      %36 = vector.shape_cast %34 : vector<2x5xf32> to vector<2x5x1xf32>
      %37 = vector.broadcast %36 : vector<2x5x1xf32> to vector<2x5x5xf32>
      %38 = arith.cmpf oge, %33, %37 : vector<2x5x5xf32>
      %c5_i32_27 = arith.constant 5 : i32
      %39 = vector.broadcast %c5_i32_27 : i32 to vector<2x5x5xi32>
      %40 = arith.select %38, %35, %39 : vector<2x5x5xi1>, vector<2x5x5xi32>
      %cst_28 = arith.constant dense<2147483647> : vector<2x5xi32>
      %41 = vector.multi_reduction <minsi>, %40, %cst_28 [2] : vector<2x5x5xi32> to vector<2x5xi32>
      %42 = arith.index_cast %26 : i32 to index
      %c0_29 = arith.constant 0 : index
      %c0_30 = arith.constant 0 : index
      %43 = vector.load %arg6[%42, %c0_29, %c0_30] : memref<7x2x5xi32, #tpu.memory_space<vmem>>, vector<1x2x5xi32>
      %44 = vector.shape_cast %43 : vector<1x2x5xi32> to vector<2x5xi32>
      %45 = vector.shape_cast %41 : vector<2x5xi32> to vector<1x2x5xi32>
      tpu.vector_store %arg6[%42, %c0_29, %c0_30], %45 {strides = array<i32>} : memref<7x2x5xi32, #tpu.memory_space<vmem>>, vector<1x2x5xi32>,
      %46 = arith.index_cast %26 : i32 to index
      %c0_31 = arith.constant 0 : index
      %c0_32 = arith.constant 0 : index
      %47 = vector.load %arg0[%46, %c0_31, %c0_32] : memref<7x2x5xf32, #tpu.memory_space<vmem>>, vector<1x2x5xf32>
      %48 = vector.shape_cast %47 : vector<1x2x5xf32> to vector<2x5xf32>
      %49 = arith.addf %34, %48 : vector<2x5xf32>
      %c0_33 = arith.constant 0 : index
      %c0_34 = arith.constant 0 : index
      %50 = vector.load %arg5[%c0_33, %c0_34] : memref<2x5xf32, #tpu.memory_space<vmem>>, vector<2x5xf32>
      tpu.vector_store %arg5[%c0_33, %c0_34], %49 {strides = array<i32>} : memref<2x5xf32, #tpu.memory_space<vmem>>, vector<2x5xf32>,
    }
    %c6_i32_6 = arith.constant 6 : i32
    %c0_7 = arith.constant 0 : index
    %c0_8 = arith.constant 0 : index
    %7 = vector.load %arg5[%c0_7, %c0_8] : memref<2x5xf32, #tpu.memory_space<vmem>>, vector<2x5xf32>
    %c0_9 = arith.constant 0 : index
    %c0_10 = arith.constant 0 : index
    %8 = vector.load %arg2[%c0_9, %c0_10] : memref<1x5xf32, #tpu.memory_space<vmem>>, vector<1x5xf32>
    %9 = vector.broadcast %8 : vector<1x5xf32> to vector<2x5xf32>
    %10 = arith.addf %7, %9 : vector<2x5xf32>
    %cst = arith.constant dense<0xFF800000> : vector<2xf32>
    %11 = vector.multi_reduction <maximumf>, %10, %cst [1] : vector<2x5xf32> to vector<2xf32>
    %12 = vector.shape_cast %11 : vector<2xf32> to vector<2x1xf32>
    %13 = tpu.iota {dimensions = array<i32: 1>} : vector<2x5xi32>
    %14 = vector.broadcast %12 : vector<2x1xf32> to vector<2x5xf32>
    %15 = arith.cmpf oge, %10, %14 : vector<2x5xf32>
    %c5_i32 = arith.constant 5 : i32
    %16 = vector.broadcast %c5_i32 : i32 to vector<2x5xi32>
    %17 = arith.select %15, %13, %16 : vector<2x5xi1>, vector<2x5xi32>
    %cst_11 = arith.constant dense<2147483647> : vector<2xi32>
    %18 = vector.multi_reduction <minsi>, %17, %cst_11 [1] : vector<2x5xi32> to vector<2xi32>
    %19 = vector.shape_cast %18 : vector<2xi32> to vector<2x1xi32>
    %c0_12 = arith.constant 0 : index
    %c0_13 = arith.constant 0 : index
    %20 = vector.load %arg7[%c0_12, %c0_13] : memref<2x1xi32, #tpu.memory_space<vmem>>, vector<2x1xi32>
    tpu.vector_store %arg7[%c0_12, %c0_13], %19 {strides = array<i32>} : memref<2x1xi32, #tpu.memory_space<vmem>>, vector<2x1xi32>,
    %c6 = arith.constant 6 : index
    %c0_14 = arith.constant 0 : index
    %c0_15 = arith.constant 0 : index
    %21 = vector.load %arg4[%c6, %c0_14, %c0_15] : memref<7x2x1xi32, #tpu.memory_space<vmem>>, vector<1x2x1xi32>
    %22 = vector.shape_cast %21 : vector<1x2x1xi32> to vector<2x1xi32>
    %23 = vector.shape_cast %19 : vector<2x1xi32> to vector<1x2x1xi32>
    tpu.vector_store %arg4[%c6, %c0_14, %c0_15], %23 {strides = array<i32>} : memref<7x2x1xi32, #tpu.memory_space<vmem>>, vector<1x2x1xi32>,
    %c0_i32_16 = arith.constant 0 : i32
    %c6_i32_17 = arith.constant 6 : i32
    %24 = arith.addi %c0_i32_16, %c6_i32_17 : i32
    %c1_i32_18 = arith.constant 1 : i32
    scf.for %arg8 = %c0_i32_16 to %24 step %c1_i32_18  : i32 {
      %c1_i32_20 = arith.constant 1 : i32
      %25 = arith.muli %arg8, %c1_i32_20 : i32
      %c1_i32_21 = arith.constant 1 : i32
      %26 = arith.addi %c1_i32_21, %25 : i32
      %c7_i32 = arith.constant 7 : i32
      %27 = arith.subi %c7_i32, %26 : i32
      %c0_22 = arith.constant 0 : index
      %c0_23 = arith.constant 0 : index
      %28 = vector.load %arg7[%c0_22, %c0_23] : memref<2x1xi32, #tpu.memory_space<vmem>>, vector<2x1xi32>
      %29 = arith.index_cast %27 : i32 to index
      %c0_24 = arith.constant 0 : index
      %c0_25 = arith.constant 0 : index
      %30 = vector.load %arg6[%29, %c0_24, %c0_25] : memref<7x2x5xi32, #tpu.memory_space<vmem>>, vector<1x2x5xi32>
      %31 = vector.shape_cast %30 : vector<1x2x5xi32> to vector<2x5xi32>
      %32 = tpu.iota {dimensions = array<i32: 1>} : vector<2x5xi32>
      %33 = vector.broadcast %28 : vector<2x1xi32> to vector<2x5xi32>
      %34 = arith.cmpi eq, %32, %33 : vector<2x5xi32>
      %c0_i32_26 = arith.constant 0 : i32
      %35 = vector.broadcast %c0_i32_26 : i32 to vector<2x5xi32>
      %36 = arith.select %34, %31, %35 : vector<2x5xi1>, vector<2x5xi32>
      %cst_27 = arith.constant dense<0> : vector<2xi32>
      %37 = vector.multi_reduction <add>, %36, %cst_27 [1] : vector<2x5xi32> to vector<2xi32>
      %38 = vector.shape_cast %37 : vector<2xi32> to vector<2x1xi32>
      %c1_i32_28 = arith.constant 1 : i32
      %39 = arith.subi %27, %c1_i32_28 : i32
      %40 = arith.index_cast %39 : i32 to index
      %c0_29 = arith.constant 0 : index
      %c0_30 = arith.constant 0 : index
      %41 = vector.load %arg4[%40, %c0_29, %c0_30] : memref<7x2x1xi32, #tpu.memory_space<vmem>>, vector<1x2x1xi32>
      %42 = vector.shape_cast %41 : vector<1x2x1xi32> to vector<2x1xi32>
      %43 = vector.shape_cast %38 : vector<2x1xi32> to vector<1x2x1xi32>
      tpu.vector_store %arg4[%40, %c0_29, %c0_30], %43 {strides = array<i32>} : memref<7x2x1xi32, #tpu.memory_space<vmem>>, vector<1x2x1xi32>,
      %c0_31 = arith.constant 0 : index
      %c0_32 = arith.constant 0 : index
      %44 = vector.load %arg7[%c0_31, %c0_32] : memref<2x1xi32, #tpu.memory_space<vmem>>, vector<2x1xi32>
      tpu.vector_store %arg7[%c0_31, %c0_32], %38 {strides = array<i32>} : memref<2x1xi32, #tpu.memory_space<vmem>>, vector<2x1xi32>,
    }
    %c6_i32_19 = arith.constant 6 : i32
    return
  }
}

</mosaic_0001>

<bundles_post_ra>
// kernel: bert_ner_forward.8
= control target key start
LH: loop header
LB: loop body
LE: loop exit
PB: predicated region body
PF: predicated region fallthrough
CT: control target
= control target key end

     0   :  { %8 = vsyncpa [#allocation3], 0  ;;  %s480_s0 = inlined_call_operand.vmem [shape: f32[16,768], index: 0, kind: input, shape index: {}]   ;;  %s481_s1 = inlined_call_operand.hbm [shape: f32[1,768], index: 1, kind: input, shape index: {}]   ;;  %s482_s2 = inlined_call_operand.hbm [shape: f32[1,768], index: 2, kind: input, shape index: {}]   ;;  %s483_s3 = inlined_call_operand.vmem [shape: bf16[16,768], index: 3, kind: output, shape index: {}]  }
   0x1   :  { %9 = vsyncpa [#allocation5], 0  ;;  %s325_s12 = smov [#allocation2]   ;;  %s326_s14 = smov [#allocation4]  }
   0x2   :  { %s18_s13 = sshll.u32 %s325_s12, 4  ;;  %s28_s15 = sshll.u32 %s326_s14, 4  ;;  %s19_s13 = int_to_ptr.vmem [resolvable:$true] %s18_s13  ;;  %s29_s15 = int_to_ptr.vmem [resolvable:$true] %s28_s15 }
   0x3   :  { %s277_s18 = scalar_lea.hbm %s481_s1, 96 }
   0x4   :  { %p278_p0 = scmp.ne.s32.totalorder %s481_s1, %s277_s18  ;;  %p281_p1 = scmp.lt.u32.totalorder %s277_s18, %s481_s1 }
   0x6   :  { %p283_p2 = pnand %p281_p1, %p278_p0 }
   0x8   :  { %286 = shalt.err (!%p283_p2)
}
   0x9   :  { %s287_s23 = scalar_lea.vmem %s19_s13, 96  ;;  %p292_p4 = scmp.lt.s32.totalorder %s19_s13, %s19_s13 }
   0xa   :  { %p288_p3 = scmp.ne.s32.totalorder %s19_s13, %s287_s23  ;;  %p293_p5 = scmp.lt.s32.totalorder %s287_s23, %s287_s23 }
   0xc   :  { %p294_p6 = por %p293_p5, %p292_p4 }
   0xe   :  { %p295_p7 = pnand %p294_p6, %p288_p3 }
  0x10   :  { %298 = shalt.err (!%p295_p7)
}
  0x11   :  { %21 = dma.hbm_to_vmem [thread:$0]  %s481_s1, 96, %s19_s13, [#allocation3]  }
  0x12   :  { %s299_s28 = scalar_lea.hbm %s482_s2, 96 }
  0x13   :  { %p300_p8 = scmp.ne.s32.totalorder %s482_s2, %s299_s28  ;;  %p303_p9 = scmp.lt.u32.totalorder %s299_s28, %s482_s2 }
  0x15   :  { %p305_p10 = pnand %p303_p9, %p300_p8 }
  0x17   :  { %308 = shalt.err (!%p305_p10)
}
  0x18   :  { %s309_s6 = scalar_lea.vmem %s29_s15, 96  ;;  %p314_p12 = scmp.lt.s32.totalorder %s29_s15, %s29_s15 }
  0x19   :  { %p310_p11 = scmp.ne.s32.totalorder %s29_s15, %s309_s6  ;;  %p315_p13 = scmp.lt.s32.totalorder %s309_s6, %s309_s6 }
  0x1b   :  { %p316_p0 = por %p315_p13, %p314_p12 }
  0x1d   :  { %p317_p1 = pnand %p316_p0, %p310_p11 }
  0x1f   :  { %320 = shalt.err (!%p317_p1)
}
  0x20   :  { %31 = dma.hbm_to_vmem [thread:$0]  %s482_s2, 96, %s29_s15, [#allocation5]  }
  0x21   :  { %321 = dma.done.wait [#allocation3], 96  }
  0x22   :  { %322 = vsyncadd [#allocation3], 4294967200 }
  0x23   :  { %323 = dma.done.wait [#allocation5], 96  }
  0x24   :  { %324 = vsyncadd [#allocation5], 4294967200  ;;  %v38_v0 = vld [vmem:[%s480_s0] sm:$0xff]  ;;  %v39_v1 = vld [vmem:[%s480_s0 + $0x8] sm:$0xff]  ;;  %v125_v61 = vlaneseq }
  0x25   :  { %v40_v2 = vld [vmem:[%s480_s0 + $0x10] sm:$0xff]  ;;  %v41_v3 = vld [vmem:[%s480_s0 + $0x18] sm:$0xff]  ;;  %v50_v4 = vadd.f32 %v39_v1, %v38_v0  ;;  %v46_v7 = vld [vmem:[%s480_s0 + $0x40] sm:$0xff] }
  0x26   :  { %v44_v5 = vld [vmem:[%s480_s0 + $0x30] sm:$0xff]  ;;  %v45_v6 = vld [vmem:[%s480_s0 + $0x38] sm:$0xff]  ;;  %v42_v10 = vld [vmem:[%s480_s0 + $0x20] sm:$0xff] }
  0x27   :  { %v51_v8 = vadd.f32 %v50_v4, %v40_v2  ;;  %v57_v9 = vadd.f32 %v45_v6, %v44_v5  ;;  %v47_v11 = vld [vmem:[%s480_s0 + $0x48] sm:$0xff]  ;;  %v48_v15 = vld [vmem:[%s480_s0 + $0x50] sm:$0xff]  ;;  %v49_v18 = vld [vmem:[%s480_s0 + $0x58] sm:$0xff] }
  0x28   :  { %v43_v14 = vld [vmem:[%s480_s0 + $0x28] sm:$0xff] }
  0x29   :  { %v52_v12 = vadd.f32 %v51_v8, %v41_v3  ;;  %v58_v13 = vadd.f32 %v57_v9, %v46_v7 }
  0x2b   :  { %v53_v16 = vadd.f32 %v52_v12, %v42_v10  ;;  %v59_v17 = vadd.f32 %v58_v13, %v47_v11 }
  0x2d   :  { %v54_v19 = vadd.f32 %v53_v16, %v43_v14  ;;  %v60_v20 = vadd.f32 %v59_v17, %v48_v15 }
  0x2f   :  { %55 = vadd.xlane.f32.xlu0 %v54_v19  ;;  %v61_v21 = vadd.f32 %v60_v20, %v49_v18 }
  0x33   :  { %62 = vadd.xlane.f32.xlu0 %v61_v21 }
  0xbc   :  { %v56_v22 = vpop.xlane.xlu0 %55 }
  0xbd   :  { %v65_v23 = vmul.f32 0.0013020834, %v56_v22 }
  0xbf   :  { %v407_v24 = vsub.f32 %v38_v0, %v65_v23  ;;  %v409_v25 = vsub.f32 %v39_v1, %v65_v23  ;;  %v411_v26 = vsub.f32 %v40_v2, %v65_v23  ;;  %v413_v28 = vsub.f32 %v41_v3, %v65_v23 }
  0xc0   :  { %v63_v27 = vpop.xlane.xlu0 %62  ;;  %v419_v32 = vsub.f32 %v42_v10, %v65_v23  ;;  %v72_v38 = vsub.f32 %v43_v14, %v65_v23  ;;  %v126_v1 = vshrl.u32 %v125_v61, 7 }
  0xc1   :  { %v66_v29 = vmul.f32 0.0013020834, %v63_v27  ;;  %v79_v30 = vmul.f32 %v407_v24, %v407_v24  ;;  %v80_v31 = vmul.f32 %v409_v25, %v409_v25  ;;  %v81_v33 = vmul.f32 %v411_v26, %v411_v26 }
  0xc2   :  { %v82_v39 = vmul.f32 %v413_v28, %v413_v28  ;;  %v83_v44 = vmul.f32 %v419_v32, %v419_v32  ;;  %v84_v49 = vmul.f32 %v72_v38, %v72_v38  ;;  %v127_v4 = vsub.s32 0, %v126_v1 }
  0xc3   :  { %v91_v34 = vadd.f32 %v80_v31, %v79_v30  ;;  %v423_v35 = vsub.f32 %v44_v5, %v66_v29  ;;  %v425_v36 = vsub.f32 %v45_v6, %v66_v29  ;;  %v427_v37 = vsub.f32 %v46_v7, %v66_v29  ;;  %v123_v6 = vld [vmem:[#allocation2] sm:$0x3f] }
  0xc4   :  { %v431_v41 = vsub.f32 %v47_v11, %v66_v29  ;;  %v439_v46 = vsub.f32 %v48_v15, %v66_v29  ;;  %v443_v51 = vsub.f32 %v49_v18, %v66_v29  ;;  %v131_v5 = vsub.s32 1, %v126_v1  ;;  %v167_v11 = vld [vmem:[#allocation4] sm:$0x3f] }
  0xc5   :  { %v92_v40 = vadd.f32 %v91_v34, %v81_v33  ;;  %v85_v42 = vmul.f32 %v423_v35, %v423_v35  ;;  %v86_v43 = vmul.f32 %v425_v36, %v425_v36  ;;  %v87_v47 = vmul.f32 %v427_v37, %v427_v37 }
  0xc6   :  { %v88_v52 = vmul.f32 %v431_v41, %v431_v41  ;;  %v89_v55 = vmul.f32 %v439_v46, %v439_v46  ;;  %v90_v57 = vmul.f32 %v443_v51, %v443_v51  ;;  %v135_v7 = vsub.s32 2, %v126_v1 }
  0xc7   :  { %v93_v45 = vadd.f32 %v92_v40, %v82_v39  ;;  %v98_v48 = vadd.f32 %v86_v43, %v85_v42  ;;  %v139_v8 = vsub.s32 3, %v126_v1  ;;  %v143_v9 = vsub.s32 4, %v126_v1 }
  0xc8   :  { %v147_v10 = vsub.s32 5, %v126_v1  ;;  %v128_v12 = vrot.slane %v123_v6, %v127_v4  ;;  %v132_v13 = vrot.slane %v123_v6, %v131_v5  ;;  %v136_v14 = vrot.slane %v123_v6, %v135_v7 }
  0xc9   :  { %v94_v50 = vadd.f32 %v93_v45, %v83_v44  ;;  %v99_v53 = vadd.f32 %v98_v48, %v87_v47  ;;  %v140_v15 = vrot.slane %v123_v6, %v139_v8  ;;  %v144_v16 = vrot.slane %v123_v6, %v143_v9 }
  0xca   :  { %v148_v17 = vrot.slane %v123_v6, %v147_v10  ;;  %v172_v19 = vrot.slane %v167_v11, %v127_v4  ;;  %v176_v20 = vrot.slane %v167_v11, %v131_v5  ;;  %v180_v21 = vrot.slane %v167_v11, %v135_v7 }
  0xcb   :  { %v95_v54 = vadd.f32 %v94_v50, %v84_v49  ;;  %v100_v56 = vadd.f32 %v99_v53, %v88_v52  ;;  %v184_v22 = vrot.slane %v167_v11, %v139_v8  ;;  %v188_v31 = vrot.slane %v167_v11, %v143_v9 }
  0xcc   :  { %v192_v33 = vrot.slane %v167_v11, %v147_v10 }
  0xcd   :  { %96 = vadd.xlane.f32.xlu1 %v95_v54  ;;  %v101_v58 = vadd.f32 %v100_v56, %v89_v55 }
  0xcf   :  { %v102_v59 = vadd.f32 %v101_v58, %v90_v57 }
  0xd1   :  { %103 = vadd.xlane.f32.xlu1 %v102_v59 }
 0x15a   :  { %v97_v60 = vpop.xlane.xlu1 %96 }
 0x15b   :  { %v105_v62 = vmul.f32 0.0013020834, %v97_v60 }
 0x15d   :  { %v107_v63 = vadd.f32 1e-12, %v105_v62 }
 0x15e   :  { %v104_v0 = vpop.xlane.xlu1 %103 }
 0x15f   :  { %273 = vrsqrt.f32 %v107_v63  ;;  %v106_v2 = vmul.f32 0.0013020834, %v104_v0 }
 0x161   :  { %v108_v3 = vadd.f32 1e-12, %v106_v2 }
 0x163   :  { %275 = vrsqrt.f32 %v108_v3 }
 0x169   :  { %v274_v18 = vpop.eup %273 }
 0x16a   :  { %v111_v23 = vmul.f32 %v274_v18, %v407_v24  ;;  %v112_v27 = vmul.f32 %v274_v18, %v409_v25  ;;  %v113_v29 = vmul.f32 %v274_v18, %v411_v26  ;;  %v114_v30 = vmul.f32 %v274_v18, %v413_v28 }
 0x16b   :  { %v115_v34 = vmul.f32 %v274_v18, %v419_v32  ;;  %v116_v39 = vmul.f32 %v274_v18, %v72_v38 }
 0x16c   :  { %v155_v40 = vmul.f32 %v128_v12, %v111_v23  ;;  %v156_v42 = vmul.f32 %v132_v13, %v112_v27  ;;  %v157_v43 = vmul.f32 %v136_v14, %v113_v29  ;;  %v158_v44 = vmul.f32 %v140_v15, %v114_v30 }
 0x16d   :  { %v276_v45 = vpop.eup %275  ;;  %v159_v47 = vmul.f32 %v144_v16, %v115_v34  ;;  %v160_v48 = vmul.f32 %v148_v17, %v116_v39 }
 0x16e   :  { %v199_v49 = vadd.f32 %v172_v19, %v155_v40  ;;  %v200_v24 = vadd.f32 %v176_v20, %v156_v42  ;;  %v201_v50 = vadd.f32 %v180_v21, %v157_v43  ;;  %v202_v25 = vadd.f32 %v184_v22, %v158_v44 }
 0x16f   :  { %v203_v52 = vadd.f32 %v188_v31, %v159_v47  ;;  %v204_v26 = vadd.f32 %v192_v33, %v160_v48  ;;  %v117_v28 = vmul.f32 %v276_v45, %v423_v35  ;;  %v118_v53 = vmul.f32 %v276_v45, %v425_v36 }
 0x170   :  { %v265_v54 = vpack.c.bf16 %v200_v24, %v199_v49  ;;  %v266_v32 = vpack.c.bf16 %v202_v25, %v201_v50  ;;  %v119_v38 = vmul.f32 %v276_v45, %v427_v37  ;;  %v120_v55 = vmul.f32 %v276_v45, %v431_v41 }
 0x171   :  { %v267_v56 = vpack.c.bf16 %v204_v26, %v203_v52  ;;  %v121_v57 = vmul.f32 %v276_v45, %v439_v46  ;;  %v122_v58 = vmul.f32 %v276_v45, %v443_v51  ;;  %v161_v59 = vmul.f32 %v128_v12, %v117_v28 }
 0x172   :  { %247 = vst [vmem:[%s483_s3] sm:$0xff] %v265_v54  ;;  %248 = vst [vmem:[%s483_s3 + $0x8] sm:$0xff] %v266_v32  ;;  %v162_v35 = vmul.f32 %v132_v13, %v118_v53  ;;  %v163_v36 = vmul.f32 %v136_v14, %v119_v38  ;;  %v164_v60 = vmul.f32 %v140_v15, %v120_v55 }
 0x173   :  { %249 = vst [vmem:[%s483_s3 + $0x10] sm:$0xff] %v267_v56  ;;  %v165_v37 = vmul.f32 %v144_v16, %v121_v57  ;;  %v166_v41 = vmul.f32 %v148_v17, %v122_v58  ;;  %v205_v46 = vadd.f32 %v172_v19, %v161_v59 }
 0x174   :  { %v206_v51 = vadd.f32 %v176_v20, %v162_v35  ;;  %v207_v61 = vadd.f32 %v180_v21, %v163_v36  ;;  %v208_v62 = vadd.f32 %v184_v22, %v164_v60 }
 0x175   :  { %v209_v63 = vadd.f32 %v188_v31, %v165_v37  ;;  %v210_v0 = vadd.f32 %v192_v33, %v166_v41 }
 0x176   :  { %v268_v1 = vpack.c.bf16 %v206_v51, %v205_v46  ;;  %v269_v2 = vpack.c.bf16 %v208_v62, %v207_v61 }
 0x177   :  { %v270_v3 = vpack.c.bf16 %v210_v0, %v209_v63 }
 0x178   :  { %250 = vst [vmem:[%s483_s3 + $0x18] sm:$0xff] %v268_v1  ;;  %251 = vst [vmem:[%s483_s3 + $0x20] sm:$0xff] %v269_v2 }
 0x179   :  { %252 = vst [vmem:[%s483_s3 + $0x28] sm:$0xff] %v270_v3 }
 0x17a   :  { %257 = vsyncpa [#allocation3], 1 }
 0x17b   :  { %258 = vsyncpa [#allocation5], 1 }

// kernel: bert_ner_forward.9
= control target key start
LH: loop header
LB: loop body
LE: loop exit
PB: predicated region body
PF: predicated region fallthrough
CT: control target
= control target key end

     0   :  { %8 = vsyncpa [#allocation3], 0  ;;  %s1866_s0 = inlined_call_operand.vmem [shape: bf16[16,768], index: 0, kind: input, shape index: {}]   ;;  %s1867_s1 = inlined_call_operand.hbm [shape: bf16[768,2304], index: 1, kind: input, shape index: {}]   ;;  %s1868_s2 = inlined_call_operand.hbm [shape: f32[1,2304], index: 2, kind: input, shape index: {}]   ;;  %s1869_s3 = inlined_call_operand.vmem [shape: bf16[16,2304], index: 3, kind: output, shape index: {}]  }
   0x1   :  { %10 = vsyncpa [#allocation3 + $0x1], 0 }
   0x2   :  { %11 = vsyncpa [#allocation5], 0 }
   0x3   :  { %13 = vsyncpa [#allocation5 + $0x1], 0  ;;  %s1588_s12 = smov 0   ;;  %s1590_s13 = smov 0  }
   0x4   :  { %s1592_s14 = smov 0   ;;  %s1594_s15 = smov 0  }
   0x5 LB: > { %s1607_s16 = sadd.s32 4294967295, %s1561_s15   ;;  %s1610_s17 = sadd.s32 1, %s1561_s15   ;;  %s1561_s15 = sphi %s1594_s15, %s1881_s15   ;;  %s1557_s14 = sphi %s1592_s14, %s1880_s14   ;;  %s1553_s13 = sphi %s1590_s13, %s1879_s13   ;;  %s1549_s12 = sphi %s1588_s12, %s1878_s12  }
   0x6   : > { %s44_s18 = ssub.s32 %s1561_s15, %s1610_s17  ;;  %s47_s19 = sadd.s32 1, %s1557_s14 }
   0x7   : > { %p45_p0 = scmp.eq.s32.totalorder %s44_s18, 0  ;;  %p54_p1 = scmp.ne.s32.totalorder %s1557_s14, %s1553_s13 }
   0x8   : > { %p55_p2 = scmp.eq.s32.totalorder %s1561_s15, 0  ;;  %p60_p3 = scmp.ne.s32.totalorder %s1553_s13, %s1549_s12 }
   0x9   : > { %s1620_s20 = scalar_select %p45_p0, %s1557_s14, %s47_s19  }
   0xa   : > { %p56_p4 = por %p55_p2, %p54_p1  ;;  %p61_p5 = scmp.eq.s32.totalorder %s1607_s16, 0 }
   0xb   : > { %p110_p6 = scmp.eq.s32.totalorder %s1607_s16, 8  ;;  %p1274_p8 = scmp.lt.s32.totalorder %s1561_s15, 9 }
   0xc   : > { %p1624_p7 = por %p61_p5, %p60_p3  ;;  %s1634_s23 = sand.u32 1, %s1557_s14  }
   0xd   : > { %p1629_p9 = por %p110_p6, %p54_p1  ;;  %s1261_s24 = smul.u32 768, %s1634_s23 }
   0xe   : > { %s1871_s21 = scalar_select %p1624_p7, 1, 0 }
   0xf   : > { %s1872_s22 = scalar_select %p1629_p9, 1, 0 }
  0x10   : > { %s1244_s25 = sshll.u32 %s1561_s15, 7  ;;  %p1638_p10 = pnand %p1274_p8, %p56_p4 }
  0x11   : > { %s1645_s29 = scalar_lea.hbm %s1867_s1, %s1244_s25  ;;  %s143_s30 = scalar_lea.vmem [#allocation2], %s1261_s24 }
  0x12   : > { %s150_s4 = sshll.u32 %s143_s30, 4  ;;  %s140_s5 = scalar_lea.sflag [#allocation3], %s1634_s23  ;;  %s1647_s4 = int_to_ptr.vmem [resolvable:$true] %s150_s4 }
  0x13   : > { %s1463_s6 = scalar_lea.hbm %s1645_s29, 12288  ;;  %p1465_p12 = pneg %p1638_p10 }
  0x14   : > { %p1464_p11 = scmp.ne.s32.totalorder %s1645_s29, %s1463_s6  ;;  %s1468_s9 = scalar_lea.hbm %s1867_s1, 110592 }
  0x15   : > { %p1469_p1 = scmp.lt.u32.totalorder %s1645_s29, %s1867_s1  ;;  %p1470_p2 = scmp.lt.u32.totalorder %s1468_s9, %s1463_s6 }
  0x16   : > { %p1466_p13 = pnand %p1465_p12, %p1464_p11  ;;  %p1472_p4 = scmp.lt.u32.totalorder %s1463_s6, %s1645_s29 }
  0x17   : > { %p1471_p3 = por %p1470_p2, %p1469_p1 }
  0x18   : > { %p1467_p0 = pneg %p1466_p13 }
  0x19   : > { %p1473_p5 = por %p1472_p4, %p1471_p3 }
  0x1b   : > { %p1474_p6 = pnand %p1473_p5, %p1467_p0 }
  0x1d   : > { %1477 = shalt.err (!%p1474_p6)
}
  0x1e   : > { %s1478_s12 = scalar_lea.vmem %s1647_s4, 12288  ;;  %s1563_s18 = smov [#allocation2]  }
  0x1f   : > { %p1479_p8 = scmp.ne.s32.totalorder %s1647_s4, %s1478_s12  ;;  %s1483_s19 = sshll.u32 %s1563_s18, 4  ;;  %s1484_s19 = int_to_ptr.vmem [resolvable:$false] %s1483_s19 }
  0x20   : > { %s1485_s24 = scalar_lea.vmem %s1484_s19, 24576  ;;  %p1486_p9 = scmp.lt.s32.totalorder %s1647_s4, %s1484_s19 }
  0x21   : > { %p1481_p11 = pnand %p1479_p8, %p1465_p12  ;;  %p1487_p1 = scmp.lt.s32.totalorder %s1485_s24, %s1478_s12 }
  0x23   : > { %p1482_p13 = pneg %p1481_p11  ;;  %p1488_p2 = por %p1487_p1, %p1486_p9 }
  0x25   : > { %p1489_p3 = pnand %p1488_p2, %p1482_p13 }
  0x27   : > { %1492 = shalt.err (!%p1489_p3)
}
  0x28   : > { %s1564_s25 = smov 1152   ;;  %s1565_s27 = smov 128  }
  0x29   : > { %s1566_s28 = smov 8   ;;  %p1132_p0 = scmp.ge.s32.totalorder %s1561_s15, 1 }
  0x2a   : > { %1270 = dma.hbm_to_vmem [thread:$0]  (!%p1638_p10), %s1645_s29, 12288, %s1647_s4, %s140_s5, %s1564_s25, %s1565_s27, %s1566_s28  }
  0x2b   : > { %p177_p9 = scmp.lt.s32.totalorder %s1561_s15, 10  ;;  %s1129_s30 = sshll.u32 %s1634_s23, 1 }
  0x2c   : > { %s1245_s7 = sshll.u32 %s1561_s15, 5  ;;  %s164_s8 = scalar_lea.vmem [#allocation4], %s1129_s30 }
  0x2d   : > { %p1680_p4 = pnand %p1132_p0, %p177_p9  ;;  %s172_s9 = sshll.u32 %s164_s8, 4  ;;  %s173_s9 = int_to_ptr.vmem [resolvable:$true] %s172_s9 }
  0x2e   : > { %s1688_s12 = scalar_lea.hbm %s1868_s2, %s1245_s7  ;;  %s161_s29 = scalar_lea.sflag [#allocation5], %s1634_s23 }
  0x2f   : > { %s1874_s6 = scalar_select %p1680_p4, 1, 0 }
  0x30   : > { %s1493_s4 = scalar_lea.hbm %s1688_s12, 32  ;;  %s1498_s18 = scalar_lea.hbm %s1868_s2, 288 }
  0x31   : > { %p1494_p5 = scmp.ne.s32.totalorder %s1688_s12, %s1493_s4  ;;  %p1499_p11 = scmp.lt.u32.totalorder %s1688_s12, %s1868_s2 }
  0x32   : > { %p1500_p13 = scmp.lt.u32.totalorder %s1498_s18, %s1493_s4  ;;  %p1502_p2 = scmp.lt.u32.totalorder %s1493_s4, %s1688_s12 }
  0x33   : > { %p1496_p6 = pnand %p1494_p5, %p1465_p12 }
  0x34   : > { %p1501_p1 = por %p1500_p13, %p1499_p11 }
  0x35   : > { %p1497_p8 = pneg %p1496_p6 }
  0x36   : > { %p1503_p3 = por %p1502_p2, %p1501_p1 }
  0x38   : > { %p1504_p0 = pnand %p1503_p3, %p1497_p8 }
  0x3a   : > { %1507 = shalt.err (!%p1504_p0)
}
  0x3b   : > { %s1508_s23 = scalar_lea.vmem %s173_s9, 32  ;;  %s1567_s25 = smov [#allocation4]  }
  0x3c   : > { %p1509_p9 = scmp.ne.s32.totalorder %s173_s9, %s1508_s23  ;;  %s1513_s27 = sshll.u32 %s1567_s25, 4  ;;  %s1514_s27 = int_to_ptr.vmem [resolvable:$false] %s1513_s27 }
  0x3d   : > { %s1515_s28 = scalar_lea.vmem %s1514_s27, 64  ;;  %p1516_p7 = scmp.lt.s32.totalorder %s173_s9, %s1514_s27 }
  0x3e   : > { %p1511_p5 = pnand %p1509_p9, %p1465_p12  ;;  %p1517_p4 = scmp.lt.s32.totalorder %s1515_s28, %s1508_s23 }
  0x40   : > { %p1512_p6 = pneg %p1511_p5  ;;  %p1518_p11 = por %p1517_p4, %p1516_p7 }
  0x42   : > { %p1519_p13 = pnand %p1518_p11, %p1512_p6 }
  0x44   : > { %1522 = shalt.err (!%p1519_p13)
}
  0x45   : > { %1273 = dma.hbm_to_vmem [thread:$0]  (!%p1638_p10), %s1688_s12, 32, %s173_s9, %s161_s29  }
  0x46   : > { %p1875_p8 = scmp.ne.s32.totalorder %s1874_s6, 0 }
  0x47   : > { %s1713_s30 = sand.u32 (!%p1875_p8), 1, %s1553_s13   ;;  %p1876_p7 = scmp.ne.s32.totalorder (!%p1875_p8), %s1871_s21, 0 }
  0x48   : > { %181 = sbr.rel (%p1875_p8) target bundleno = 440 (0x1b8), region = 32  ;;  %s184_s8 = scalar_lea.sflag (!%p1875_p8), [#allocation3], %s1713_s30 }
  0x49   : > { %s1262_s7 = smul.u32 (!%p1875_p8), 768, %s1713_s30 }
  0x4b   : > { %s1717_s10 = scalar_lea.vmem (!%p1875_p8), [#allocation2], %s1262_s7 }
  0x4f   : > { %1540 = dma.done.wait (%p1876_p7), %s184_s8, 12288  }
  0x50   : > { %1542 = vsyncadd (%p1876_p7), %s184_s8, 4294955008  ;;  %s1133_s26 = sshll.u32 %s1713_s30, 1  ;;  %s193_s6 = scalar_lea.sflag [#allocation5], %s1713_s30 }
  0x51   : > { %s1725_s9 = scalar_lea.vmem [#allocation4], %s1133_s26 }
  0x52   : > { %1544 = dma.done.wait (%p1876_p7), %s193_s6, 32  }
  0x53   : > { %1546 = vsyncadd (%p1876_p7), %s193_s6, 4294967264  ;;  %v1310_v0 = vld [vmem:[%s1717_s10 + $0x104] ss:$8 sps:$4 sm:$0xff]   ;;  %v1312_v1 = vld [vmem:[%s1717_s10 + $0x100] ss:$8 sps:$4 sm:$0xff]   ;;  %s1134_s27 = sshll.u32 %s1713_s30, 4 }
  0x54   : > { %893 = vmatprep.subr.bf16.mxu0 %v1310_v0  ;;  %v1313_v2 = vld [vmem:[%s1717_s10 + $0x114] ss:$8 sps:$4 sm:$0xff]   ;;  %v1315_v3 = vld [vmem:[%s1717_s10 + $0x110] ss:$8 sps:$4 sm:$0xff]   ;;  %v1316_v4 = vld [vmem:[%s1717_s10 + $0x124] ss:$8 sps:$4 sm:$0xff]  }
  0x55   : > { %894 = vmatpush1.bf16.msra.mxu0 %v1312_v1  ;;  %v1318_v5 = vld [vmem:[%s1717_s10 + $0x120] ss:$8 sps:$4 sm:$0xff]   ;;  %v1319_v6 = vld [vmem:[%s1717_s10 + $0x134] ss:$8 sps:$4 sm:$0xff]   ;;  %v1321_v7 = vld [vmem:[%s1717_s10 + $0x130] ss:$8 sps:$4 sm:$0xff]  }
  0x56   : > { %895 = vmatprep.subr.bf16.mxu0 %v1313_v2  ;;  %v1322_v8 = vld [vmem:[%s1717_s10 + $0x144] ss:$8 sps:$4 sm:$0xff]   ;;  %v1324_v9 = vld [vmem:[%s1717_s10 + $0x140] ss:$8 sps:$4 sm:$0xff]   ;;  %v1325_v10 = vld [vmem:[%s1717_s10 + $0x154] ss:$8 sps:$4 sm:$0xff]  }
  0x57   : > { %v1327_v11 = vld [vmem:[%s1717_s10 + $0x150] ss:$8 sps:$4 sm:$0xff]   ;;  %v1328_v12 = vld [vmem:[%s1717_s10 + $0x164] ss:$8 sps:$4 sm:$0xff]   ;;  %v1357_v14 = vld [vmem:[%s1717_s10] ss:$8 sps:$4 sm:$0xff]  }
  0x58   : > { %v1355_v13 = vld [vmem:[%s1717_s10 + $0x4] ss:$8 sps:$4 sm:$0xff]   ;;  %v1330_v15 = vld [vmem:[%s1717_s10 + $0x160] ss:$8 sps:$4 sm:$0xff]   ;;  %v1361_v16 = vld [vmem:[%s1717_s10 + $0x14] ss:$8 sps:$4 sm:$0xff]  }
  0x59   : > { %896 = vmatpush1.bf16.msra.mxu0 %v1315_v3  ;;  %850 = vmatprep.subr.bf16.mxu1 %v1355_v13  ;;  %v1363_v17 = vld [vmem:[%s1717_s10 + $0x10] ss:$8 sps:$4 sm:$0xff]   ;;  %v1331_v18 = vld [vmem:[%s1717_s10 + $0x174] ss:$8 sps:$4 sm:$0xff]   ;;  %v1366_v19 = vld [vmem:[%s1866_s0 + $0xc] ss:$24 sps:$4 sm:$0xff]  }
  0x5a   : > { %897 = vmatprep.subr.bf16.mxu0 %v1316_v4  ;;  %851 = vmatpush1.bf16.msra.mxu1 %v1357_v14  ;;  %v1333_v20 = vld [vmem:[%s1717_s10 + $0x170] ss:$8 sps:$4 sm:$0xff]   ;;  %v1370_v21 = vld [vmem:[%s1717_s10 + $0x24] ss:$8 sps:$4 sm:$0xff]   ;;  %v1372_v22 = vld [vmem:[%s1717_s10 + $0x20] ss:$8 sps:$4 sm:$0xff]  }
  0x5b   : > { %852 = vmatprep.subr.bf16.mxu1 %v1361_v16  ;;  %v1334_v23 = vld [vmem:[%s1717_s10 + $0x184] ss:$8 sps:$4 sm:$0xff]   ;;  %925 = vmatprep.mubr.bf16.mxu0 %v1366_v19  ;;  %v1336_v24 = vld [vmem:[%s1717_s10 + $0x180] ss:$8 sps:$4 sm:$0xff]   ;;  %v1376_v25 = vld [vmem:[%s1717_s10 + $0x34] ss:$8 sps:$4 sm:$0xff]  }
  0x5c   : > { %v1337_v26 = vld [vmem:[%s1717_s10 + $0x194] ss:$8 sps:$4 sm:$0xff]   ;;  %v1378_v27 = vld [vmem:[%s1717_s10 + $0x30] ss:$8 sps:$4 sm:$0xff]   ;;  %v1382_v28 = vld [vmem:[%s1717_s10 + $0x44] ss:$8 sps:$4 sm:$0xff]  }
  0x5d   : > { %898 = vmatpush1.bf16.msra.mxu0 %v1318_v5  ;;  %v1339_v29 = vld [vmem:[%s1717_s10 + $0x190] ss:$8 sps:$4 sm:$0xff]   ;;  %v1340_v30 = vld [vmem:[%s1717_s10 + $0x1a4] ss:$8 sps:$4 sm:$0xff]   ;;  %v1384_v31 = vld [vmem:[%s1717_s10 + $0x40] ss:$8 sps:$4 sm:$0xff]  }
  0x5e   : > { %899 = vmatprep.subr.bf16.mxu0 %v1319_v6  ;;  %853 = vmatpush1.bf16.msra.mxu1 %v1363_v17  ;;  %v1388_v32 = vld [vmem:[%s1717_s10 + $0x54] ss:$8 sps:$4 sm:$0xff]   ;;  %v1342_v33 = vld [vmem:[%s1717_s10 + $0x1a0] ss:$8 sps:$4 sm:$0xff]   ;;  %v1390_v35 = vld [vmem:[%s1717_s10 + $0x50] ss:$8 sps:$4 sm:$0xff]  }
  0x5f   : > { %854 = vmatprep.subr.bf16.mxu1 %v1370_v21  ;;  %v1343_v34 = vld [vmem:[%s1717_s10 + $0x1b4] ss:$8 sps:$4 sm:$0xff]   ;;  %v1394_v36 = vld [vmem:[%s1717_s10 + $0x64] ss:$8 sps:$4 sm:$0xff]   ;;  %v1345_v37 = vld [vmem:[%s1717_s10 + $0x1b0] ss:$8 sps:$4 sm:$0xff]  }
  0x60   : > { %v1346_v38 = vld [vmem:[%s1717_s10 + $0x1c4] ss:$8 sps:$4 sm:$0xff]   ;;  %v1396_v39 = vld [vmem:[%s1717_s10 + $0x60] ss:$8 sps:$4 sm:$0xff]   ;;  %v1400_v40 = vld [vmem:[%s1717_s10 + $0x74] ss:$8 sps:$4 sm:$0xff]  }
  0x61   : > { %900 = vmatpush1.bf16.msra.mxu0 %v1321_v7  ;;  %v1348_v41 = vld [vmem:[%s1717_s10 + $0x1c0] ss:$8 sps:$4 sm:$0xff]   ;;  %v1349_v42 = vld [vmem:[%s1717_s10 + $0x1d4] ss:$8 sps:$4 sm:$0xff]   ;;  %v1402_v43 = vld [vmem:[%s1717_s10 + $0x70] ss:$8 sps:$4 sm:$0xff]  }
  0x62   : > { %901 = vmatprep.subr.bf16.mxu0 %v1322_v8  ;;  %855 = vmatpush1.bf16.msra.mxu1 %v1372_v22  ;;  %v1406_v44 = vld [vmem:[%s1717_s10 + $0x84] ss:$8 sps:$4 sm:$0xff]   ;;  %v1351_v45 = vld [vmem:[%s1717_s10 + $0x1d0] ss:$8 sps:$4 sm:$0xff]   ;;  %v1408_v47 = vld [vmem:[%s1717_s10 + $0x80] ss:$8 sps:$4 sm:$0xff]  }
  0x63   : > { %856 = vmatprep.subr.bf16.mxu1 %v1376_v25  ;;  %v1352_v46 = vld [vmem:[%s1717_s10 + $0x1e4] ss:$8 sps:$4 sm:$0xff]   ;;  %v1412_v48 = vld [vmem:[%s1717_s10 + $0x94] ss:$8 sps:$4 sm:$0xff]   ;;  %v1354_v49 = vld [vmem:[%s1717_s10 + $0x1e0] ss:$8 sps:$4 sm:$0xff]  }
  0x64   : > { %v1358_v50 = vld [vmem:[%s1717_s10 + $0x1f4] ss:$8 sps:$4 sm:$0xff]   ;;  %v1414_v51 = vld [vmem:[%s1717_s10 + $0x90] ss:$8 sps:$4 sm:$0xff]   ;;  %v1418_v52 = vld [vmem:[%s1717_s10 + $0xa4] ss:$8 sps:$4 sm:$0xff]  }
  0x65   : > { %902 = vmatpush1.bf16.msra.mxu0 %v1324_v9  ;;  %v1360_v53 = vld [vmem:[%s1717_s10 + $0x1f0] ss:$8 sps:$4 sm:$0xff]   ;;  %v1369_v54 = vld [vmem:[%s1717_s10 + $0x204] ss:$8 sps:$4 sm:$0xff]   ;;  %v1420_v55 = vld [vmem:[%s1717_s10 + $0xa0] ss:$8 sps:$4 sm:$0xff]  }
  0x66   : > { %903 = vmatprep.subr.bf16.mxu0 %v1325_v10  ;;  %857 = vmatpush1.bf16.msra.mxu1 %v1378_v27  ;;  %v1424_v56 = vld [vmem:[%s1717_s10 + $0xb4] ss:$8 sps:$4 sm:$0xff]   ;;  %v1364_v57 = vld [vmem:[%s1866_s0 + $0x8] ss:$24 sps:$4 sm:$0xff]   ;;  %v1426_v60 = vld [vmem:[%s1717_s10 + $0xb0] ss:$8 sps:$4 sm:$0xff]  }
  0x67   : > { %858 = vmatprep.subr.bf16.mxu1 %v1382_v28  ;;  %v1367_v58 = vld [vmem:[%s1717_s10 + $0x200] ss:$8 sps:$4 sm:$0xff]   ;;  %v1375_v59 = vld [vmem:[%s1717_s10 + $0x214] ss:$8 sps:$4 sm:$0xff]   ;;  %v1430_v61 = vld [vmem:[%s1717_s10 + $0xc4] ss:$8 sps:$4 sm:$0xff]  }
  0x68   : > { %v1456_v62 = vld [vmem:[%s1866_s0 + $0x4] ss:$24 sps:$4 sm:$0xff]   ;;  %v1373_v63 = vld [vmem:[%s1717_s10 + $0x210] ss:$8 sps:$4 sm:$0xff]   ;;  %v1432_v0 = vld [vmem:[%s1717_s10 + $0xc0] ss:$8 sps:$4 sm:$0xff]  }
  0x69   : > { %904 = vmatpush1.bf16.msra.mxu0 %v1327_v11  ;;  %v1462_v1 = vld [vmem:[%s1866_s0 + $0x14] ss:$24 sps:$4 sm:$0xff]   ;;  %882 = vmatprep.mubr.bf16.mxu1 %v1456_v62  ;;  %v1379_v4 = vld [vmem:[%s1717_s10 + $0x220] ss:$8 sps:$4 sm:$0xff]   ;;  %v1438_v5 = vld [vmem:[%s1717_s10 + $0xd0] ss:$8 sps:$4 sm:$0xff]  }
  0x6a   : > { %905 = vmatprep.subr.bf16.mxu0 %v1328_v12  ;;  %859 = vmatpush1.bf16.msra.mxu1 %v1384_v31  ;;  %v1381_v2 = vld [vmem:[%s1717_s10 + $0x224] ss:$8 sps:$4 sm:$0xff]   ;;  %v1436_v3 = vld [vmem:[%s1717_s10 + $0xd4] ss:$8 sps:$4 sm:$0xff]   ;;  %v1385_v8 = vld [vmem:[%s1717_s10 + $0x230] ss:$8 sps:$4 sm:$0xff]  }
  0x6b   : > { %860 = vmatprep.subr.bf16.mxu1 %v1388_v32  ;;  %v1387_v6 = vld [vmem:[%s1717_s10 + $0x234] ss:$8 sps:$4 sm:$0xff]   ;;  %v1442_v7 = vld [vmem:[%s1717_s10 + $0xe4] ss:$8 sps:$4 sm:$0xff]   ;;  %v1444_v9 = vld [vmem:[%s1717_s10 + $0xe0] ss:$8 sps:$4 sm:$0xff]  }
  0x6c   : > { %v1393_v10 = vld [vmem:[%s1717_s10 + $0x244] ss:$8 sps:$4 sm:$0xff]   ;;  %v1448_v11 = vld [vmem:[%s1717_s10 + $0xf4] ss:$8 sps:$4 sm:$0xff]   ;;  %v1391_v12 = vld [vmem:[%s1717_s10 + $0x240] ss:$8 sps:$4 sm:$0xff]  }
  0x6d   : > { %906 = vmatpush1.bf16.msra.mxu0 %v1330_v15  ;;  %v1450_v13 = vld [vmem:[%s1717_s10 + $0xf0] ss:$8 sps:$4 sm:$0xff]   ;;  %v1399_v14 = vld [vmem:[%s1717_s10 + $0x254] ss:$8 sps:$4 sm:$0xff]   ;;  %v1405_v17 = vld [vmem:[%s1717_s10 + $0x264] ss:$8 sps:$4 sm:$0xff]  }
  0x6e   : > { %907 = vmatprep.subr.bf16.mxu0 %v1331_v18  ;;  %861 = vmatpush1.bf16.msra.mxu1 %v1390_v35  ;;  %v1454_v15 = vld [vmem:[%s1866_s0] ss:$24 sps:$4 sm:$0xff]   ;;  %v1411_v19 = vld [vmem:[%s1717_s10 + $0x274] ss:$8 sps:$4 sm:$0xff]   ;;  %v1417_v21 = vld [vmem:[%s1717_s10 + $0x284] ss:$8 sps:$4 sm:$0xff]  }
  0x6f   : > { %862 = vmatprep.subr.bf16.mxu1 %v1394_v36  ;;  %v1397_v16 = vld [vmem:[%s1717_s10 + $0x250] ss:$8 sps:$4 sm:$0xff]   ;;  %v1403_v18 = vld [vmem:[%s1717_s10 + $0x260] ss:$8 sps:$4 sm:$0xff]   ;;  %v1429_v25 = vld [vmem:[%s1717_s10 + $0x2a4] ss:$8 sps:$4 sm:$0xff]  }
  0x70   : > { %v1415_v22 = vld [vmem:[%s1717_s10 + $0x280] ss:$8 sps:$4 sm:$0xff]   ;;  %v1435_v27 = vld [vmem:[%s1717_s10 + $0x2b4] ss:$8 sps:$4 sm:$0xff]   ;;  %v1433_v28 = vld [vmem:[%s1717_s10 + $0x2b0] ss:$8 sps:$4 sm:$0xff]  }
  0x71   : > { %908 = vmatpush1.bf16.msra.mxu0 %v1333_v20  ;;  %v1409_v20 = vld [vmem:[%s1717_s10 + $0x270] ss:$8 sps:$4 sm:$0xff]   ;;  %v1447_v31 = vld [vmem:[%s1717_s10 + $0x2d4] ss:$8 sps:$4 sm:$0xff]   ;;  %s222_s28 = scalar_lea.vmem [#allocation6], %s1134_s27  ;;  %p1877_p10 = scmp.ne.s32.totalorder %s1872_s22, 0 }
  0x72   : > { %909 = vmatprep.subr.bf16.mxu0 %v1334_v23  ;;  %863 = vmatpush1.bf16.msra.mxu1 %v1396_v39  ;;  %v1423_v23 = vld [vmem:[%s1717_s10 + $0x294] ss:$8 sps:$4 sm:$0xff]   ;;  %v1445_v32 = vld [vmem:[%s1717_s10 + $0x2d0] ss:$8 sps:$4 sm:$0xff]   ;;  %s1248_s7 = sshll.u32 (%p1877_p10), %s1607_s16, 3 }
  0x73   : > { %864 = vmatprep.subr.bf16.mxu1 %v1400_v40  ;;  %v1459_v35 = vld [vmem:[%s1717_s10 + $0x2f4] ss:$8 sps:$4 sm:$0xff]   ;;  %v1457_v36 = vld [vmem:[%s1717_s10 + $0x2f0] ss:$8 sps:$4 sm:$0xff]  }
  0x75   : > { %910 = vmatpush1.bf16.msra.mxu0 %v1336_v24  ;;  %v1421_v24 = vld [vmem:[%s1717_s10 + $0x290] ss:$8 sps:$4 sm:$0xff]  }
  0x76   : > { %911 = vmatprep.subr.bf16.mxu0 %v1337_v26  ;;  %865 = vmatpush1.bf16.msra.mxu1 %v1402_v43  ;;  %v1427_v26 = vld [vmem:[%s1717_s10 + $0x2a0] ss:$8 sps:$4 sm:$0xff]  }
  0x77   : > { %866 = vmatprep.subr.bf16.mxu1 %v1406_v44 }
  0x79   : > { %912 = vmatpush1.bf16.msra.mxu0 %v1339_v29  ;;  %v1441_v29 = vld [vmem:[%s1717_s10 + $0x2c4] ss:$8 sps:$4 sm:$0xff]  }
  0x7a   : > { %913 = vmatprep.subr.bf16.mxu0 %v1340_v30  ;;  %867 = vmatpush1.bf16.msra.mxu1 %v1408_v47  ;;  %v1439_v30 = vld [vmem:[%s1717_s10 + $0x2c0] ss:$8 sps:$4 sm:$0xff]  }
  0x7b   : > { %868 = vmatprep.subr.bf16.mxu1 %v1412_v48 }
  0x7d   : > { %914 = vmatpush1.bf16.msra.mxu0 %v1342_v33  ;;  %v1453_v33 = vld [vmem:[%s1717_s10 + $0x2e4] ss:$8 sps:$4 sm:$0xff]  }
  0x7e   : > { %915 = vmatprep.subr.bf16.mxu0 %v1343_v34  ;;  %869 = vmatpush1.bf16.msra.mxu1 %v1414_v51  ;;  %v1451_v34 = vld [vmem:[%s1717_s10 + $0x2e0] ss:$8 sps:$4 sm:$0xff]   ;;  %s1002_s10 = scalar_lea.vmem (%p1877_p10), %s1869_s3, %s1248_s7 }
  0x7f   : > { %870 = vmatprep.subr.bf16.mxu1 %v1418_v52 }
  0x81   : > { %916 = vmatpush1.bf16.msra.mxu0 %v1345_v37  ;;  %v1460_v37 = vld [vmem:[%s1866_s0 + $0x10] ss:$24 sps:$4 sm:$0xff]  }
  0x82   : > { %917 = vmatprep.subr.bf16.mxu0 %v1346_v38  ;;  %871 = vmatpush1.bf16.msra.mxu1 %v1420_v55 }
  0x83   : > { %872 = vmatprep.subr.bf16.mxu1 %v1424_v56 }
  0x85   : > { %918 = vmatpush1.bf16.msra.mxu0 %v1348_v41 }
  0x86   : > { %919 = vmatprep.subr.bf16.mxu0 %v1349_v42  ;;  %873 = vmatpush1.bf16.msra.mxu1 %v1426_v60  ;;  %v330_v42 = vlaneseq }
  0x87   : > { %874 = vmatprep.subr.bf16.mxu1 %v1430_v61 }
  0x88   : > { %v331_v43 = vshrl.u32 %v330_v42, 7 }
  0x89   : > { %920 = vmatpush1.bf16.msra.mxu0 %v1351_v45  ;;  %v328_v45 = vld [vmem:[%s1725_s9] sm:$0x3] }
  0x8a   : > { %921 = vmatprep.subr.bf16.mxu0 %v1352_v46  ;;  %875 = vmatpush1.bf16.msra.mxu1 %v1432_v0  ;;  %v332_v44 = vsub.s32 0, %v331_v43  ;;  %v336_v46 = vsub.s32 1, %v331_v43 }
  0x8b   : > { %876 = vmatprep.subr.bf16.mxu1 %v1436_v3 }
  0x8c   : > { %v333_v47 = vrot.slane %v328_v45, %v332_v44  ;;  %v337_v48 = vrot.slane %v328_v45, %v336_v46 }
  0x8d   : > { %922 = vmatpush1.bf16.msra.mxu0 %v1354_v49 }
  0x8e   : > { %923 = vmatprep.subr.bf16.mxu0 %v1358_v50  ;;  %877 = vmatpush1.bf16.msra.mxu1 %v1438_v5 }
  0x8f   : > { %878 = vmatprep.subr.bf16.mxu1 %v1442_v7 }
  0x91   : > { %924 = vmatpush1.bf16.msra.mxu0 %v1360_v53 }
  0x92   : > { %936 = vmatprep.subr.bf16.mxu0 %v1369_v54  ;;  %879 = vmatpush1.bf16.msra.mxu1 %v1444_v9 }
  0x93   : > { %880 = vmatprep.subr.bf16.mxu1 %v1448_v11 }
  0x94   : > { %926 = vmatmul.mubr.bf16.vlgmr.msra.gmra.mrb[0].mxu0 %v1364_v57 }
  0x95   : > { %937 = vmatpush1.bf16.msra.mxu0 %v1367_v58  ;;  %968 = vmatprep.mubr.bf16.mxu0 %v1462_v1 }
  0x96   : > { %938 = vmatprep.subr.bf16.mxu0 %v1375_v59  ;;  %881 = vmatpush1.bf16.msra.mxu1 %v1450_v13 }
  0x99   : > { %939 = vmatpush1.bf16.msra.mxu0 %v1373_v63  ;;  %883 = vmatmul.mubr.bf16.vlgmr.msra.gmra.mrb[0].mxu1 %v1454_v15 }
  0x9a   : > { %940 = vmatprep.subr.bf16.mxu0 %v1381_v2 }
  0x9d   : > { %941 = vmatpush1.bf16.msra.mxu0 %v1379_v4 }
  0x9e   : > { %942 = vmatprep.subr.bf16.mxu0 %v1387_v6 }
  0xa1   : > { %943 = vmatpush1.bf16.msra.mxu0 %v1385_v8 }
  0xa2   : > { %944 = vmatprep.subr.bf16.mxu0 %v1393_v10 }
  0xa5   : > { %945 = vmatpush1.bf16.msra.mxu0 %v1391_v12 }
  0xa6   : > { %946 = vmatprep.subr.bf16.mxu0 %v1399_v14 }
  0xa9   : > { %947 = vmatpush1.bf16.msra.mxu0 %v1397_v16 }
  0xaa   : > { %948 = vmatprep.subr.bf16.mxu0 %v1405_v17 }
  0xad   : > { %949 = vmatpush1.bf16.msra.mxu0 %v1403_v18 }
  0xae   : > { %950 = vmatprep.subr.bf16.mxu0 %v1411_v19 }
  0xb1   : > { %951 = vmatpush1.bf16.msra.mxu0 %v1409_v20 }
  0xb2   : > { %952 = vmatprep.subr.bf16.mxu0 %v1417_v21 }
  0xb5   : > { %953 = vmatpush1.bf16.msra.mxu0 %v1415_v22 }
  0xb6   : > { %954 = vmatprep.subr.bf16.mxu0 %v1423_v23 }
  0xb9   : > { %955 = vmatpush1.bf16.msra.mxu0 %v1421_v24 }
  0xba   : > { %956 = vmatprep.subr.bf16.mxu0 %v1429_v25 }
  0xbd   : > { %957 = vmatpush1.bf16.msra.mxu0 %v1427_v26 }
  0xbe   : > { %958 = vmatprep.subr.bf16.mxu0 %v1435_v27 }
  0xc1   : > { %959 = vmatpush1.bf16.msra.mxu0 %v1433_v28 }
  0xc2   : > { %960 = vmatprep.subr.bf16.mxu0 %v1441_v29 }
  0xc5   : > { %961 = vmatpush1.bf16.msra.mxu0 %v1439_v30 }
  0xc6   : > { %962 = vmatprep.subr.bf16.mxu0 %v1447_v31 }
  0xc9   : > { %963 = vmatpush1.bf16.msra.mxu0 %v1445_v32 }
  0xca   : > { %964 = vmatprep.subr.bf16.mxu0 %v1453_v33 }
  0xcd   : > { %965 = vmatpush1.bf16.msra.mxu0 %v1451_v34 }
  0xce   : > { %966 = vmatprep.subr.bf16.mxu0 %v1459_v35 }
  0xd1   : > { %967 = vmatpush1.bf16.msra.mxu0 %v1457_v36 }
  0xd4   : > { %969 = vmatmul.mubr.bf16.vlgmr.msra.gmra.mrb[0].mxu0 %v1460_v37 }
 0x16c   : > { %v884_v38 = vpop.f32.mrb[0].mxu1 }
 0x16d   : > { %v886_v39 = vpop.f32.mrb[1].mxu1  ;;  %v885_v49 = vadd.f32 %v884_v38, %v333_v47 }
 0x16e   : > { %v888_v40 = vpop.f32.mrb[2].mxu1  ;;  %v887_v50 = vadd.f32 %v886_v39, %v337_v48 }
 0x16f   : > { %v890_v41 = vpop.f32.mrb[3].mxu1  ;;  %v889_v52 = vadd.f32 %v888_v40, %v333_v47 }
 0x170   : > { %v891_v55 = vadd.f32 %v890_v41, %v337_v48 }
 0x1a7   : > { %v970_v51 = vpop.f32.mrb[0].mxu0 }
 0x1a8   : > { %v1250_v53 = vadd.f32 %v970_v51, %v885_v49  ;;  %v972_v54 = vpop.f32.mrb[1].mxu0 }
 0x1a9   : > { %v1252_v56 = vadd.f32 %v972_v54, %v887_v50  ;;  %v974_v57 = vpop.f32.mrb[2].mxu0  ;;  %999 = sbr.rel (!%p1877_p10) target bundleno = 440 (0x1b8), region = 44 }
 0x1aa   : > { %v1254_v58 = vadd.f32 %v974_v57, %v889_v52  ;;  %v976_v59 = vpop.f32.mrb[3].mxu0 }
 0x1ab   : > { %v1246_v60 = vpack.c.bf16 %v1252_v56, %v1250_v53  ;;  %v1256_v61 = vadd.f32 %v976_v59, %v891_v55 }
 0x1ad   : > { %991 = vst [vmem:[%s222_s28] sm:$0xff] %v1246_v60  ;;  %v1247_v62 = vpack.c.bf16 %v1256_v61, %v1254_v58 }
 0x1af   : > { %992 = vst [vmem:[%s222_s28 + $0x8] sm:$0xff] %v1247_v62 }
 0x1b4   : > { %v1032_v63 = vld [vmem:[%s222_s28] sm:$0xff] }
 0x1b5   : > { %1033 = vst [vmem:[%s1002_s10] sm:$0xff] %v1032_v63 }
 0x1b6   : > { %v1034_v0 = vld [vmem:[%s222_s28 + $0x8] sm:$0xff] }
 0x1b7   : > { %1035 = vst [vmem:[%s1002_s10 + $0x48] sm:$0xff] %v1034_v0 }
 0x1b8 PF: > { %p16_p12 = scmp.ge.s32.totalorder %s1610_s17, 11   ;;  %s1878_s12 = smov %s1553_s13 }
 0x1b9   : > { %s1879_s13 = smov %s1557_s14  ;;  %s1880_s14 = smov %s1620_s20 }
 0x1ba   : > { %s1881_s15 = smov %s1610_s17  ;;  %18 = sbr.rel (!%p16_p12) target bundleno = 5 (0x5), region = 123 }
 0x1c1   :  { %1051 = vsyncpa [#allocation3], 1 }
 0x1c2   :  { %1053 = vsyncpa [#allocation3 + $0x1], 1 }
 0x1c3   :  { %1054 = vsyncpa [#allocation5], 1 }
 0x1c4   :  { %1056 = vsyncpa [#allocation5 + $0x1], 1 }

// kernel: bert_ner_forward.10
= control target key start
LH: loop header
LB: loop body
LE: loop exit
PB: predicated region body
PF: predicated region fallthrough
CT: control target
= control target key end

     0   :  { %s2022_s9 = smov 0   ;;  %s2397_s0 = inlined_call_operand.vmem [shape: bf16[2,8,2304], index: 0, kind: input, shape index: {}]   ;;  %s2398_s1 = inlined_call_operand.vmem [shape: f32[2,1,8], index: 1, kind: input, shape index: {}]   ;;  %s2399_s2 = inlined_call_operand.vmem [shape: bf16[2,8,768], index: 2, kind: output, shape index: {}]  }
   0x1 LB: > { %s1652_s10 = sadd.s32 4294967295, %s2002_s9   ;;  %p1656_p0 = scmp.ge.s32.totalorder %s2002_s9, 1  ;;  %s2002_s9 = sphi %s2022_s9, %s12_s9  }
   0x2   : > { %p120_p1 = scmp.lt.s32.totalorder %s2002_s9, 3 }
   0x4   : > { %p121_p2 = pnand %p1656_p0, %p120_p1 }
   0x5   : > { %p145_p3 = scmp.lt.s32.totalorder (!%p121_p2), %s1652_s10, 1  ;;  %v2004_v0 = vmov (!%p121_p2), 0.0   ;;  %vm2005_vm0 = vmmov (!%p121_p2), 0   ;;  %vm169_vm1 = vcmask (!%p121_p2), 523264   ;;  %vm224_vm2 = vcmask (!%p121_p2), 64512   ;;  %s2006_s18 = smov (!%p121_p2), 64  }
   0x6   : > { %124 = sbr.rel (%p121_p2) target bundleno = 1579 (0x62b), region = 28  ;;  %1758 = vmatprep.subr.bf16.mxu0 (!%p121_p2), %v2004_v0  ;;  %1760 = vmatprep.mubr.msk.bf16.mxu0 (!%p121_p2), %vm2005_vm0, %v2004_v0  ;;  %vm240_vm3 = vcmask (!%p121_p2), 1043456  }
   0x7   : > { %1764 = vmatprep.subr.bf16.mxu1 (!%p121_p2), %v2004_v0  ;;  %1766 = vmatprep.mubr.msk.bf16.mxu1 (!%p121_p2), %vm2005_vm0, %v2004_v0 }
   0xd   : > { %s2401_s10 = smov (!%p145_p3, %s1652_s10), 1 }
   0xe   : > { %s1902_s11 = smul.u32 72, %s2401_s10  ;;  %s152_s17 = scalar_lea.vmem %s2398_s1, %s2401_s10 }
   0xf   : > { %v2055_v4 = vld [vmem:[%s152_s17] ss:$0 sm:$0xff]  ;;  %s1903_s19 = smul.u32 24, %s2401_s10 }
  0x10   : > { %s2042_s14 = scalar_lea.vmem %s2397_s0, %s1902_s11 }
  0x11   : > { %v162_v1 = vld [vmem:[%s2042_s14 + $0x18] sm:$0xff]  ;;  %v159_v3 = vld [vmem:[%s2042_s14] sm:$0xff]  ;;  %v2064_v17 = vld [vmem:[%s2042_s14 + $0x8] sm:$0xff]  ;;  %s157_s22 = scalar_lea.vmem %s2399_s2, %s1903_s19 }
  0x12   : > { %v174_v2 = vsel %vm169_vm1, %v162_v1, 0  ;;  %v1663_v12 = vcombine.low %v162_v1, %v162_v1  ;;  %v1662_v13 = vcombine.low %v159_v3, %v159_v3  ;;  %v1667_v14 = vcombine.high %v159_v3, %v159_v3  ;;  %v163_v15 = vld [vmem:[%s2042_s14 + $0x20] sm:$0xff]  ;;  %v2079_v21 = vld [vmem:[%s2042_s14 + $0x28] sm:$0xff]  ;;  %v2094_v29 = vld [vmem:[%s2042_s14 + $0x30] sm:$0xff] }
  0x13   : > { %1759 = vmatpush3.bf16.xpose.msra.mxu0 %v174_v2  ;;  %v1677_v16 = vcombine.low %v163_v15, %v163_v15  ;;  %v1676_v18 = vcombine.low %v2064_v17, %v2064_v17  ;;  %v2070_v19 = vcombine.high %v163_v15, %v163_v15  ;;  %v2076_v20 = vcombine.high %v2064_v17, %v2064_v17  ;;  %v161_v32 = vld [vmem:[%s2042_s14 + $0x10] sm:$0xff] }
  0x14   : > { %1776 = vmatprep.subr.bf16.mxu0 %v2004_v0  ;;  %292 = vrot.lane.b32.xlu1 %v1663_v12, %s2006_s18  ;;  %v1691_v22 = vcombine.low %v2079_v21, %v2079_v21  ;;  %v2088_v23 = vcombine.high %v2079_v21, %v2079_v21  ;;  %v242_v30 = vsel %vm240_vm3, %v2094_v29, 0  ;;  %v1668_v31 = vcombine.high %v162_v1, %v162_v1 }
  0x15   : > { %1765 = vmatpush3.bf16.msra.mxu1 %v242_v30  ;;  %v1690_v33 = vcombine.low %v161_v32, %v161_v32  ;;  %v2102_v34 = vcombine.high %v161_v32, %v161_v32  ;;  %v633_v46 = vsel %vm169_vm1, %v163_v15, 0  ;;  %v864_v50 = vsel %vm169_vm1, %v2070_v19, 0 }
  0x16   : > { %1770 = vmatprep.subr.bf16.mxu1 %v2004_v0  ;;  %v413_v42 = vsel %vm169_vm1, %v1668_v31, 0  ;;  %v1084_v54 = vsel %vm169_vm1, %v2079_v21, 0  ;;  %v1315_v58 = vsel %vm169_vm1, %v2088_v23, 0 }
  0x18   : > { %287 = vrot.lane.b32.xlu1 %v1662_v13, %s2006_s18 }
  0x1a   : > { %1761 = vmatmul.mubr.msk.bf16.vlgmr.msra.gmra.mrb[0].mxu0 %vm169_vm1, %v159_v3 }
  0x1b   : > { %1778 = vmatprep.mubr.msk.bf16.mxu0 %vm2005_vm0, %v2004_v0 }
  0x1c   : > { %517 = vrot.lane.b32.xlu1 %v1667_v14, %s2006_s18 }
  0x20   : > { %743 = vrot.lane.b32.xlu1 %v1677_v16, %s2006_s18 }
  0x24   : > { %738 = vrot.lane.b32.xlu1 %v1676_v18, %s2006_s18 }
  0x28   : > { %970 = vrot.lane.b32.xlu1 %v2070_v19, %s2006_s18 }
  0x2c   : > { %968 = vrot.lane.b32.xlu1 %v2076_v20, %s2006_s18 }
  0x30   : > { %1194 = vrot.lane.b32.xlu1 %v1691_v22, %s2006_s18 }
  0x34   : > { %1421 = vrot.lane.b32.xlu1 %v2088_v23, %s2006_s18 }
  0x86   : > { %v293_v37 = vpop.permute.xlu1 %292 }
  0x87   : > { %v298_v39 = vsel %vm169_vm1, %v293_v37, 0 }
  0x8a   : > { %v288_v41 = vpop.permute.xlu1 %287 }
  0x8e   : > { %v518_v45 = vpop.permute.xlu1 %517 }
  0x92   : > { %v744_v47 = vpop.permute.xlu1 %743 }
  0x93   : > { %v749_v48 = vsel %vm169_vm1, %v744_v47, 0 }
  0x96   : > { %v739_v49 = vpop.permute.xlu1 %738 }
  0x9a   : > { %v971_v51 = vpop.permute.xlu1 %970 }
  0x9b   : > { %v976_v52 = vsel %vm169_vm1, %v971_v51, 0 }
  0x9e   : > { %v969_v53 = vpop.permute.xlu1 %968 }
  0xa2   : > { %v1195_v55 = vpop.permute.xlu1 %1194 }
  0xa3   : > { %v1200_v56 = vsel %vm169_vm1, %v1195_v55, 0 }
  0xa6   : > { %v1422_v59 = vpop.permute.xlu1 %1421 }
  0xa7   : > { %v1427_v60 = vsel %vm169_vm1, %v1422_v59, 0 }
  0xed   : > { %v210_v5 = vpop.f32.mrb[0].mxu0 }
  0xee   : > { %v216_v6 = vmul.f32 0.125, %v210_v5  ;;  %v1762_v7 = vpop.f32.mrb[1].mxu0 }
  0xef   : > { %v213_v8 = vpop.f32.mrb[2].mxu0 }
  0xf0   : > { %v1763_v9 = vpop.f32.mrb[3].mxu0  ;;  %v223_v10 = vadd.f32 %v2055_v4, %v216_v6 }
  0xf2   : > { %v225_v11 = vsel %vm224_vm2, %v223_v10, -inf }
  0xf3   : > { %226 = vmax.xlane.f32.xlu0 %v225_v11 }
 0x180   : > { %v227_v24 = vpop.xlane.xlu0 %226 }
 0x181   : > { %v228_v25 = vsub.f32 %v223_v10, %v227_v24 }
 0x183   : > { %v229_v26 = vmul.f32 1.442695, %v228_v25 }
 0x185   : > { %1948 = vpow2.f32 %v229_v26 }
 0x18f   : > { %v1949_v27 = vpop.eup %1948 }
 0x190   : > { %v231_v28 = vsel %vm224_vm2, %v1949_v27, 0.0 }
 0x191   : > { %232 = vadd.xlane.f32.xlu0 %v231_v28 }
 0x1a7   : > { %519 = vrot.lane.b32.xlu0 %v1668_v31, %s2006_s18 }
 0x1ab   : > { %1189 = vrot.lane.b32.xlu0 %v1690_v33, %s2006_s18 }
 0x1af   : > { %1419 = vrot.lane.b32.xlu0 %v2102_v34, %s2006_s18 }
 0x21e   : > { %v233_v35 = vpop.xlane.xlu0 %232 }
 0x21f   : > { %1950 = vrcp.f32 %v233_v35 }
 0x222   : > { %v520_v43 = vpop.permute.xlu0 %519 }
 0x223   : > { %v525_v44 = vsel %vm169_vm1, %v520_v43, 0 }
 0x226   : > { %v1190_v57 = vpop.permute.xlu0 %1189 }
 0x229   : > { %v1951_v36 = vpop.eup %1950 }
 0x22a   : > { %v235_v38 = vmul.f32 %v1951_v36, %v1949_v27  ;;  %v1420_v61 = vpop.permute.xlu0 %1419 }
 0x22c   : > { %v236_v40 = vpack.c.bf16 %v235_v38, %v235_v38 }
 0x22e   : > { %1767 = vmatmul.mubr.msk.bf16.vlgmr.msra.gmra.mrb[0].mxu1 %vm224_vm2, %v236_v40 }
 0x22f   : > { %1771 = vmatpush3.bf16.xpose.msra.mxu1 %v298_v39  ;;  %1772 = vmatprep.mubr.msk.bf16.mxu1 %vm2005_vm0, %v2004_v0 }
 0x230   : > { %1782 = vmatprep.subr.bf16.mxu1 %v2004_v0 }
 0x236   : > { %1773 = vmatmul.mubr.msk.bf16.vlgmr.msra.gmra.mrb[4].mxu1 %vm169_vm1, %v288_v41 }
 0x237   : > { %1783 = vmatpush3.bf16.xpose.msra.mxu1 %v413_v42  ;;  %1784 = vmatprep.mubr.msk.bf16.mxu1 %vm2005_vm0, %v2004_v0 }
 0x238   : > { %1794 = vmatprep.subr.bf16.mxu1 %v2004_v0 }
 0x23e   : > { %1785 = vmatmul.mubr.msk.bf16.vlgmr.msra.gmra.mrb[8].mxu1 %vm169_vm1, %v1667_v14 }
 0x23f   : > { %1795 = vmatpush3.bf16.xpose.msra.mxu1 %v525_v44  ;;  %1796 = vmatprep.mubr.msk.bf16.mxu1 %vm2005_vm0, %v2004_v0 }
 0x240   : > { %1806 = vmatprep.subr.bf16.mxu1 %v2004_v0 }
 0x246   : > { %1797 = vmatmul.mubr.msk.bf16.vlgmr.msra.gmra.mrb[12].mxu1 %vm169_vm1, %v518_v45 }
 0x247   : > { %1807 = vmatpush3.bf16.xpose.msra.mxu1 %v633_v46  ;;  %1808 = vmatprep.mubr.msk.bf16.mxu1 %vm2005_vm0, %v2004_v0 }
 0x248   : > { %1818 = vmatprep.subr.bf16.mxu1 %v2004_v0 }
 0x24e   : > { %1809 = vmatmul.mubr.msk.bf16.vlgmr.msra.gmra.mrb[16].mxu1 %vm169_vm1, %v2064_v17 }
 0x24f   : > { %1819 = vmatpush3.bf16.xpose.msra.mxu1 %v749_v48  ;;  %1820 = vmatprep.mubr.msk.bf16.mxu1 %vm2005_vm0, %v2004_v0 }
 0x250   : > { %1830 = vmatprep.subr.bf16.mxu1 %v2004_v0 }
 0x256   : > { %1821 = vmatmul.mubr.msk.bf16.vlgmr.msra.gmra.mrb[20].mxu1 %vm169_vm1, %v739_v49 }
 0x257   : > { %1831 = vmatpush3.bf16.xpose.msra.mxu1 %v864_v50  ;;  %1832 = vmatprep.mubr.msk.bf16.mxu1 %vm2005_vm0, %v2004_v0 }
 0x258   : > { %1842 = vmatprep.subr.bf16.mxu1 %v2004_v0 }
 0x25e   : > { %1833 = vmatmul.mubr.msk.bf16.vlgmr.msra.gmra.mrb[24].mxu1 %vm169_vm1, %v2076_v20 }
 0x25f   : > { %1843 = vmatpush3.bf16.xpose.msra.mxu1 %v976_v52  ;;  %1844 = vmatprep.mubr.msk.bf16.mxu1 %vm2005_vm0, %v2004_v0 }
 0x260   : > { %1854 = vmatprep.subr.bf16.mxu1 %v2004_v0 }
 0x266   : > { %1845 = vmatmul.mubr.msk.bf16.vlgmr.msra.gmra.mrb[28].mxu1 %vm169_vm1, %v969_v53 }
 0x267   : > { %1855 = vmatpush3.bf16.xpose.msra.mxu1 %v1084_v54  ;;  %1856 = vmatprep.mubr.msk.bf16.mxu1 %vm2005_vm0, %v2004_v0 }
 0x268   : > { %1866 = vmatprep.subr.bf16.mxu1 %v2004_v0 }
 0x26e   : > { %1857 = vmatmul.mubr.msk.bf16.vlgmr.msra.gmra.mrb[32].mxu1 %vm169_vm1, %v161_v32 }
 0x26f   : > { %1867 = vmatpush3.bf16.xpose.msra.mxu1 %v1200_v56  ;;  %1868 = vmatprep.mubr.msk.bf16.mxu1 %vm2005_vm0, %v2004_v0 }
 0x270   : > { %1878 = vmatprep.subr.bf16.mxu1 %v2004_v0 }
 0x276   : > { %1869 = vmatmul.mubr.msk.bf16.vlgmr.msra.gmra.mrb[36].mxu1 %vm169_vm1, %v1190_v57 }
 0x277   : > { %1879 = vmatpush3.bf16.xpose.msra.mxu1 %v1315_v58  ;;  %1880 = vmatprep.mubr.msk.bf16.mxu1 %vm2005_vm0, %v2004_v0 }
 0x278   : > { %1890 = vmatprep.subr.bf16.mxu1 %v2004_v0 }
 0x27e   : > { %1881 = vmatmul.mubr.msk.bf16.vlgmr.msra.gmra.mrb[40].mxu1 %vm169_vm1, %v2102_v34 }
 0x27f   : > { %1891 = vmatpush3.bf16.xpose.msra.mxu1 %v1427_v60  ;;  %1892 = vmatprep.mubr.msk.bf16.mxu1 %vm2005_vm0, %v2004_v0 }
 0x286   : > { %1893 = vmatmul.mubr.msk.bf16.vlgmr.msra.gmra.mrb[44].mxu1 %vm169_vm1, %v1420_v61 }
 0x301   : > { %v2167_v62 = vpop.f32.mrb[0].mxu1 }
 0x302   : > { %v1768_v63 = vpop.f32.mrb[1].mxu1 }
 0x303   : > { %v281_v1 = vpop.f32.mrb[2].mxu1 }
 0x304   : > { %v1769_v2 = vpop.f32.mrb[3].mxu1 }
 0x309   : > { %v334_v3 = vpop.f32.mrb[4].mxu1 }
 0x30a   : > { %v340_v5 = vmul.f32 0.125, %v334_v3  ;;  %v1774_v6 = vpop.f32.mrb[5].mxu1 }
 0x30b   : > { %v337_v7 = vpop.f32.mrb[6].mxu1 }
 0x30c   : > { %v1775_v8 = vpop.f32.mrb[7].mxu1  ;;  %v2170_v9 = vadd.f32 %v2055_v4, %v340_v5 }
 0x30e   : > { %v342_v10 = vsel %vm224_vm2, %v2170_v9, -inf }
 0x30f   : > { %343 = vmax.xlane.f32.xlu1 %v342_v10 }
 0x311   : > { %v449_v11 = vpop.f32.mrb[8].mxu1 }
 0x312   : > { %v455_v12 = vmul.f32 0.125, %v449_v11  ;;  %v1786_v13 = vpop.f32.mrb[9].mxu1 }
 0x313   : > { %v452_v14 = vpop.f32.mrb[10].mxu1 }
 0x314   : > { %v1787_v15 = vpop.f32.mrb[11].mxu1  ;;  %v2175_v16 = vadd.f32 %v2055_v4, %v455_v12 }
 0x316   : > { %v457_v17 = vsel %vm224_vm2, %v2175_v16, -inf }
 0x317   : > { %458 = vmax.xlane.f32.xlu0 %v457_v17 }
 0x319   : > { %v561_v18 = vpop.f32.mrb[12].mxu1 }
 0x31a   : > { %v567_v19 = vmul.f32 0.125, %v561_v18  ;;  %v1798_v20 = vpop.f32.mrb[13].mxu1 }
 0x31b   : > { %v564_v21 = vpop.f32.mrb[14].mxu1 }
 0x31c   : > { %v2180_v22 = vadd.f32 %v2055_v4, %v567_v19  ;;  %v1799_v23 = vpop.f32.mrb[15].mxu1 }
 0x31e   : > { %v569_v24 = vsel %vm224_vm2, %v2180_v22, -inf }
 0x31f   : > { %570 = vmax.xlane.f32.xlu0 %v569_v24 }
 0x321   : > { %v669_v25 = vpop.f32.mrb[16].mxu1 }
 0x322   : > { %v675_v26 = vmul.f32 0.125, %v669_v25  ;;  %v1810_v27 = vpop.f32.mrb[17].mxu1 }
 0x323   : > { %v672_v28 = vpop.f32.mrb[18].mxu1 }
 0x324   : > { %v2185_v30 = vadd.f32 %v2055_v4, %v675_v26  ;;  %v1811_v31 = vpop.f32.mrb[19].mxu1 }
 0x326   : > { %v677_v32 = vsel %vm224_vm2, %v2185_v30, -inf }
 0x327   : > { %678 = vmax.xlane.f32.xlu1 %v677_v32 }
 0x329   : > { %v785_v33 = vpop.f32.mrb[20].mxu1 }
 0x32a   : > { %v791_v34 = vmul.f32 0.125, %v785_v33  ;;  %v1822_v35 = vpop.f32.mrb[21].mxu1 }
 0x32b   : > { %v788_v36 = vpop.f32.mrb[22].mxu1 }
 0x32c   : > { %v2190_v37 = vadd.f32 %v2055_v4, %v791_v34  ;;  %v1823_v38 = vpop.f32.mrb[23].mxu1 }
 0x32e   : > { %v793_v39 = vsel %vm224_vm2, %v2190_v37, -inf }
 0x32f   : > { %794 = vmax.xlane.f32.xlu0 %v793_v39  ;;  %v2241_v39 = vcombine.high %v2094_v29, %v2094_v29 }
 0x331   : > { %v900_v40 = vpop.f32.mrb[24].mxu1 }
 0x332   : > { %v906_v41 = vmul.f32 0.125, %v900_v40  ;;  %v1834_v42 = vpop.f32.mrb[25].mxu1 }
 0x333   : > { %v903_v43 = vpop.f32.mrb[26].mxu1 }
 0x334   : > { %v2195_v44 = vadd.f32 %v2055_v4, %v906_v41  ;;  %v1835_v45 = vpop.f32.mrb[27].mxu1 }
 0x336   : > { %v908_v46 = vsel %vm224_vm2, %v2195_v44, -inf }
 0x337   : > { %909 = vmax.xlane.f32.xlu1 %v908_v46 }
 0x339   : > { %v1012_v47 = vpop.f32.mrb[28].mxu1 }
 0x33a   : > { %v1018_v48 = vmul.f32 0.125, %v1012_v47  ;;  %v1846_v49 = vpop.f32.mrb[29].mxu1 }
 0x33b   : > { %v1015_v50 = vpop.f32.mrb[30].mxu1 }
 0x33c   : > { %v2200_v51 = vadd.f32 %v2055_v4, %v1018_v48  ;;  %v1847_v52 = vpop.f32.mrb[31].mxu1 }
 0x33e   : > { %v1020_v53 = vsel %vm224_vm2, %v2200_v51, -inf }
 0x33f   : > { %1021 = vmax.xlane.f32.xlu0 %v1020_v53 }
 0x341   : > { %v1120_v54 = vpop.f32.mrb[32].mxu1 }
 0x342   : > { %v1126_v55 = vmul.f32 0.125, %v1120_v54  ;;  %v1858_v56 = vpop.f32.mrb[33].mxu1 }
 0x343   : > { %v1123_v57 = vpop.f32.mrb[34].mxu1 }
 0x344   : > { %v2205_v58 = vadd.f32 %v2055_v4, %v1126_v55  ;;  %v1859_v59 = vpop.f32.mrb[35].mxu1  ;;  %v2269_v57 = vld [vmem:[%s2042_s14 + $0x38] sm:$0xff] }
 0x345   : > { %v1679_v59 = vcombine.low %v2269_v57, %v2269_v57 }
 0x346   : > { %v1128_v60 = vsel %vm224_vm2, %v2205_v58, -inf }
 0x347   : > { %1129 = vmax.xlane.f32.xlu1 %v1128_v60  ;;  %v2276_v60 = vcombine.high %v2269_v57, %v2269_v57 }
 0x349   : > { %v1236_v61 = vpop.f32.mrb[36].mxu1 }
 0x34a   : > { %v1242_v63 = vmul.f32 0.125, %v1236_v61  ;;  %v1870_v1 = vpop.f32.mrb[37].mxu1 }
 0x34b   : > { %v1239_v2 = vpop.f32.mrb[38].mxu1 }
 0x34c   : > { %v2210_v3 = vadd.f32 %v2055_v4, %v1242_v63  ;;  %v1871_v5 = vpop.f32.mrb[39].mxu1 }
 0x34e   : > { %v1244_v6 = vsel %vm224_vm2, %v2210_v3, -inf }
 0x34f   : > { %1245 = vmax.xlane.f32.xlu0 %v1244_v6 }
 0x351   : > { %v1351_v7 = vpop.f32.mrb[40].mxu1 }
 0x352   : > { %v1357_v8 = vmul.f32 0.125, %v1351_v7  ;;  %v1882_v10 = vpop.f32.mrb[41].mxu1 }
 0x353   : > { %v1354_v11 = vpop.f32.mrb[42].mxu1 }
 0x354   : > { %v2215_v12 = vadd.f32 %v2055_v4, %v1357_v8  ;;  %v1883_v13 = vpop.f32.mrb[43].mxu1 }
 0x356   : > { %v1359_v14 = vsel %vm224_vm2, %v2215_v12, -inf }
 0x357   : > { %1360 = vmax.xlane.f32.xlu1 %v1359_v14 }
 0x359   : > { %v1463_v15 = vpop.f32.mrb[44].mxu1 }
 0x35a   : > { %v1469_v17 = vmul.f32 0.125, %v1463_v15  ;;  %v1894_v18 = vpop.f32.mrb[45].mxu1 }
 0x35b   : > { %v1466_v19 = vpop.f32.mrb[46].mxu1 }
 0x35c   : > { %v2220_v20 = vadd.f32 %v2055_v4, %v1469_v17  ;;  %v1895_v21 = vpop.f32.mrb[47].mxu1 }
 0x35e   : > { %v1471_v23 = vsel %vm224_vm2, %v2220_v20, -inf }
 0x35f   : > { %1472 = vmax.xlane.f32.xlu0 %v1471_v23  ;;  %v2301_v23 = vld [vmem:[%s2042_s14 + $0x40] sm:$0xff] }
 0x39c   : > { %v344_v24 = vpop.xlane.xlu1 %343 }
 0x39d   : > { %v345_v25 = vsub.f32 %v2170_v9, %v344_v24  ;;  %v1693_v24 = vcombine.low %v2301_v23, %v2301_v23 }
 0x39f   : > { %v346_v26 = vmul.f32 1.442695, %v345_v25 }
 0x3a1   : > { %1952 = vpow2.f32 %v346_v26  ;;  %v2308_v26 = vcombine.high %v2301_v23, %v2301_v23 }
 0x3a4   : > { %v459_v27 = vpop.xlane.xlu0 %458 }
 0x3a5   : > { %v460_v28 = vsub.f32 %v2175_v16, %v459_v27 }
 0x3a7   : > { %v461_v31 = vmul.f32 1.442695, %v460_v28 }
 0x3a9   : > { %1954 = vpow2.f32 %v461_v31 }
 0x3ab   : > { %v2226_v32 = vpop.eup %1952 }
 0x3ac   : > { %v571_v33 = vpop.xlane.xlu0 %570  ;;  %v348_v4 = vsel %vm224_vm2, %v2226_v32, 0.0 }
 0x3ad   : > { %v572_v34 = vsub.f32 %v2180_v22, %v571_v33  ;;  %349 = vadd.xlane.f32.xlu1 %v348_v4  ;;  %v1665_v22 = vcombine.low %v2094_v29, %v2094_v29 }
 0x3af   : > { %v573_v35 = vmul.f32 1.442695, %v572_v34 }
 0x3b1   : > { %1956 = vpow2.f32 %v573_v35  ;;  %v475_v35 = vsel %vm240_vm3, %v2241_v39, 0 }
 0x3b3   : > { %v2231_v36 = vpop.eup %1954 }
 0x3b4   : > { %v463_v9 = vsel %vm224_vm2, %v2231_v36, 0.0  ;;  %v679_v40 = vpop.xlane.xlu1 %678 }
 0x3b5   : > { %464 = vadd.xlane.f32.xlu0 %v463_v9  ;;  %v680_v41 = vsub.f32 %v2185_v30, %v679_v40 }
 0x3b7   : > { %v681_v43 = vmul.f32 1.442695, %v680_v41 }
 0x3b9   : > { %1958 = vpow2.f32 %v681_v43 }
 0x3bb   : > { %v2235_v16 = vpop.eup %1956 }
 0x3bc   : > { %v575_v38 = vsel %vm224_vm2, %v2235_v16, 0.0  ;;  %v795_v42 = vpop.xlane.xlu0 %794 }
 0x3bd   : > { %576 = vadd.xlane.f32.xlu1 %v575_v38  ;;  %v796_v45 = vsub.f32 %v2190_v37, %v795_v42 }
 0x3bf   : > { %v797_v49 = vmul.f32 1.442695, %v796_v45 }
 0x3c1   : > { %1960 = vpow2.f32 %v797_v49 }
 0x3c3   : > { %v2252_v53 = vpop.eup %1958 }
 0x3c4   : > { %v910_v46 = vpop.xlane.xlu1 %909  ;;  %v683_v30 = vsel %vm224_vm2, %v2252_v53, 0.0 }
 0x3c5   : > { %v911_v48 = vsub.f32 %v2195_v44, %v910_v46 }
 0x3c7   : > { %v912_v50 = vmul.f32 1.442695, %v911_v48 }
 0x3c9   : > { %1962 = vpow2.f32 %v912_v50 }
 0x3cb   : > { %581 = vrot.lane.b32.xlu0 %v2241_v39, %s2006_s18  ;;  %v2256_v37 = vpop.eup %1960 }
 0x3cc   : > { %v1022_v47 = vpop.xlane.xlu0 %1021  ;;  %v799_v44 = vsel %vm224_vm2, %v2256_v37, 0.0 }
 0x3cd   : > { %v1023_v29 = vsub.f32 %v2200_v51, %v1022_v47 }
 0x3ce   : > { %357 = vrot.lane.b32.xlu1 %v1665_v22, %s2006_s18 }
 0x3cf   : > { %v1024_v52 = vmul.f32 1.442695, %v1023_v29 }
 0x3d1   : > { %1964 = vpow2.f32 %v1024_v52 }
 0x3d3   : > { %v2258_v54 = vpop.eup %1962 }
 0x3d4   : > { %v914_v55 = vsel %vm224_vm2, %v2258_v54, 0.0  ;;  %v1130_v63 = vpop.xlane.xlu1 %1129 }
 0x3d5   : > { %v1131_v2 = vsub.f32 %v2205_v58, %v1130_v63 }
 0x3d7   : > { %v1132_v6 = vmul.f32 1.442695, %v1131_v2 }
 0x3d9   : > { %1966 = vpow2.f32 %v1132_v6 }
 0x3db   : > { %v2262_v51 = vpop.eup %1964 }
 0x3dc   : > { %v1026_v56 = vsel %vm224_vm2, %v2262_v51, 0.0  ;;  %v1246_v61 = vpop.xlane.xlu0 %1245 }
 0x3dd   : > { %v1247_v7 = vsub.f32 %v2210_v3, %v1246_v61 }
 0x3df   : > { %v1248_v11 = vmul.f32 1.442695, %v1247_v7 }
 0x3e3   : > { %v2284_v15 = vpop.eup %1966 }
 0x3e4   : > { %v1361_v10 = vpop.xlane.xlu1 %1360  ;;  %v1134_v58 = vsel %vm224_vm2, %v2284_v15, 0.0 }
 0x3e5   : > { %v1362_v13 = vsub.f32 %v2215_v12, %v1361_v10 }
 0x3e7   : > { %v1363_v14 = vmul.f32 1.442695, %v1362_v13 }
 0x3ea   : > { %684 = vadd.xlane.f32.xlu0 %v683_v30 }
 0x3ec   : > { %v1473_v1 = vpop.xlane.xlu0 %1472 }
 0x3ed   : > { %v1474_v5 = vsub.f32 %v2220_v20, %v1473_v1 }
 0x3ee   : > { %800 = vadd.xlane.f32.xlu0 %v799_v44 }
 0x3ef   : > { %v1475_v8 = vmul.f32 1.442695, %v1474_v5 }
 0x3f1   : > { %1968 = vpow2.f32 %v1475_v8 }
 0x3f2   : > { %915 = vadd.xlane.f32.xlu0 %v914_v55  ;;  %1027 = vadd.xlane.f32.xlu1 %v1026_v56  ;;  %1970 = vpow2.f32 %v1248_v11 }
 0x3f3   : > { %1972 = vpow2.f32 %v1363_v14 }
 0x3fb   : > { %v2286_v17 = vpop.eup %1968 }
 0x3fc   : > { %v1477_v3 = vsel %vm224_vm2, %v2286_v17, 0.0  ;;  %v2292_v18 = vpop.eup %1970 }
 0x3fd   : > { %v1250_v12 = vsel %vm224_vm2, %v2292_v18, 0.0  ;;  %v2296_v19 = vpop.eup %1972 }
 0x3fe   : > { %v1365_v20 = vsel %vm224_vm2, %v2296_v19, 0.0 }
 0x403   : > { %808 = vrot.lane.b32.xlu1 %v1679_v59, %s2006_s18 }
 0x408   : > { %1032 = vrot.lane.b32.xlu0 %v2276_v60, %s2006_s18 }
 0x427   : > { %1135 = vadd.xlane.f32.xlu0 %v1134_v58  ;;  %1478 = vadd.xlane.f32.xlu1 %v1477_v3 }
 0x42b   : > { %1251 = vadd.xlane.f32.xlu0 %v1250_v12 }
 0x42f   : > { %1366 = vadd.xlane.f32.xlu0 %v1365_v20 }
 0x43a   : > { %v350_v21 = vpop.xlane.xlu1 %349 }
 0x43b   : > { %1974 = vrcp.f32 %v350_v21 }
 0x442   : > { %v465_v25 = vpop.xlane.xlu0 %464 }
 0x443   : > { %1976 = vrcp.f32 %v465_v25 }
 0x445   : > { %1259 = vrot.lane.b32.xlu0 %v1693_v24, %s2006_s18  ;;  %v1975_v27 = vpop.eup %1974 }
 0x446   : > { %v352_v31 = vmul.f32 %v1975_v27, %v2226_v32  ;;  %v582_v38 = vpop.permute.xlu0 %581 }
 0x447   : > { %v587_v41 = vsel %vm240_vm3, %v582_v38, 0 }
 0x448   : > { %v353_v34 = vpack.c.bf16 %v352_v31, %v352_v31 }
 0x449   : > { %1483 = vrot.lane.b32.xlu0 %v2308_v26, %s2006_s18 }
 0x44a   : > { %v577_v28 = vpop.xlane.xlu1 %576 }
 0x44b   : > { %1978 = vrcp.f32 %v577_v28 }
 0x44d   : > { %v1977_v9 = vpop.eup %1976 }
 0x44e   : > { %v358_v33 = vpop.permute.xlu1 %357  ;;  %v467_v32 = vmul.f32 %v1977_v9, %v2231_v36  ;;  %v693_v36 = vsel %vm240_vm3, %v2269_v57, 0 }
 0x44f   : > { %v363_v4 = vsel %vm240_vm3, %v358_v33, 0 }
 0x450   : > { %1777 = vmatpush3.bf16.msra.mxu0 %v363_v4  ;;  %v468_v22 = vpack.c.bf16 %v467_v32, %v467_v32 }
 0x451   : > { %1788 = vmatprep.subr.bf16.mxu0 %v2004_v0 }
 0x453   : > { %1779 = vmatmul.mubr.msk.bf16.vlgmr.msra.gmra.mrb[4].mxu0 %vm224_vm2, %v353_v34 }
 0x454   : > { %1789 = vmatpush3.bf16.msra.mxu0 %v475_v35  ;;  %1790 = vmatprep.mubr.msk.bf16.mxu0 %vm2005_vm0, %v2004_v0 }
 0x455   : > { %1800 = vmatprep.subr.bf16.mxu0 %v2004_v0  ;;  %v1979_v40 = vpop.eup %1978 }
 0x456   : > { %v579_v39 = vmul.f32 %v1979_v40, %v2235_v16 }
 0x458   : > { %v580_v42 = vpack.c.bf16 %v579_v39, %v579_v39 }
 0x45b   : > { %1791 = vmatmul.mubr.msk.bf16.vlgmr.msra.gmra.mrb[8].mxu0 %vm224_vm2, %v468_v22 }
 0x45c   : > { %1801 = vmatpush3.bf16.msra.mxu0 %v587_v41  ;;  %1802 = vmatprep.mubr.msk.bf16.mxu0 %vm2005_vm0, %v2004_v0 }
 0x45d   : > { %1812 = vmatprep.subr.bf16.mxu0 %v2004_v0 }
 0x463   : > { %1803 = vmatmul.mubr.msk.bf16.vlgmr.msra.gmra.mrb[12].mxu0 %vm224_vm2, %v580_v42 }
 0x464   : > { %1813 = vmatpush3.bf16.msra.mxu0 %v693_v36  ;;  %1814 = vmatprep.mubr.msk.bf16.mxu0 %vm2005_vm0, %v2004_v0 }
 0x465   : > { %1824 = vmatprep.subr.bf16.mxu0 %v2004_v0 }
 0x477   : > { %v685_v43 = vpop.xlane.xlu0 %684 }
 0x478   : > { %1980 = vrcp.f32 %v685_v43 }
 0x47b   : > { %v801_v45 = vpop.xlane.xlu0 %800 }
 0x47c   : > { %1982 = vrcp.f32 %v801_v45 }
 0x47f   : > { %v1028_v46 = vpop.xlane.xlu1 %1027  ;;  %v916_v16 = vpop.xlane.xlu0 %915 }
 0x480   : > { %1984 = vrcp.f32 %v916_v16 }
 0x481   : > { %1986 = vrcp.f32 %v1028_v46 }
 0x482   : > { %v1981_v47 = vpop.eup %1980 }
 0x483   : > { %v687_v48 = vmul.f32 %v1981_v47, %v2252_v53  ;;  %v809_v49 = vpop.permute.xlu1 %808  ;;  %v926_v53 = vsel %vm240_vm3, %v2276_v60, 0  ;;  %v1033_v57 = vpop.permute.xlu0 %1032 }
 0x484   : > { %v814_v50 = vsel %vm240_vm3, %v809_v49, 0  ;;  %v1038_v61 = vsel %vm240_vm3, %v1033_v57, 0 }
 0x485   : > { %v688_v29 = vpack.c.bf16 %v687_v48, %v687_v48 }
 0x486   : > { %v1983_v52 = vpop.eup %1982 }
 0x487   : > { %1815 = vmatmul.mubr.msk.bf16.vlgmr.msra.gmra.mrb[16].mxu0 %vm224_vm2, %v688_v29  ;;  %v803_v30 = vmul.f32 %v1983_v52, %v2256_v37 }
 0x488   : > { %1825 = vmatpush3.bf16.msra.mxu0 %v814_v50  ;;  %1826 = vmatprep.mubr.msk.bf16.mxu0 %vm2005_vm0, %v2004_v0 }
 0x489   : > { %1836 = vmatprep.subr.bf16.mxu0 %v2004_v0  ;;  %v804_v44 = vpack.c.bf16 %v803_v30, %v803_v30 }
 0x48a   : > { %v1985_v55 = vpop.eup %1984 }
 0x48b   : > { %v918_v56 = vmul.f32 %v1985_v55, %v2258_v54  ;;  %v1987_v59 = vpop.eup %1986  ;;  %v1144_v54 = vsel %vm240_vm3, %v2301_v23, 0 }
 0x48c   : > { %v1030_v60 = vmul.f32 %v1987_v59, %v2262_v51 }
 0x48d   : > { %v919_v37 = vpack.c.bf16 %v918_v56, %v918_v56 }
 0x48e   : > { %v1031_v63 = vpack.c.bf16 %v1030_v60, %v1030_v60 }
 0x48f   : > { %1827 = vmatmul.mubr.msk.bf16.vlgmr.msra.gmra.mrb[20].mxu0 %vm224_vm2, %v804_v44 }
 0x490   : > { %1837 = vmatpush3.bf16.msra.mxu0 %v926_v53  ;;  %1838 = vmatprep.mubr.msk.bf16.mxu0 %vm2005_vm0, %v2004_v0 }
 0x491   : > { %1848 = vmatprep.subr.bf16.mxu0 %v2004_v0 }
 0x497   : > { %1839 = vmatmul.mubr.msk.bf16.vlgmr.msra.gmra.mrb[24].mxu0 %vm224_vm2, %v919_v37 }
 0x498   : > { %1849 = vmatpush3.bf16.msra.mxu0 %v1038_v61  ;;  %1850 = vmatprep.mubr.msk.bf16.mxu0 %vm2005_vm0, %v2004_v0 }
 0x499   : > { %1860 = vmatprep.subr.bf16.mxu0 %v2004_v0 }
 0x49f   : > { %1851 = vmatmul.mubr.msk.bf16.vlgmr.msra.gmra.mrb[28].mxu0 %vm224_vm2, %v1031_v63 }
 0x4a0   : > { %1861 = vmatpush3.bf16.msra.mxu0 %v1144_v54  ;;  %1862 = vmatprep.mubr.msk.bf16.mxu0 %vm2005_vm0, %v2004_v0 }
 0x4a1   : > { %1872 = vmatprep.subr.bf16.mxu0 %v2004_v0 }
 0x4b4   : > { %v1136_v1 = vpop.xlane.xlu0 %1135  ;;  %v1479_v13 = vpop.xlane.xlu1 %1478 }
 0x4b5   : > { %1988 = vrcp.f32 %v1136_v1 }
 0x4b8   : > { %v1252_v2 = vpop.xlane.xlu0 %1251 }
 0x4b9   : > { %1990 = vrcp.f32 %v1252_v2 }
 0x4bc   : > { %v1367_v5 = vpop.xlane.xlu0 %1366 }
 0x4bd   : > { %1992 = vrcp.f32 %v1367_v5 }
 0x4be   : > { %1994 = vrcp.f32 %v1479_v13 }
 0x4bf   : > { %v1989_v51 = vpop.eup %1988 }
 0x4c0   : > { %v1260_v6 = vpop.permute.xlu0 %1259  ;;  %v1138_v7 = vmul.f32 %v1989_v51, %v2284_v15  ;;  %v1377_v15 = vsel %vm240_vm3, %v2308_v26, 0 }
 0x4c1   : > { %v1265_v8 = vsel %vm240_vm3, %v1260_v6, 0 }
 0x4c2   : > { %v1139_v10 = vpack.c.bf16 %v1138_v7, %v1138_v7 }
 0x4c3   : > { %v1991_v11 = vpop.eup %1990 }
 0x4c4   : > { %1863 = vmatmul.mubr.msk.bf16.vlgmr.msra.gmra.mrb[32].mxu0 %vm224_vm2, %v1139_v10  ;;  %v1254_v14 = vmul.f32 %v1991_v11, %v2292_v18  ;;  %v1484_v20 = vpop.permute.xlu0 %1483 }
 0x4c5   : > { %1873 = vmatpush3.bf16.msra.mxu0 %v1265_v8  ;;  %1874 = vmatprep.mubr.msk.bf16.mxu0 %vm2005_vm0, %v2004_v0  ;;  %v1489_v18 = vsel %vm240_vm3, %v1484_v20, 0 }
 0x4c6   : > { %1884 = vmatprep.subr.bf16.mxu0 %v2004_v0  ;;  %v1255_v58 = vpack.c.bf16 %v1254_v14, %v1254_v14 }
 0x4c7   : > { %v1993_v3 = vpop.eup %1992 }
 0x4c8   : > { %v1369_v12 = vmul.f32 %v1993_v3, %v2296_v19  ;;  %v1995_v23 = vpop.eup %1994 }
 0x4c9   : > { %v1481_v24 = vmul.f32 %v1995_v23, %v2286_v17 }
 0x4ca   : > { %v1370_v21 = vpack.c.bf16 %v1369_v12, %v1369_v12 }
 0x4cb   : > { %v1482_v25 = vpack.c.bf16 %v1481_v24, %v1481_v24 }
 0x4cc   : > { %1875 = vmatmul.mubr.msk.bf16.vlgmr.msra.gmra.mrb[36].mxu0 %vm224_vm2, %v1255_v58 }
 0x4cd   : > { %1885 = vmatpush3.bf16.msra.mxu0 %v1377_v15  ;;  %1886 = vmatprep.mubr.msk.bf16.mxu0 %vm2005_vm0, %v2004_v0 }
 0x4ce   : > { %1896 = vmatprep.subr.bf16.mxu0 %v2004_v0 }
 0x4d4   : > { %1887 = vmatmul.mubr.msk.bf16.vlgmr.msra.gmra.mrb[40].mxu0 %vm224_vm2, %v1370_v21 }
 0x4d5   : > { %1897 = vmatpush3.bf16.msra.mxu0 %v1489_v18  ;;  %1898 = vmatprep.mubr.msk.bf16.mxu0 %vm2005_vm0, %v2004_v0 }
 0x4dc   : > { %1899 = vmatmul.mubr.msk.bf16.vlgmr.msra.gmra.mrb[44].mxu0 %vm224_vm2, %v1482_v25 }
 0x526   : > { %v399_v26 = vpop.f32.mrb[4].mxu0 }
 0x527   : > { %v1780_v19 = vpop.f32.mrb[5].mxu0 }
 0x528   : > { %v402_v27 = vpop.f32.mrb[6].mxu0 }
 0x529   : > { %v1781_v28 = vpop.f32.mrb[7].mxu0 }
 0x52e   : > { %v511_v31 = vpop.f32.mrb[8].mxu0 }
 0x52f   : > { %v1792_v33 = vpop.f32.mrb[9].mxu0 }
 0x530   : > { %v514_v4 = vpop.f32.mrb[10].mxu0 }
 0x531   : > { %v1793_v34 = vpop.f32.mrb[11].mxu0 }
 0x536   : > { %v623_v35 = vpop.f32.mrb[12].mxu0 }
 0x537   : > { %v1915_v9 = vpack.i.bf16 %v623_v35, %v399_v26  ;;  %v1804_v32 = vpop.f32.mrb[13].mxu0 }
 0x538   : > { %v626_v38 = vpop.f32.mrb[14].mxu0 }
 0x539   : > { %1916 = vrot.lane.b32.xlu0 %v1915_v9, %s2006_s18  ;;  %v1805_v0 = vpop.f32.mrb[15].mxu0 }
 0x55a   : > { %v729_v22 = vpop.f32.mrb[16].mxu0 }
 0x55b   : > { %v1816_v17 = vpop.f32.mrb[17].mxu0 }
 0x55c   : > { %v732_v40 = vpop.f32.mrb[18].mxu0 }
 0x55d   : > { %v1817_v41 = vpop.f32.mrb[19].mxu0 }
 0x562   : > { %v850_v39 = vpop.f32.mrb[20].mxu0 }
 0x563   : > { %v1828_v42 = vpop.f32.mrb[21].mxu0 }
 0x564   : > { %v853_v36 = vpop.f32.mrb[22].mxu0 }
 0x565   : > { %v1829_v43 = vpop.f32.mrb[23].mxu0 }
 0x56a   : > { %v962_v45 = vpop.f32.mrb[24].mxu0 }
 0x56b   : > { %v1840_v46 = vpop.f32.mrb[25].mxu0 }
 0x56c   : > { %v965_v16 = vpop.f32.mrb[26].mxu0 }
 0x56d   : > { %v1841_v47 = vpop.f32.mrb[27].mxu0 }
 0x572   : > { %v1074_v48 = vpop.f32.mrb[28].mxu0 }
 0x573   : > { %v1920_v49 = vpack.i.bf16 %v1074_v48, %v850_v39  ;;  %v1852_v29 = vpop.f32.mrb[29].mxu0 }
 0x574   : > { %v1077_v50 = vpop.f32.mrb[30].mxu0 }
 0x575   : > { %1921 = vrot.lane.b32.xlu0 %v1920_v49, %s2006_s18  ;;  %v1853_v52 = vpop.f32.mrb[31].mxu0 }
 0x597   : > { %v1180_v30 = vpop.f32.mrb[32].mxu0 }
 0x598   : > { %v1864_v44 = vpop.f32.mrb[33].mxu0 }
 0x599   : > { %v1183_v53 = vpop.f32.mrb[34].mxu0 }
 0x59a   : > { %v1865_v55 = vpop.f32.mrb[35].mxu0 }
 0x59f   : > { %v1301_v56 = vpop.f32.mrb[36].mxu0 }
 0x5a0   : > { %v1876_v57 = vpop.f32.mrb[37].mxu0 }
 0x5a1   : > { %v1304_v37 = vpop.f32.mrb[38].mxu0 }
 0x5a2   : > { %v1877_v59 = vpop.f32.mrb[39].mxu0 }
 0x5a7   : > { %v1413_v61 = vpop.f32.mrb[40].mxu0 }
 0x5a8   : > { %v1888_v60 = vpop.f32.mrb[41].mxu0 }
 0x5a9   : > { %v1416_v63 = vpop.f32.mrb[42].mxu0 }
 0x5aa   : > { %v1889_v54 = vpop.f32.mrb[43].mxu0 }
 0x5ab   : > { %v1917_v1 = vpop.permute.xlu0 %1916 }
 0x5ac   : > { %v1919_v2 = vunpack.i.h.bf16 %v1917_v1  ;;  %v1918_v5 = vunpack.i.l.bf16 %v1917_v1 }
 0x5ae   : > { %v1556_v51 = vsel %vm169_vm1, %v511_v31, %v1919_v2  ;;  %v1555_v6 = vsel %vm169_vm1, %v2167_v62, %v1918_v5 }
 0x5af   : > { %v1707_v7 = vpack.c.bf16 %v1556_v51, %v1555_v6  ;;  %v1525_v8 = vpop.f32.mrb[44].mxu0 }
 0x5b0   : > { %v1925_v10 = vpack.i.bf16 %v1525_v8, %v1301_v56  ;;  %v1900_v11 = vpop.f32.mrb[45].mxu0 }
 0x5b1   : > { %1585 = vst [vmem:[%s157_s22] sm:$0xff] %v1707_v7  ;;  %v1528_v13 = vpop.f32.mrb[46].mxu0 }
 0x5b2   : > { %1926 = vrot.lane.b32.xlu1 %v1925_v10, %s2006_s18  ;;  %v1901_v14 = vpop.f32.mrb[47].mxu0 }
 0x5e7   : > { %v1922_v58 = vpop.permute.xlu0 %1921 }
 0x5e8   : > { %v1924_v15 = vunpack.i.h.bf16 %v1922_v58  ;;  %v1923_v3 = vunpack.i.l.bf16 %v1922_v58 }
 0x5ea   : > { %v1558_v12 = vsel %vm169_vm1, %v962_v45, %v1924_v15  ;;  %v1557_v20 = vsel %vm169_vm1, %v729_v22, %v1923_v3 }
 0x5eb   : > { %v1708_v18 = vpack.c.bf16 %v1558_v12, %v1557_v20 }
 0x5ed   : > { %1586 = vst [vmem:[%s157_s22 + $0x8] sm:$0xff] %v1708_v18 }
 0x624   : > { %v1927_v21 = vpop.permute.xlu1 %1926 }
 0x625   : > { %v1929_v62 = vunpack.i.h.bf16 %v1927_v21  ;;  %v1928_v23 = vunpack.i.l.bf16 %v1927_v21 }
 0x627   : > { %v1560_v24 = vsel %vm169_vm1, %v1413_v61, %v1929_v62  ;;  %v1559_v25 = vsel %vm169_vm1, %v1180_v30, %v1928_v23 }
 0x628   : > { %v1709_v26 = vpack.c.bf16 %v1560_v24, %v1559_v25 }
 0x62a   : > { %1587 = vst [vmem:[%s157_s22 + $0x10] sm:$0xff] %v1709_v26 }
 0x62b PF: > { %s12_s9 = sadd.s32 1, %s2002_s9  }
 0x62c   : > { %p9_p4 = scmp.ge.s32.totalorder %s12_s9, 4  }
 0x62e   :  { %11 = sbr.rel (!%p9_p4) target bundleno = 1 (0x1), region = 61 }

// kernel: bert_ner_forward.12
= control target key start
LH: loop header
LB: loop body
LE: loop exit
PB: predicated region body
PF: predicated region fallthrough
CT: control target
= control target key end

     0   :  { %s1880_s12 = smov 0   ;;  %s1882_s13 = smov 0   ;;  %s2260_s0 = inlined_call_operand.vmem [shape: bf16[16,768], index: 0, kind: input, shape index: {}]   ;;  %s2261_s1 = inlined_call_operand.vmem [shape: bf16[768,3072], index: 1, kind: input, shape index: {}]   ;;  %s2262_s2 = inlined_call_operand.vmem [shape: f32[1,3072], index: 2, kind: input, shape index: {}]   ;;  %s2263_s3 = inlined_call_operand.vmem [shape: bf16[16,3072], index: 3, kind: output, shape index: {}]  }
   0x1   :  { %s1884_s14 = smov 0  }
   0x2 LB: > { %s1896_s15 = sadd.s32 4294967295, %s1858_s14   ;;  %s1899_s16 = sadd.s32 1, %s1858_s14   ;;  %s1858_s14 = sphi %s1884_s14, %s2267_s14   ;;  %s1854_s13 = sphi %s1882_s13, %s2266_s13   ;;  %s1850_s12 = sphi %s1880_s12, %s2265_s12  }
   0x3   : > { %s38_s17 = ssub.s32 %s1858_s14, %s1899_s16  ;;  %s41_s18 = sadd.s32 1, %s1854_s13 }
   0x4   : > { %p39_p0 = scmp.eq.s32.totalorder %s38_s17, 0  ;;  %p48_p1 = scmp.ne.s32.totalorder %s1854_s13, %s1850_s12 }
   0x5   : > { %p49_p2 = scmp.eq.s32.totalorder %s1858_s14, 0  ;;  %p104_p3 = scmp.eq.s32.totalorder %s1896_s15, 11 }
   0x6   : > { %s1909_s19 = scalar_select %p39_p0, %s1854_s13, %s41_s18  }
   0x7   : > { %p50_p4 = por %p49_p2, %p48_p1  ;;  %p1911_p5 = por %p104_p3, %p48_p1 }
   0x8   : > { %p1518_p6 = scmp.ge.s32.totalorder %s1858_s14, 12 }
   0xa   : > { %129 = sbr.rel (%p1518_p6) target bundleno = 117 (0x75), region = 20 }
  0x11   : > { %132 = sbr.rel (!%p50_p4) target bundleno = 117 (0x75), region = 24  ;;  %s134_s21 = sand.u32 (%p50_p4), 1, %s1854_s13  }
  0x12   : > { %s1633_s22 = sshll.u32 (%p50_p4), %s1858_s14, 3  ;;  %s1649_s23 = smul.u32 (%p50_p4), 768, %s134_s21 }
  0x13   : > { %s1921_s26 = scalar_lea.vmem (%p50_p4), %s2261_s1, %s1633_s22 }
  0x14   : > { %v357_v0 = vld [vmem:[%s1921_s26] sm:$0xff] (%p50_p4)  ;;  %s1929_s27 = scalar_lea.vmem (%p50_p4), [#allocation2], %s1649_s23 }
  0x15   : > { %v359_v1 = vld [vmem:[%s1921_s26 + $0x60] sm:$0xff] (%p50_p4)  ;;  %358 = vst [vmem:[%s1929_s27] sm:$0xff] (%p50_p4), %v357_v0 }
  0x16   : > { %v361_v2 = vld [vmem:[%s1921_s26 + $0xc0] sm:$0xff] (%p50_p4)  ;;  %360 = vst [vmem:[%s1929_s27 + $0x8] sm:$0xff] (%p50_p4), %v359_v1 }
  0x17   : > { %v363_v3 = vld [vmem:[%s1921_s26 + $0x120] sm:$0xff] (%p50_p4)  ;;  %362 = vst [vmem:[%s1929_s27 + $0x10] sm:$0xff] (%p50_p4), %v361_v2 }
  0x18   : > { %v365_v4 = vld [vmem:[%s1921_s26 + $0x180] sm:$0xff]  ;;  %364 = vst [vmem:[%s1929_s27 + $0x18] sm:$0xff] %v363_v3 }
  0x19   : > { %v367_v5 = vld [vmem:[%s1921_s26 + $0x1e0] sm:$0xff]  ;;  %366 = vst [vmem:[%s1929_s27 + $0x20] sm:$0xff] %v365_v4 }
  0x1a   : > { %368 = vst [vmem:[%s1929_s27 + $0x28] sm:$0xff] %v367_v5  ;;  %v369_v6 = vld [vmem:[%s1921_s26 + $0x240] sm:$0xff] }
  0x1b   : > { %v371_v7 = vld [vmem:[%s1921_s26 + $0x2a0] sm:$0xff]  ;;  %370 = vst [vmem:[%s1929_s27 + $0x30] sm:$0xff] %v369_v6 }
  0x1c   : > { %v373_v8 = vld [vmem:[%s1921_s26 + $0x300] sm:$0xff]  ;;  %372 = vst [vmem:[%s1929_s27 + $0x38] sm:$0xff] %v371_v7 }
  0x1d   : > { %374 = vst [vmem:[%s1929_s27 + $0x40] sm:$0xff] %v373_v8  ;;  %v375_v9 = vld [vmem:[%s1921_s26 + $0x360] sm:$0xff] }
  0x1e   : > { %v377_v10 = vld [vmem:[%s1921_s26 + $0x3c0] sm:$0xff]  ;;  %376 = vst [vmem:[%s1929_s27 + $0x48] sm:$0xff] %v375_v9 }
  0x1f   : > { %v379_v11 = vld [vmem:[%s1921_s26 + $0x420] sm:$0xff]  ;;  %378 = vst [vmem:[%s1929_s27 + $0x50] sm:$0xff] %v377_v10 }
  0x20   : > { %380 = vst [vmem:[%s1929_s27 + $0x58] sm:$0xff] %v379_v11  ;;  %v381_v12 = vld [vmem:[%s1921_s26 + $0x480] sm:$0xff] }
  0x21   : > { %v383_v13 = vld [vmem:[%s1921_s26 + $0x4e0] sm:$0xff]  ;;  %382 = vst [vmem:[%s1929_s27 + $0x60] sm:$0xff] %v381_v12 }
  0x22   : > { %v385_v14 = vld [vmem:[%s1921_s26 + $0x540] sm:$0xff]  ;;  %384 = vst [vmem:[%s1929_s27 + $0x68] sm:$0xff] %v383_v13 }
  0x23   : > { %386 = vst [vmem:[%s1929_s27 + $0x70] sm:$0xff] %v385_v14  ;;  %v387_v15 = vld [vmem:[%s1921_s26 + $0x5a0] sm:$0xff] }
  0x24   : > { %v389_v16 = vld [vmem:[%s1921_s26 + $0x600] sm:$0xff]  ;;  %388 = vst [vmem:[%s1929_s27 + $0x78] sm:$0xff] %v387_v15 }
  0x25   : > { %v391_v17 = vld [vmem:[%s1921_s26 + $0x660] sm:$0xff]  ;;  %390 = vst [vmem:[%s1929_s27 + $0x80] sm:$0xff] %v389_v16 }
  0x26   : > { %392 = vst [vmem:[%s1929_s27 + $0x88] sm:$0xff] %v391_v17  ;;  %v393_v18 = vld [vmem:[%s1921_s26 + $0x6c0] sm:$0xff] }
  0x27   : > { %v395_v19 = vld [vmem:[%s1921_s26 + $0x720] sm:$0xff]  ;;  %394 = vst [vmem:[%s1929_s27 + $0x90] sm:$0xff] %v393_v18 }
  0x28   : > { %v397_v20 = vld [vmem:[%s1921_s26 + $0x780] sm:$0xff]  ;;  %396 = vst [vmem:[%s1929_s27 + $0x98] sm:$0xff] %v395_v19 }
  0x29   : > { %398 = vst [vmem:[%s1929_s27 + $0xa0] sm:$0xff] %v397_v20  ;;  %v399_v21 = vld [vmem:[%s1921_s26 + $0x7e0] sm:$0xff] }
  0x2a   : > { %v401_v22 = vld [vmem:[%s1921_s26 + $0x840] sm:$0xff]  ;;  %400 = vst [vmem:[%s1929_s27 + $0xa8] sm:$0xff] %v399_v21 }
  0x2b   : > { %v403_v23 = vld [vmem:[%s1921_s26 + $0x8a0] sm:$0xff]  ;;  %402 = vst [vmem:[%s1929_s27 + $0xb0] sm:$0xff] %v401_v22 }
  0x2c   : > { %404 = vst [vmem:[%s1929_s27 + $0xb8] sm:$0xff] %v403_v23  ;;  %v405_v24 = vld [vmem:[%s1921_s26 + $0x900] sm:$0xff] }
  0x2d   : > { %v407_v25 = vld [vmem:[%s1921_s26 + $0x960] sm:$0xff]  ;;  %406 = vst [vmem:[%s1929_s27 + $0xc0] sm:$0xff] %v405_v24 }
  0x2e   : > { %v409_v26 = vld [vmem:[%s1921_s26 + $0x9c0] sm:$0xff]  ;;  %408 = vst [vmem:[%s1929_s27 + $0xc8] sm:$0xff] %v407_v25 }
  0x2f   : > { %410 = vst [vmem:[%s1929_s27 + $0xd0] sm:$0xff] %v409_v26  ;;  %v411_v27 = vld [vmem:[%s1921_s26 + $0xa20] sm:$0xff] }
  0x30   : > { %v413_v28 = vld [vmem:[%s1921_s26 + $0xa80] sm:$0xff]  ;;  %412 = vst [vmem:[%s1929_s27 + $0xd8] sm:$0xff] %v411_v27 }
  0x31   : > { %v415_v29 = vld [vmem:[%s1921_s26 + $0xae0] sm:$0xff]  ;;  %414 = vst [vmem:[%s1929_s27 + $0xe0] sm:$0xff] %v413_v28 }
  0x32   : > { %416 = vst [vmem:[%s1929_s27 + $0xe8] sm:$0xff] %v415_v29  ;;  %v417_v30 = vld [vmem:[%s1921_s26 + $0xb40] sm:$0xff] }
  0x33   : > { %v419_v31 = vld [vmem:[%s1921_s26 + $0xba0] sm:$0xff]  ;;  %418 = vst [vmem:[%s1929_s27 + $0xf0] sm:$0xff] %v417_v30 }
  0x34   : > { %v421_v32 = vld [vmem:[%s1921_s26 + $0xc00] sm:$0xff]  ;;  %420 = vst [vmem:[%s1929_s27 + $0xf8] sm:$0xff] %v419_v31 }
  0x35   : > { %422 = vst [vmem:[%s1929_s27 + $0x100] sm:$0xff] %v421_v32  ;;  %v423_v33 = vld [vmem:[%s1921_s26 + $0xc60] sm:$0xff] }
  0x36   : > { %v425_v34 = vld [vmem:[%s1921_s26 + $0xcc0] sm:$0xff]  ;;  %424 = vst [vmem:[%s1929_s27 + $0x108] sm:$0xff] %v423_v33 }
  0x37   : > { %v427_v35 = vld [vmem:[%s1921_s26 + $0xd20] sm:$0xff]  ;;  %426 = vst [vmem:[%s1929_s27 + $0x110] sm:$0xff] %v425_v34 }
  0x38   : > { %428 = vst [vmem:[%s1929_s27 + $0x118] sm:$0xff] %v427_v35  ;;  %v429_v36 = vld [vmem:[%s1921_s26 + $0xd80] sm:$0xff] }
  0x39   : > { %v431_v37 = vld [vmem:[%s1921_s26 + $0xde0] sm:$0xff]  ;;  %430 = vst [vmem:[%s1929_s27 + $0x120] sm:$0xff] %v429_v36 }
  0x3a   : > { %v433_v38 = vld [vmem:[%s1921_s26 + $0xe40] sm:$0xff]  ;;  %432 = vst [vmem:[%s1929_s27 + $0x128] sm:$0xff] %v431_v37 }
  0x3b   : > { %434 = vst [vmem:[%s1929_s27 + $0x130] sm:$0xff] %v433_v38  ;;  %v435_v39 = vld [vmem:[%s1921_s26 + $0xea0] sm:$0xff] }
  0x3c   : > { %v437_v40 = vld [vmem:[%s1921_s26 + $0xf00] sm:$0xff]  ;;  %436 = vst [vmem:[%s1929_s27 + $0x138] sm:$0xff] %v435_v39 }
  0x3d   : > { %v439_v41 = vld [vmem:[%s1921_s26 + $0xf60] sm:$0xff]  ;;  %438 = vst [vmem:[%s1929_s27 + $0x140] sm:$0xff] %v437_v40 }
  0x3e   : > { %440 = vst [vmem:[%s1929_s27 + $0x148] sm:$0xff] %v439_v41  ;;  %v441_v42 = vld [vmem:[%s1921_s26 + $0xfc0] sm:$0xff] }
  0x3f   : > { %v443_v43 = vld [vmem:[%s1921_s26 + $0x1020] sm:$0xff]  ;;  %442 = vst [vmem:[%s1929_s27 + $0x150] sm:$0xff] %v441_v42 }
  0x40   : > { %v445_v44 = vld [vmem:[%s1921_s26 + $0x1080] sm:$0xff]  ;;  %444 = vst [vmem:[%s1929_s27 + $0x158] sm:$0xff] %v443_v43 }
  0x41   : > { %446 = vst [vmem:[%s1929_s27 + $0x160] sm:$0xff] %v445_v44  ;;  %v447_v45 = vld [vmem:[%s1921_s26 + $0x10e0] sm:$0xff] }
  0x42   : > { %v449_v46 = vld [vmem:[%s1921_s26 + $0x1140] sm:$0xff]  ;;  %448 = vst [vmem:[%s1929_s27 + $0x168] sm:$0xff] %v447_v45 }
  0x43   : > { %v451_v47 = vld [vmem:[%s1921_s26 + $0x11a0] sm:$0xff]  ;;  %450 = vst [vmem:[%s1929_s27 + $0x170] sm:$0xff] %v449_v46 }
  0x44   : > { %452 = vst [vmem:[%s1929_s27 + $0x178] sm:$0xff] %v451_v47  ;;  %v453_v48 = vld [vmem:[%s1921_s26 + $0x1200] sm:$0xff] }
  0x45   : > { %v455_v49 = vld [vmem:[%s1921_s26 + $0x1260] sm:$0xff]  ;;  %454 = vst [vmem:[%s1929_s27 + $0x180] sm:$0xff] %v453_v48 }
  0x46   : > { %v457_v50 = vld [vmem:[%s1921_s26 + $0x12c0] sm:$0xff]  ;;  %456 = vst [vmem:[%s1929_s27 + $0x188] sm:$0xff] %v455_v49 }
  0x47   : > { %458 = vst [vmem:[%s1929_s27 + $0x190] sm:$0xff] %v457_v50  ;;  %v459_v51 = vld [vmem:[%s1921_s26 + $0x1320] sm:$0xff] }
  0x48   : > { %v461_v52 = vld [vmem:[%s1921_s26 + $0x1380] sm:$0xff]  ;;  %460 = vst [vmem:[%s1929_s27 + $0x198] sm:$0xff] %v459_v51 }
  0x49   : > { %v463_v53 = vld [vmem:[%s1921_s26 + $0x13e0] sm:$0xff]  ;;  %462 = vst [vmem:[%s1929_s27 + $0x1a0] sm:$0xff] %v461_v52 }
  0x4a   : > { %464 = vst [vmem:[%s1929_s27 + $0x1a8] sm:$0xff] %v463_v53  ;;  %v465_v54 = vld [vmem:[%s1921_s26 + $0x1440] sm:$0xff] }
  0x4b   : > { %v467_v55 = vld [vmem:[%s1921_s26 + $0x14a0] sm:$0xff]  ;;  %466 = vst [vmem:[%s1929_s27 + $0x1b0] sm:$0xff] %v465_v54 }
  0x4c   : > { %v469_v56 = vld [vmem:[%s1921_s26 + $0x1500] sm:$0xff]  ;;  %468 = vst [vmem:[%s1929_s27 + $0x1b8] sm:$0xff] %v467_v55 }
  0x4d   : > { %470 = vst [vmem:[%s1929_s27 + $0x1c0] sm:$0xff] %v469_v56  ;;  %v471_v57 = vld [vmem:[%s1921_s26 + $0x1560] sm:$0xff] }
  0x4e   : > { %v473_v58 = vld [vmem:[%s1921_s26 + $0x15c0] sm:$0xff]  ;;  %472 = vst [vmem:[%s1929_s27 + $0x1c8] sm:$0xff] %v471_v57 }
  0x4f   : > { %v475_v59 = vld [vmem:[%s1921_s26 + $0x1620] sm:$0xff]  ;;  %474 = vst [vmem:[%s1929_s27 + $0x1d0] sm:$0xff] %v473_v58 }
  0x50   : > { %476 = vst [vmem:[%s1929_s27 + $0x1d8] sm:$0xff] %v475_v59  ;;  %v477_v60 = vld [vmem:[%s1921_s26 + $0x1680] sm:$0xff] }
  0x51   : > { %v479_v61 = vld [vmem:[%s1921_s26 + $0x16e0] sm:$0xff]  ;;  %478 = vst [vmem:[%s1929_s27 + $0x1e0] sm:$0xff] %v477_v60 }
  0x52   : > { %v481_v62 = vld [vmem:[%s1921_s26 + $0x1740] sm:$0xff]  ;;  %480 = vst [vmem:[%s1929_s27 + $0x1e8] sm:$0xff] %v479_v61 }
  0x53   : > { %482 = vst [vmem:[%s1929_s27 + $0x1f0] sm:$0xff] %v481_v62  ;;  %v483_v63 = vld [vmem:[%s1921_s26 + $0x17a0] sm:$0xff] }
  0x54   : > { %v485_v0 = vld [vmem:[%s1921_s26 + $0x1800] sm:$0xff]  ;;  %484 = vst [vmem:[%s1929_s27 + $0x1f8] sm:$0xff] %v483_v63 }
  0x55   : > { %v487_v1 = vld [vmem:[%s1921_s26 + $0x1860] sm:$0xff]  ;;  %486 = vst [vmem:[%s1929_s27 + $0x200] sm:$0xff] %v485_v0 }
  0x56   : > { %488 = vst [vmem:[%s1929_s27 + $0x208] sm:$0xff] %v487_v1  ;;  %v489_v2 = vld [vmem:[%s1921_s26 + $0x18c0] sm:$0xff] }
  0x57   : > { %v491_v3 = vld [vmem:[%s1921_s26 + $0x1920] sm:$0xff]  ;;  %490 = vst [vmem:[%s1929_s27 + $0x210] sm:$0xff] %v489_v2 }
  0x58   : > { %v493_v4 = vld [vmem:[%s1921_s26 + $0x1980] sm:$0xff]  ;;  %492 = vst [vmem:[%s1929_s27 + $0x218] sm:$0xff] %v491_v3 }
  0x59   : > { %494 = vst [vmem:[%s1929_s27 + $0x220] sm:$0xff] %v493_v4  ;;  %v495_v5 = vld [vmem:[%s1921_s26 + $0x19e0] sm:$0xff] }
  0x5a   : > { %v497_v6 = vld [vmem:[%s1921_s26 + $0x1a40] sm:$0xff]  ;;  %496 = vst [vmem:[%s1929_s27 + $0x228] sm:$0xff] %v495_v5 }
  0x5b   : > { %v499_v7 = vld [vmem:[%s1921_s26 + $0x1aa0] sm:$0xff]  ;;  %498 = vst [vmem:[%s1929_s27 + $0x230] sm:$0xff] %v497_v6 }
  0x5c   : > { %500 = vst [vmem:[%s1929_s27 + $0x238] sm:$0xff] %v499_v7  ;;  %v501_v8 = vld [vmem:[%s1921_s26 + $0x1b00] sm:$0xff] }
  0x5d   : > { %v503_v9 = vld [vmem:[%s1921_s26 + $0x1b60] sm:$0xff]  ;;  %502 = vst [vmem:[%s1929_s27 + $0x240] sm:$0xff] %v501_v8 }
  0x5e   : > { %v505_v10 = vld [vmem:[%s1921_s26 + $0x1bc0] sm:$0xff]  ;;  %504 = vst [vmem:[%s1929_s27 + $0x248] sm:$0xff] %v503_v9 }
  0x5f   : > { %506 = vst [vmem:[%s1929_s27 + $0x250] sm:$0xff] %v505_v10  ;;  %v507_v11 = vld [vmem:[%s1921_s26 + $0x1c20] sm:$0xff] }
  0x60   : > { %v509_v12 = vld [vmem:[%s1921_s26 + $0x1c80] sm:$0xff]  ;;  %508 = vst [vmem:[%s1929_s27 + $0x258] sm:$0xff] %v507_v11 }
  0x61   : > { %v511_v13 = vld [vmem:[%s1921_s26 + $0x1ce0] sm:$0xff]  ;;  %510 = vst [vmem:[%s1929_s27 + $0x260] sm:$0xff] %v509_v12 }
  0x62   : > { %512 = vst [vmem:[%s1929_s27 + $0x268] sm:$0xff] %v511_v13  ;;  %v513_v14 = vld [vmem:[%s1921_s26 + $0x1d40] sm:$0xff] }
  0x63   : > { %v515_v15 = vld [vmem:[%s1921_s26 + $0x1da0] sm:$0xff]  ;;  %514 = vst [vmem:[%s1929_s27 + $0x270] sm:$0xff] %v513_v14 }
  0x64   : > { %v517_v16 = vld [vmem:[%s1921_s26 + $0x1e00] sm:$0xff]  ;;  %516 = vst [vmem:[%s1929_s27 + $0x278] sm:$0xff] %v515_v15 }
  0x65   : > { %518 = vst [vmem:[%s1929_s27 + $0x280] sm:$0xff] %v517_v16  ;;  %v519_v17 = vld [vmem:[%s1921_s26 + $0x1e60] sm:$0xff] }
  0x66   : > { %v521_v18 = vld [vmem:[%s1921_s26 + $0x1ec0] sm:$0xff]  ;;  %520 = vst [vmem:[%s1929_s27 + $0x288] sm:$0xff] %v519_v17 }
  0x67   : > { %v523_v19 = vld [vmem:[%s1921_s26 + $0x1f20] sm:$0xff]  ;;  %522 = vst [vmem:[%s1929_s27 + $0x290] sm:$0xff] %v521_v18 }
  0x68   : > { %524 = vst [vmem:[%s1929_s27 + $0x298] sm:$0xff] %v523_v19  ;;  %v525_v20 = vld [vmem:[%s1921_s26 + $0x1f80] sm:$0xff] }
  0x69   : > { %v527_v21 = vld [vmem:[%s1921_s26 + $0x1fe0] sm:$0xff]  ;;  %526 = vst [vmem:[%s1929_s27 + $0x2a0] sm:$0xff] %v525_v20 }
  0x6a   : > { %v529_v22 = vld [vmem:[%s1921_s26 + $0x2040] sm:$0xff]  ;;  %528 = vst [vmem:[%s1929_s27 + $0x2a8] sm:$0xff] %v527_v21 }
  0x6b   : > { %530 = vst [vmem:[%s1929_s27 + $0x2b0] sm:$0xff] %v529_v22  ;;  %v531_v23 = vld [vmem:[%s1921_s26 + $0x20a0] sm:$0xff] }
  0x6c   : > { %v533_v24 = vld [vmem:[%s1921_s26 + $0x2100] sm:$0xff]  ;;  %532 = vst [vmem:[%s1929_s27 + $0x2b8] sm:$0xff] %v531_v23 }
  0x6d   : > { %v535_v25 = vld [vmem:[%s1921_s26 + $0x2160] sm:$0xff]  ;;  %534 = vst [vmem:[%s1929_s27 + $0x2c0] sm:$0xff] %v533_v24 }
  0x6e   : > { %536 = vst [vmem:[%s1929_s27 + $0x2c8] sm:$0xff] %v535_v25  ;;  %v537_v26 = vld [vmem:[%s1921_s26 + $0x21c0] sm:$0xff] }
  0x6f   : > { %v539_v27 = vld [vmem:[%s1921_s26 + $0x2220] sm:$0xff]  ;;  %538 = vst [vmem:[%s1929_s27 + $0x2d0] sm:$0xff] %v537_v26 }
  0x70   : > { %v541_v28 = vld [vmem:[%s1921_s26 + $0x2280] sm:$0xff]  ;;  %540 = vst [vmem:[%s1929_s27 + $0x2d8] sm:$0xff] %v539_v27 }
  0x71   : > { %542 = vst [vmem:[%s1929_s27 + $0x2e0] sm:$0xff] %v541_v28  ;;  %v543_v29 = vld [vmem:[%s1921_s26 + $0x22e0] sm:$0xff] }
  0x72   : > { %v545_v30 = vld [vmem:[%s1921_s26 + $0x2340] sm:$0xff]  ;;  %544 = vst [vmem:[%s1929_s27 + $0x2e8] sm:$0xff] %v543_v29 }
  0x73   : > { %v547_v31 = vld [vmem:[%s1921_s26 + $0x23a0] sm:$0xff]  ;;  %546 = vst [vmem:[%s1929_s27 + $0x2f0] sm:$0xff] %v545_v30 }
  0x74   : > { %548 = vst [vmem:[%s1929_s27 + $0x2f8] sm:$0xff] %v547_v31 }
  0x75 PF: > { %p1521_p7 = scmp.ge.s32.totalorder %s1858_s14, 1  ;;  %p561_p8 = scmp.lt.s32.totalorder %s1858_s14, 13 }
  0x77   : > { %p562_p9 = pnand %p1521_p7, %p561_p8 }
  0x78   : > { %s568_s28 = sand.u32 (!%p562_p9), 1, %s1850_s12   ;;  %v1731_v32 = vld [vmem:[%s2260_s0 + $0xc] ss:$24 sps:$4 sm:$0xff] (!%p562_p9)   ;;  %v1729_v26 = vld [vmem:[%s2260_s0 + $0x8] ss:$24 sps:$4 sm:$0xff] (!%p562_p9)   ;;  %s1523_s22 = sshll.u32 (!%p562_p9), %s1896_s15, 1 }
  0x79   : > { %565 = sbr.rel (%p562_p9) target bundleno = 507 (0x1fb), region = 66  ;;  %v1821_v33 = vld [vmem:[%s2260_s0 + $0x4] ss:$24 sps:$4 sm:$0xff] (!%p562_p9)   ;;  %1300 = vmatprep.mubr.bf16.mxu0 (!%p562_p9), %v1731_v32  ;;  %v1827_v31 = vld [vmem:[%s2260_s0 + $0x14] ss:$24 sps:$4 sm:$0xff] (!%p562_p9)   ;;  %p596_p10 = scmp.lt.s32.totalorder (!%p562_p9), %s1523_s22, 23 }
  0x7a   : > { %s1650_s29 = smul.u32 (!%p562_p9), 768, %s568_s28  ;;  %1257 = vmatprep.mubr.bf16.mxu1 (!%p562_p9), %v1821_v33  ;;  %s1522_s26 = sshll.u32 (!%p562_p9), %s568_s28, 4 }
  0x7b   : > { %s593_s27 = scalar_lea.vmem (!%p562_p9), [#allocation3], %s1522_s26 }
  0x7c   : > { %s2128_s7 = scalar_lea.vmem (!%p562_p9), [#allocation2], %s1650_s29 }
  0x7d   : > { %v1675_v34 = vld [vmem:[%s2128_s7 + $0x104] ss:$8 sps:$4 sm:$0xff] (!%p562_p9)   ;;  %v1677_v35 = vld [vmem:[%s2128_s7 + $0x100] ss:$8 sps:$4 sm:$0xff] (!%p562_p9)   ;;  %v1678_v36 = vld [vmem:[%s2128_s7 + $0x114] ss:$8 sps:$4 sm:$0xff] (!%p562_p9)  }
  0x7e   : > { %1268 = vmatprep.subr.bf16.mxu0 (!%p562_p9), %v1675_v34  ;;  %v1680_v37 = vld [vmem:[%s2128_s7 + $0x110] ss:$8 sps:$4 sm:$0xff] (!%p562_p9)   ;;  %v1681_v38 = vld [vmem:[%s2128_s7 + $0x124] ss:$8 sps:$4 sm:$0xff] (!%p562_p9)   ;;  %v1683_v39 = vld [vmem:[%s2128_s7 + $0x120] ss:$8 sps:$4 sm:$0xff] (!%p562_p9)  }
  0x7f   : > { %1269 = vmatpush1.bf16.msra.mxu0 (!%p562_p9), %v1677_v35  ;;  %v1684_v40 = vld [vmem:[%s2128_s7 + $0x134] ss:$8 sps:$4 sm:$0xff] (!%p562_p9)   ;;  %v1686_v41 = vld [vmem:[%s2128_s7 + $0x130] ss:$8 sps:$4 sm:$0xff] (!%p562_p9)   ;;  %v1687_v42 = vld [vmem:[%s2128_s7 + $0x144] ss:$8 sps:$4 sm:$0xff] (!%p562_p9)  }
  0x80   : > { %1270 = vmatprep.subr.bf16.mxu0 %v1678_v36  ;;  %v1689_v43 = vld [vmem:[%s2128_s7 + $0x140] ss:$8 sps:$4 sm:$0xff]   ;;  %v1690_v44 = vld [vmem:[%s2128_s7 + $0x154] ss:$8 sps:$4 sm:$0xff]   ;;  %v1692_v45 = vld [vmem:[%s2128_s7 + $0x150] ss:$8 sps:$4 sm:$0xff]  }
  0x81   : > { %v1693_v46 = vld [vmem:[%s2128_s7 + $0x164] ss:$8 sps:$4 sm:$0xff]   ;;  %v1722_v48 = vld [vmem:[%s2128_s7] ss:$8 sps:$4 sm:$0xff]   ;;  %v1726_v50 = vld [vmem:[%s2128_s7 + $0x14] ss:$8 sps:$4 sm:$0xff]  }
  0x82   : > { %v1720_v47 = vld [vmem:[%s2128_s7 + $0x4] ss:$8 sps:$4 sm:$0xff]   ;;  %v1695_v49 = vld [vmem:[%s2128_s7 + $0x160] ss:$8 sps:$4 sm:$0xff]   ;;  %v1728_v51 = vld [vmem:[%s2128_s7 + $0x10] ss:$8 sps:$4 sm:$0xff]  }
  0x83   : > { %1271 = vmatpush1.bf16.msra.mxu0 %v1680_v37  ;;  %1225 = vmatprep.subr.bf16.mxu1 %v1720_v47  ;;  %v1696_v52 = vld [vmem:[%s2128_s7 + $0x174] ss:$8 sps:$4 sm:$0xff]   ;;  %v1698_v53 = vld [vmem:[%s2128_s7 + $0x170] ss:$8 sps:$4 sm:$0xff]   ;;  %v1735_v54 = vld [vmem:[%s2128_s7 + $0x24] ss:$8 sps:$4 sm:$0xff]  }
  0x84   : > { %1272 = vmatprep.subr.bf16.mxu0 %v1681_v38  ;;  %1226 = vmatpush1.bf16.msra.mxu1 %v1722_v48  ;;  %v1699_v55 = vld [vmem:[%s2128_s7 + $0x184] ss:$8 sps:$4 sm:$0xff]   ;;  %v1737_v56 = vld [vmem:[%s2128_s7 + $0x20] ss:$8 sps:$4 sm:$0xff]   ;;  %v1741_v57 = vld [vmem:[%s2128_s7 + $0x34] ss:$8 sps:$4 sm:$0xff]  }
  0x85   : > { %1227 = vmatprep.subr.bf16.mxu1 %v1726_v50  ;;  %v1701_v58 = vld [vmem:[%s2128_s7 + $0x180] ss:$8 sps:$4 sm:$0xff]   ;;  %v1702_v59 = vld [vmem:[%s2128_s7 + $0x194] ss:$8 sps:$4 sm:$0xff]   ;;  %v1743_v60 = vld [vmem:[%s2128_s7 + $0x30] ss:$8 sps:$4 sm:$0xff]  }
  0x86   : > { %v1747_v61 = vld [vmem:[%s2128_s7 + $0x44] ss:$8 sps:$4 sm:$0xff]   ;;  %v1704_v62 = vld [vmem:[%s2128_s7 + $0x190] ss:$8 sps:$4 sm:$0xff]   ;;  %v1749_v0 = vld [vmem:[%s2128_s7 + $0x40] ss:$8 sps:$4 sm:$0xff]  }
  0x87   : > { %1273 = vmatpush1.bf16.msra.mxu0 %v1683_v39  ;;  %v1705_v63 = vld [vmem:[%s2128_s7 + $0x1a4] ss:$8 sps:$4 sm:$0xff]   ;;  %v1753_v1 = vld [vmem:[%s2128_s7 + $0x54] ss:$8 sps:$4 sm:$0xff]   ;;  %v1707_v2 = vld [vmem:[%s2128_s7 + $0x1a0] ss:$8 sps:$4 sm:$0xff]  }
  0x88   : > { %1274 = vmatprep.subr.bf16.mxu0 %v1684_v40  ;;  %1228 = vmatpush1.bf16.msra.mxu1 %v1728_v51  ;;  %v1708_v3 = vld [vmem:[%s2128_s7 + $0x1b4] ss:$8 sps:$4 sm:$0xff]   ;;  %v1755_v4 = vld [vmem:[%s2128_s7 + $0x50] ss:$8 sps:$4 sm:$0xff]   ;;  %v1759_v5 = vld [vmem:[%s2128_s7 + $0x64] ss:$8 sps:$4 sm:$0xff]  }
  0x89   : > { %1229 = vmatprep.subr.bf16.mxu1 %v1735_v54  ;;  %v1710_v6 = vld [vmem:[%s2128_s7 + $0x1b0] ss:$8 sps:$4 sm:$0xff]   ;;  %v1711_v7 = vld [vmem:[%s2128_s7 + $0x1c4] ss:$8 sps:$4 sm:$0xff]   ;;  %v1761_v8 = vld [vmem:[%s2128_s7 + $0x60] ss:$8 sps:$4 sm:$0xff]  }
  0x8a   : > { %v1765_v9 = vld [vmem:[%s2128_s7 + $0x74] ss:$8 sps:$4 sm:$0xff]   ;;  %v1713_v10 = vld [vmem:[%s2128_s7 + $0x1c0] ss:$8 sps:$4 sm:$0xff]   ;;  %v1767_v12 = vld [vmem:[%s2128_s7 + $0x70] ss:$8 sps:$4 sm:$0xff]  }
  0x8b   : > { %1275 = vmatpush1.bf16.msra.mxu0 %v1686_v41  ;;  %v1714_v11 = vld [vmem:[%s2128_s7 + $0x1d4] ss:$8 sps:$4 sm:$0xff]   ;;  %v1771_v13 = vld [vmem:[%s2128_s7 + $0x84] ss:$8 sps:$4 sm:$0xff]   ;;  %v1716_v14 = vld [vmem:[%s2128_s7 + $0x1d0] ss:$8 sps:$4 sm:$0xff]  }
  0x8c   : > { %1276 = vmatprep.subr.bf16.mxu0 %v1687_v42  ;;  %1230 = vmatpush1.bf16.msra.mxu1 %v1737_v56  ;;  %v1717_v15 = vld [vmem:[%s2128_s7 + $0x1e4] ss:$8 sps:$4 sm:$0xff]   ;;  %v1773_v16 = vld [vmem:[%s2128_s7 + $0x80] ss:$8 sps:$4 sm:$0xff]   ;;  %v1777_v17 = vld [vmem:[%s2128_s7 + $0x94] ss:$8 sps:$4 sm:$0xff]  }
  0x8d   : > { %1231 = vmatprep.subr.bf16.mxu1 %v1741_v57  ;;  %v1719_v18 = vld [vmem:[%s2128_s7 + $0x1e0] ss:$8 sps:$4 sm:$0xff]   ;;  %v1723_v19 = vld [vmem:[%s2128_s7 + $0x1f4] ss:$8 sps:$4 sm:$0xff]   ;;  %v1779_v20 = vld [vmem:[%s2128_s7 + $0x90] ss:$8 sps:$4 sm:$0xff]  }
  0x8e   : > { %v1783_v21 = vld [vmem:[%s2128_s7 + $0xa4] ss:$8 sps:$4 sm:$0xff]   ;;  %v1725_v22 = vld [vmem:[%s2128_s7 + $0x1f0] ss:$8 sps:$4 sm:$0xff]   ;;  %v1785_v24 = vld [vmem:[%s2128_s7 + $0xa0] ss:$8 sps:$4 sm:$0xff]  }
  0x8f   : > { %1277 = vmatpush1.bf16.msra.mxu0 %v1689_v43  ;;  %v1734_v23 = vld [vmem:[%s2128_s7 + $0x204] ss:$8 sps:$4 sm:$0xff]   ;;  %v1789_v25 = vld [vmem:[%s2128_s7 + $0xb4] ss:$8 sps:$4 sm:$0xff]   ;;  %v1732_v27 = vld [vmem:[%s2128_s7 + $0x200] ss:$8 sps:$4 sm:$0xff]  }
  0x90   : > { %1278 = vmatprep.subr.bf16.mxu0 %v1690_v44  ;;  %1232 = vmatpush1.bf16.msra.mxu1 %v1743_v60  ;;  %v1791_v28 = vld [vmem:[%s2128_s7 + $0xb0] ss:$8 sps:$4 sm:$0xff]   ;;  %v1740_v29 = vld [vmem:[%s2128_s7 + $0x214] ss:$8 sps:$4 sm:$0xff]   ;;  %v1795_v30 = vld [vmem:[%s2128_s7 + $0xc4] ss:$8 sps:$4 sm:$0xff]  }
  0x91   : > { %1233 = vmatprep.subr.bf16.mxu1 %v1747_v61  ;;  %v1738_v32 = vld [vmem:[%s2128_s7 + $0x210] ss:$8 sps:$4 sm:$0xff]   ;;  %v1797_v33 = vld [vmem:[%s2128_s7 + $0xc0] ss:$8 sps:$4 sm:$0xff]   ;;  %v1746_v34 = vld [vmem:[%s2128_s7 + $0x224] ss:$8 sps:$4 sm:$0xff]  }
  0x92   : > { %v1801_v35 = vld [vmem:[%s2128_s7 + $0xd4] ss:$8 sps:$4 sm:$0xff]   ;;  %v1744_v36 = vld [vmem:[%s2128_s7 + $0x220] ss:$8 sps:$4 sm:$0xff]   ;;  %v1803_v37 = vld [vmem:[%s2128_s7 + $0xd0] ss:$8 sps:$4 sm:$0xff]  }
  0x93   : > { %1279 = vmatpush1.bf16.msra.mxu0 %v1692_v45  ;;  %v1752_v38 = vld [vmem:[%s2128_s7 + $0x234] ss:$8 sps:$4 sm:$0xff]   ;;  %v1807_v39 = vld [vmem:[%s2128_s7 + $0xe4] ss:$8 sps:$4 sm:$0xff]   ;;  %v1750_v40 = vld [vmem:[%s2128_s7 + $0x230] ss:$8 sps:$4 sm:$0xff]  }
  0x94   : > { %1280 = vmatprep.subr.bf16.mxu0 %v1693_v46  ;;  %1234 = vmatpush1.bf16.msra.mxu1 %v1749_v0  ;;  %v1809_v41 = vld [vmem:[%s2128_s7 + $0xe0] ss:$8 sps:$4 sm:$0xff]   ;;  %v1758_v42 = vld [vmem:[%s2128_s7 + $0x244] ss:$8 sps:$4 sm:$0xff]   ;;  %v1813_v43 = vld [vmem:[%s2128_s7 + $0xf4] ss:$8 sps:$4 sm:$0xff]  }
  0x95   : > { %1235 = vmatprep.subr.bf16.mxu1 %v1753_v1  ;;  %v1756_v44 = vld [vmem:[%s2128_s7 + $0x240] ss:$8 sps:$4 sm:$0xff]   ;;  %v1815_v45 = vld [vmem:[%s2128_s7 + $0xf0] ss:$8 sps:$4 sm:$0xff]   ;;  %v1764_v46 = vld [vmem:[%s2128_s7 + $0x254] ss:$8 sps:$4 sm:$0xff]  }
  0x96   : > { %v1819_v47 = vld [vmem:[%s2260_s0] ss:$24 sps:$4 sm:$0xff]   ;;  %v1776_v51 = vld [vmem:[%s2128_s7 + $0x274] ss:$8 sps:$4 sm:$0xff]   ;;  %v1794_v57 = vld [vmem:[%s2128_s7 + $0x2a4] ss:$8 sps:$4 sm:$0xff]  }
  0x97   : > { %1281 = vmatpush1.bf16.msra.mxu0 %v1695_v49  ;;  %v1762_v48 = vld [vmem:[%s2128_s7 + $0x250] ss:$8 sps:$4 sm:$0xff]   ;;  %v1770_v49 = vld [vmem:[%s2128_s7 + $0x264] ss:$8 sps:$4 sm:$0xff]   ;;  %v1768_v50 = vld [vmem:[%s2128_s7 + $0x260] ss:$8 sps:$4 sm:$0xff]  }
  0x98   : > { %1282 = vmatprep.subr.bf16.mxu0 %v1696_v52  ;;  %1236 = vmatpush1.bf16.msra.mxu1 %v1755_v4  ;;  %v1774_v52 = vld [vmem:[%s2128_s7 + $0x270] ss:$8 sps:$4 sm:$0xff]   ;;  %v1780_v54 = vld [vmem:[%s2128_s7 + $0x280] ss:$8 sps:$4 sm:$0xff]   ;;  %v1806_v61 = vld [vmem:[%s2128_s7 + $0x2c4] ss:$8 sps:$4 sm:$0xff]  }
  0x99   : > { %1237 = vmatprep.subr.bf16.mxu1 %v1759_v5  ;;  %v1786_v56 = vld [vmem:[%s2128_s7 + $0x290] ss:$8 sps:$4 sm:$0xff]   ;;  %v1818_v1 = vld [vmem:[%s2128_s7 + $0x2e4] ss:$8 sps:$4 sm:$0xff]   ;;  %s2269_s22 = smov (!%p596_p10, %s1523_s22), 23  ;;  %s1636_s12 = sshll.u32 (%p1911_p5), %s1896_s15, 3 }
  0x9a   : > { %v1798_v60 = vld [vmem:[%s2128_s7 + $0x2b0] ss:$8 sps:$4 sm:$0xff]   ;;  %s598_s25 = scalar_lea.vmem %s2262_s2, %s2269_s22  ;;  %s1413_s30 = scalar_lea.vmem (%p1911_p5), %s2263_s3, %s1636_s12 }
  0x9b   : > { %1283 = vmatpush1.bf16.msra.mxu0 %v1698_v53  ;;  %v1782_v53 = vld [vmem:[%s2128_s7 + $0x284] ss:$8 sps:$4 sm:$0xff]   ;;  %v1810_v0 = vld [vmem:[%s2128_s7 + $0x2d0] ss:$8 sps:$4 sm:$0xff]  }
  0x9c   : > { %1284 = vmatprep.subr.bf16.mxu0 %v1699_v55  ;;  %1238 = vmatpush1.bf16.msra.mxu1 %v1761_v8  ;;  %v1788_v55 = vld [vmem:[%s2128_s7 + $0x294] ss:$8 sps:$4 sm:$0xff]   ;;  %v1822_v4 = vld [vmem:[%s2128_s7 + $0x2f0] ss:$8 sps:$4 sm:$0xff]  }
  0x9d   : > { %1239 = vmatprep.subr.bf16.mxu1 %v1765_v9  ;;  %v1825_v5 = vld [vmem:[%s2260_s0 + $0x10] ss:$24 sps:$4 sm:$0xff]  }
  0x9f   : > { %1285 = vmatpush1.bf16.msra.mxu0 %v1701_v58  ;;  %v1792_v58 = vld [vmem:[%s2128_s7 + $0x2a0] ss:$8 sps:$4 sm:$0xff]  }
  0xa0   : > { %1286 = vmatprep.subr.bf16.mxu0 %v1702_v59  ;;  %1240 = vmatpush1.bf16.msra.mxu1 %v1767_v12  ;;  %v1800_v59 = vld [vmem:[%s2128_s7 + $0x2b4] ss:$8 sps:$4 sm:$0xff]  }
  0xa1   : > { %1241 = vmatprep.subr.bf16.mxu1 %v1771_v13  ;;  %v703_v13 = vld [vmem:[%s598_s25] sm:$0x3] }
  0xa3   : > { %1287 = vmatpush1.bf16.msra.mxu0 %v1704_v62  ;;  %v1804_v62 = vld [vmem:[%s2128_s7 + $0x2c0] ss:$8 sps:$4 sm:$0xff]  }
  0xa4   : > { %1288 = vmatprep.subr.bf16.mxu0 %v1705_v63  ;;  %1242 = vmatpush1.bf16.msra.mxu1 %v1773_v16  ;;  %v1812_v63 = vld [vmem:[%s2128_s7 + $0x2d4] ss:$8 sps:$4 sm:$0xff]  }
  0xa5   : > { %1243 = vmatprep.subr.bf16.mxu1 %v1777_v17 }
  0xa7   : > { %1289 = vmatpush1.bf16.msra.mxu0 %v1707_v2  ;;  %v1816_v2 = vld [vmem:[%s2128_s7 + $0x2e0] ss:$8 sps:$4 sm:$0xff]  }
  0xa8   : > { %1290 = vmatprep.subr.bf16.mxu0 %v1708_v3  ;;  %1244 = vmatpush1.bf16.msra.mxu1 %v1779_v20  ;;  %v1824_v3 = vld [vmem:[%s2128_s7 + $0x2f4] ss:$8 sps:$4 sm:$0xff]  }
  0xa9   : > { %1245 = vmatprep.subr.bf16.mxu1 %v1783_v21 }
  0xab   : > { %1291 = vmatpush1.bf16.msra.mxu0 %v1710_v6 }
  0xac   : > { %1292 = vmatprep.subr.bf16.mxu0 %v1711_v7  ;;  %1246 = vmatpush1.bf16.msra.mxu1 %v1785_v24 }
  0xad   : > { %1247 = vmatprep.subr.bf16.mxu1 %v1789_v25 }
  0xaf   : > { %1293 = vmatpush1.bf16.msra.mxu0 %v1713_v10  ;;  %v705_v10 = vlaneseq }
  0xb0   : > { %1294 = vmatprep.subr.bf16.mxu0 %v1714_v11  ;;  %1248 = vmatpush1.bf16.msra.mxu1 %v1791_v28 }
  0xb1   : > { %1249 = vmatprep.subr.bf16.mxu1 %v1795_v30  ;;  %v706_v11 = vshrl.u32 %v705_v10, 7 }
  0xb3   : > { %1295 = vmatpush1.bf16.msra.mxu0 %v1716_v14  ;;  %v707_v12 = vsub.s32 0, %v706_v11  ;;  %v711_v14 = vsub.s32 1, %v706_v11 }
  0xb4   : > { %1296 = vmatprep.subr.bf16.mxu0 %v1717_v15  ;;  %1250 = vmatpush1.bf16.msra.mxu1 %v1797_v33 }
  0xb5   : > { %1251 = vmatprep.subr.bf16.mxu1 %v1801_v35  ;;  %v708_v15 = vrot.slane %v703_v13, %v707_v12  ;;  %v712_v16 = vrot.slane %v703_v13, %v711_v14 }
  0xb7   : > { %1297 = vmatpush1.bf16.msra.mxu0 %v1719_v18 }
  0xb8   : > { %1298 = vmatprep.subr.bf16.mxu0 %v1723_v19  ;;  %1252 = vmatpush1.bf16.msra.mxu1 %v1803_v37 }
  0xb9   : > { %1253 = vmatprep.subr.bf16.mxu1 %v1807_v39 }
  0xbb   : > { %1299 = vmatpush1.bf16.msra.mxu0 %v1725_v22 }
  0xbc   : > { %1311 = vmatprep.subr.bf16.mxu0 %v1734_v23  ;;  %1254 = vmatpush1.bf16.msra.mxu1 %v1809_v41 }
  0xbd   : > { %1255 = vmatprep.subr.bf16.mxu1 %v1813_v43 }
  0xbe   : > { %1301 = vmatmul.mubr.bf16.vlgmr.msra.gmra.mrb[0].mxu0 %v1729_v26 }
  0xbf   : > { %1312 = vmatpush1.bf16.msra.mxu0 %v1732_v27  ;;  %1343 = vmatprep.mubr.bf16.mxu0 %v1827_v31 }
  0xc0   : > { %1313 = vmatprep.subr.bf16.mxu0 %v1740_v29  ;;  %1256 = vmatpush1.bf16.msra.mxu1 %v1815_v45 }
  0xc3   : > { %1314 = vmatpush1.bf16.msra.mxu0 %v1738_v32  ;;  %1258 = vmatmul.mubr.bf16.vlgmr.msra.gmra.mrb[0].mxu1 %v1819_v47 }
  0xc4   : > { %1315 = vmatprep.subr.bf16.mxu0 %v1746_v34 }
  0xc7   : > { %1316 = vmatpush1.bf16.msra.mxu0 %v1744_v36 }
  0xc8   : > { %1317 = vmatprep.subr.bf16.mxu0 %v1752_v38 }
  0xcb   : > { %1318 = vmatpush1.bf16.msra.mxu0 %v1750_v40 }
  0xcc   : > { %1319 = vmatprep.subr.bf16.mxu0 %v1758_v42 }
  0xcf   : > { %1320 = vmatpush1.bf16.msra.mxu0 %v1756_v44 }
  0xd0   : > { %1321 = vmatprep.subr.bf16.mxu0 %v1764_v46 }
  0xd3   : > { %1322 = vmatpush1.bf16.msra.mxu0 %v1762_v48 }
  0xd4   : > { %1323 = vmatprep.subr.bf16.mxu0 %v1770_v49 }
  0xd7   : > { %1324 = vmatpush1.bf16.msra.mxu0 %v1768_v50 }
  0xd8   : > { %1325 = vmatprep.subr.bf16.mxu0 %v1776_v51 }
  0xdb   : > { %1326 = vmatpush1.bf16.msra.mxu0 %v1774_v52 }
  0xdc   : > { %1327 = vmatprep.subr.bf16.mxu0 %v1782_v53 }
  0xdf   : > { %1328 = vmatpush1.bf16.msra.mxu0 %v1780_v54 }
  0xe0   : > { %1329 = vmatprep.subr.bf16.mxu0 %v1788_v55 }
  0xe3   : > { %1330 = vmatpush1.bf16.msra.mxu0 %v1786_v56 }
  0xe4   : > { %1331 = vmatprep.subr.bf16.mxu0 %v1794_v57 }
  0xe7   : > { %1332 = vmatpush1.bf16.msra.mxu0 %v1792_v58 }
  0xe8   : > { %1333 = vmatprep.subr.bf16.mxu0 %v1800_v59 }
  0xeb   : > { %1334 = vmatpush1.bf16.msra.mxu0 %v1798_v60 }
  0xec   : > { %1335 = vmatprep.subr.bf16.mxu0 %v1806_v61 }
  0xef   : > { %1336 = vmatpush1.bf16.msra.mxu0 %v1804_v62 }
  0xf0   : > { %1337 = vmatprep.subr.bf16.mxu0 %v1812_v63 }
  0xf3   : > { %1338 = vmatpush1.bf16.msra.mxu0 %v1810_v0 }
  0xf4   : > { %1339 = vmatprep.subr.bf16.mxu0 %v1818_v1 }
  0xf7   : > { %1340 = vmatpush1.bf16.msra.mxu0 %v1816_v2 }
  0xf8   : > { %1341 = vmatprep.subr.bf16.mxu0 %v1824_v3 }
  0xfb   : > { %1342 = vmatpush1.bf16.msra.mxu0 %v1822_v4 }
  0xfe   : > { %1344 = vmatmul.mubr.bf16.vlgmr.msra.gmra.mrb[0].mxu0 %v1825_v5 }
 0x196   : > { %v1259_v6 = vpop.f32.mrb[0].mxu1 }
 0x197   : > { %v1261_v7 = vpop.f32.mrb[1].mxu1  ;;  %v1260_v17 = vadd.f32 %v1259_v6, %v708_v15 }
 0x198   : > { %v1263_v8 = vpop.f32.mrb[2].mxu1  ;;  %v1262_v18 = vadd.f32 %v1261_v7, %v712_v16 }
 0x199   : > { %v1265_v9 = vpop.f32.mrb[3].mxu1  ;;  %v1264_v20 = vadd.f32 %v1263_v8, %v708_v15 }
 0x19a   : > { %v1266_v23 = vadd.f32 %v1265_v9, %v712_v16 }
 0x1d1   : > { %v1345_v19 = vpop.f32.mrb[0].mxu0 }
 0x1d2   : > { %v1638_v21 = vadd.f32 %v1345_v19, %v1260_v17  ;;  %v1347_v22 = vpop.f32.mrb[1].mxu0 }
 0x1d3   : > { %v1640_v24 = vadd.f32 %v1347_v22, %v1262_v18  ;;  %v1349_v25 = vpop.f32.mrb[2].mxu0 }
 0x1d4   : > { %v1358_v26 = vmul.f32 0.044715, %v1638_v21  ;;  %v1642_v27 = vadd.f32 %v1349_v25, %v1264_v20  ;;  %v1351_v28 = vpop.f32.mrb[3].mxu0  ;;  %v1354_v51 = vmul.f32 0.5, %v1638_v21 }
 0x1d5   : > { %v1359_v29 = vmul.f32 0.044715, %v1640_v24  ;;  %v1644_v30 = vadd.f32 %v1351_v28, %v1266_v23  ;;  %v1355_v54 = vmul.f32 0.5, %v1640_v24 }
 0x1d6   : > { %v1362_v31 = vmul.f32 %v1638_v21, %v1358_v26  ;;  %v1360_v32 = vmul.f32 0.044715, %v1642_v27  ;;  %v1356_v58 = vmul.f32 0.5, %v1642_v27 }
 0x1d7   : > { %v1363_v33 = vmul.f32 %v1640_v24, %v1359_v29  ;;  %v1361_v34 = vmul.f32 0.044715, %v1644_v30  ;;  %v1357_v61 = vmul.f32 0.5, %v1644_v30 }
 0x1d8   : > { %v1366_v35 = vmul.f32 %v1638_v21, %v1362_v31  ;;  %v1364_v36 = vmul.f32 %v1642_v27, %v1360_v32 }
 0x1d9   : > { %v1367_v37 = vmul.f32 %v1640_v24, %v1363_v33  ;;  %v1365_v38 = vmul.f32 %v1644_v30, %v1361_v34 }
 0x1da   : > { %v1370_v39 = vadd.f32 %v1638_v21, %v1366_v35  ;;  %v1368_v40 = vmul.f32 %v1642_v27, %v1364_v36 }
 0x1db   : > { %v1371_v41 = vadd.f32 %v1640_v24, %v1367_v37  ;;  %v1369_v42 = vmul.f32 %v1644_v30, %v1365_v38 }
 0x1dc   : > { %v1374_v43 = vmul.f32 0.7978846, %v1370_v39  ;;  %v1372_v44 = vadd.f32 %v1642_v27, %v1368_v40 }
 0x1dd   : > { %v1375_v45 = vmul.f32 0.7978846, %v1371_v41  ;;  %v1373_v46 = vadd.f32 %v1644_v30, %v1369_v42 }
 0x1de   : > { %1828 = vtanh.f32 %v1374_v43  ;;  %v1376_v47 = vmul.f32 0.7978846, %v1372_v44 }
 0x1df   : > { %1830 = vtanh.f32 %v1375_v45  ;;  %v1377_v48 = vmul.f32 0.7978846, %v1373_v46 }
 0x1e0   : > { %1832 = vtanh.f32 %v1376_v47 }
 0x1e1   : > { %1834 = vtanh.f32 %v1377_v48 }
 0x1e8   : > { %v1829_v49 = vpop.eup %1828 }
 0x1e9   : > { %v1831_v50 = vpop.eup %1830  ;;  %v1382_v52 = vadd.f32 1.0, %v1829_v49 }
 0x1ea   : > { %v1833_v53 = vpop.eup %1832  ;;  %v1383_v55 = vadd.f32 1.0, %v1831_v50 }
 0x1eb   : > { %v1835_v56 = vpop.eup %1834  ;;  %v1386_v57 = vmul.f32 %v1382_v52, %v1354_v51  ;;  %v1384_v59 = vadd.f32 1.0, %v1833_v53 }
 0x1ec   : > { %v1387_v60 = vmul.f32 %v1383_v55, %v1355_v54  ;;  %v1385_v62 = vadd.f32 1.0, %v1835_v56  ;;  %1410 = sbr.rel (!%p1911_p5) target bundleno = 507 (0x1fb), region = 74 }
 0x1ed   : > { %v1388_v63 = vmul.f32 %v1384_v59, %v1356_v58 }
 0x1ee   : > { %v1634_v0 = vpack.c.bf16 %v1387_v60, %v1386_v57  ;;  %v1389_v1 = vmul.f32 %v1385_v62, %v1357_v61 }
 0x1f0   : > { %1402 = vst [vmem:[%s593_s27] sm:$0xff] %v1634_v0  ;;  %v1635_v2 = vpack.c.bf16 %v1389_v1, %v1388_v63 }
 0x1f2   : > { %1403 = vst [vmem:[%s593_s27 + $0x8] sm:$0xff] %v1635_v2 }
 0x1f7   : > { %v1443_v3 = vld [vmem:[%s593_s27] sm:$0xff] }
 0x1f8   : > { %1444 = vst [vmem:[%s1413_s30] sm:$0xff] %v1443_v3 }
 0x1f9   : > { %v1445_v4 = vld [vmem:[%s593_s27 + $0x8] sm:$0xff] }
 0x1fa   : > { %1446 = vst [vmem:[%s1413_s30 + $0x60] sm:$0xff] %v1445_v4 }
 0x1fb PF: > { %p10_p11 = scmp.ge.s32.totalorder %s1899_s16, 14   ;;  %s2265_s12 = smov %s1854_s13 }
 0x1fc   : > { %s2266_s13 = smov %s1909_s19  ;;  %s2267_s14 = smov %s1899_s16 }
 0x1fd   :  { %12 = sbr.rel (!%p10_p11) target bundleno = 2 (0x2), region = 146 }

// kernel: bert_ner_forward.11
= control target key start
LH: loop header
LB: loop body
LE: loop exit
PB: predicated region body
PF: predicated region fallthrough
CT: control target
= control target key end

     0   :  { %11 = vsyncpa [#allocation3], 0  ;;  %s3623_s0 = inlined_call_operand.vmem [shape: bf16[16,768], index: 0, kind: input, shape index: {}]   ;;  %s3624_s1 = inlined_call_operand.hbm [shape: bf16[768,768], index: 1, kind: input, shape index: {}]   ;;  %s3625_s2 = inlined_call_operand.hbm [shape: f32[1,768], index: 2, kind: input, shape index: {}]   ;;  %s3626_s3 = inlined_call_operand.vmem [shape: bf16[16,768], index: 3, kind: input, shape index: {}]   ;;  %s3627_s4 = inlined_call_operand.hbm [shape: f32[1,768], index: 4, kind: input, shape index: {}]   ;;  %s3628_s5 = inlined_call_operand.hbm [shape: f32[1,768], index: 5, kind: input, shape index: {}]   ;;  %s3629_s6 = inlined_call_operand.vmem [shape: bf16[16,768], index: 6, kind: output, shape index: {}]  }
   0x1   :  { %12 = vsyncpa [#allocation5], 0 }
   0x2   :  { %13 = vsyncpa [#allocation8], 0  ;;  %s3384_s21 = smov [#allocation4]   ;;  %s3385_s23 = smov [#allocation2]  }
   0x3   :  { %s34_s22 = sshll.u32 %s3384_s21, 4  ;;  %s21_s24 = sshll.u32 %s3385_s23, 4  ;;  %s35_s22 = int_to_ptr.vmem [resolvable:$true] %s34_s22  ;;  %s3425_s24 = int_to_ptr.vmem [resolvable:$true] %s21_s24 }
   0x4   :  { %s3290_s27 = scalar_lea.hbm %s3625_s2, 96 }
   0x5   :  { %p3291_p0 = scmp.ne.s32.totalorder %s3625_s2, %s3290_s27  ;;  %p3294_p1 = scmp.lt.u32.totalorder %s3290_s27, %s3625_s2 }
   0x7   :  { %p3296_p2 = pnand %p3294_p1, %p3291_p0 }
   0x9   :  { %3299 = shalt.err (!%p3296_p2)
}
   0xa   :  { %s3300_s8 = scalar_lea.vmem %s35_s22, 96  ;;  %p3305_p4 = scmp.lt.s32.totalorder %s35_s22, %s35_s22 }
   0xb   :  { %p3301_p3 = scmp.ne.s32.totalorder %s35_s22, %s3300_s8  ;;  %p3306_p5 = scmp.lt.s32.totalorder %s3300_s8, %s3300_s8 }
   0xd   :  { %p3307_p6 = por %p3306_p5, %p3305_p4 }
   0xf   :  { %p3308_p7 = pnand %p3307_p6, %p3301_p3 }
  0x11   :  { %3311 = shalt.err (!%p3308_p7)
}
  0x12   :  { %37 = dma.hbm_to_vmem [thread:$0]  %s3625_s2, 96, %s35_s22, [#allocation5]  }
  0x13   :  { %s3312_s13 = scalar_lea.hbm %s3624_s1, 36864 }
  0x14   :  { %p3313_p8 = scmp.ne.s32.totalorder %s3624_s1, %s3312_s13  ;;  %p3316_p9 = scmp.lt.u32.totalorder %s3312_s13, %s3624_s1 }
  0x16   :  { %p3318_p10 = pnand %p3316_p9, %p3313_p8 }
  0x18   :  { %3321 = shalt.err (!%p3318_p10)
}
  0x19   :  { %s3322_s18 = scalar_lea.vmem %s3425_s24, 36864  ;;  %p3327_p12 = scmp.lt.s32.totalorder %s3425_s24, %s3425_s24 }
  0x1a   :  { %p3323_p11 = scmp.ne.s32.totalorder %s3425_s24, %s3322_s18  ;;  %p3328_p13 = scmp.lt.s32.totalorder %s3322_s18, %s3322_s18 }
  0x1c   :  { %p3329_p0 = por %p3328_p13, %p3327_p12 }
  0x1e   :  { %p3330_p1 = pnand %p3329_p0, %p3323_p11 }
  0x20   :  { %3333 = shalt.err (!%p3330_p1)
}
  0x21   :  { %s3386_s2 = smov 384   ;;  %s3387_s19 = smov 24  }
  0x22   :  { %27 = dma.hbm_to_vmem [thread:$0]  %s3624_s1, 36864, %s3425_s24, [#allocation3], %s3386_s2, %s3386_s2, %s3387_s19  }
  0x23   :  { %s3388_s22 = smov [#allocation6]   ;;  %s3389_s25 = smov [#allocation7]  }
  0x24   :  { %s46_s23 = sshll.u32 %s3388_s22, 4  ;;  %s56_s26 = sshll.u32 %s3389_s25, 4  ;;  %s47_s23 = int_to_ptr.vmem [resolvable:$true] %s46_s23  ;;  %s57_s26 = int_to_ptr.vmem [resolvable:$true] %s56_s26 }
  0x25   :  { %s3334_s29 = scalar_lea.hbm %s3627_s4, 96 }
  0x26   :  { %p3335_p2 = scmp.ne.s32.totalorder %s3627_s4, %s3334_s29  ;;  %p3338_p3 = scmp.lt.u32.totalorder %s3334_s29, %s3627_s4 }
  0x28   :  { %p3340_p4 = pnand %p3338_p3, %p3335_p2 }
  0x2a   :  { %3343 = shalt.err (!%p3340_p4)
}
  0x2b   :  { %s3344_s1 = scalar_lea.vmem %s47_s23, 96  ;;  %p3349_p6 = scmp.lt.s32.totalorder %s47_s23, %s47_s23 }
  0x2c   :  { %p3345_p5 = scmp.ne.s32.totalorder %s47_s23, %s3344_s1  ;;  %p3350_p7 = scmp.lt.s32.totalorder %s3344_s1, %s3344_s1 }
  0x2e   :  { %p3351_p8 = por %p3350_p7, %p3349_p6 }
  0x30   :  { %p3352_p9 = pnand %p3351_p8, %p3345_p5 }
  0x32   :  { %3355 = shalt.err (!%p3352_p9)
}
  0x33   :  { %49 = dma.hbm_to_vmem [thread:$0]  %s3627_s4, 96, %s47_s23, [#allocation5]  }
  0x34   :  { %s3356_s13 = scalar_lea.hbm %s3628_s5, 96 }
  0x35   :  { %p3357_p10 = scmp.ne.s32.totalorder %s3628_s5, %s3356_s13  ;;  %p3360_p11 = scmp.lt.u32.totalorder %s3356_s13, %s3628_s5 }
  0x37   :  { %p3362_p12 = pnand %p3360_p11, %p3357_p10 }
  0x39   :  { %3365 = shalt.err (!%p3362_p12)
}
  0x3a   :  { %s3366_s18 = scalar_lea.vmem %s57_s26, 96  ;;  %p3371_p0 = scmp.lt.s32.totalorder %s57_s26, %s57_s26 }
  0x3b   :  { %p3367_p13 = scmp.ne.s32.totalorder %s57_s26, %s3366_s18  ;;  %p3372_p1 = scmp.lt.s32.totalorder %s3366_s18, %s3366_s18 }
  0x3d   :  { %p3373_p2 = por %p3372_p1, %p3371_p0 }
  0x3f   :  { %p3374_p3 = pnand %p3373_p2, %p3367_p13 }
  0x41   :  { %3377 = shalt.err (!%p3374_p3)
}
  0x42   :  { %59 = dma.hbm_to_vmem [thread:$0]  %s3628_s5, 96, %s57_s26, [#allocation8]  }
  0x43   :  { %3378 = dma.done.wait [#allocation3], 36864  }
  0x44   :  { %3379 = vsyncadd [#allocation3], 4294930432 }
  0x45   :  { %3380 = dma.done.wait [#allocation5], 192  }
  0x46   :  { %3381 = vsyncadd [#allocation5], 4294967104 }
  0x47   :  { %3382 = dma.done.wait [#allocation8], 96  }
  0x48   :  { %3383 = vsyncadd [#allocation8], 4294967200  ;;  %v2843_v0 = vld [vmem:[#allocation2 + $0x4] ss:$24 sps:$4 sm:$0xff]   ;;  %v2847_v2 = vld [vmem:[#allocation2] ss:$24 sps:$4 sm:$0xff]  }
  0x49   :  { %v2845_v1 = vld [vmem:[#allocation2 + $0x304] ss:$24 sps:$4 sm:$0xff]   ;;  %1868 = vmatprep.subr.bf16.mxu1 %v2843_v0  ;;  %v2848_v3 = vld [vmem:[#allocation2 + $0x300] ss:$24 sps:$4 sm:$0xff]   ;;  %v2849_v4 = vld [vmem:[#allocation2 + $0x34] ss:$24 sps:$4 sm:$0xff]  }
  0x4a   :  { %1911 = vmatprep.subr.bf16.mxu0 %v2845_v1  ;;  %1869 = vmatpush1.bf16.msra.mxu1 %v2847_v2  ;;  %v2851_v5 = vld [vmem:[#allocation2 + $0x334] ss:$24 sps:$4 sm:$0xff]   ;;  %v2853_v6 = vld [vmem:[#allocation2 + $0x30] ss:$24 sps:$4 sm:$0xff]   ;;  %v2855_v8 = vld [vmem:[#allocation2 + $0x64] ss:$24 sps:$4 sm:$0xff]  }
  0x4b   :  { %1912 = vmatpush1.bf16.msra.mxu0 %v2848_v3  ;;  %1870 = vmatprep.subr.bf16.mxu1 %v2849_v4  ;;  %v2854_v7 = vld [vmem:[#allocation2 + $0x330] ss:$24 sps:$4 sm:$0xff]   ;;  %v2857_v9 = vld [vmem:[#allocation2 + $0x364] ss:$24 sps:$4 sm:$0xff]   ;;  %v2859_v10 = vld [vmem:[#allocation2 + $0x60] ss:$24 sps:$4 sm:$0xff]  }
  0x4c   :  { %1913 = vmatprep.subr.bf16.mxu0 %v2851_v5  ;;  %v2860_v11 = vld [vmem:[#allocation2 + $0x360] ss:$24 sps:$4 sm:$0xff]   ;;  %v2861_v12 = vld [vmem:[#allocation2 + $0x94] ss:$24 sps:$4 sm:$0xff]   ;;  %v2865_v14 = vld [vmem:[#allocation2 + $0x90] ss:$24 sps:$4 sm:$0xff]  }
  0x4d   :  { %v2863_v13 = vld [vmem:[#allocation2 + $0x394] ss:$24 sps:$4 sm:$0xff]   ;;  %v2866_v15 = vld [vmem:[#allocation2 + $0x390] ss:$24 sps:$4 sm:$0xff]   ;;  %v2867_v16 = vld [vmem:[#allocation2 + $0xc4] ss:$24 sps:$4 sm:$0xff]  }
  0x4e   :  { %1871 = vmatpush1.bf16.msra.mxu1 %v2853_v6  ;;  %v2869_v17 = vld [vmem:[#allocation2 + $0x3c4] ss:$24 sps:$4 sm:$0xff]   ;;  %v2871_v18 = vld [vmem:[#allocation2 + $0xc0] ss:$24 sps:$4 sm:$0xff]   ;;  %v2873_v20 = vld [vmem:[#allocation2 + $0xf4] ss:$24 sps:$4 sm:$0xff]  }
  0x4f   :  { %1914 = vmatpush1.bf16.msra.mxu0 %v2854_v7  ;;  %1872 = vmatprep.subr.bf16.mxu1 %v2855_v8  ;;  %v2872_v19 = vld [vmem:[#allocation2 + $0x3c0] ss:$24 sps:$4 sm:$0xff]   ;;  %v2875_v21 = vld [vmem:[#allocation2 + $0x3f4] ss:$24 sps:$4 sm:$0xff]   ;;  %v2877_v22 = vld [vmem:[#allocation2 + $0xf0] ss:$24 sps:$4 sm:$0xff]  }
  0x50   :  { %1915 = vmatprep.subr.bf16.mxu0 %v2857_v9  ;;  %v2878_v23 = vld [vmem:[#allocation2 + $0x3f0] ss:$24 sps:$4 sm:$0xff]   ;;  %v2879_v24 = vld [vmem:[#allocation2 + $0x124] ss:$24 sps:$4 sm:$0xff]   ;;  %v2883_v26 = vld [vmem:[#allocation2 + $0x120] ss:$24 sps:$4 sm:$0xff]  }
  0x51   :  { %v2881_v25 = vld [vmem:[#allocation2 + $0x424] ss:$24 sps:$4 sm:$0xff]   ;;  %v2884_v27 = vld [vmem:[#allocation2 + $0x420] ss:$24 sps:$4 sm:$0xff]   ;;  %v2885_v28 = vld [vmem:[#allocation2 + $0x154] ss:$24 sps:$4 sm:$0xff]  }
  0x52   :  { %1873 = vmatpush1.bf16.msra.mxu1 %v2859_v10  ;;  %v2887_v29 = vld [vmem:[#allocation2 + $0x454] ss:$24 sps:$4 sm:$0xff]   ;;  %v2889_v30 = vld [vmem:[#allocation2 + $0x150] ss:$24 sps:$4 sm:$0xff]   ;;  %v2891_v32 = vld [vmem:[#allocation2 + $0x184] ss:$24 sps:$4 sm:$0xff]  }
  0x53   :  { %1916 = vmatpush1.bf16.msra.mxu0 %v2860_v11  ;;  %1874 = vmatprep.subr.bf16.mxu1 %v2861_v12  ;;  %v2890_v31 = vld [vmem:[#allocation2 + $0x450] ss:$24 sps:$4 sm:$0xff]   ;;  %v2893_v33 = vld [vmem:[#allocation2 + $0x484] ss:$24 sps:$4 sm:$0xff]   ;;  %v2895_v34 = vld [vmem:[#allocation2 + $0x180] ss:$24 sps:$4 sm:$0xff]  }
  0x54   :  { %1917 = vmatprep.subr.bf16.mxu0 %v2863_v13  ;;  %v2896_v35 = vld [vmem:[#allocation2 + $0x480] ss:$24 sps:$4 sm:$0xff]   ;;  %v2897_v36 = vld [vmem:[#allocation2 + $0x1b4] ss:$24 sps:$4 sm:$0xff]   ;;  %v2901_v38 = vld [vmem:[#allocation2 + $0x1b0] ss:$24 sps:$4 sm:$0xff]  }
  0x55   :  { %v2899_v37 = vld [vmem:[#allocation2 + $0x4b4] ss:$24 sps:$4 sm:$0xff]   ;;  %v2902_v39 = vld [vmem:[#allocation2 + $0x4b0] ss:$24 sps:$4 sm:$0xff]   ;;  %v2903_v40 = vld [vmem:[#allocation2 + $0x1e4] ss:$24 sps:$4 sm:$0xff]  }
  0x56   :  { %1875 = vmatpush1.bf16.msra.mxu1 %v2865_v14  ;;  %v2905_v41 = vld [vmem:[#allocation2 + $0x4e4] ss:$24 sps:$4 sm:$0xff]   ;;  %v2907_v42 = vld [vmem:[#allocation2 + $0x1e0] ss:$24 sps:$4 sm:$0xff]   ;;  %v2909_v44 = vld [vmem:[#allocation2 + $0x214] ss:$24 sps:$4 sm:$0xff]  }
  0x57   :  { %1918 = vmatpush1.bf16.msra.mxu0 %v2866_v15  ;;  %1876 = vmatprep.subr.bf16.mxu1 %v2867_v16  ;;  %v2908_v43 = vld [vmem:[#allocation2 + $0x4e0] ss:$24 sps:$4 sm:$0xff]   ;;  %v2911_v45 = vld [vmem:[#allocation2 + $0x514] ss:$24 sps:$4 sm:$0xff]   ;;  %v2913_v46 = vld [vmem:[#allocation2 + $0x210] ss:$24 sps:$4 sm:$0xff]  }
  0x58   :  { %1919 = vmatprep.subr.bf16.mxu0 %v2869_v17  ;;  %v2914_v47 = vld [vmem:[#allocation2 + $0x510] ss:$24 sps:$4 sm:$0xff]   ;;  %v3483_v48 = vld [vmem:[%s3623_s0 + $0x4] ss:$24 sps:$4 sm:$0xff]   ;;  %v2919_v52 = vld [vmem:[#allocation2 + $0x240] ss:$24 sps:$4 sm:$0xff]  }
  0x59   :  { %v3488_v49 = vld [vmem:[%s3623_s0 + $0xc] ss:$24 sps:$4 sm:$0xff]   ;;  %1900 = vmatprep.mubr.bf16.mxu1 %v3483_v48  ;;  %v2920_v53 = vld [vmem:[#allocation2 + $0x540] ss:$24 sps:$4 sm:$0xff]   ;;  %v2925_v56 = vld [vmem:[#allocation2 + $0x270] ss:$24 sps:$4 sm:$0xff]  }
  0x5a   :  { %1877 = vmatpush1.bf16.msra.mxu1 %v2871_v18  ;;  %v2915_v50 = vld [vmem:[#allocation2 + $0x244] ss:$24 sps:$4 sm:$0xff]   ;;  %1943 = vmatprep.mubr.bf16.mxu0 %v3488_v49  ;;  %v2921_v54 = vld [vmem:[#allocation2 + $0x274] ss:$24 sps:$4 sm:$0xff]   ;;  %v2926_v57 = vld [vmem:[#allocation2 + $0x570] ss:$24 sps:$4 sm:$0xff]  }
  0x5b   :  { %1920 = vmatpush1.bf16.msra.mxu0 %v2872_v19  ;;  %1878 = vmatprep.subr.bf16.mxu1 %v2873_v20  ;;  %v2917_v51 = vld [vmem:[#allocation2 + $0x544] ss:$24 sps:$4 sm:$0xff]   ;;  %v2923_v55 = vld [vmem:[#allocation2 + $0x574] ss:$24 sps:$4 sm:$0xff]   ;;  %v2931_v60 = vld [vmem:[#allocation2 + $0x2a0] ss:$24 sps:$4 sm:$0xff]  }
  0x5c   :  { %1921 = vmatprep.subr.bf16.mxu0 %v2875_v21  ;;  %v2927_v58 = vld [vmem:[#allocation2 + $0x2a4] ss:$24 sps:$4 sm:$0xff]   ;;  %v2932_v61 = vld [vmem:[#allocation2 + $0x5a0] ss:$24 sps:$4 sm:$0xff]   ;;  %v2933_v62 = vld [vmem:[#allocation2 + $0x2d4] ss:$24 sps:$4 sm:$0xff]  }
  0x5d   :  { %v2929_v59 = vld [vmem:[#allocation2 + $0x5a4] ss:$24 sps:$4 sm:$0xff]   ;;  %v2935_v63 = vld [vmem:[#allocation2 + $0x5d4] ss:$24 sps:$4 sm:$0xff]   ;;  %v2937_v0 = vld [vmem:[#allocation2 + $0x2d0] ss:$24 sps:$4 sm:$0xff]  }
  0x5e   :  { %1879 = vmatpush1.bf16.msra.mxu1 %v2877_v22  ;;  %v2938_v1 = vld [vmem:[#allocation2 + $0x5d0] ss:$24 sps:$4 sm:$0xff]   ;;  %v2945_v2 = vld [vmem:[#allocation2 + $0x604] ss:$24 sps:$4 sm:$0xff]   ;;  %v2943_v4 = vld [vmem:[#allocation2 + $0x600] ss:$24 sps:$4 sm:$0xff]  }
  0x5f   :  { %1922 = vmatpush1.bf16.msra.mxu0 %v2878_v23  ;;  %1880 = vmatprep.subr.bf16.mxu1 %v2879_v24  ;;  %v2948_v3 = vld [vmem:[#allocation2 + $0xc] ss:$24 sps:$4 sm:$0xff]   ;;  %v2946_v5 = vld [vmem:[#allocation2 + $0x8] ss:$24 sps:$4 sm:$0xff]   ;;  %v2956_v9 = vld [vmem:[#allocation2 + $0x3c] ss:$24 sps:$4 sm:$0xff]  }
  0x60   :  { %1923 = vmatprep.subr.bf16.mxu0 %v2881_v25  ;;  %v3495_v6 = vld [vmem:[%s3623_s0] ss:$24 sps:$4 sm:$0xff]   ;;  %v2953_v8 = vld [vmem:[#allocation2 + $0x634] ss:$24 sps:$4 sm:$0xff]   ;;  %v2951_v10 = vld [vmem:[#allocation2 + $0x630] ss:$24 sps:$4 sm:$0xff]  }
  0x61   :  { %v3500_v7 = vld [vmem:[%s3623_s0 + $0x8] ss:$24 sps:$4 sm:$0xff]   ;;  %v2954_v11 = vld [vmem:[#allocation2 + $0x38] ss:$24 sps:$4 sm:$0xff]   ;;  %v2959_v12 = vld [vmem:[#allocation2 + $0x664] ss:$24 sps:$4 sm:$0xff]  }
  0x62   :  { %1881 = vmatpush1.bf16.msra.mxu1 %v2883_v26  ;;  %v2962_v13 = vld [vmem:[#allocation2 + $0x6c] ss:$24 sps:$4 sm:$0xff]   ;;  %v2957_v14 = vld [vmem:[#allocation2 + $0x660] ss:$24 sps:$4 sm:$0xff]   ;;  %v2968_v17 = vld [vmem:[#allocation2 + $0x9c] ss:$24 sps:$4 sm:$0xff]  }
  0x63   :  { %1924 = vmatpush1.bf16.msra.mxu0 %v2884_v27  ;;  %1882 = vmatprep.subr.bf16.mxu1 %v2885_v28  ;;  %v2960_v15 = vld [vmem:[#allocation2 + $0x68] ss:$24 sps:$4 sm:$0xff]   ;;  %v2965_v16 = vld [vmem:[#allocation2 + $0x694] ss:$24 sps:$4 sm:$0xff]   ;;  %v2966_v19 = vld [vmem:[#allocation2 + $0x98] ss:$24 sps:$4 sm:$0xff]  }
  0x64   :  { %1925 = vmatprep.subr.bf16.mxu0 %v2887_v29  ;;  %v2963_v18 = vld [vmem:[#allocation2 + $0x690] ss:$24 sps:$4 sm:$0xff]   ;;  %v2971_v20 = vld [vmem:[#allocation2 + $0x6c4] ss:$24 sps:$4 sm:$0xff]   ;;  %v2969_v22 = vld [vmem:[#allocation2 + $0x6c0] ss:$24 sps:$4 sm:$0xff]  }
  0x65   :  { %v2974_v21 = vld [vmem:[#allocation2 + $0xcc] ss:$24 sps:$4 sm:$0xff]   ;;  %v2972_v23 = vld [vmem:[#allocation2 + $0xc8] ss:$24 sps:$4 sm:$0xff]   ;;  %v2980_v25 = vld [vmem:[#allocation2 + $0xfc] ss:$24 sps:$4 sm:$0xff]  }
  0x66   :  { %1883 = vmatpush1.bf16.msra.mxu1 %v2889_v30  ;;  %v2977_v24 = vld [vmem:[#allocation2 + $0x6f4] ss:$24 sps:$4 sm:$0xff]   ;;  %v2975_v26 = vld [vmem:[#allocation2 + $0x6f0] ss:$24 sps:$4 sm:$0xff]   ;;  %v2983_v28 = vld [vmem:[#allocation2 + $0x724] ss:$24 sps:$4 sm:$0xff]  }
  0x67   :  { %1926 = vmatpush1.bf16.msra.mxu0 %v2890_v31  ;;  %1884 = vmatprep.subr.bf16.mxu1 %v2891_v32  ;;  %v2978_v27 = vld [vmem:[#allocation2 + $0xf8] ss:$24 sps:$4 sm:$0xff]   ;;  %v2986_v29 = vld [vmem:[#allocation2 + $0x12c] ss:$24 sps:$4 sm:$0xff]   ;;  %v2984_v31 = vld [vmem:[#allocation2 + $0x128] ss:$24 sps:$4 sm:$0xff]  }
  0x68   :  { %1927 = vmatprep.subr.bf16.mxu0 %v2893_v33  ;;  %v2981_v30 = vld [vmem:[#allocation2 + $0x720] ss:$24 sps:$4 sm:$0xff]   ;;  %v2989_v32 = vld [vmem:[#allocation2 + $0x754] ss:$24 sps:$4 sm:$0xff]  }
  0x69   :  { %v2992_v33 = vld [vmem:[#allocation2 + $0x15c] ss:$24 sps:$4 sm:$0xff]  }
  0x6a   :  { %1885 = vmatpush1.bf16.msra.mxu1 %v2895_v34  ;;  %v3508_v34 = vld [vmem:[%s3623_s0 + $0x14] ss:$24 sps:$4 sm:$0xff]  }
  0x6b   :  { %1928 = vmatpush1.bf16.msra.mxu0 %v2896_v35  ;;  %1886 = vmatprep.subr.bf16.mxu1 %v2897_v36  ;;  %v2987_v35 = vld [vmem:[#allocation2 + $0x750] ss:$24 sps:$4 sm:$0xff]  }
  0x6c   :  { %1929 = vmatprep.subr.bf16.mxu0 %v2899_v37  ;;  %v2990_v36 = vld [vmem:[#allocation2 + $0x158] ss:$24 sps:$4 sm:$0xff]   ;;  %v2995_v37 = vld [vmem:[#allocation2 + $0x784] ss:$24 sps:$4 sm:$0xff]  }
  0x6e   :  { %1887 = vmatpush1.bf16.msra.mxu1 %v2901_v38  ;;  %v2998_v38 = vld [vmem:[#allocation2 + $0x18c] ss:$24 sps:$4 sm:$0xff]  }
  0x6f   :  { %1930 = vmatpush1.bf16.msra.mxu0 %v2902_v39  ;;  %1888 = vmatprep.subr.bf16.mxu1 %v2903_v40  ;;  %v2993_v39 = vld [vmem:[#allocation2 + $0x780] ss:$24 sps:$4 sm:$0xff]  }
  0x70   :  { %1931 = vmatprep.subr.bf16.mxu0 %v2905_v41  ;;  %v2996_v40 = vld [vmem:[#allocation2 + $0x188] ss:$24 sps:$4 sm:$0xff]   ;;  %v3001_v41 = vld [vmem:[#allocation2 + $0x7b4] ss:$24 sps:$4 sm:$0xff]  }
  0x72   :  { %1889 = vmatpush1.bf16.msra.mxu1 %v2907_v42  ;;  %v3004_v42 = vld [vmem:[#allocation2 + $0x1bc] ss:$24 sps:$4 sm:$0xff]  }
  0x73   :  { %1932 = vmatpush1.bf16.msra.mxu0 %v2908_v43  ;;  %1890 = vmatprep.subr.bf16.mxu1 %v2909_v44  ;;  %v2999_v43 = vld [vmem:[#allocation2 + $0x7b0] ss:$24 sps:$4 sm:$0xff]  }
  0x74   :  { %1933 = vmatprep.subr.bf16.mxu0 %v2911_v45  ;;  %v3002_v44 = vld [vmem:[#allocation2 + $0x1b8] ss:$24 sps:$4 sm:$0xff]   ;;  %v3007_v45 = vld [vmem:[#allocation2 + $0x7e4] ss:$24 sps:$4 sm:$0xff]  }
  0x76   :  { %1891 = vmatpush1.bf16.msra.mxu1 %v2913_v46  ;;  %v3010_v46 = vld [vmem:[#allocation2 + $0x1ec] ss:$24 sps:$4 sm:$0xff]  }
  0x77   :  { %1934 = vmatpush1.bf16.msra.mxu0 %v2914_v47  ;;  %1892 = vmatprep.subr.bf16.mxu1 %v2915_v50  ;;  %v3005_v47 = vld [vmem:[#allocation2 + $0x7e0] ss:$24 sps:$4 sm:$0xff]  }
  0x78   :  { %1935 = vmatprep.subr.bf16.mxu0 %v2917_v51  ;;  %v3008_v50 = vld [vmem:[#allocation2 + $0x1e8] ss:$24 sps:$4 sm:$0xff]   ;;  %v3013_v51 = vld [vmem:[#allocation2 + $0x814] ss:$24 sps:$4 sm:$0xff]  }
  0x7a   :  { %1893 = vmatpush1.bf16.msra.mxu1 %v2919_v52  ;;  %v3016_v52 = vld [vmem:[#allocation2 + $0x21c] ss:$24 sps:$4 sm:$0xff]  }
  0x7b   :  { %1936 = vmatpush1.bf16.msra.mxu0 %v2920_v53  ;;  %1894 = vmatprep.subr.bf16.mxu1 %v2921_v54  ;;  %v3011_v53 = vld [vmem:[#allocation2 + $0x810] ss:$24 sps:$4 sm:$0xff]  }
  0x7c   :  { %1937 = vmatprep.subr.bf16.mxu0 %v2923_v55  ;;  %v3014_v54 = vld [vmem:[#allocation2 + $0x218] ss:$24 sps:$4 sm:$0xff]   ;;  %v3019_v55 = vld [vmem:[#allocation2 + $0x844] ss:$24 sps:$4 sm:$0xff]  }
  0x7e   :  { %1895 = vmatpush1.bf16.msra.mxu1 %v2925_v56  ;;  %v3022_v56 = vld [vmem:[#allocation2 + $0x24c] ss:$24 sps:$4 sm:$0xff]  }
  0x7f   :  { %1938 = vmatpush1.bf16.msra.mxu0 %v2926_v57  ;;  %1896 = vmatprep.subr.bf16.mxu1 %v2927_v58  ;;  %v3017_v57 = vld [vmem:[#allocation2 + $0x840] ss:$24 sps:$4 sm:$0xff]  }
  0x80   :  { %1939 = vmatprep.subr.bf16.mxu0 %v2929_v59  ;;  %v3020_v58 = vld [vmem:[#allocation2 + $0x248] ss:$24 sps:$4 sm:$0xff]   ;;  %v3025_v59 = vld [vmem:[#allocation2 + $0x874] ss:$24 sps:$4 sm:$0xff]  }
  0x82   :  { %1897 = vmatpush1.bf16.msra.mxu1 %v2931_v60  ;;  %v3028_v60 = vld [vmem:[#allocation2 + $0x27c] ss:$24 sps:$4 sm:$0xff]  }
  0x83   :  { %1940 = vmatpush1.bf16.msra.mxu0 %v2932_v61  ;;  %1898 = vmatprep.subr.bf16.mxu1 %v2933_v62  ;;  %v3023_v61 = vld [vmem:[#allocation2 + $0x870] ss:$24 sps:$4 sm:$0xff]  }
  0x84   :  { %1941 = vmatprep.subr.bf16.mxu0 %v2935_v63  ;;  %v3026_v62 = vld [vmem:[#allocation2 + $0x278] ss:$24 sps:$4 sm:$0xff]   ;;  %v3031_v63 = vld [vmem:[#allocation2 + $0x8a4] ss:$24 sps:$4 sm:$0xff]  }
  0x86   :  { %1899 = vmatpush1.bf16.msra.mxu1 %v2937_v0  ;;  %v3034_v0 = vld [vmem:[#allocation2 + $0x2ac] ss:$24 sps:$4 sm:$0xff]  }
  0x87   :  { %1942 = vmatpush1.bf16.msra.mxu0 %v2938_v1  ;;  %1997 = vmatprep.subr.bf16.mxu1 %v2948_v3  ;;  %v3029_v1 = vld [vmem:[#allocation2 + $0x8a0] ss:$24 sps:$4 sm:$0xff]   ;;  %v3037_v3 = vld [vmem:[#allocation2 + $0x8d4] ss:$24 sps:$4 sm:$0xff]  }
  0x88   :  { %1954 = vmatprep.subr.bf16.mxu0 %v2945_v2  ;;  %v3032_v2 = vld [vmem:[#allocation2 + $0x2a8] ss:$24 sps:$4 sm:$0xff]  }
  0x89   :  { %1901 = vmatmul.mubr.bf16.vlgmr.msra.gmra.mrb[0].mxu1 %v3495_v6 }
  0x8a   :  { %1944 = vmatmul.mubr.bf16.vlgmr.msra.gmra.mrb[0].mxu0 %v3500_v7  ;;  %1998 = vmatpush1.bf16.msra.mxu1 %v2946_v5  ;;  %v3035_v5 = vld [vmem:[#allocation2 + $0x8d0] ss:$24 sps:$4 sm:$0xff]  }
  0x8b   :  { %1955 = vmatpush1.bf16.msra.mxu0 %v2943_v4  ;;  %1999 = vmatprep.subr.bf16.mxu1 %v2956_v9  ;;  %v3040_v4 = vld [vmem:[#allocation2 + $0x2dc] ss:$24 sps:$4 sm:$0xff]   ;;  %v3046_v9 = vld [vmem:[#allocation2 + $0x30c] ss:$24 sps:$4 sm:$0xff]  }
  0x8c   :  { %1956 = vmatprep.subr.bf16.mxu0 %v2953_v8  ;;  %2029 = vmatprep.mubr.bf16.mxu1 %v3483_v48  ;;  %v3038_v8 = vld [vmem:[#allocation2 + $0x2d8] ss:$24 sps:$4 sm:$0xff]  }
  0x8d   :  { %1986 = vmatprep.mubr.bf16.mxu0 %v3508_v34 }
  0x8e   :  { %2000 = vmatpush1.bf16.msra.mxu1 %v2954_v11  ;;  %v3514_v11 = vld [vmem:[%s3623_s0 + $0x10] ss:$24 sps:$4 sm:$0xff]  }
  0x8f   :  { %1957 = vmatpush1.bf16.msra.mxu0 %v2951_v10  ;;  %2001 = vmatprep.subr.bf16.mxu1 %v2962_v13  ;;  %v3049_v10 = vld [vmem:[#allocation2 + $0x14] ss:$24 sps:$4 sm:$0xff]   ;;  %v3047_v13 = vld [vmem:[#allocation2 + $0x10] ss:$24 sps:$4 sm:$0xff]  }
  0x90   :  { %1958 = vmatprep.subr.bf16.mxu0 %v2959_v12  ;;  %v3044_v12 = vld [vmem:[#allocation2 + $0x308] ss:$24 sps:$4 sm:$0xff]  }
  0x92   :  { %2002 = vmatpush1.bf16.msra.mxu1 %v2960_v15  ;;  %v3055_v15 = vld [vmem:[#allocation2 + $0x44] ss:$24 sps:$4 sm:$0xff]  }
  0x93   :  { %1959 = vmatpush1.bf16.msra.mxu0 %v2957_v14  ;;  %2003 = vmatprep.subr.bf16.mxu1 %v2968_v17  ;;  %v3052_v14 = vld [vmem:[#allocation2 + $0x33c] ss:$24 sps:$4 sm:$0xff]   ;;  %v3053_v17 = vld [vmem:[#allocation2 + $0x40] ss:$24 sps:$4 sm:$0xff]  }
  0x94   :  { %1960 = vmatprep.subr.bf16.mxu0 %v2965_v16  ;;  %v3050_v16 = vld [vmem:[#allocation2 + $0x338] ss:$24 sps:$4 sm:$0xff]  }
  0x96   :  { %2004 = vmatpush1.bf16.msra.mxu1 %v2966_v19  ;;  %v3061_v19 = vld [vmem:[#allocation2 + $0x74] ss:$24 sps:$4 sm:$0xff]  }
  0x97   :  { %1961 = vmatpush1.bf16.msra.mxu0 %v2963_v18  ;;  %2005 = vmatprep.subr.bf16.mxu1 %v2974_v21  ;;  %v3058_v18 = vld [vmem:[#allocation2 + $0x36c] ss:$24 sps:$4 sm:$0xff]   ;;  %v3059_v21 = vld [vmem:[#allocation2 + $0x70] ss:$24 sps:$4 sm:$0xff]  }
  0x98   :  { %1962 = vmatprep.subr.bf16.mxu0 %v2971_v20  ;;  %v3056_v20 = vld [vmem:[#allocation2 + $0x368] ss:$24 sps:$4 sm:$0xff]  }
  0x9a   :  { %2006 = vmatpush1.bf16.msra.mxu1 %v2972_v23  ;;  %v3067_v23 = vld [vmem:[#allocation2 + $0xa4] ss:$24 sps:$4 sm:$0xff]  }
  0x9b   :  { %1963 = vmatpush1.bf16.msra.mxu0 %v2969_v22  ;;  %2007 = vmatprep.subr.bf16.mxu1 %v2980_v25  ;;  %v3064_v22 = vld [vmem:[#allocation2 + $0x39c] ss:$24 sps:$4 sm:$0xff]   ;;  %v3065_v25 = vld [vmem:[#allocation2 + $0xa0] ss:$24 sps:$4 sm:$0xff]  }
  0x9c   :  { %1964 = vmatprep.subr.bf16.mxu0 %v2977_v24  ;;  %v3062_v24 = vld [vmem:[#allocation2 + $0x398] ss:$24 sps:$4 sm:$0xff]  }
  0x9e   :  { %2008 = vmatpush1.bf16.msra.mxu1 %v2978_v27  ;;  %v3073_v27 = vld [vmem:[#allocation2 + $0xd4] ss:$24 sps:$4 sm:$0xff]  }
  0x9f   :  { %1965 = vmatpush1.bf16.msra.mxu0 %v2975_v26  ;;  %2009 = vmatprep.subr.bf16.mxu1 %v2986_v29  ;;  %v3070_v26 = vld [vmem:[#allocation2 + $0x3cc] ss:$24 sps:$4 sm:$0xff]  }
  0xa0   :  { %1966 = vmatprep.subr.bf16.mxu0 %v2983_v28  ;;  %v3068_v28 = vld [vmem:[#allocation2 + $0x3c8] ss:$24 sps:$4 sm:$0xff]   ;;  %v3079_v29 = vld [vmem:[#allocation2 + $0x104] ss:$24 sps:$4 sm:$0xff]  }
  0xa2   :  { %2010 = vmatpush1.bf16.msra.mxu1 %v2984_v31  ;;  %v3077_v31 = vld [vmem:[#allocation2 + $0x100] ss:$24 sps:$4 sm:$0xff]  }
  0xa3   :  { %1967 = vmatpush1.bf16.msra.mxu0 %v2981_v30  ;;  %2011 = vmatprep.subr.bf16.mxu1 %v2992_v33  ;;  %v3074_v30 = vld [vmem:[#allocation2 + $0x3f8] ss:$24 sps:$4 sm:$0xff]   ;;  %v3085_v33 = vld [vmem:[#allocation2 + $0x134] ss:$24 sps:$4 sm:$0xff]  }
  0xa4   :  { %1968 = vmatprep.subr.bf16.mxu0 %v2989_v32  ;;  %v3082_v32 = vld [vmem:[#allocation2 + $0x42c] ss:$24 sps:$4 sm:$0xff]  }
  0xa6   :  { %2012 = vmatpush1.bf16.msra.mxu1 %v2990_v36  ;;  %v3083_v36 = vld [vmem:[#allocation2 + $0x130] ss:$24 sps:$4 sm:$0xff]  }
  0xa7   :  { %1969 = vmatpush1.bf16.msra.mxu0 %v2987_v35  ;;  %2013 = vmatprep.subr.bf16.mxu1 %v2998_v38  ;;  %v3080_v35 = vld [vmem:[#allocation2 + $0x428] ss:$24 sps:$4 sm:$0xff]   ;;  %v3091_v38 = vld [vmem:[#allocation2 + $0x164] ss:$24 sps:$4 sm:$0xff]  }
  0xa8   :  { %1970 = vmatprep.subr.bf16.mxu0 %v2995_v37  ;;  %v3088_v37 = vld [vmem:[#allocation2 + $0x45c] ss:$24 sps:$4 sm:$0xff]  }
  0xaa   :  { %2014 = vmatpush1.bf16.msra.mxu1 %v2996_v40  ;;  %v3089_v40 = vld [vmem:[#allocation2 + $0x160] ss:$24 sps:$4 sm:$0xff]  }
  0xab   :  { %1971 = vmatpush1.bf16.msra.mxu0 %v2993_v39  ;;  %2015 = vmatprep.subr.bf16.mxu1 %v3004_v42  ;;  %v3086_v39 = vld [vmem:[#allocation2 + $0x458] ss:$24 sps:$4 sm:$0xff]   ;;  %v3097_v42 = vld [vmem:[#allocation2 + $0x194] ss:$24 sps:$4 sm:$0xff]  }
  0xac   :  { %1972 = vmatprep.subr.bf16.mxu0 %v3001_v41  ;;  %v3094_v41 = vld [vmem:[#allocation2 + $0x48c] ss:$24 sps:$4 sm:$0xff]  }
  0xae   :  { %2016 = vmatpush1.bf16.msra.mxu1 %v3002_v44  ;;  %v3095_v44 = vld [vmem:[#allocation2 + $0x190] ss:$24 sps:$4 sm:$0xff]  }
  0xaf   :  { %1973 = vmatpush1.bf16.msra.mxu0 %v2999_v43  ;;  %2017 = vmatprep.subr.bf16.mxu1 %v3010_v46  ;;  %v3092_v43 = vld [vmem:[#allocation2 + $0x488] ss:$24 sps:$4 sm:$0xff]   ;;  %v3103_v46 = vld [vmem:[#allocation2 + $0x1c4] ss:$24 sps:$4 sm:$0xff]  }
  0xb0   :  { %1974 = vmatprep.subr.bf16.mxu0 %v3007_v45  ;;  %v3100_v45 = vld [vmem:[#allocation2 + $0x4bc] ss:$24 sps:$4 sm:$0xff]  }
  0xb2   :  { %2018 = vmatpush1.bf16.msra.mxu1 %v3008_v50  ;;  %v3101_v50 = vld [vmem:[#allocation2 + $0x1c0] ss:$24 sps:$4 sm:$0xff]  }
  0xb3   :  { %1975 = vmatpush1.bf16.msra.mxu0 %v3005_v47  ;;  %2019 = vmatprep.subr.bf16.mxu1 %v3016_v52  ;;  %v3098_v47 = vld [vmem:[#allocation2 + $0x4b8] ss:$24 sps:$4 sm:$0xff]   ;;  %v3109_v52 = vld [vmem:[#allocation2 + $0x1f4] ss:$24 sps:$4 sm:$0xff]  }
  0xb4   :  { %1976 = vmatprep.subr.bf16.mxu0 %v3013_v51  ;;  %v3106_v51 = vld [vmem:[#allocation2 + $0x4ec] ss:$24 sps:$4 sm:$0xff]  }
  0xb6   :  { %2020 = vmatpush1.bf16.msra.mxu1 %v3014_v54  ;;  %v3107_v54 = vld [vmem:[#allocation2 + $0x1f0] ss:$24 sps:$4 sm:$0xff]  }
  0xb7   :  { %1977 = vmatpush1.bf16.msra.mxu0 %v3011_v53  ;;  %2021 = vmatprep.subr.bf16.mxu1 %v3022_v56  ;;  %v3104_v53 = vld [vmem:[#allocation2 + $0x4e8] ss:$24 sps:$4 sm:$0xff]   ;;  %v3115_v56 = vld [vmem:[#allocation2 + $0x224] ss:$24 sps:$4 sm:$0xff]  }
  0xb8   :  { %1978 = vmatprep.subr.bf16.mxu0 %v3019_v55  ;;  %v3112_v55 = vld [vmem:[#allocation2 + $0x51c] ss:$24 sps:$4 sm:$0xff]  }
  0xba   :  { %2022 = vmatpush1.bf16.msra.mxu1 %v3020_v58  ;;  %v3113_v58 = vld [vmem:[#allocation2 + $0x220] ss:$24 sps:$4 sm:$0xff]  }
  0xbb   :  { %1979 = vmatpush1.bf16.msra.mxu0 %v3017_v57  ;;  %2023 = vmatprep.subr.bf16.mxu1 %v3028_v60  ;;  %v3110_v57 = vld [vmem:[#allocation2 + $0x518] ss:$24 sps:$4 sm:$0xff]   ;;  %v3121_v60 = vld [vmem:[#allocation2 + $0x254] ss:$24 sps:$4 sm:$0xff]  }
  0xbc   :  { %1980 = vmatprep.subr.bf16.mxu0 %v3025_v59  ;;  %v3118_v59 = vld [vmem:[#allocation2 + $0x54c] ss:$24 sps:$4 sm:$0xff]  }
  0xbe   :  { %2024 = vmatpush1.bf16.msra.mxu1 %v3026_v62  ;;  %v3119_v62 = vld [vmem:[#allocation2 + $0x250] ss:$24 sps:$4 sm:$0xff]  }
  0xbf   :  { %1981 = vmatpush1.bf16.msra.mxu0 %v3023_v61  ;;  %2025 = vmatprep.subr.bf16.mxu1 %v3034_v0  ;;  %v3116_v61 = vld [vmem:[#allocation2 + $0x548] ss:$24 sps:$4 sm:$0xff]   ;;  %v3127_v0 = vld [vmem:[#allocation2 + $0x284] ss:$24 sps:$4 sm:$0xff]  }
  0xc0   :  { %1982 = vmatprep.subr.bf16.mxu0 %v3031_v63  ;;  %v3124_v63 = vld [vmem:[#allocation2 + $0x57c] ss:$24 sps:$4 sm:$0xff]  }
  0xc2   :  { %2026 = vmatpush1.bf16.msra.mxu1 %v3032_v2  ;;  %v3125_v2 = vld [vmem:[#allocation2 + $0x280] ss:$24 sps:$4 sm:$0xff]  }
  0xc3   :  { %1983 = vmatpush1.bf16.msra.mxu0 %v3029_v1  ;;  %2027 = vmatprep.subr.bf16.mxu1 %v3040_v4  ;;  %v3122_v1 = vld [vmem:[#allocation2 + $0x578] ss:$24 sps:$4 sm:$0xff]   ;;  %v3133_v4 = vld [vmem:[#allocation2 + $0x2b4] ss:$24 sps:$4 sm:$0xff]  }
  0xc4   :  { %1984 = vmatprep.subr.bf16.mxu0 %v3037_v3  ;;  %v3130_v3 = vld [vmem:[#allocation2 + $0x5ac] ss:$24 sps:$4 sm:$0xff]  }
  0xc6   :  { %2028 = vmatpush1.bf16.msra.mxu1 %v3038_v8  ;;  %v3131_v8 = vld [vmem:[#allocation2 + $0x2b0] ss:$24 sps:$4 sm:$0xff]  }
  0xc7   :  { %1985 = vmatpush1.bf16.msra.mxu0 %v3035_v5  ;;  %2040 = vmatprep.subr.bf16.mxu1 %v3046_v9  ;;  %v3128_v5 = vld [vmem:[#allocation2 + $0x5a8] ss:$24 sps:$4 sm:$0xff]   ;;  %v3136_v9 = vld [vmem:[#allocation2 + $0x5dc] ss:$24 sps:$4 sm:$0xff]  }
  0xc8   :  { %2126 = vmatprep.subr.bf16.mxu0 %v3049_v10  ;;  %v3139_v10 = vld [vmem:[#allocation2 + $0x2e4] ss:$24 sps:$4 sm:$0xff]  }
  0xc9   :  { %2030 = vmatmul.mubr.bf16.vlgmr.msra.gmra.mrb[4].mxu1 %v3495_v6 }
  0xca   :  { %1987 = vmatmul.mubr.bf16.vlgmr.msra.gmra.mrb[0].mxu0 %v3514_v11  ;;  %2041 = vmatpush1.bf16.msra.mxu1 %v3044_v12  ;;  %v3134_v12 = vld [vmem:[#allocation2 + $0x5d8] ss:$24 sps:$4 sm:$0xff]  }
  0xcb   :  { %2127 = vmatpush1.bf16.msra.mxu0 %v3047_v13  ;;  %2042 = vmatprep.subr.bf16.mxu1 %v3052_v14  ;;  %v3137_v13 = vld [vmem:[#allocation2 + $0x2e0] ss:$24 sps:$4 sm:$0xff]   ;;  %v3142_v14 = vld [vmem:[#allocation2 + $0x60c] ss:$24 sps:$4 sm:$0xff]  }
  0xcc   :  { %2128 = vmatprep.subr.bf16.mxu0 %v3055_v15  ;;  %2072 = vmatprep.mubr.bf16.mxu1 %v3488_v49  ;;  %v3071_v49 = vld [vmem:[#allocation2 + $0xd0] ss:$24 sps:$4 sm:$0xff]   ;;  %v3145_v15 = vld [vmem:[#allocation2 + $0x314] ss:$24 sps:$4 sm:$0xff]  }
  0xcd   :  { %2158 = vmatprep.mubr.bf16.mxu0 %v3483_v48  ;;  %v3076_v48 = vld [vmem:[#allocation2 + $0x3fc] ss:$24 sps:$4 sm:$0xff]  }
  0xce   :  { %2043 = vmatpush1.bf16.msra.mxu1 %v3050_v16  ;;  %v3140_v16 = vld [vmem:[#allocation2 + $0x608] ss:$24 sps:$4 sm:$0xff]  }
  0xcf   :  { %2129 = vmatpush1.bf16.msra.mxu0 %v3053_v17  ;;  %2044 = vmatprep.subr.bf16.mxu1 %v3058_v18  ;;  %v3143_v17 = vld [vmem:[#allocation2 + $0x310] ss:$24 sps:$4 sm:$0xff]   ;;  %v3148_v18 = vld [vmem:[#allocation2 + $0x63c] ss:$24 sps:$4 sm:$0xff]  }
  0xd0   :  { %2130 = vmatprep.subr.bf16.mxu0 %v3061_v19  ;;  %v3151_v19 = vld [vmem:[#allocation2 + $0x344] ss:$24 sps:$4 sm:$0xff]  }
  0xd2   :  { %2045 = vmatpush1.bf16.msra.mxu1 %v3056_v20  ;;  %v3146_v20 = vld [vmem:[#allocation2 + $0x638] ss:$24 sps:$4 sm:$0xff]  }
  0xd3   :  { %2131 = vmatpush1.bf16.msra.mxu0 %v3059_v21  ;;  %2046 = vmatprep.subr.bf16.mxu1 %v3064_v22  ;;  %v3149_v21 = vld [vmem:[#allocation2 + $0x340] ss:$24 sps:$4 sm:$0xff]   ;;  %v3154_v22 = vld [vmem:[#allocation2 + $0x66c] ss:$24 sps:$4 sm:$0xff]  }
  0xd4   :  { %2132 = vmatprep.subr.bf16.mxu0 %v3067_v23  ;;  %v3157_v23 = vld [vmem:[#allocation2 + $0x374] ss:$24 sps:$4 sm:$0xff]  }
  0xd6   :  { %2047 = vmatpush1.bf16.msra.mxu1 %v3062_v24  ;;  %v3288_v24 = vld [vmem:[%s3623_s0 + $0xc] ss:$24 sps:$4 sm:$0xff]  }
  0xd7   :  { %2133 = vmatpush1.bf16.msra.mxu0 %v3065_v25  ;;  %2048 = vmatprep.subr.bf16.mxu1 %v3070_v26  ;;  %v3155_v25 = vld [vmem:[#allocation2 + $0x370] ss:$24 sps:$4 sm:$0xff]   ;;  %v3163_v26 = vld [vmem:[#allocation2 + $0x3a4] ss:$24 sps:$4 sm:$0xff]  }
  0xd8   :  { %2134 = vmatprep.subr.bf16.mxu0 %v3073_v27  ;;  %v3158_v27 = vld [vmem:[#allocation2 + $0x698] ss:$24 sps:$4 sm:$0xff]  }
  0xda   :  { %2049 = vmatpush1.bf16.msra.mxu1 %v3068_v28  ;;  %v3161_v28 = vld [vmem:[#allocation2 + $0x3a0] ss:$24 sps:$4 sm:$0xff]  }
  0xdb   :  { %2135 = vmatpush1.bf16.msra.mxu0 %v3071_v49  ;;  %2050 = vmatprep.subr.bf16.mxu1 %v3076_v48  ;;  %v3166_v49 = vld [vmem:[#allocation2 + $0x6cc] ss:$24 sps:$4 sm:$0xff]  }
  0xdc   :  { %2136 = vmatprep.subr.bf16.mxu0 %v3079_v29  ;;  %v3169_v48 = vld [vmem:[#allocation2 + $0x3d4] ss:$24 sps:$4 sm:$0xff]   ;;  %v3164_v29 = vld [vmem:[#allocation2 + $0x6c8] ss:$24 sps:$4 sm:$0xff]  }
  0xde   :  { %2051 = vmatpush1.bf16.msra.mxu1 %v3074_v30  ;;  %v3167_v30 = vld [vmem:[#allocation2 + $0x3d0] ss:$24 sps:$4 sm:$0xff]  }
  0xdf   :  { %2137 = vmatpush1.bf16.msra.mxu0 %v3077_v31  ;;  %2052 = vmatprep.subr.bf16.mxu1 %v3082_v32  ;;  %v3172_v31 = vld [vmem:[#allocation2 + $0x6fc] ss:$24 sps:$4 sm:$0xff]  }
  0xe0   :  { %2138 = vmatprep.subr.bf16.mxu0 %v3085_v33  ;;  %v3175_v32 = vld [vmem:[#allocation2 + $0x404] ss:$24 sps:$4 sm:$0xff]   ;;  %v3170_v33 = vld [vmem:[#allocation2 + $0x6f8] ss:$24 sps:$4 sm:$0xff]  }
  0xe2   :  { %2053 = vmatpush1.bf16.msra.mxu1 %v3080_v35  ;;  %v3173_v35 = vld [vmem:[#allocation2 + $0x400] ss:$24 sps:$4 sm:$0xff]  }
  0xe3   :  { %2139 = vmatpush1.bf16.msra.mxu0 %v3083_v36  ;;  %2054 = vmatprep.subr.bf16.mxu1 %v3088_v37  ;;  %v3178_v36 = vld [vmem:[#allocation2 + $0x72c] ss:$24 sps:$4 sm:$0xff]  }
  0xe4   :  { %2140 = vmatprep.subr.bf16.mxu0 %v3091_v38  ;;  %v3181_v37 = vld [vmem:[#allocation2 + $0x434] ss:$24 sps:$4 sm:$0xff]   ;;  %v3176_v38 = vld [vmem:[#allocation2 + $0x728] ss:$24 sps:$4 sm:$0xff]  }
  0xe6   :  { %2055 = vmatpush1.bf16.msra.mxu1 %v3086_v39  ;;  %v3179_v39 = vld [vmem:[#allocation2 + $0x430] ss:$24 sps:$4 sm:$0xff]  }
  0xe7   :  { %2141 = vmatpush1.bf16.msra.mxu0 %v3089_v40  ;;  %2056 = vmatprep.subr.bf16.mxu1 %v3094_v41  ;;  %v3184_v40 = vld [vmem:[#allocation2 + $0x75c] ss:$24 sps:$4 sm:$0xff]  }
  0xe8   :  { %2142 = vmatprep.subr.bf16.mxu0 %v3097_v42  ;;  %v3187_v41 = vld [vmem:[#allocation2 + $0x464] ss:$24 sps:$4 sm:$0xff]   ;;  %v3182_v42 = vld [vmem:[#allocation2 + $0x758] ss:$24 sps:$4 sm:$0xff]  }
  0xea   :  { %2057 = vmatpush1.bf16.msra.mxu1 %v3092_v43  ;;  %v3185_v43 = vld [vmem:[#allocation2 + $0x460] ss:$24 sps:$4 sm:$0xff]  }
  0xeb   :  { %2143 = vmatpush1.bf16.msra.mxu0 %v3095_v44  ;;  %2058 = vmatprep.subr.bf16.mxu1 %v3100_v45  ;;  %v3190_v44 = vld [vmem:[#allocation2 + $0x78c] ss:$24 sps:$4 sm:$0xff]  }
  0xec   :  { %2144 = vmatprep.subr.bf16.mxu0 %v3103_v46  ;;  %v3193_v45 = vld [vmem:[#allocation2 + $0x494] ss:$24 sps:$4 sm:$0xff]   ;;  %v3188_v46 = vld [vmem:[#allocation2 + $0x788] ss:$24 sps:$4 sm:$0xff]  }
  0xee   :  { %2059 = vmatpush1.bf16.msra.mxu1 %v3098_v47  ;;  %v3191_v47 = vld [vmem:[#allocation2 + $0x490] ss:$24 sps:$4 sm:$0xff]  }
  0xef   :  { %2145 = vmatpush1.bf16.msra.mxu0 %v3101_v50  ;;  %2060 = vmatprep.subr.bf16.mxu1 %v3106_v51  ;;  %v3196_v50 = vld [vmem:[#allocation2 + $0x7bc] ss:$24 sps:$4 sm:$0xff]  }
  0xf0   :  { %2146 = vmatprep.subr.bf16.mxu0 %v3109_v52  ;;  %v3199_v51 = vld [vmem:[#allocation2 + $0x4c4] ss:$24 sps:$4 sm:$0xff]   ;;  %v3194_v52 = vld [vmem:[#allocation2 + $0x7b8] ss:$24 sps:$4 sm:$0xff]  }
  0xf2   :  { %2061 = vmatpush1.bf16.msra.mxu1 %v3104_v53  ;;  %v3197_v53 = vld [vmem:[#allocation2 + $0x4c0] ss:$24 sps:$4 sm:$0xff]  }
  0xf3   :  { %2147 = vmatpush1.bf16.msra.mxu0 %v3107_v54  ;;  %2062 = vmatprep.subr.bf16.mxu1 %v3112_v55  ;;  %v3202_v54 = vld [vmem:[#allocation2 + $0x7ec] ss:$24 sps:$4 sm:$0xff]  }
  0xf4   :  { %2148 = vmatprep.subr.bf16.mxu0 %v3115_v56  ;;  %v3205_v55 = vld [vmem:[#allocation2 + $0x4f4] ss:$24 sps:$4 sm:$0xff]   ;;  %v3200_v56 = vld [vmem:[#allocation2 + $0x7e8] ss:$24 sps:$4 sm:$0xff]  }
  0xf6   :  { %2063 = vmatpush1.bf16.msra.mxu1 %v3110_v57  ;;  %v3203_v57 = vld [vmem:[#allocation2 + $0x4f0] ss:$24 sps:$4 sm:$0xff]  }
  0xf7   :  { %2149 = vmatpush1.bf16.msra.mxu0 %v3113_v58  ;;  %2064 = vmatprep.subr.bf16.mxu1 %v3118_v59  ;;  %v3208_v58 = vld [vmem:[#allocation2 + $0x81c] ss:$24 sps:$4 sm:$0xff]  }
  0xf8   :  { %2150 = vmatprep.subr.bf16.mxu0 %v3121_v60  ;;  %v3211_v59 = vld [vmem:[#allocation2 + $0x524] ss:$24 sps:$4 sm:$0xff]   ;;  %v3206_v60 = vld [vmem:[#allocation2 + $0x818] ss:$24 sps:$4 sm:$0xff]  }
  0xfa   :  { %2065 = vmatpush1.bf16.msra.mxu1 %v3116_v61  ;;  %v3209_v61 = vld [vmem:[#allocation2 + $0x520] ss:$24 sps:$4 sm:$0xff]  }
  0xfb   :  { %2151 = vmatpush1.bf16.msra.mxu0 %v3119_v62  ;;  %2066 = vmatprep.subr.bf16.mxu1 %v3124_v63  ;;  %v3214_v62 = vld [vmem:[#allocation2 + $0x84c] ss:$24 sps:$4 sm:$0xff]  }
  0xfc   :  { %2152 = vmatprep.subr.bf16.mxu0 %v3127_v0  ;;  %v3217_v63 = vld [vmem:[#allocation2 + $0x554] ss:$24 sps:$4 sm:$0xff]   ;;  %v3212_v0 = vld [vmem:[#allocation2 + $0x848] ss:$24 sps:$4 sm:$0xff]  }
  0xfe   :  { %2067 = vmatpush1.bf16.msra.mxu1 %v3122_v1  ;;  %v3215_v1 = vld [vmem:[#allocation2 + $0x550] ss:$24 sps:$4 sm:$0xff]  }
  0xff   :  { %2153 = vmatpush1.bf16.msra.mxu0 %v3125_v2  ;;  %2068 = vmatprep.subr.bf16.mxu1 %v3130_v3  ;;  %v3220_v2 = vld [vmem:[#allocation2 + $0x87c] ss:$24 sps:$4 sm:$0xff]  }
 0x100   :  { %2154 = vmatprep.subr.bf16.mxu0 %v3133_v4  ;;  %v3223_v3 = vld [vmem:[#allocation2 + $0x584] ss:$24 sps:$4 sm:$0xff]   ;;  %v3218_v4 = vld [vmem:[#allocation2 + $0x878] ss:$24 sps:$4 sm:$0xff]  }
 0x102   :  { %2069 = vmatpush1.bf16.msra.mxu1 %v3128_v5  ;;  %v3221_v5 = vld [vmem:[#allocation2 + $0x580] ss:$24 sps:$4 sm:$0xff]  }
 0x103   :  { %2155 = vmatpush1.bf16.msra.mxu0 %v3131_v8  ;;  %2070 = vmatprep.subr.bf16.mxu1 %v3136_v9  ;;  %v3226_v8 = vld [vmem:[#allocation2 + $0x8ac] ss:$24 sps:$4 sm:$0xff]  }
 0x104   :  { %2156 = vmatprep.subr.bf16.mxu0 %v3139_v10  ;;  %v3229_v9 = vld [vmem:[#allocation2 + $0x5b4] ss:$24 sps:$4 sm:$0xff]   ;;  %v3224_v10 = vld [vmem:[#allocation2 + $0x8a8] ss:$24 sps:$4 sm:$0xff]  }
 0x106   :  { %2071 = vmatpush1.bf16.msra.mxu1 %v3134_v12  ;;  %v3227_v12 = vld [vmem:[#allocation2 + $0x5b0] ss:$24 sps:$4 sm:$0xff]  }
 0x107   :  { %2157 = vmatpush1.bf16.msra.mxu0 %v3137_v13  ;;  %2083 = vmatprep.subr.bf16.mxu1 %v3142_v14  ;;  %v3232_v13 = vld [vmem:[#allocation2 + $0x8dc] ss:$24 sps:$4 sm:$0xff]  }
 0x108   :  { %2169 = vmatprep.subr.bf16.mxu0 %v3145_v15  ;;  %v3235_v14 = vld [vmem:[#allocation2 + $0x5e4] ss:$24 sps:$4 sm:$0xff]   ;;  %v3230_v15 = vld [vmem:[#allocation2 + $0x8d8] ss:$24 sps:$4 sm:$0xff]  }
 0x109   :  { %2073 = vmatmul.mubr.bf16.vlgmr.msra.gmra.mrb[4].mxu1 %v3500_v7  ;;  %v3152_v7 = vld [vmem:[#allocation2 + $0x668] ss:$24 sps:$4 sm:$0xff]  }
 0x10a   :  { %2159 = vmatmul.mubr.bf16.vlgmr.msra.gmra.mrb[4].mxu0 %v3495_v6  ;;  %2084 = vmatpush1.bf16.msra.mxu1 %v3140_v16  ;;  %v3160_v6 = vld [vmem:[#allocation2 + $0x69c] ss:$24 sps:$4 sm:$0xff]   ;;  %v3233_v16 = vld [vmem:[#allocation2 + $0x5e0] ss:$24 sps:$4 sm:$0xff]  }
 0x10b   :  { %2170 = vmatpush1.bf16.msra.mxu0 %v3143_v17  ;;  %2085 = vmatprep.subr.bf16.mxu1 %v3148_v18  ;;  %v3238_v17 = vld [vmem:[#allocation2 + $0x614] ss:$24 sps:$4 sm:$0xff]   ;;  %v3236_v18 = vld [vmem:[#allocation2 + $0x610] ss:$24 sps:$4 sm:$0xff]  }
 0x10c   :  { %2171 = vmatprep.subr.bf16.mxu0 %v3151_v19  ;;  %2115 = vmatprep.mubr.bf16.mxu1 %v3508_v34  ;;  %v3241_v19 = vld [vmem:[#allocation2 + $0x644] ss:$24 sps:$4 sm:$0xff]  }
 0x10d   :  { %2201 = vmatprep.mubr.bf16.mxu0 %v3288_v24  ;;  %v3247_v24 = vld [vmem:[#allocation2 + $0x6a4] ss:$24 sps:$4 sm:$0xff]  }
 0x10e   :  { %2086 = vmatpush1.bf16.msra.mxu1 %v3146_v20  ;;  %v3289_v20 = vld [vmem:[%s3623_s0 + $0x8] ss:$24 sps:$4 sm:$0xff]  }
 0x10f   :  { %2172 = vmatpush1.bf16.msra.mxu0 %v3149_v21  ;;  %2087 = vmatprep.subr.bf16.mxu1 %v3154_v22  ;;  %v3239_v21 = vld [vmem:[#allocation2 + $0x640] ss:$24 sps:$4 sm:$0xff]   ;;  %v3244_v22 = vld [vmem:[#allocation2 + $0x674] ss:$24 sps:$4 sm:$0xff]  }
 0x110   :  { %2173 = vmatprep.subr.bf16.mxu0 %v3157_v23  ;;  %v3242_v23 = vld [vmem:[#allocation2 + $0x670] ss:$24 sps:$4 sm:$0xff]  }
 0x112   :  { %2088 = vmatpush1.bf16.msra.mxu1 %v3152_v7  ;;  %v3245_v7 = vld [vmem:[#allocation2 + $0x6a0] ss:$24 sps:$4 sm:$0xff]  }
 0x113   :  { %2174 = vmatpush1.bf16.msra.mxu0 %v3155_v25  ;;  %2089 = vmatprep.subr.bf16.mxu1 %v3160_v6  ;;  %v3250_v25 = vld [vmem:[#allocation2 + $0x6d4] ss:$24 sps:$4 sm:$0xff]   ;;  %v3248_v6 = vld [vmem:[#allocation2 + $0x6d0] ss:$24 sps:$4 sm:$0xff]  }
 0x114   :  { %2175 = vmatprep.subr.bf16.mxu0 %v3163_v26  ;;  %v3253_v26 = vld [vmem:[#allocation2 + $0x704] ss:$24 sps:$4 sm:$0xff]  }
 0x116   :  { %2090 = vmatpush1.bf16.msra.mxu1 %v3158_v27  ;;  %v3251_v27 = vld [vmem:[#allocation2 + $0x700] ss:$24 sps:$4 sm:$0xff]  }
 0x117   :  { %2176 = vmatpush1.bf16.msra.mxu0 %v3161_v28  ;;  %2091 = vmatprep.subr.bf16.mxu1 %v3166_v49  ;;  %v3256_v28 = vld [vmem:[#allocation2 + $0x734] ss:$24 sps:$4 sm:$0xff]  }
 0x118   :  { %2177 = vmatprep.subr.bf16.mxu0 %v3169_v48  ;;  %v3254_v48 = vld [vmem:[#allocation2 + $0x730] ss:$24 sps:$4 sm:$0xff]  }
 0x11a   :  { %2092 = vmatpush1.bf16.msra.mxu1 %v3164_v29 }
 0x11b   :  { %2178 = vmatpush1.bf16.msra.mxu0 %v3167_v30  ;;  %2093 = vmatprep.subr.bf16.mxu1 %v3172_v31  ;;  %v3259_v30 = vld [vmem:[#allocation2 + $0x764] ss:$24 sps:$4 sm:$0xff]  }
 0x11c   :  { %2179 = vmatprep.subr.bf16.mxu0 %v3175_v32  ;;  %v3257_v32 = vld [vmem:[#allocation2 + $0x760] ss:$24 sps:$4 sm:$0xff]  }
 0x11e   :  { %2094 = vmatpush1.bf16.msra.mxu1 %v3170_v33  ;;  %v3262_v33 = vld [vmem:[#allocation2 + $0x794] ss:$24 sps:$4 sm:$0xff]  }
 0x11f   :  { %2180 = vmatpush1.bf16.msra.mxu0 %v3173_v35  ;;  %2095 = vmatprep.subr.bf16.mxu1 %v3178_v36  ;;  %v3260_v35 = vld [vmem:[#allocation2 + $0x790] ss:$24 sps:$4 sm:$0xff]   ;;  %v3265_v36 = vld [vmem:[#allocation2 + $0x7c4] ss:$24 sps:$4 sm:$0xff]  }
 0x120   :  { %2181 = vmatprep.subr.bf16.mxu0 %v3181_v37  ;;  %v3263_v37 = vld [vmem:[#allocation2 + $0x7c0] ss:$24 sps:$4 sm:$0xff]  }
 0x122   :  { %2096 = vmatpush1.bf16.msra.mxu1 %v3176_v38  ;;  %v3268_v38 = vld [vmem:[#allocation2 + $0x7f4] ss:$24 sps:$4 sm:$0xff]  }
 0x123   :  { %2182 = vmatpush1.bf16.msra.mxu0 %v3179_v39  ;;  %2097 = vmatprep.subr.bf16.mxu1 %v3184_v40  ;;  %v3266_v39 = vld [vmem:[#allocation2 + $0x7f0] ss:$24 sps:$4 sm:$0xff]   ;;  %v3271_v40 = vld [vmem:[#allocation2 + $0x824] ss:$24 sps:$4 sm:$0xff]  }
 0x124   :  { %2183 = vmatprep.subr.bf16.mxu0 %v3187_v41  ;;  %v3269_v41 = vld [vmem:[#allocation2 + $0x820] ss:$24 sps:$4 sm:$0xff]  }
 0x126   :  { %2098 = vmatpush1.bf16.msra.mxu1 %v3182_v42  ;;  %v3274_v42 = vld [vmem:[#allocation2 + $0x854] ss:$24 sps:$4 sm:$0xff]  }
 0x127   :  { %2184 = vmatpush1.bf16.msra.mxu0 %v3185_v43  ;;  %2099 = vmatprep.subr.bf16.mxu1 %v3190_v44  ;;  %v3272_v43 = vld [vmem:[#allocation2 + $0x850] ss:$24 sps:$4 sm:$0xff]   ;;  %v3277_v44 = vld [vmem:[#allocation2 + $0x884] ss:$24 sps:$4 sm:$0xff]  }
 0x128   :  { %2185 = vmatprep.subr.bf16.mxu0 %v3193_v45  ;;  %v3275_v45 = vld [vmem:[#allocation2 + $0x880] ss:$24 sps:$4 sm:$0xff]  }
 0x12a   :  { %2100 = vmatpush1.bf16.msra.mxu1 %v3188_v46  ;;  %v3280_v46 = vld [vmem:[#allocation2 + $0x8b4] ss:$24 sps:$4 sm:$0xff]  }
 0x12b   :  { %2186 = vmatpush1.bf16.msra.mxu0 %v3191_v47  ;;  %2101 = vmatprep.subr.bf16.mxu1 %v3196_v50  ;;  %v3278_v47 = vld [vmem:[#allocation2 + $0x8b0] ss:$24 sps:$4 sm:$0xff]   ;;  %v3283_v50 = vld [vmem:[#allocation2 + $0x8e4] ss:$24 sps:$4 sm:$0xff]  }
 0x12c   :  { %2187 = vmatprep.subr.bf16.mxu0 %v3199_v51  ;;  %v3281_v51 = vld [vmem:[#allocation2 + $0x8e0] ss:$24 sps:$4 sm:$0xff]  }
 0x12e   :  { %2102 = vmatpush1.bf16.msra.mxu1 %v3194_v52  ;;  %v368_v52 = vlaneseq }
 0x12f   :  { %2188 = vmatpush1.bf16.msra.mxu0 %v3197_v53  ;;  %2103 = vmatprep.subr.bf16.mxu1 %v3202_v54 }
 0x130   :  { %2189 = vmatprep.subr.bf16.mxu0 %v3205_v55  ;;  %v369_v53 = vshrl.u32 %v368_v52, 7  ;;  %v366_v55 = vld [vmem:[#allocation4] sm:$0x3f] }
 0x132   :  { %2104 = vmatpush1.bf16.msra.mxu1 %v3200_v56  ;;  %v3532_v54 = vsub.s32 0, %v369_v53  ;;  %v3534_v56 = vsub.s32 1, %v369_v53 }
 0x133   :  { %2190 = vmatpush1.bf16.msra.mxu0 %v3203_v57  ;;  %2105 = vmatprep.subr.bf16.mxu1 %v3208_v58 }
 0x134   :  { %2191 = vmatprep.subr.bf16.mxu0 %v3211_v59  ;;  %v371_v57 = vrot.slane %v366_v55, %v3532_v54  ;;  %v375_v58 = vrot.slane %v366_v55, %v3534_v56 }
 0x136   :  { %2106 = vmatpush1.bf16.msra.mxu1 %v3206_v60 }
 0x137   :  { %2192 = vmatpush1.bf16.msra.mxu0 %v3209_v61  ;;  %2107 = vmatprep.subr.bf16.mxu1 %v3214_v62 }
 0x138   :  { %2193 = vmatprep.subr.bf16.mxu0 %v3217_v63 }
 0x13a   :  { %2108 = vmatpush1.bf16.msra.mxu1 %v3212_v0 }
 0x13b   :  { %2194 = vmatpush1.bf16.msra.mxu0 %v3215_v1  ;;  %2109 = vmatprep.subr.bf16.mxu1 %v3220_v2 }
 0x13c   :  { %2195 = vmatprep.subr.bf16.mxu0 %v3223_v3 }
 0x13e   :  { %2110 = vmatpush1.bf16.msra.mxu1 %v3218_v4 }
 0x13f   :  { %2196 = vmatpush1.bf16.msra.mxu0 %v3221_v5  ;;  %2111 = vmatprep.subr.bf16.mxu1 %v3226_v8 }
 0x140   :  { %2197 = vmatprep.subr.bf16.mxu0 %v3229_v9 }
 0x142   :  { %2112 = vmatpush1.bf16.msra.mxu1 %v3224_v10 }
 0x143   :  { %2198 = vmatpush1.bf16.msra.mxu0 %v3227_v12  ;;  %2113 = vmatprep.subr.bf16.mxu1 %v3232_v13  ;;  %v3538_v13 = vsub.s32 2, %v369_v53 }
 0x144   :  { %2199 = vmatprep.subr.bf16.mxu0 %v3235_v14  ;;  %v2255_v14 = vld [vmem:[%s3626_s3] sm:$0xff] }
 0x146   :  { %2114 = vmatpush1.bf16.msra.mxu1 %v3230_v15  ;;  %v2258_v15 = vld [vmem:[%s3626_s3 + $0x18] sm:$0xff] }
 0x147   :  { %2200 = vmatpush1.bf16.msra.mxu0 %v3233_v16  ;;  %v379_v16 = vrot.slane %v366_v55, %v3538_v13 }
 0x148   :  { %2212 = vmatprep.subr.bf16.mxu0 %v3238_v17  ;;  %v3547_v17 = vsub.s32 3, %v369_v53 }
 0x149   :  { %2116 = vmatmul.mubr.bf16.vlgmr.msra.gmra.mrb[4].mxu1 %v3514_v11 }
 0x14a   :  { %2202 = vmatmul.mubr.bf16.vlgmr.msra.gmra.mrb[4].mxu0 %v3289_v20  ;;  %v2262_v20 = vunpack.c.h.bf16 %v2255_v14 }
 0x14b   :  { %2213 = vmatpush1.bf16.msra.mxu0 %v3236_v18  ;;  %2244 = vmatprep.mubr.bf16.mxu0 %v3508_v34  ;;  %v2261_v18 = vunpack.c.l.bf16 %v2255_v14 }
 0x14c   :  { %2214 = vmatprep.subr.bf16.mxu0 %v3241_v19  ;;  %v2256_v19 = vld [vmem:[%s3626_s3 + $0x8] sm:$0xff] }
 0x14f   :  { %2215 = vmatpush1.bf16.msra.mxu0 %v3239_v21  ;;  %v2267_v21 = vunpack.c.l.bf16 %v2258_v15 }
 0x150   :  { %2216 = vmatprep.subr.bf16.mxu0 %v3244_v22  ;;  %v2259_v22 = vld [vmem:[%s3626_s3 + $0x20] sm:$0xff] }
 0x153   :  { %2217 = vmatpush1.bf16.msra.mxu0 %v3242_v23  ;;  %v2268_v23 = vunpack.c.h.bf16 %v2258_v15 }
 0x154   :  { %2218 = vmatprep.subr.bf16.mxu0 %v3247_v24 }
 0x157   :  { %2219 = vmatpush1.bf16.msra.mxu0 %v3245_v7  ;;  %v2263_v7 = vunpack.c.l.bf16 %v2256_v19 }
 0x158   :  { %2220 = vmatprep.subr.bf16.mxu0 %v3250_v25  ;;  %v383_v25 = vrot.slane %v366_v55, %v3547_v17 }
 0x15b   :  { %2221 = vmatpush1.bf16.msra.mxu0 %v3248_v6 }
 0x15c   :  { %2222 = vmatprep.subr.bf16.mxu0 %v3253_v26  ;;  %v1902_v49 = vpop.f32.mrb[0].mxu1 }
 0x15d   :  { %v1904_v34 = vpop.f32.mrb[1].mxu1  ;;  %v1903_v59 = vadd.f32 %v1902_v49, %v371_v57  ;;  %v3556_v49 = vsub.s32 4, %v369_v53 }
 0x15e   :  { %v1906_v29 = vpop.f32.mrb[2].mxu1  ;;  %v1905_v60 = vadd.f32 %v1904_v34, %v375_v58  ;;  %v2264_v34 = vunpack.c.h.bf16 %v2256_v19 }
 0x15f   :  { %2223 = vmatpush1.bf16.msra.mxu0 %v3251_v27  ;;  %v1908_v31 = vpop.f32.mrb[3].mxu1  ;;  %v1907_v62 = vadd.f32 %v1906_v29, %v371_v57 }
 0x160   :  { %2224 = vmatprep.subr.bf16.mxu0 %v3256_v28  ;;  %v1909_v1 = vadd.f32 %v1908_v31, %v375_v58  ;;  %v2269_v28 = vunpack.c.l.bf16 %v2259_v22 }
 0x163   :  { %2225 = vmatpush1.bf16.msra.mxu0 %v3254_v48  ;;  %v3558_v48 = vsub.s32 5, %v369_v53 }
 0x164   :  { %2226 = vmatprep.subr.bf16.mxu0 %v3259_v30 }
 0x167   :  { %2227 = vmatpush1.bf16.msra.mxu0 %v3257_v32 }
 0x168   :  { %2228 = vmatprep.subr.bf16.mxu0 %v3262_v33  ;;  %v2270_v33 = vunpack.c.h.bf16 %v2259_v22 }
 0x16b   :  { %2229 = vmatpush1.bf16.msra.mxu0 %v3260_v35  ;;  %v2257_v35 = vld [vmem:[%s3626_s3 + $0x10] sm:$0xff] }
 0x16c   :  { %2230 = vmatprep.subr.bf16.mxu0 %v3265_v36 }
 0x16f   :  { %2231 = vmatpush1.bf16.msra.mxu0 %v3263_v37 }
 0x170   :  { %2232 = vmatprep.subr.bf16.mxu0 %v3268_v38 }
 0x173   :  { %2233 = vmatpush1.bf16.msra.mxu0 %v3266_v39  ;;  %v387_v39 = vrot.slane %v366_v55, %v3556_v49 }
 0x174   :  { %2234 = vmatprep.subr.bf16.mxu0 %v3271_v40  ;;  %v391_v40 = vrot.slane %v366_v55, %v3558_v48 }
 0x177   :  { %2235 = vmatpush1.bf16.msra.mxu0 %v3269_v41  ;;  %v2260_v41 = vld [vmem:[%s3626_s3 + $0x28] sm:$0xff] }
 0x178   :  { %2236 = vmatprep.subr.bf16.mxu0 %v3274_v42  ;;  %v2271_v57 = vunpack.c.l.bf16 %v2260_v41 }
 0x17b   :  { %2237 = vmatpush1.bf16.msra.mxu0 %v3272_v43 }
 0x17c   :  { %2238 = vmatprep.subr.bf16.mxu0 %v3277_v44 }
 0x17f   :  { %2239 = vmatpush1.bf16.msra.mxu0 %v3275_v45  ;;  %v2265_v45 = vunpack.c.l.bf16 %v2257_v35 }
 0x180   :  { %2240 = vmatprep.subr.bf16.mxu0 %v3280_v46 }
 0x183   :  { %2241 = vmatpush1.bf16.msra.mxu0 %v3278_v47  ;;  %v2266_v47 = vunpack.c.h.bf16 %v2257_v35 }
 0x184   :  { %2242 = vmatprep.subr.bf16.mxu0 %v3283_v50 }
 0x187   :  { %2243 = vmatpush1.bf16.msra.mxu0 %v3281_v51 }
 0x18a   :  { %2245 = vmatmul.mubr.bf16.vlgmr.msra.gmra.mrb[4].mxu0 %v3514_v11 }
 0x19d   :  { %v1988_v61 = vpop.f32.mrb[0].mxu0 }
 0x19e   :  { %v2802_v63 = vadd.f32 %v1988_v61, %v1903_v59  ;;  %v1990_v0 = vpop.f32.mrb[1].mxu0 }
 0x19f   :  { %v2804_v2 = vadd.f32 %v1990_v0, %v1905_v60  ;;  %v1992_v11 = vpop.f32.mrb[2].mxu0 }
 0x1a0   :  { %v2806_v3 = vadd.f32 %v1992_v11, %v1907_v62  ;;  %v1994_v4 = vpop.f32.mrb[3].mxu0  ;;  %v2273_v6 = vadd.f32 %v2802_v63, %v2261_v18  ;;  %v2272_v62 = vunpack.c.h.bf16 %v2260_v41 }
 0x1a1   :  { %v2808_v5 = vadd.f32 %v1994_v4, %v1909_v1  ;;  %v2274_v26 = vadd.f32 %v2804_v2, %v2262_v20 }
 0x1a2   :  { %v2279_v29 = vadd.f32 %v2806_v3, %v2267_v21 }
 0x1a3   :  { %v2280_v30 = vadd.f32 %v2808_v5, %v2268_v23  ;;  %v2285_v36 = vadd.f32 %v2274_v26, %v2273_v6 }
 0x1a5   :  { %v2292_v42 = vadd.f32 %v2280_v30, %v2279_v29 }
 0x21c   :  { %v2117_v8 = vpop.f32.mrb[4].mxu1 }
 0x21d   :  { %v2119_v9 = vpop.f32.mrb[5].mxu1  ;;  %v2809_v24 = vadd.f32 %v2117_v8, %v379_v16 }
 0x21e   :  { %v2121_v10 = vpop.f32.mrb[6].mxu1  ;;  %v2810_v32 = vadd.f32 %v2119_v9, %v383_v25 }
 0x21f   :  { %v2123_v12 = vpop.f32.mrb[7].mxu1  ;;  %v2811_v27 = vadd.f32 %v2121_v10, %v379_v16  ;;  %v2275_v31 = vadd.f32 %v2809_v24, %v2263_v7 }
 0x220   :  { %v2812_v38 = vadd.f32 %v2123_v12, %v383_v25  ;;  %v2276_v44 = vadd.f32 %v2810_v32, %v2264_v34 }
 0x221   :  { %v2281_v37 = vadd.f32 %v2811_v27, %v2269_v28  ;;  %v2286_v43 = vadd.f32 %v2285_v36, %v2275_v31 }
 0x222   :  { %v2282_v51 = vadd.f32 %v2812_v38, %v2270_v33 }
 0x223   :  { %v2293_v50 = vadd.f32 %v2292_v42, %v2281_v37  ;;  %v2287_v63 = vadd.f32 %v2286_v43, %v2276_v44 }
 0x225   :  { %v2294_v2 = vadd.f32 %v2293_v50, %v2282_v51 }
 0x25d   :  { %v2246_v46 = vpop.f32.mrb[4].mxu0 }
 0x25e   :  { %v2813_v52 = vadd.f32 %v2246_v46, %v387_v39  ;;  %v2248_v53 = vpop.f32.mrb[5].mxu0 }
 0x25f   :  { %v2814_v58 = vadd.f32 %v2248_v53, %v391_v40  ;;  %v2250_v59 = vpop.f32.mrb[6].mxu0 }
 0x260   :  { %v2277_v60 = vadd.f32 %v2813_v52, %v2265_v45  ;;  %v2815_v61 = vadd.f32 %v2250_v59, %v387_v39  ;;  %v2252_v55 = vpop.f32.mrb[7].mxu0 }
 0x261   :  { %v2816_v0 = vadd.f32 %v2252_v55, %v391_v40  ;;  %v2278_v1 = vadd.f32 %v2814_v58, %v2266_v47 }
 0x262   :  { %v2283_v11 = vadd.f32 %v2815_v61, %v2271_v57  ;;  %v2288_v3 = vadd.f32 %v2287_v63, %v2277_v60  ;;  %v2402_v61 = vld [vmem:[#allocation7] sm:$0x3f] }
 0x263   :  { %v2284_v4 = vadd.f32 %v2816_v0, %v2272_v62  ;;  %v2407_v62 = vrot.slane %v2402_v61, %v3532_v54  ;;  %v2411_v0 = vrot.slane %v2402_v61, %v3534_v56 }
 0x264   :  { %v2289_v5 = vadd.f32 %v2288_v3, %v2278_v1  ;;  %v2295_v8 = vadd.f32 %v2294_v2, %v2283_v11  ;;  %v2415_v3 = vrot.slane %v2402_v61, %v3538_v13 }
 0x266   :  { %2290 = vadd.xlane.f32.xlu0 %v2289_v5  ;;  %v2296_v9 = vadd.f32 %v2295_v8, %v2284_v4 }
 0x26a   :  { %2297 = vadd.xlane.f32.xlu0 %v2296_v9 }
 0x2f3   :  { %v2291_v10 = vpop.xlane.xlu0 %2290 }
 0x2f4   :  { %v2300_v12 = vmul.f32 0.0013020834, %v2291_v10 }
 0x2f6   :  { %v2302_v14 = vsub.f32 %v2273_v6, %v2300_v12  ;;  %v2303_v15 = vsub.f32 %v2274_v26, %v2300_v12  ;;  %v2304_v16 = vsub.f32 %v2275_v31, %v2300_v12  ;;  %v2305_v19 = vsub.f32 %v2276_v44, %v2300_v12 }
 0x2f7   :  { %v2298_v18 = vpop.xlane.xlu0 %2297  ;;  %v2306_v23 = vsub.f32 %v2277_v60, %v2300_v12  ;;  %v2307_v34 = vsub.f32 %v2278_v1, %v2300_v12  ;;  %v2358_v60 = vld [vmem:[#allocation6] sm:$0x3f] }
 0x2f8   :  { %v2301_v20 = vmul.f32 0.0013020834, %v2298_v18  ;;  %v2314_v21 = vmul.f32 %v2302_v14, %v2302_v14  ;;  %v2315_v22 = vmul.f32 %v2303_v15, %v2303_v15  ;;  %v2316_v24 = vmul.f32 %v2304_v16, %v2304_v16 }
 0x2f9   :  { %v2317_v32 = vmul.f32 %v2305_v19, %v2305_v19  ;;  %v2318_v35 = vmul.f32 %v2306_v23, %v2306_v23  ;;  %v2363_v55 = vrot.slane %v2358_v60, %v3532_v54  ;;  %v2367_v63 = vrot.slane %v2358_v60, %v3534_v56 }
 0x2fa   :  { %v2326_v7 = vadd.f32 %v2315_v22, %v2314_v21  ;;  %v3568_v25 = vsub.f32 %v2279_v29, %v2301_v20  ;;  %v3570_v27 = vsub.f32 %v2280_v30, %v2301_v20  ;;  %v3572_v28 = vsub.f32 %v2281_v37, %v2301_v20 }
 0x2fb   :  { %v3574_v6 = vsub.f32 %v2282_v51, %v2301_v20  ;;  %v3580_v38 = vsub.f32 %v2283_v11, %v2301_v20  ;;  %v2319_v37 = vmul.f32 %v2307_v34, %v2307_v34  ;;  %v2313_v40 = vsub.f32 %v2284_v4, %v2301_v20 }
 0x2fc   :  { %v2327_v33 = vadd.f32 %v2326_v7, %v2316_v24  ;;  %v2320_v26 = vmul.f32 %v3568_v25, %v3568_v25  ;;  %v2321_v31 = vmul.f32 %v3570_v27, %v3570_v27  ;;  %v2322_v29 = vmul.f32 %v3572_v28, %v3572_v28 }
 0x2fd   :  { %v2323_v41 = vmul.f32 %v3574_v6, %v3574_v6  ;;  %v2324_v44 = vmul.f32 %v3580_v38, %v3580_v38  ;;  %v2325_v46 = vmul.f32 %v2313_v40, %v2313_v40  ;;  %v2371_v1 = vrot.slane %v2358_v60, %v3538_v13 }
 0x2fe   :  { %v2328_v36 = vadd.f32 %v2327_v33, %v2317_v32  ;;  %v2333_v30 = vadd.f32 %v2321_v31, %v2320_v26  ;;  %v2375_v2 = vrot.slane %v2358_v60, %v3547_v17  ;;  %v2419_v4 = vrot.slane %v2402_v61, %v3547_v17 }
 0x2ff   :  { %v2379_v5 = vrot.slane %v2358_v60, %v3556_v49  ;;  %v2383_v8 = vrot.slane %v2358_v60, %v3558_v48  ;;  %v2423_v18 = vrot.slane %v2402_v61, %v3556_v49  ;;  %v2427_v56 = vrot.slane %v2402_v61, %v3558_v48 }
 0x300   :  { %v2329_v39 = vadd.f32 %v2328_v36, %v2318_v35  ;;  %v2334_v42 = vadd.f32 %v2333_v30, %v2322_v29 }
 0x302   :  { %v2330_v43 = vadd.f32 %v2329_v39, %v2319_v37  ;;  %v2335_v45 = vadd.f32 %v2334_v42, %v2323_v41 }
 0x304   :  { %2331 = vadd.xlane.f32.xlu1 %v2330_v43  ;;  %v2336_v47 = vadd.f32 %v2335_v45, %v2324_v44 }
 0x306   :  { %v2337_v50 = vadd.f32 %v2336_v47, %v2325_v46 }
 0x308   :  { %2338 = vadd.xlane.f32.xlu1 %v2337_v50 }
 0x391   :  { %v2332_v51 = vpop.xlane.xlu1 %2331 }
 0x392   :  { %v2340_v52 = vmul.f32 0.0013020834, %v2332_v51 }
 0x394   :  { %v2342_v53 = vadd.f32 1e-12, %v2340_v52 }
 0x395   :  { %v2339_v57 = vpop.xlane.xlu1 %2338 }
 0x396   :  { %3284 = vrsqrt.f32 %v2342_v53  ;;  %v2341_v58 = vmul.f32 0.0013020834, %v2339_v57 }
 0x398   :  { %v2343_v59 = vadd.f32 1e-12, %v2341_v58 }
 0x39a   :  { %3286 = vrsqrt.f32 %v2343_v59 }
 0x3a0   :  { %v3285_v11 = vpop.eup %3284 }
 0x3a1   :  { %v2346_v9 = vmul.f32 %v3285_v11, %v2302_v14  ;;  %v2347_v10 = vmul.f32 %v3285_v11, %v2303_v15  ;;  %v2348_v54 = vmul.f32 %v3285_v11, %v2304_v16  ;;  %v2349_v12 = vmul.f32 %v3285_v11, %v2305_v19 }
 0x3a2   :  { %v2350_v20 = vmul.f32 %v3285_v11, %v2306_v23  ;;  %v2351_v21 = vmul.f32 %v3285_v11, %v2307_v34 }
 0x3a3   :  { %v2390_v22 = vmul.f32 %v2363_v55, %v2346_v9  ;;  %v2391_v24 = vmul.f32 %v2367_v63, %v2347_v10  ;;  %v2392_v7 = vmul.f32 %v2371_v1, %v2348_v54  ;;  %v2393_v13 = vmul.f32 %v2375_v2, %v2349_v12 }
 0x3a4   :  { %v3287_v32 = vpop.eup %3286  ;;  %v2394_v17 = vmul.f32 %v2379_v5, %v2350_v20  ;;  %v2395_v33 = vmul.f32 %v2383_v8, %v2351_v21 }
 0x3a5   :  { %v2434_v26 = vadd.f32 %v2407_v62, %v2390_v22  ;;  %v2435_v31 = vadd.f32 %v2411_v0, %v2391_v24  ;;  %v2436_v35 = vadd.f32 %v2415_v3, %v2392_v7  ;;  %v2437_v14 = vadd.f32 %v2419_v4, %v2393_v13 }
 0x3a6   :  { %v2438_v15 = vadd.f32 %v2423_v18, %v2394_v17  ;;  %v2439_v16 = vadd.f32 %v2427_v56, %v2395_v33  ;;  %v2352_v19 = vmul.f32 %v3287_v32, %v3568_v25  ;;  %v2353_v49 = vmul.f32 %v3287_v32, %v3570_v27 }
 0x3a7   :  { %v2795_v48 = vpack.c.bf16 %v2435_v31, %v2434_v26  ;;  %v2796_v23 = vpack.c.bf16 %v2437_v14, %v2436_v35  ;;  %v2354_v34 = vmul.f32 %v3287_v32, %v3572_v28  ;;  %v2355_v36 = vmul.f32 %v3287_v32, %v3574_v6 }
 0x3a8   :  { %v2797_v29 = vpack.c.bf16 %v2439_v16, %v2438_v15  ;;  %v2356_v30 = vmul.f32 %v3287_v32, %v3580_v38  ;;  %v2357_v37 = vmul.f32 %v3287_v32, %v2313_v40  ;;  %v2396_v39 = vmul.f32 %v2363_v55, %v2352_v19 }
 0x3a9   :  { %2482 = vst [vmem:[%s3629_s6] sm:$0xff] %v2795_v48  ;;  %2483 = vst [vmem:[%s3629_s6 + $0x8] sm:$0xff] %v2796_v23  ;;  %v2397_v25 = vmul.f32 %v2367_v63, %v2353_v49  ;;  %v2398_v27 = vmul.f32 %v2371_v1, %v2354_v34  ;;  %v2399_v41 = vmul.f32 %v2375_v2, %v2355_v36 }
 0x3aa   :  { %2484 = vst [vmem:[%s3629_s6 + $0x10] sm:$0xff] %v2797_v29  ;;  %v2400_v28 = vmul.f32 %v2379_v5, %v2356_v30  ;;  %v2401_v6 = vmul.f32 %v2383_v8, %v2357_v37  ;;  %v2440_v38 = vadd.f32 %v2407_v62, %v2396_v39 }
 0x3ab   :  { %v2441_v40 = vadd.f32 %v2411_v0, %v2397_v25  ;;  %v2442_v42 = vadd.f32 %v2415_v3, %v2398_v27  ;;  %v2443_v43 = vadd.f32 %v2419_v4, %v2399_v41 }
 0x3ac   :  { %v2444_v44 = vadd.f32 %v2423_v18, %v2400_v28  ;;  %v2445_v45 = vadd.f32 %v2427_v56, %v2401_v6 }
 0x3ad   :  { %v2798_v46 = vpack.c.bf16 %v2441_v40, %v2440_v38  ;;  %v2799_v47 = vpack.c.bf16 %v2443_v43, %v2442_v42 }
 0x3ae   :  { %v2800_v50 = vpack.c.bf16 %v2445_v45, %v2444_v44 }
 0x3af   :  { %2485 = vst [vmem:[%s3629_s6 + $0x18] sm:$0xff] %v2798_v46  ;;  %2486 = vst [vmem:[%s3629_s6 + $0x20] sm:$0xff] %v2799_v47 }
 0x3b0   :  { %2487 = vst [vmem:[%s3629_s6 + $0x28] sm:$0xff] %v2800_v50 }
 0x3b1   :  { %2492 = vsyncpa [#allocation3], 1 }
 0x3b2   :  { %2493 = vsyncpa [#allocation5], 1 }
 0x3b3   :  { %2494 = vsyncpa [#allocation8], 1 }

// kernel: bert_ner_forward.14
= control target key start
LH: loop header
LB: loop body
LE: loop exit
PB: predicated region body
PF: predicated region fallthrough
CT: control target
= control target key end

     0   :  { %s940_s1 = inlined_call_operand.vmem [shape: bf16[768,128], index: 1, kind: input, shape index: {}]   ;;  %s941_s0 = inlined_call_operand.vmem [shape: bf16[16,768], index: 0, kind: input, shape index: {}]   ;;  %s942_s2 = inlined_call_operand.vmem [shape: f32[1,128], index: 2, kind: input, shape index: {}]   ;;  %s943_s3 = inlined_call_operand.vmem [shape: f32[16,128], index: 3, kind: output, shape index: {}]  }
   0x1   :  { %v692_v0 = vld [vmem:[%s940_s1 + $0x40] sm:$0xff]   ;;  %v696_v4 = vld [vmem:[%s940_s1 + $0x48] sm:$0xff]   ;;  %v700_v8 = vld [vmem:[%s940_s1 + $0x50] sm:$0xff]  }
   0x2   :  { %v693_v1 = vld [vmem:[%s940_s1] sm:$0xff]   ;;  %626 = vmatprep.subr.bf16.mxu0 %v692_v0  ;;  %v697_v5 = vld [vmem:[%s940_s1 + $0x8] sm:$0xff]   ;;  %v701_v9 = vld [vmem:[%s940_s1 + $0x10] sm:$0xff]  }
   0x3   :  { %v694_v2 = vld [vmem:[%s940_s1 + $0xc0] sm:$0xff]   ;;  %627 = vmatpush3.bf16.msra.mxu0 %v693_v1  ;;  %v698_v6 = vld [vmem:[%s940_s1 + $0xc8] sm:$0xff]   ;;  %v702_v10 = vld [vmem:[%s940_s1 + $0xd0] sm:$0xff]  }
   0x4   :  { %v695_v3 = vld [vmem:[%s940_s1 + $0x80] sm:$0xff]   ;;  %648 = vmatprep.subr.bf16.mxu1 %v694_v2  ;;  %628 = vmatprep.subr.bf16.mxu0 %v696_v4  ;;  %v699_v7 = vld [vmem:[%s940_s1 + $0x88] sm:$0xff]   ;;  %v703_v11 = vld [vmem:[%s940_s1 + $0x90] sm:$0xff]  }
   0x5   :  { %649 = vmatpush3.bf16.msra.mxu1 %v695_v3  ;;  %v704_v12 = vld [vmem:[%s940_s1 + $0x58] sm:$0xff]   ;;  %v708_v16 = vld [vmem:[%s940_s1 + $0x60] sm:$0xff]   ;;  %v712_v20 = vld [vmem:[%s940_s1 + $0x68] sm:$0xff]  }
   0x6   :  { %650 = vmatprep.subr.bf16.mxu1 %v698_v6  ;;  %v705_v13 = vld [vmem:[%s940_s1 + $0x18] sm:$0xff]   ;;  %v709_v17 = vld [vmem:[%s940_s1 + $0x20] sm:$0xff]   ;;  %v713_v21 = vld [vmem:[%s940_s1 + $0x28] sm:$0xff]  }
   0x7   :  { %629 = vmatpush3.bf16.msra.mxu0 %v697_v5  ;;  %v706_v14 = vld [vmem:[%s940_s1 + $0xd8] sm:$0xff]   ;;  %v710_v18 = vld [vmem:[%s940_s1 + $0xe0] sm:$0xff]   ;;  %v714_v22 = vld [vmem:[%s940_s1 + $0xe8] sm:$0xff]  }
   0x8   :  { %630 = vmatprep.subr.bf16.mxu0 %v700_v8  ;;  %v707_v15 = vld [vmem:[%s940_s1 + $0x98] sm:$0xff]   ;;  %v711_v19 = vld [vmem:[%s940_s1 + $0xa0] sm:$0xff]   ;;  %v715_v23 = vld [vmem:[%s940_s1 + $0xa8] sm:$0xff]  }
   0x9   :  { %651 = vmatpush3.bf16.msra.mxu1 %v699_v7  ;;  %v716_v24 = vld [vmem:[%s940_s1 + $0x70] sm:$0xff]   ;;  %v720_v28 = vld [vmem:[%s940_s1 + $0x78] sm:$0xff]   ;;  %v727_v34 = vld [vmem:[%s940_s1 + $0x140] sm:$0xff]  }
   0xa   :  { %652 = vmatprep.subr.bf16.mxu1 %v702_v10  ;;  %v717_v25 = vld [vmem:[%s940_s1 + $0x30] sm:$0xff]   ;;  %v721_v29 = vld [vmem:[%s940_s1 + $0x38] sm:$0xff]   ;;  %v728_v35 = vld [vmem:[%s941_s0 + $0x8] ss:$24 sps:$4 sm:$0xff]  }
   0xb   :  { %631 = vmatpush3.bf16.msra.mxu0 %v701_v9  ;;  %v718_v26 = vld [vmem:[%s940_s1 + $0xf0] sm:$0xff]   ;;  %v722_v30 = vld [vmem:[%s940_s1 + $0xf8] sm:$0xff]   ;;  %v730_v36 = vld [vmem:[%s941_s0 + $0xc] ss:$24 sps:$4 sm:$0xff]  }
   0xc   :  { %632 = vmatprep.subr.bf16.mxu0 %v704_v12  ;;  %v719_v27 = vld [vmem:[%s940_s1 + $0xb0] sm:$0xff]   ;;  %v723_v31 = vld [vmem:[%s941_s0] ss:$24 sps:$4 sm:$0xff]   ;;  %v725_v32 = vld [vmem:[%s941_s0 + $0x4] ss:$24 sps:$4 sm:$0xff]   ;;  %515 = vmatprep.mubr.bf16.mxu1 %v730_v36 }
   0xd   :  { %653 = vmatpush3.bf16.msra.mxu1 %v703_v11  ;;  %v726_v33 = vld [vmem:[%s940_s1 + $0xb8] sm:$0xff]   ;;  %474 = vmatprep.mubr.bf16.mxu0 %v725_v32  ;;  %v731_v37 = vld [vmem:[%s940_s1 + $0x100] sm:$0xff]   ;;  %v732_v38 = vld [vmem:[%s940_s1 + $0x148] sm:$0xff]  }
   0xe   :  { %654 = vmatprep.subr.bf16.mxu1 %v706_v14  ;;  %v733_v39 = vld [vmem:[%s940_s1 + $0x108] sm:$0xff]   ;;  %v734_v40 = vld [vmem:[%s940_s1 + $0x150] sm:$0xff]   ;;  %v736_v42 = vld [vmem:[%s940_s1 + $0x158] sm:$0xff]  }
   0xf   :  { %633 = vmatpush3.bf16.msra.mxu0 %v705_v13  ;;  %v735_v41 = vld [vmem:[%s940_s1 + $0x110] sm:$0xff]   ;;  %v737_v43 = vld [vmem:[%s940_s1 + $0x118] sm:$0xff]   ;;  %v738_v44 = vld [vmem:[%s940_s1 + $0x160] sm:$0xff]  }
  0x10   :  { %634 = vmatprep.subr.bf16.mxu0 %v708_v16  ;;  %v739_v45 = vld [vmem:[%s940_s1 + $0x120] sm:$0xff]   ;;  %v740_v46 = vld [vmem:[%s940_s1 + $0x168] sm:$0xff]   ;;  %v742_v49 = vld [vmem:[%s940_s1 + $0x170] sm:$0xff]  }
  0x11   :  { %655 = vmatpush3.bf16.msra.mxu1 %v707_v15  ;;  %v748_v47 = vld [vmem:[%s941_s0 + $0x14] ss:$24 sps:$4 sm:$0xff]   ;;  %v744_v51 = vld [vmem:[%s940_s1 + $0x178] sm:$0xff]   ;;  %v746_v53 = vld [vmem:[%s941_s0 + $0x10] ss:$24 sps:$4 sm:$0xff]  }
  0x12   :  { %656 = vmatprep.subr.bf16.mxu1 %v710_v18  ;;  %v741_v48 = vld [vmem:[%s940_s1 + $0x128] sm:$0xff]   ;;  %v743_v50 = vld [vmem:[%s940_s1 + $0x130] sm:$0xff]   ;;  %v745_v52 = vld [vmem:[%s940_s1 + $0x138] sm:$0xff]  }
  0x13   :  { %635 = vmatpush3.bf16.msra.mxu0 %v709_v17  ;;  %v571_v55 = vld [vmem:[%s942_s2] ss:$0 sm:$0xff] }
  0x14   :  { %636 = vmatprep.subr.bf16.mxu0 %v712_v20 }
  0x15   :  { %657 = vmatpush3.bf16.msra.mxu1 %v711_v19 }
  0x16   :  { %658 = vmatprep.subr.bf16.mxu1 %v714_v22 }
  0x17   :  { %637 = vmatpush3.bf16.msra.mxu0 %v713_v21 }
  0x18   :  { %638 = vmatprep.subr.bf16.mxu0 %v716_v24 }
  0x19   :  { %659 = vmatpush3.bf16.msra.mxu1 %v715_v23 }
  0x1a   :  { %660 = vmatprep.subr.bf16.mxu1 %v718_v26 }
  0x1b   :  { %639 = vmatpush3.bf16.msra.mxu0 %v717_v25 }
  0x1c   :  { %640 = vmatprep.subr.bf16.mxu0 %v720_v28 }
  0x1d   :  { %661 = vmatpush3.bf16.msra.mxu1 %v719_v27 }
  0x1e   :  { %662 = vmatprep.subr.bf16.mxu1 %v722_v30 }
  0x1f   :  { %641 = vmatpush3.bf16.msra.mxu0 %v721_v29 }
  0x20   :  { %670 = vmatprep.subr.bf16.mxu0 %v727_v34 }
  0x21   :  { %663 = vmatpush3.bf16.msra.mxu1 %v726_v33 }
  0x22   :  { %475 = vmatmul.mubr.bf16.vlgmr.msra.gmra.mrb[0].mxu0 %v723_v31 }
  0x23   :  { %671 = vmatpush3.bf16.msra.mxu0 %v731_v37  ;;  %556 = vmatprep.mubr.bf16.mxu0 %v748_v47 }
  0x24   :  { %516 = vmatmul.mubr.bf16.vlgmr.msra.gmra.mrb[0].mxu1 %v728_v35  ;;  %672 = vmatprep.subr.bf16.mxu0 %v732_v38 }
  0x27   :  { %673 = vmatpush3.bf16.msra.mxu0 %v733_v39 }
  0x28   :  { %674 = vmatprep.subr.bf16.mxu0 %v734_v40 }
  0x2b   :  { %675 = vmatpush3.bf16.msra.mxu0 %v735_v41 }
  0x2c   :  { %676 = vmatprep.subr.bf16.mxu0 %v736_v42 }
  0x2f   :  { %677 = vmatpush3.bf16.msra.mxu0 %v737_v43 }
  0x30   :  { %678 = vmatprep.subr.bf16.mxu0 %v738_v44 }
  0x33   :  { %679 = vmatpush3.bf16.msra.mxu0 %v739_v45 }
  0x34   :  { %680 = vmatprep.subr.bf16.mxu0 %v740_v46 }
  0x37   :  { %681 = vmatpush3.bf16.msra.mxu0 %v741_v48 }
  0x38   :  { %682 = vmatprep.subr.bf16.mxu0 %v742_v49 }
  0x3b   :  { %683 = vmatpush3.bf16.msra.mxu0 %v743_v50 }
  0x3c   :  { %684 = vmatprep.subr.bf16.mxu0 %v744_v51 }
  0x3f   :  { %685 = vmatpush3.bf16.msra.mxu0 %v745_v52 }
  0x42   :  { %557 = vmatmul.mubr.bf16.vlgmr.msra.gmra.mrb[4].mxu0 %v746_v53 }
  0xf5   :  { %v642_v54 = vpop.f32.mrb[0].mxu0 }
  0xf6   :  { %v643_v56 = vpop.f32.mrb[1].mxu0 }
  0xf7   :  { %v644_v57 = vadd.f32 %v643_v56, %v642_v54  ;;  %v645_v58 = vpop.f32.mrb[2].mxu0  ;;  %v664_v59 = vpop.f32.mrb[0].mxu1 }
  0xf8   :  { %v646_v60 = vpop.f32.mrb[3].mxu0  ;;  %v665_v63 = vpop.f32.mrb[1].mxu1 }
  0xf9   :  { %v477_v61 = vadd.f32 %v644_v57, %v571_v55  ;;  %v647_v62 = vadd.f32 %v646_v60, %v645_v58  ;;  %v666_v0 = vadd.f32 %v665_v63, %v664_v59  ;;  %v667_v1 = vpop.f32.mrb[2].mxu1 }
  0xfa   :  { %v668_v3 = vpop.f32.mrb[3].mxu1 }
  0xfb   :  { %v480_v2 = vadd.f32 %v647_v62, %v571_v55  ;;  %v518_v4 = vadd.f32 %v666_v0, %v477_v61  ;;  %v669_v5 = vadd.f32 %v668_v3, %v667_v1 }
  0xfd   :  { %v521_v6 = vadd.f32 %v669_v5, %v480_v2 }
 0x115   :  { %v686_v7 = vpop.f32.mrb[4].mxu0 }
 0x116   :  { %v687_v8 = vpop.f32.mrb[5].mxu0 }
 0x117   :  { %v688_v9 = vadd.f32 %v687_v8, %v686_v7  ;;  %v689_v10 = vpop.f32.mrb[6].mxu0 }
 0x118   :  { %v690_v11 = vpop.f32.mrb[7].mxu0 }
 0x119   :  { %v559_v12 = vadd.f32 %v688_v9, %v518_v4  ;;  %v691_v13 = vadd.f32 %v690_v11, %v689_v10 }
 0x11b   :  { %565 = vst [vmem:[%s943_s3] sm:$0xff] %v559_v12  ;;  %v562_v14 = vadd.f32 %v691_v13, %v521_v6 }
 0x11d   :  { %566 = vst [vmem:[%s943_s3 + $0x8] sm:$0xff] %v562_v14 }

// kernel: bert_ner_forward.15
= control target key start
LH: loop header
LB: loop body
LE: loop exit
PB: predicated region body
PF: predicated region fallthrough
CT: control target
= control target key end

     0   :  { %vm26_vm0 = vcmask 33792   ;;  %s344_s19 = smov 0   ;;  %s408_s0 = inlined_call_operand.vmem [shape: f32[7,2,5], index: 0, kind: input, shape index: {}]   ;;  %s409_s1 = inlined_call_operand.vmem [shape: f32[1,5], index: 1, kind: input, shape index: {}]   ;;  %s410_s2 = inlined_call_operand.vmem [shape: f32[1,5], index: 2, kind: input, shape index: {}]   ;;  %s411_s3 = inlined_call_operand.vmem [shape: f32[5,5], index: 3, kind: input, shape index: {}]   ;;  %s412_s4 = inlined_call_operand.vmem [shape: s32[7,2,1], index: 4, kind: output, shape index: {}]  }
   0x1   :  { %v17_v0 = vld [vmem:[%s408_s0] sm:$0x3] }
   0x2   :  { %v261_v1 = vld [vmem:[%s409_s1] ss:$0 sm:$0xff] }
   0x3   :  { %v25_v2 = vadd.f32 %v261_v1, %v17_v0 }
   0x5   :  { %27 = vst.msk [vmem:[#allocation2] sm:$0x3] %vm26_vm0, %v25_v2 }
   0x6 LB: > { %v48_v3 = vlaneseq  ;;  %v309_v4 = vmov 1966171168   ;;  %v59_v14 = vld [vmem:[%s411_s3] sm:$0x1f]  ;;  %vm72_vm1 = vcmask 36864   ;;  %s263_s21 = sshll.u32 %s303_s19, 1  ;;  %s303_s19 = sphi %s344_s19, %s33_s19  }
   0x7   : > { %v46_v5 = vunpack.c.l.s4 %v309_v4  ;;  %s245_s24 = scalar_lea.vmem %s408_s0, %s263_s21  ;;  %v310_v36 = vmov 0   ;;  %vm123_vm6 = vcmask 1041409   ;;  %s242_s25 = scalar_lea.vmem [#allocation3], %s263_s21 }
   0x8   : > { %v349_v7 = vshrl.u32 %v48_v3, 7  ;;  %v266_v21 = vld [vmem:[%s245_s24 + $0x2] sm:$0x3]  ;;  %v365_v25 = vand.u32 127, %v48_v3  ;;  %291 = vset.pattern.permute.xlu1 %v310_v36  ;;  %290 = vset.pattern.permute.xlu0 %v310_v36  ;;  %s33_s19 = sadd.s32 1, %s303_s19  }
   0x9   : > { %v47_v8 = vunpack.c.0.s8 %v46_v5  ;;  %p30_p0 = scmp.ge.s32.totalorder %s33_s19, 6  }
   0xa   : > { %v62_v11 = vsub.s32 0, %v349_v7  ;;  %v140_v23 = vsub.s32 1, %v349_v7  ;;  %v117_v51 = vsub.s32 %v365_v25, %v349_v7  ;;  %v267_v5 = vld [vmem:[%s410_s2] ss:$0 sm:$0xff] (%p30_p0)  ;;  %vm199_vm9 = vcmask (%p30_p0), 1024   ;;  %s391_s3 = smov (%p30_p0), 0  }
   0xb   : > { %v50_v10 = vsub.s32 %v47_v8, %v349_v7 }
   0xc   : > { %v262_v6 = vld.sshfl [vmem:[#allocation2] sm:$0x11 pattern:$0x75316420]  ;;  %v134_v22 = vrot.slane %v266_v21, %v62_v11  ;;  %v141_v24 = vrot.slane %v266_v21, %v140_v23 }
   0xd   : > { %v44_v9 = vcombine.high %v262_v6, %v262_v6  ;;  %v51_v12 = vrot.slane %v262_v6, %v50_v10 }
   0xf   : > { %v58_v13 = vrot.slane %v44_v9, %v50_v10  ;;  %v63_v15 = vrot.slane %v51_v12, %v62_v11 }
  0x11   : > { %v67_v16 = vrot.slane %v58_v13, %v62_v11  ;;  %v70_v17 = vadd.f32 %v63_v15, %v59_v14 }
  0x13   : > { %v71_v18 = vadd.f32 %v67_v16, %v59_v14  ;;  %v73_v19 = vsel %vm72_vm1, %v70_v17, -inf }
  0x14   : > { %74 = vmax.xlane.f32.xlu0 %v73_v19 }
  0x15   : > { %v76_v20 = vsel %vm72_vm1, %v71_v18, -inf }
  0x18   : > { %77 = vmax.xlane.f32.xlu0 %v76_v20 }
  0x2e   : > { %136 = vbcast.lane.b32.xlu0 %v134_v22, 256 }
  0xa1   : > { %v75_v26 = vpop.xlane.xlu0 %74 }
  0xa2   : > { %vm81_vm2 = vcmp.ge.f32.partialorder %v70_v17, %v75_v26 }
  0xa3   : > { %v83_v27 = vsel %vm81_vm2, %v365_v25, 5 }
  0xa4   : > { %v85_v28 = vsel %vm72_vm1, %v83_v27, 2147483647 }
  0xa5   : > { %v78_v29 = vpop.xlane.xlu0 %77  ;;  %v87_v30 = vshra.s32 %v85_v28, 16  ;;  %v86_v37 = vand.u32 65535, %v85_v28 }
  0xa6   : > { %vm82_vm3 = vcmp.ge.f32.partialorder %v71_v18, %v78_v29 }
  0xa7   : > { %v84_v31 = vsel %vm82_vm3, %v365_v25, 5  ;;  %v89_v32 = vcvt.s32.f32 %v87_v30  ;;  %v88_v39 = vcvt.s32.f32 %v86_v37 }
  0xa8   : > { %v100_v33 = vsel %vm72_vm1, %v84_v31, 2147483647 }
  0xa9   : > { %90 = vmin.xlane.f32.xlu1 %v89_v32  ;;  %v102_v34 = vshra.s32 %v100_v33, 16  ;;  %v101_v40 = vand.u32 65535, %v100_v33  ;;  %v137_v47 = vpop.permute.xlu0 %136 }
  0xaa   : > { %v147_v48 = vadd.f32 %v137_v47, %v75_v26 }
  0xab   : > { %v104_v35 = vcvt.s32.f32 %v102_v34  ;;  %v103_v43 = vcvt.s32.f32 %v101_v40 }
  0xad   : > { %105 = vmin.xlane.f32.xlu1 %v104_v35 }
  0xbe   : > { %143 = vbcast.lane.b32.xlu1 %v141_v24, 256 }
 0x136   : > { %v91_v38 = vpop.xlane.xlu1 %90 }
 0x137   : > { %vm92_vm4 = vcmp.eq.f32.partialorder %v89_v32, %v91_v38  ;;  %v97_v49 = vcvt.f32.s32 %v91_v38 }
 0x138   : > { %v93_v41 = vsel %vm92_vm4, %v88_v39, inf }
 0x139   : > { %94 = vmin.xlane.f32.xlu1 %v93_v41  ;;  %v98_v52 = vshll.u32 %v97_v49, 16 }
 0x13a   : > { %v106_v42 = vpop.xlane.xlu1 %105 }
 0x13b   : > { %vm107_vm5 = vcmp.eq.f32.partialorder %v104_v35, %v106_v42  ;;  %v112_v53 = vcvt.f32.s32 %v106_v42 }
 0x13c   : > { %v108_v44 = vsel %vm107_vm5, %v103_v43, inf }
 0x13d   : > { %109 = vmin.xlane.f32.xlu0 %v108_v44  ;;  %v113_v57 = vshll.u32 %v112_v53, 16 }
 0x13e   : > { %v144_v45 = vpop.permute.xlu1 %143 }
 0x13f   : > { %v148_v46 = vadd.f32 %v144_v45, %v78_v29 }
 0x14a   : > { %155 = vperm.xlu1 %291, %v148_v46  }
 0x153   : > { %152 = vperm.xlu0 %290, %v147_v48  }
 0x1c6   : > { %v95_v50 = vpop.xlane.xlu1 %94 }
 0x1c7   : > { %v96_v54 = vcvt.f32.s32 %v95_v50 }
 0x1c9   : > { %v99_v55 = vadd.s32 %v98_v52, %v96_v54 }
 0x1ca   : > { %v110_v56 = vpop.xlane.xlu0 %109  ;;  %v156_v62 = vpop.permute.xlu1 %155 }
 0x1cb   : > { %v118_v58 = vrot.slane %v99_v55, %v117_v51  ;;  %v111_v59 = vcvt.f32.s32 %v110_v56  ;;  %v164_v1 = vrot.slane %v156_v62, %v117_v51 }
 0x1cd   : > { %v114_v60 = vadd.s32 %v113_v57, %v111_v59 }
 0x1cf   : > { %v122_v61 = vrot.slane %v114_v60, %v117_v51 }
 0x1d0   :  { %32 = sbr.rel (!%p30_p0) target bundleno = 6 (0x6), region = 55 }
 0x1d1   : > { %v124_v63 = vsel %vm123_vm6, %v122_v61, %v118_v58 }
 0x1d2   : > { %v153_v0 = vpop.permute.xlu0 %152  ;;  %264 = vst.msk [vmem:[%s242_s25 + $0x2] sm:$0x3] %vm26_vm0, %v124_v63 }
 0x1d3   : > { %v160_v2 = vrot.slane %v153_v0, %v117_v51 }
 0x1d5   : > { %v165_v3 = vsel %vm123_vm6, %v164_v1, %v160_v2 }
 0x1d6   : > { %167 = vst.msk [vmem:[#allocation2] sm:$0x3] %vm26_vm0, %v165_v3 }
 0x1dd   :  { %v168_v4 = vld [vmem:[#allocation2] sm:$0x3] }
 0x1de   :  { %v176_v6 = vadd.f32 %v267_v5, %v168_v4 }
 0x1e0   :  { %v177_v7 = vsel %vm26_vm0, %v176_v6, -inf }
 0x1e1   :  { %178 = vmax.xlane.f32.xlu0 %v177_v7 }
 0x26e   :  { %v179_v8 = vpop.xlane.xlu0 %178 }
 0x26f   :  { %vm182_vm7 = vcmp.ge.f32.partialorder %v176_v6, %v179_v8 }
 0x270   :  { %v183_v9 = vsel %vm182_vm7, %v365_v25, 5 }
 0x271   :  { %v184_v10 = vsel %vm26_vm0, %v183_v9, 2147483647 }
 0x272   :  { %v186_v11 = vshra.s32 %v184_v10, 16  ;;  %v185_v13 = vand.u32 65535, %v184_v10 }
 0x274   :  { %v188_v12 = vcvt.s32.f32 %v186_v11  ;;  %v187_v15 = vcvt.s32.f32 %v185_v13 }
 0x276   :  { %189 = vmin.xlane.f32.xlu0 %v188_v12 }
 0x303   :  { %v190_v14 = vpop.xlane.xlu0 %189 }
 0x304   :  { %vm191_vm8 = vcmp.eq.f32.partialorder %v188_v12, %v190_v14  ;;  %v196_v17 = vcvt.f32.s32 %v190_v14 }
 0x305   :  { %v192_v16 = vsel %vm191_vm8, %v187_v15, inf }
 0x306   :  { %193 = vmin.xlane.f32.xlu1 %v192_v16  ;;  %v197_v19 = vshll.u32 %v196_v17, 16 }
 0x393   :  { %v194_v18 = vpop.xlane.xlu1 %193 }
 0x394   :  { %v195_v20 = vcvt.f32.s32 %v194_v18 }
 0x396   :  { %v198_v21 = vadd.s32 %v197_v19, %v195_v20 }
 0x398   :  { %200 = vst.msk [vmem:[#allocation4] sm:$0x3] %vm199_vm9, %v198_v21  ;;  %268 = vst.msk [vmem:[%s412_s4 + $0xc] sm:$0x3] %vm199_vm9, %v198_v21 }
 0x399 LB: > { %v311_v23 = vmov 0   ;;  %s209_s28 = ssub.s32 6, %s307_s3  ;;  %s232_s5 = ssub.s32 5, %s307_s3  ;;  %s307_s3 = sphi %s391_s3, %s208_s3  }
 0x39a   : > { %292 = vset.pattern.permute.xlu0 %v311_v23  ;;  %s269_s29 = sshll.u32 %s209_s28, 1  ;;  %s270_s6 = sshll.u32 %s232_s5, 1 }
 0x39b   : > { %s212_s30 = scalar_lea.vmem [#allocation3], %s269_s29  ;;  %s234_s9 = scalar_lea.vmem %s412_s4, %s270_s6 }
 0x39c   : > { %v213_v24 = vld [vmem:[%s212_s30] sm:$0x3]  ;;  %s208_s3 = sadd.s32 1, %s307_s3  }
 0x39d   : > { %p205_p1 = scmp.ge.s32.totalorder %s208_s3, 6  }
 0x39f   : > { %v210_v22 = vld [vmem:[#allocation4] sm:$0x3] }
 0x3a0   : > { %215 = vperm.xlu0 %292, %v210_v22  }
 0x41f   : > { %v216_v26 = vpop.permute.xlu0 %215 }
 0x420   : > { %vm217_vm10 = vcmp.eq.s32.totalorder %v365_v25, %v216_v26 }
 0x421   : > { %v218_v27 = vsel %vm217_vm10, %v213_v24, 0 }
 0x422   : > { %v219_v28 = vsel %vm26_vm0, %v218_v27, 0 }
 0x423   : > { %v221_v29 = vshrl.u32 %v219_v28, 16  ;;  %v220_v30 = vand.u32 65535, %v219_v28 }
 0x425   : > { %v223_v31 = vcvt.s32.f32 %v221_v29  ;;  %v222_v32 = vcvt.s32.f32 %v220_v30 }
 0x427   : > { %226 = vadd.xlane.f32.xlu0 %v223_v31  ;;  %224 = vadd.xlane.f32.xlu1 %v222_v32 }
 0x4b4   : > { %v227_v33 = vpop.xlane.xlu0 %226  ;;  %v225_v34 = vpop.xlane.xlu1 %224 }
 0x4b5   : > { %v229_v35 = vcvt.f32.s32 %v227_v33  ;;  %v228_v37 = vcvt.f32.s32 %v225_v34  ;;  %207 = sbr.rel (!%p205_p1) target bundleno = 921 (0x399), region = 66 }
 0x4b7   : > { %v230_v36 = vshll.u32 %v229_v35, 16 }
 0x4b9   : > { %v231_v38 = vadd.s32 %v230_v36, %v228_v37 }
 0x4bb   : > { %235 = vst.msk [vmem:[%s234_s9] sm:$0x3] %vm199_vm9, %v231_v38  ;;  %236 = vst.msk [vmem:[#allocation4] sm:$0x3] %vm199_vm9, %v231_v38 }

// kernel: bert_ner_forward.13
= control target key start
LH: loop header
LB: loop body
LE: loop exit
PB: predicated region body
PF: predicated region fallthrough
CT: control target
= control target key end

     0   :  { %s15860_s1 = inlined_call_operand.vmem [shape: bf16[3072,768], index: 1, kind: input, shape index: {}]   ;;  %s15861_s0 = inlined_call_operand.vmem [shape: bf16[16,3072], index: 0, kind: input, shape index: {}]   ;;  %s15862_s2 = inlined_call_operand.vmem [shape: f32[1,768], index: 2, kind: input, shape index: {}]   ;;  %s15863_s3 = inlined_call_operand.vmem [shape: bf16[16,768], index: 3, kind: input, shape index: {}]   ;;  %s15864_s4 = inlined_call_operand.vmem [shape: f32[1,768], index: 4, kind: input, shape index: {}]   ;;  %s15865_s5 = inlined_call_operand.vmem [shape: f32[1,768], index: 5, kind: input, shape index: {}]   ;;  %s15866_s6 = inlined_call_operand.vmem [shape: bf16[16,768], index: 6, kind: output, shape index: {}]  }
   0x1   :  { %v10228_v0 = vld [vmem:[%s15860_s1 + $0x4] ss:$24 sps:$4 sm:$0xff]   ;;  %v10232_v2 = vld [vmem:[%s15860_s1] ss:$24 sps:$4 sm:$0xff]   ;;  %v10234_v4 = vld [vmem:[%s15860_s1 + $0x34] ss:$24 sps:$4 sm:$0xff]  }
   0x2   :  { %v10230_v1 = vld [vmem:[%s15860_s1 + $0x1204] ss:$24 sps:$4 sm:$0xff]   ;;  %7111 = vmatprep.subr.bf16.mxu1 %v10228_v0  ;;  %v10233_v3 = vld [vmem:[%s15860_s1 + $0x1200] ss:$24 sps:$4 sm:$0xff]   ;;  %v10236_v5 = vld [vmem:[%s15860_s1 + $0x1234] ss:$24 sps:$4 sm:$0xff]  }
   0x3   :  { %7369 = vmatprep.subr.bf16.mxu0 %v10230_v1  ;;  %7112 = vmatpush1.bf16.msra.mxu1 %v10232_v2  ;;  %v10238_v6 = vld [vmem:[%s15860_s1 + $0x30] ss:$24 sps:$4 sm:$0xff]   ;;  %v10240_v8 = vld [vmem:[%s15860_s1 + $0x64] ss:$24 sps:$4 sm:$0xff]   ;;  %v10244_v10 = vld [vmem:[%s15860_s1 + $0x60] ss:$24 sps:$4 sm:$0xff]  }
   0x4   :  { %7370 = vmatpush1.bf16.msra.mxu0 %v10233_v3  ;;  %7113 = vmatprep.subr.bf16.mxu1 %v10234_v4  ;;  %v10239_v7 = vld [vmem:[%s15860_s1 + $0x1230] ss:$24 sps:$4 sm:$0xff]   ;;  %v10242_v9 = vld [vmem:[%s15860_s1 + $0x1264] ss:$24 sps:$4 sm:$0xff]   ;;  %v10245_v11 = vld [vmem:[%s15860_s1 + $0x1260] ss:$24 sps:$4 sm:$0xff]  }
   0x5   :  { %7371 = vmatprep.subr.bf16.mxu0 %v10236_v5  ;;  %v10246_v12 = vld [vmem:[%s15860_s1 + $0x94] ss:$24 sps:$4 sm:$0xff]   ;;  %v10250_v14 = vld [vmem:[%s15860_s1 + $0x90] ss:$24 sps:$4 sm:$0xff]   ;;  %v10252_v16 = vld [vmem:[%s15860_s1 + $0xc4] ss:$24 sps:$4 sm:$0xff]  }
   0x6   :  { %v10248_v13 = vld [vmem:[%s15860_s1 + $0x1294] ss:$24 sps:$4 sm:$0xff]   ;;  %v10251_v15 = vld [vmem:[%s15860_s1 + $0x1290] ss:$24 sps:$4 sm:$0xff]   ;;  %v10254_v17 = vld [vmem:[%s15860_s1 + $0x12c4] ss:$24 sps:$4 sm:$0xff]  }
   0x7   :  { %7114 = vmatpush1.bf16.msra.mxu1 %v10238_v6  ;;  %v10256_v18 = vld [vmem:[%s15860_s1 + $0xc0] ss:$24 sps:$4 sm:$0xff]   ;;  %v10258_v20 = vld [vmem:[%s15860_s1 + $0xf4] ss:$24 sps:$4 sm:$0xff]   ;;  %v10262_v22 = vld [vmem:[%s15860_s1 + $0xf0] ss:$24 sps:$4 sm:$0xff]  }
   0x8   :  { %7372 = vmatpush1.bf16.msra.mxu0 %v10239_v7  ;;  %7115 = vmatprep.subr.bf16.mxu1 %v10240_v8  ;;  %v10257_v19 = vld [vmem:[%s15860_s1 + $0x12c0] ss:$24 sps:$4 sm:$0xff]   ;;  %v10260_v21 = vld [vmem:[%s15860_s1 + $0x12f4] ss:$24 sps:$4 sm:$0xff]   ;;  %v10263_v23 = vld [vmem:[%s15860_s1 + $0x12f0] ss:$24 sps:$4 sm:$0xff]  }
   0x9   :  { %7373 = vmatprep.subr.bf16.mxu0 %v10242_v9  ;;  %v10264_v24 = vld [vmem:[%s15860_s1 + $0x124] ss:$24 sps:$4 sm:$0xff]   ;;  %v10268_v26 = vld [vmem:[%s15860_s1 + $0x120] ss:$24 sps:$4 sm:$0xff]   ;;  %v10270_v28 = vld [vmem:[%s15860_s1 + $0x154] ss:$24 sps:$4 sm:$0xff]  }
   0xa   :  { %v10266_v25 = vld [vmem:[%s15860_s1 + $0x1324] ss:$24 sps:$4 sm:$0xff]   ;;  %v10269_v27 = vld [vmem:[%s15860_s1 + $0x1320] ss:$24 sps:$4 sm:$0xff]   ;;  %v10272_v29 = vld [vmem:[%s15860_s1 + $0x1354] ss:$24 sps:$4 sm:$0xff]  }
   0xb   :  { %7116 = vmatpush1.bf16.msra.mxu1 %v10244_v10  ;;  %v10274_v30 = vld [vmem:[%s15860_s1 + $0x150] ss:$24 sps:$4 sm:$0xff]   ;;  %v10276_v32 = vld [vmem:[%s15860_s1 + $0x184] ss:$24 sps:$4 sm:$0xff]   ;;  %v10280_v34 = vld [vmem:[%s15860_s1 + $0x180] ss:$24 sps:$4 sm:$0xff]  }
   0xc   :  { %7374 = vmatpush1.bf16.msra.mxu0 %v10245_v11  ;;  %7117 = vmatprep.subr.bf16.mxu1 %v10246_v12  ;;  %v10275_v31 = vld [vmem:[%s15860_s1 + $0x1350] ss:$24 sps:$4 sm:$0xff]   ;;  %v10278_v33 = vld [vmem:[%s15860_s1 + $0x1384] ss:$24 sps:$4 sm:$0xff]   ;;  %v10281_v35 = vld [vmem:[%s15860_s1 + $0x1380] ss:$24 sps:$4 sm:$0xff]  }
   0xd   :  { %7375 = vmatprep.subr.bf16.mxu0 %v10248_v13  ;;  %v10282_v36 = vld [vmem:[%s15860_s1 + $0x1b4] ss:$24 sps:$4 sm:$0xff]   ;;  %v10286_v38 = vld [vmem:[%s15860_s1 + $0x1b0] ss:$24 sps:$4 sm:$0xff]   ;;  %v10288_v40 = vld [vmem:[%s15860_s1 + $0x1e4] ss:$24 sps:$4 sm:$0xff]  }
   0xe   :  { %v10284_v37 = vld [vmem:[%s15860_s1 + $0x13b4] ss:$24 sps:$4 sm:$0xff]   ;;  %v10287_v39 = vld [vmem:[%s15860_s1 + $0x13b0] ss:$24 sps:$4 sm:$0xff]   ;;  %v10290_v41 = vld [vmem:[%s15860_s1 + $0x13e4] ss:$24 sps:$4 sm:$0xff]  }
   0xf   :  { %7118 = vmatpush1.bf16.msra.mxu1 %v10250_v14  ;;  %v10292_v42 = vld [vmem:[%s15860_s1 + $0x1e0] ss:$24 sps:$4 sm:$0xff]   ;;  %v10294_v44 = vld [vmem:[%s15860_s1 + $0x214] ss:$24 sps:$4 sm:$0xff]   ;;  %v10298_v46 = vld [vmem:[%s15860_s1 + $0x210] ss:$24 sps:$4 sm:$0xff]  }
  0x10   :  { %7376 = vmatpush1.bf16.msra.mxu0 %v10251_v15  ;;  %7119 = vmatprep.subr.bf16.mxu1 %v10252_v16  ;;  %v10293_v43 = vld [vmem:[%s15860_s1 + $0x13e0] ss:$24 sps:$4 sm:$0xff]   ;;  %v10296_v45 = vld [vmem:[%s15860_s1 + $0x1414] ss:$24 sps:$4 sm:$0xff]   ;;  %v10299_v47 = vld [vmem:[%s15860_s1 + $0x1410] ss:$24 sps:$4 sm:$0xff]  }
  0x11   :  { %7377 = vmatprep.subr.bf16.mxu0 %v10254_v17  ;;  %v23_v48 = vld [vmem:[%s15861_s0] sm:$0xff]  ;;  %v29_v53 = vld [vmem:[%s15861_s0 + $0x30] sm:$0xff] }
  0x12   :  { %v35_v49 = vld [vmem:[%s15861_s0 + $0x60] sm:$0xff]  ;;  %v41_v54 = vld [vmem:[%s15861_s0 + $0x90] sm:$0xff] }
  0x13   :  { %7120 = vmatpush1.bf16.msra.mxu1 %v10256_v18  ;;  %v10300_v50 = vld [vmem:[%s15860_s1 + $0x244] ss:$24 sps:$4 sm:$0xff]   ;;  %v12152_v52 = vcombine.high %v23_v48, %v35_v49  ;;  %v12161_v55 = vcombine.high %v29_v53, %v41_v54  ;;  %v10304_v56 = vld [vmem:[%s15860_s1 + $0x240] ss:$24 sps:$4 sm:$0xff]   ;;  %v10306_v58 = vld [vmem:[%s15860_s1 + $0x274] ss:$24 sps:$4 sm:$0xff]   ;;  %v12218_v10 = vcombine.low %v23_v48, %v35_v49  ;;  %v12220_v11 = vcombine.low %v29_v53, %v41_v54 }
  0x14   :  { %7378 = vmatpush1.bf16.msra.mxu0 %v10257_v19  ;;  %7121 = vmatprep.subr.bf16.mxu1 %v10258_v20  ;;  %v10302_v51 = vld [vmem:[%s15860_s1 + $0x1444] ss:$24 sps:$4 sm:$0xff]   ;;  %v10305_v57 = vld [vmem:[%s15860_s1 + $0x1440] ss:$24 sps:$4 sm:$0xff]   ;;  %v10308_v59 = vld [vmem:[%s15860_s1 + $0x1474] ss:$24 sps:$4 sm:$0xff]  }
  0x15   :  { %7379 = vmatprep.subr.bf16.mxu0 %v10260_v21  ;;  %7143 = vmatprep.mubr.bf16.mxu1 %v12152_v52  ;;  %v10310_v60 = vld [vmem:[%s15860_s1 + $0x270] ss:$24 sps:$4 sm:$0xff]   ;;  %v10312_v62 = vld [vmem:[%s15860_s1 + $0x2a4] ss:$24 sps:$4 sm:$0xff]   ;;  %v10316_v0 = vld [vmem:[%s15860_s1 + $0x2a0] ss:$24 sps:$4 sm:$0xff]  }
  0x16   :  { %7401 = vmatprep.mubr.bf16.mxu0 %v12161_v55  ;;  %v10311_v61 = vld [vmem:[%s15860_s1 + $0x1470] ss:$24 sps:$4 sm:$0xff]   ;;  %v10314_v63 = vld [vmem:[%s15860_s1 + $0x14a4] ss:$24 sps:$4 sm:$0xff]   ;;  %v10317_v1 = vld [vmem:[%s15860_s1 + $0x14a0] ss:$24 sps:$4 sm:$0xff]  }
  0x17   :  { %7122 = vmatpush1.bf16.msra.mxu1 %v10262_v22  ;;  %v10318_v2 = vld [vmem:[%s15860_s1 + $0x2d4] ss:$24 sps:$4 sm:$0xff]   ;;  %v10322_v4 = vld [vmem:[%s15860_s1 + $0x2d0] ss:$24 sps:$4 sm:$0xff]   ;;  %v10326_v6 = vld [vmem:[%s15860_s1 + $0x304] ss:$24 sps:$4 sm:$0xff]  }
  0x18   :  { %7380 = vmatpush1.bf16.msra.mxu0 %v10263_v23  ;;  %7123 = vmatprep.subr.bf16.mxu1 %v10264_v24  ;;  %v10320_v3 = vld [vmem:[%s15860_s1 + $0x14d4] ss:$24 sps:$4 sm:$0xff]   ;;  %v10323_v5 = vld [vmem:[%s15860_s1 + $0x14d0] ss:$24 sps:$4 sm:$0xff]   ;;  %v10329_v7 = vld [vmem:[%s15860_s1 + $0x1504] ss:$24 sps:$4 sm:$0xff]  }
  0x19   :  { %7381 = vmatprep.subr.bf16.mxu0 %v10266_v25  ;;  %v10324_v8 = vld [vmem:[%s15860_s1 + $0x300] ss:$24 sps:$4 sm:$0xff]   ;;  %v10332_v12 = vld [vmem:[%s15860_s1 + $0x334] ss:$24 sps:$4 sm:$0xff]   ;;  %v10330_v14 = vld [vmem:[%s15860_s1 + $0x330] ss:$24 sps:$4 sm:$0xff]  }
  0x1a   :  { %v10327_v9 = vld [vmem:[%s15860_s1 + $0x1500] ss:$24 sps:$4 sm:$0xff]   ;;  %v10335_v13 = vld [vmem:[%s15860_s1 + $0x1534] ss:$24 sps:$4 sm:$0xff]   ;;  %v10333_v15 = vld [vmem:[%s15860_s1 + $0x1530] ss:$24 sps:$4 sm:$0xff]  }
  0x1b   :  { %7124 = vmatpush1.bf16.msra.mxu1 %v10268_v26  ;;  %v10338_v16 = vld [vmem:[%s15860_s1 + $0x364] ss:$24 sps:$4 sm:$0xff]   ;;  %v10336_v18 = vld [vmem:[%s15860_s1 + $0x360] ss:$24 sps:$4 sm:$0xff]   ;;  %v10344_v20 = vld [vmem:[%s15860_s1 + $0x394] ss:$24 sps:$4 sm:$0xff]  }
  0x1c   :  { %7382 = vmatpush1.bf16.msra.mxu0 %v10269_v27  ;;  %7125 = vmatprep.subr.bf16.mxu1 %v10270_v28  ;;  %v10341_v17 = vld [vmem:[%s15860_s1 + $0x1564] ss:$24 sps:$4 sm:$0xff]   ;;  %v10339_v19 = vld [vmem:[%s15860_s1 + $0x1560] ss:$24 sps:$4 sm:$0xff]   ;;  %v10347_v21 = vld [vmem:[%s15860_s1 + $0x1594] ss:$24 sps:$4 sm:$0xff]  }
  0x1d   :  { %7383 = vmatprep.subr.bf16.mxu0 %v10272_v29  ;;  %v10342_v22 = vld [vmem:[%s15860_s1 + $0x390] ss:$24 sps:$4 sm:$0xff]   ;;  %v10350_v24 = vld [vmem:[%s15860_s1 + $0x3c4] ss:$24 sps:$4 sm:$0xff]   ;;  %v10348_v26 = vld [vmem:[%s15860_s1 + $0x3c0] ss:$24 sps:$4 sm:$0xff]  }
  0x1e   :  { %v10345_v23 = vld [vmem:[%s15860_s1 + $0x1590] ss:$24 sps:$4 sm:$0xff]   ;;  %v10353_v25 = vld [vmem:[%s15860_s1 + $0x15c4] ss:$24 sps:$4 sm:$0xff]   ;;  %v10351_v27 = vld [vmem:[%s15860_s1 + $0x15c0] ss:$24 sps:$4 sm:$0xff]  }
  0x1f   :  { %7126 = vmatpush1.bf16.msra.mxu1 %v10274_v30  ;;  %v10356_v28 = vld [vmem:[%s15860_s1 + $0x3f4] ss:$24 sps:$4 sm:$0xff]   ;;  %v10354_v30 = vld [vmem:[%s15860_s1 + $0x3f0] ss:$24 sps:$4 sm:$0xff]   ;;  %v10372_v48 = vld [vmem:[%s15860_s1 + $0x480] ss:$24 sps:$4 sm:$0xff]  }
  0x20   :  { %7384 = vmatpush1.bf16.msra.mxu0 %v10275_v31  ;;  %7127 = vmatprep.subr.bf16.mxu1 %v10276_v32  ;;  %v10359_v29 = vld [vmem:[%s15860_s1 + $0x15f4] ss:$24 sps:$4 sm:$0xff]   ;;  %v10357_v31 = vld [vmem:[%s15860_s1 + $0x15f0] ss:$24 sps:$4 sm:$0xff]   ;;  %v10362_v32 = vld [vmem:[%s15860_s1 + $0x424] ss:$24 sps:$4 sm:$0xff]  }
  0x21   :  { %7385 = vmatprep.subr.bf16.mxu0 %v10278_v33  ;;  %v10365_v33 = vld [vmem:[%s15860_s1 + $0x1624] ss:$24 sps:$4 sm:$0xff]   ;;  %v10375_v49 = vld [vmem:[%s15860_s1 + $0x1680] ss:$24 sps:$4 sm:$0xff]   ;;  %v10378_v53 = vld [vmem:[%s15860_s1 + $0x4b0] ss:$24 sps:$4 sm:$0xff]  }
  0x22   :  { %v10381_v54 = vld [vmem:[%s15860_s1 + $0x16b0] ss:$24 sps:$4 sm:$0xff]  }
  0x23   :  { %7128 = vmatpush1.bf16.msra.mxu1 %v10280_v34  ;;  %v10360_v34 = vld [vmem:[%s15860_s1 + $0x420] ss:$24 sps:$4 sm:$0xff]  }
  0x24   :  { %7386 = vmatpush1.bf16.msra.mxu0 %v10281_v35  ;;  %7129 = vmatprep.subr.bf16.mxu1 %v10282_v36  ;;  %v10363_v35 = vld [vmem:[%s15860_s1 + $0x1620] ss:$24 sps:$4 sm:$0xff]   ;;  %v12299_v36 = vld [vmem:[%s15861_s0 + $0x8] sm:$0xff] }
  0x25   :  { %7387 = vmatprep.subr.bf16.mxu0 %v10284_v37  ;;  %v12304_v37 = vld [vmem:[%s15861_s0 + $0x68] sm:$0xff] }
  0x27   :  { %7130 = vmatpush1.bf16.msra.mxu1 %v10286_v38  ;;  %v10368_v38 = vld [vmem:[%s15860_s1 + $0x454] ss:$24 sps:$4 sm:$0xff]  }
  0x28   :  { %7388 = vmatpush1.bf16.msra.mxu0 %v10287_v39  ;;  %7131 = vmatprep.subr.bf16.mxu1 %v10288_v40  ;;  %v10371_v39 = vld [vmem:[%s15860_s1 + $0x1654] ss:$24 sps:$4 sm:$0xff]   ;;  %v12314_v40 = vcombine.high %v12299_v36, %v12304_v37 }
  0x29   :  { %7389 = vmatprep.subr.bf16.mxu0 %v10290_v41  ;;  %v12319_v41 = vld [vmem:[%s15861_s0 + $0x38] sm:$0xff] }
  0x2b   :  { %7132 = vmatpush1.bf16.msra.mxu1 %v10292_v42  ;;  %v12324_v42 = vld [vmem:[%s15861_s0 + $0x98] sm:$0xff] }
  0x2c   :  { %7390 = vmatpush1.bf16.msra.mxu0 %v10293_v43  ;;  %7133 = vmatprep.subr.bf16.mxu1 %v10294_v44  ;;  %v12329_v43 = vcombine.high %v12319_v41, %v12324_v42  ;;  %v10366_v44 = vld [vmem:[%s15860_s1 + $0x450] ss:$24 sps:$4 sm:$0xff]  }
  0x2d   :  { %7391 = vmatprep.subr.bf16.mxu0 %v10296_v45  ;;  %v10369_v45 = vld [vmem:[%s15860_s1 + $0x1650] ss:$24 sps:$4 sm:$0xff]  }
  0x2f   :  { %7134 = vmatpush1.bf16.msra.mxu1 %v10298_v46  ;;  %v10374_v46 = vld [vmem:[%s15860_s1 + $0x484] ss:$24 sps:$4 sm:$0xff]  }
  0x30   :  { %7392 = vmatpush1.bf16.msra.mxu0 %v10299_v47  ;;  %7135 = vmatprep.subr.bf16.mxu1 %v10300_v50  ;;  %v10377_v47 = vld [vmem:[%s15860_s1 + $0x1684] ss:$24 sps:$4 sm:$0xff]   ;;  %v10380_v50 = vld [vmem:[%s15860_s1 + $0x4b4] ss:$24 sps:$4 sm:$0xff]  }
  0x31   :  { %7393 = vmatprep.subr.bf16.mxu0 %v10302_v51  ;;  %v10383_v51 = vld [vmem:[%s15860_s1 + $0x16b4] ss:$24 sps:$4 sm:$0xff]  }
  0x33   :  { %7136 = vmatpush1.bf16.msra.mxu1 %v10304_v56  ;;  %v10386_v56 = vld [vmem:[%s15860_s1 + $0x4e4] ss:$24 sps:$4 sm:$0xff]  }
  0x34   :  { %7394 = vmatpush1.bf16.msra.mxu0 %v10305_v57  ;;  %7137 = vmatprep.subr.bf16.mxu1 %v10306_v58  ;;  %v10389_v57 = vld [vmem:[%s15860_s1 + $0x16e4] ss:$24 sps:$4 sm:$0xff]   ;;  %v10384_v58 = vld [vmem:[%s15860_s1 + $0x4e0] ss:$24 sps:$4 sm:$0xff]  }
  0x35   :  { %7395 = vmatprep.subr.bf16.mxu0 %v10308_v59  ;;  %v10387_v59 = vld [vmem:[%s15860_s1 + $0x16e0] ss:$24 sps:$4 sm:$0xff]  }
  0x37   :  { %7138 = vmatpush1.bf16.msra.mxu1 %v10310_v60  ;;  %v10392_v60 = vld [vmem:[%s15860_s1 + $0x514] ss:$24 sps:$4 sm:$0xff]  }
  0x38   :  { %7396 = vmatpush1.bf16.msra.mxu0 %v10311_v61  ;;  %7139 = vmatprep.subr.bf16.mxu1 %v10312_v62  ;;  %v10395_v61 = vld [vmem:[%s15860_s1 + $0x1714] ss:$24 sps:$4 sm:$0xff]   ;;  %v10390_v62 = vld [vmem:[%s15860_s1 + $0x510] ss:$24 sps:$4 sm:$0xff]  }
  0x39   :  { %7397 = vmatprep.subr.bf16.mxu0 %v10314_v63  ;;  %v10393_v63 = vld [vmem:[%s15860_s1 + $0x1710] ss:$24 sps:$4 sm:$0xff]  }
  0x3b   :  { %7140 = vmatpush1.bf16.msra.mxu1 %v10316_v0  ;;  %v10398_v0 = vld [vmem:[%s15860_s1 + $0x544] ss:$24 sps:$4 sm:$0xff]  }
  0x3c   :  { %7398 = vmatpush1.bf16.msra.mxu0 %v10317_v1  ;;  %7141 = vmatprep.subr.bf16.mxu1 %v10318_v2  ;;  %v10401_v1 = vld [vmem:[%s15860_s1 + $0x1744] ss:$24 sps:$4 sm:$0xff]   ;;  %v10396_v2 = vld [vmem:[%s15860_s1 + $0x540] ss:$24 sps:$4 sm:$0xff]  }
  0x3d   :  { %7399 = vmatprep.subr.bf16.mxu0 %v10320_v3  ;;  %v10399_v3 = vld [vmem:[%s15860_s1 + $0x1740] ss:$24 sps:$4 sm:$0xff]  }
  0x3f   :  { %7142 = vmatpush1.bf16.msra.mxu1 %v10322_v4  ;;  %v10404_v4 = vld [vmem:[%s15860_s1 + $0x574] ss:$24 sps:$4 sm:$0xff]  }
  0x40   :  { %7400 = vmatpush1.bf16.msra.mxu0 %v10323_v5  ;;  %7154 = vmatprep.subr.bf16.mxu1 %v10326_v6  ;;  %v10407_v5 = vld [vmem:[%s15860_s1 + $0x1774] ss:$24 sps:$4 sm:$0xff]   ;;  %v10402_v6 = vld [vmem:[%s15860_s1 + $0x570] ss:$24 sps:$4 sm:$0xff]  }
  0x41   :  { %7412 = vmatprep.subr.bf16.mxu0 %v10329_v7  ;;  %v10405_v7 = vld [vmem:[%s15860_s1 + $0x1770] ss:$24 sps:$4 sm:$0xff]  }
  0x42   :  { %7144 = vmatmul.mubr.bf16.vlgmr.msra.gmra.mrb[0].mxu1 %v12218_v10 }
  0x43   :  { %7402 = vmatmul.mubr.bf16.vlgmr.msra.gmra.mrb[0].mxu0 %v12220_v11  ;;  %7155 = vmatpush1.bf16.msra.mxu1 %v10324_v8  ;;  %v10410_v8 = vld [vmem:[%s15860_s1 + $0x5a4] ss:$24 sps:$4 sm:$0xff]  }
  0x44   :  { %7413 = vmatpush1.bf16.msra.mxu0 %v10327_v9  ;;  %7156 = vmatprep.subr.bf16.mxu1 %v10332_v12  ;;  %v10413_v9 = vld [vmem:[%s15860_s1 + $0x17a4] ss:$24 sps:$4 sm:$0xff]   ;;  %v10408_v12 = vld [vmem:[%s15860_s1 + $0x5a0] ss:$24 sps:$4 sm:$0xff]  }
  0x45   :  { %7414 = vmatprep.subr.bf16.mxu0 %v10335_v13  ;;  %7186 = vmatprep.mubr.bf16.mxu1 %v12314_v40  ;;  %v10411_v13 = vld [vmem:[%s15860_s1 + $0x17a0] ss:$24 sps:$4 sm:$0xff]  }
  0x46   :  { %7444 = vmatprep.mubr.bf16.mxu0 %v12329_v43 }
  0x47   :  { %7157 = vmatpush1.bf16.msra.mxu1 %v10330_v14  ;;  %v10416_v14 = vld [vmem:[%s15860_s1 + $0x5d4] ss:$24 sps:$4 sm:$0xff]  }
  0x48   :  { %7415 = vmatpush1.bf16.msra.mxu0 %v10333_v15  ;;  %7158 = vmatprep.subr.bf16.mxu1 %v10338_v16  ;;  %v10419_v15 = vld [vmem:[%s15860_s1 + $0x17d4] ss:$24 sps:$4 sm:$0xff]   ;;  %v10414_v16 = vld [vmem:[%s15860_s1 + $0x5d0] ss:$24 sps:$4 sm:$0xff]  }
  0x49   :  { %7416 = vmatprep.subr.bf16.mxu0 %v10341_v17  ;;  %v10417_v17 = vld [vmem:[%s15860_s1 + $0x17d0] ss:$24 sps:$4 sm:$0xff]  }
  0x4b   :  { %7159 = vmatpush1.bf16.msra.mxu1 %v10336_v18  ;;  %v10422_v18 = vld [vmem:[%s15860_s1 + $0x604] ss:$24 sps:$4 sm:$0xff]  }
  0x4c   :  { %7417 = vmatpush1.bf16.msra.mxu0 %v10339_v19  ;;  %7160 = vmatprep.subr.bf16.mxu1 %v10344_v20  ;;  %v10425_v19 = vld [vmem:[%s15860_s1 + $0x1804] ss:$24 sps:$4 sm:$0xff]   ;;  %v12442_v20 = vcombine.low %v12299_v36, %v12304_v37  ;;  %v10432_v36 = vld [vmem:[%s15860_s1 + $0x660] ss:$24 sps:$4 sm:$0xff]  }
  0x4d   :  { %7418 = vmatprep.subr.bf16.mxu0 %v10347_v21  ;;  %v10420_v21 = vld [vmem:[%s15860_s1 + $0x600] ss:$24 sps:$4 sm:$0xff]  }
  0x4e   :  { %v10435_v37 = vld [vmem:[%s15860_s1 + $0x1860] ss:$24 sps:$4 sm:$0xff]  }
  0x4f   :  { %7161 = vmatpush1.bf16.msra.mxu1 %v10342_v22  ;;  %v12449_v22 = vcombine.low %v12319_v41, %v12324_v42  ;;  %v10438_v41 = vld [vmem:[%s15860_s1 + $0x690] ss:$24 sps:$4 sm:$0xff]  }
  0x50   :  { %7419 = vmatpush1.bf16.msra.mxu0 %v10345_v23  ;;  %7162 = vmatprep.subr.bf16.mxu1 %v10350_v24  ;;  %v10423_v23 = vld [vmem:[%s15860_s1 + $0x1800] ss:$24 sps:$4 sm:$0xff]   ;;  %v10428_v24 = vld [vmem:[%s15860_s1 + $0x634] ss:$24 sps:$4 sm:$0xff]   ;;  %v10441_v42 = vld [vmem:[%s15860_s1 + $0x1890] ss:$24 sps:$4 sm:$0xff]  }
  0x51   :  { %7420 = vmatprep.subr.bf16.mxu0 %v10353_v25  ;;  %v10431_v25 = vld [vmem:[%s15860_s1 + $0x1834] ss:$24 sps:$4 sm:$0xff]  }
  0x53   :  { %7163 = vmatpush1.bf16.msra.mxu1 %v10348_v26  ;;  %v10426_v26 = vld [vmem:[%s15860_s1 + $0x630] ss:$24 sps:$4 sm:$0xff]  }
  0x54   :  { %7421 = vmatpush1.bf16.msra.mxu0 %v10351_v27  ;;  %7164 = vmatprep.subr.bf16.mxu1 %v10356_v28  ;;  %v10429_v27 = vld [vmem:[%s15860_s1 + $0x1830] ss:$24 sps:$4 sm:$0xff]  }
  0x55   :  { %7422 = vmatprep.subr.bf16.mxu0 %v10359_v29  ;;  %v12469_v28 = vld [vmem:[%s15861_s0 + $0x10] sm:$0xff] }
  0x56   :  { %v12476_v29 = vld [vmem:[%s15861_s0 + $0x70] sm:$0xff] }
  0x57   :  { %7165 = vmatpush1.bf16.msra.mxu1 %v10354_v30  ;;  %v10434_v30 = vld [vmem:[%s15860_s1 + $0x664] ss:$24 sps:$4 sm:$0xff]  }
  0x58   :  { %7423 = vmatpush1.bf16.msra.mxu0 %v10357_v31  ;;  %7166 = vmatprep.subr.bf16.mxu1 %v10362_v32  ;;  %v10437_v31 = vld [vmem:[%s15860_s1 + $0x1864] ss:$24 sps:$4 sm:$0xff]   ;;  %v12486_v32 = vcombine.high %v12469_v28, %v12476_v29 }
  0x59   :  { %7424 = vmatprep.subr.bf16.mxu0 %v10365_v33  ;;  %v12491_v33 = vld [vmem:[%s15861_s0 + $0x40] sm:$0xff] }
  0x5b   :  { %7167 = vmatpush1.bf16.msra.mxu1 %v10360_v34  ;;  %v12496_v34 = vld [vmem:[%s15861_s0 + $0xa0] sm:$0xff] }
  0x5c   :  { %7425 = vmatpush1.bf16.msra.mxu0 %v10363_v35  ;;  %7168 = vmatprep.subr.bf16.mxu1 %v10368_v38  ;;  %v12501_v35 = vcombine.high %v12491_v33, %v12496_v34  ;;  %v10440_v38 = vld [vmem:[%s15860_s1 + $0x694] ss:$24 sps:$4 sm:$0xff]  }
  0x5d   :  { %7426 = vmatprep.subr.bf16.mxu0 %v10371_v39  ;;  %v10443_v39 = vld [vmem:[%s15860_s1 + $0x1894] ss:$24 sps:$4 sm:$0xff]  }
  0x5f   :  { %7169 = vmatpush1.bf16.msra.mxu1 %v10366_v44  ;;  %v10446_v44 = vld [vmem:[%s15860_s1 + $0x6c4] ss:$24 sps:$4 sm:$0xff]  }
  0x60   :  { %7427 = vmatpush1.bf16.msra.mxu0 %v10369_v45  ;;  %7170 = vmatprep.subr.bf16.mxu1 %v10374_v46  ;;  %v10449_v45 = vld [vmem:[%s15860_s1 + $0x18c4] ss:$24 sps:$4 sm:$0xff]   ;;  %v10444_v46 = vld [vmem:[%s15860_s1 + $0x6c0] ss:$24 sps:$4 sm:$0xff]  }
  0x61   :  { %7428 = vmatprep.subr.bf16.mxu0 %v10377_v47  ;;  %v10447_v47 = vld [vmem:[%s15860_s1 + $0x18c0] ss:$24 sps:$4 sm:$0xff]  }
  0x63   :  { %7171 = vmatpush1.bf16.msra.mxu1 %v10372_v48  ;;  %v10452_v48 = vld [vmem:[%s15860_s1 + $0x6f4] ss:$24 sps:$4 sm:$0xff]  }
  0x64   :  { %7429 = vmatpush1.bf16.msra.mxu0 %v10375_v49  ;;  %7172 = vmatprep.subr.bf16.mxu1 %v10380_v50  ;;  %v10455_v49 = vld [vmem:[%s15860_s1 + $0x18f4] ss:$24 sps:$4 sm:$0xff]   ;;  %v10450_v50 = vld [vmem:[%s15860_s1 + $0x6f0] ss:$24 sps:$4 sm:$0xff]  }
  0x65   :  { %7430 = vmatprep.subr.bf16.mxu0 %v10383_v51  ;;  %v10453_v51 = vld [vmem:[%s15860_s1 + $0x18f0] ss:$24 sps:$4 sm:$0xff]  }
  0x67   :  { %7173 = vmatpush1.bf16.msra.mxu1 %v10378_v53  ;;  %v10458_v53 = vld [vmem:[%s15860_s1 + $0x724] ss:$24 sps:$4 sm:$0xff]  }
  0x68   :  { %7431 = vmatpush1.bf16.msra.mxu0 %v10381_v54  ;;  %7174 = vmatprep.subr.bf16.mxu1 %v10386_v56  ;;  %v10461_v54 = vld [vmem:[%s15860_s1 + $0x1924] ss:$24 sps:$4 sm:$0xff]   ;;  %v10456_v56 = vld [vmem:[%s15860_s1 + $0x720] ss:$24 sps:$4 sm:$0xff]  }
  0x69   :  { %7432 = vmatprep.subr.bf16.mxu0 %v10389_v57  ;;  %v10459_v57 = vld [vmem:[%s15860_s1 + $0x1920] ss:$24 sps:$4 sm:$0xff]  }
  0x6b   :  { %7175 = vmatpush1.bf16.msra.mxu1 %v10384_v58  ;;  %v10464_v58 = vld [vmem:[%s15860_s1 + $0x754] ss:$24 sps:$4 sm:$0xff]  }
  0x6c   :  { %7433 = vmatpush1.bf16.msra.mxu0 %v10387_v59  ;;  %7176 = vmatprep.subr.bf16.mxu1 %v10392_v60  ;;  %v10467_v59 = vld [vmem:[%s15860_s1 + $0x1954] ss:$24 sps:$4 sm:$0xff]   ;;  %v10462_v60 = vld [vmem:[%s15860_s1 + $0x750] ss:$24 sps:$4 sm:$0xff]  }
  0x6d   :  { %7434 = vmatprep.subr.bf16.mxu0 %v10395_v61  ;;  %v10465_v61 = vld [vmem:[%s15860_s1 + $0x1950] ss:$24 sps:$4 sm:$0xff]  }
  0x6f   :  { %7177 = vmatpush1.bf16.msra.mxu1 %v10390_v62  ;;  %v10470_v62 = vld [vmem:[%s15860_s1 + $0x784] ss:$24 sps:$4 sm:$0xff]  }
  0x70   :  { %7435 = vmatpush1.bf16.msra.mxu0 %v10393_v63  ;;  %7178 = vmatprep.subr.bf16.mxu1 %v10398_v0  ;;  %v10473_v63 = vld [vmem:[%s15860_s1 + $0x1984] ss:$24 sps:$4 sm:$0xff]   ;;  %v10468_v0 = vld [vmem:[%s15860_s1 + $0x780] ss:$24 sps:$4 sm:$0xff]  }
  0x71   :  { %7436 = vmatprep.subr.bf16.mxu0 %v10401_v1  ;;  %v10471_v1 = vld [vmem:[%s15860_s1 + $0x1980] ss:$24 sps:$4 sm:$0xff]  }
  0x73   :  { %7179 = vmatpush1.bf16.msra.mxu1 %v10396_v2  ;;  %v10476_v2 = vld [vmem:[%s15860_s1 + $0x7b4] ss:$24 sps:$4 sm:$0xff]  }
  0x74   :  { %7437 = vmatpush1.bf16.msra.mxu0 %v10399_v3  ;;  %7180 = vmatprep.subr.bf16.mxu1 %v10404_v4  ;;  %v10479_v3 = vld [vmem:[%s15860_s1 + $0x19b4] ss:$24 sps:$4 sm:$0xff]   ;;  %v10474_v4 = vld [vmem:[%s15860_s1 + $0x7b0] ss:$24 sps:$4 sm:$0xff]  }
  0x75   :  { %7438 = vmatprep.subr.bf16.mxu0 %v10407_v5  ;;  %v10477_v5 = vld [vmem:[%s15860_s1 + $0x19b0] ss:$24 sps:$4 sm:$0xff]  }
  0x77   :  { %7181 = vmatpush1.bf16.msra.mxu1 %v10402_v6  ;;  %v10482_v6 = vld [vmem:[%s15860_s1 + $0x7e4] ss:$24 sps:$4 sm:$0xff]  }
  0x78   :  { %7439 = vmatpush1.bf16.msra.mxu0 %v10405_v7  ;;  %7182 = vmatprep.subr.bf16.mxu1 %v10410_v8  ;;  %v10485_v7 = vld [vmem:[%s15860_s1 + $0x19e4] ss:$24 sps:$4 sm:$0xff]   ;;  %v10480_v8 = vld [vmem:[%s15860_s1 + $0x7e0] ss:$24 sps:$4 sm:$0xff]  }
  0x79   :  { %7440 = vmatprep.subr.bf16.mxu0 %v10413_v9  ;;  %v10483_v9 = vld [vmem:[%s15860_s1 + $0x19e0] ss:$24 sps:$4 sm:$0xff]  }
  0x7b   :  { %7183 = vmatpush1.bf16.msra.mxu1 %v10408_v12  ;;  %v10488_v12 = vld [vmem:[%s15860_s1 + $0x814] ss:$24 sps:$4 sm:$0xff]  }
  0x7c   :  { %7441 = vmatpush1.bf16.msra.mxu0 %v10411_v13  ;;  %7184 = vmatprep.subr.bf16.mxu1 %v10416_v14  ;;  %v10491_v13 = vld [vmem:[%s15860_s1 + $0x1a14] ss:$24 sps:$4 sm:$0xff]   ;;  %v10486_v14 = vld [vmem:[%s15860_s1 + $0x810] ss:$24 sps:$4 sm:$0xff]  }
  0x7d   :  { %7442 = vmatprep.subr.bf16.mxu0 %v10419_v15  ;;  %v10489_v15 = vld [vmem:[%s15860_s1 + $0x1a10] ss:$24 sps:$4 sm:$0xff]  }
  0x7f   :  { %7185 = vmatpush1.bf16.msra.mxu1 %v10414_v16  ;;  %v10494_v16 = vld [vmem:[%s15860_s1 + $0x844] ss:$24 sps:$4 sm:$0xff]  }
  0x80   :  { %7443 = vmatpush1.bf16.msra.mxu0 %v10417_v17  ;;  %7197 = vmatprep.subr.bf16.mxu1 %v10422_v18  ;;  %v10497_v17 = vld [vmem:[%s15860_s1 + $0x1a44] ss:$24 sps:$4 sm:$0xff]   ;;  %v10492_v18 = vld [vmem:[%s15860_s1 + $0x840] ss:$24 sps:$4 sm:$0xff]  }
  0x81   :  { %7455 = vmatprep.subr.bf16.mxu0 %v10425_v19  ;;  %v10495_v19 = vld [vmem:[%s15860_s1 + $0x1a40] ss:$24 sps:$4 sm:$0xff]  }
  0x82   :  { %7187 = vmatmul.mubr.bf16.vlgmr.msra.gmra.mrb[0].mxu1 %v12442_v20 }
  0x83   :  { %7445 = vmatmul.mubr.bf16.vlgmr.msra.gmra.mrb[0].mxu0 %v12449_v22  ;;  %7198 = vmatpush1.bf16.msra.mxu1 %v10420_v21  ;;  %v10500_v21 = vld [vmem:[%s15860_s1 + $0x874] ss:$24 sps:$4 sm:$0xff]  }
  0x84   :  { %7456 = vmatpush1.bf16.msra.mxu0 %v10423_v23  ;;  %7199 = vmatprep.subr.bf16.mxu1 %v10428_v24  ;;  %v10503_v23 = vld [vmem:[%s15860_s1 + $0x1a74] ss:$24 sps:$4 sm:$0xff]   ;;  %v10498_v24 = vld [vmem:[%s15860_s1 + $0x870] ss:$24 sps:$4 sm:$0xff]  }
  0x85   :  { %7457 = vmatprep.subr.bf16.mxu0 %v10431_v25  ;;  %7229 = vmatprep.mubr.bf16.mxu1 %v12486_v32  ;;  %v10501_v25 = vld [vmem:[%s15860_s1 + $0x1a70] ss:$24 sps:$4 sm:$0xff]  }
  0x86   :  { %7487 = vmatprep.mubr.bf16.mxu0 %v12501_v35 }
  0x87   :  { %7200 = vmatpush1.bf16.msra.mxu1 %v10426_v26  ;;  %v10506_v26 = vld [vmem:[%s15860_s1 + $0x8a4] ss:$24 sps:$4 sm:$0xff]  }
  0x88   :  { %7458 = vmatpush1.bf16.msra.mxu0 %v10429_v27  ;;  %7201 = vmatprep.subr.bf16.mxu1 %v10434_v30  ;;  %v10509_v27 = vld [vmem:[%s15860_s1 + $0x1aa4] ss:$24 sps:$4 sm:$0xff]   ;;  %v10504_v30 = vld [vmem:[%s15860_s1 + $0x8a0] ss:$24 sps:$4 sm:$0xff]  }
  0x89   :  { %7459 = vmatprep.subr.bf16.mxu0 %v10437_v31  ;;  %v10507_v31 = vld [vmem:[%s15860_s1 + $0x1aa0] ss:$24 sps:$4 sm:$0xff]  }
  0x8b   :  { %7202 = vmatpush1.bf16.msra.mxu1 %v10432_v36  ;;  %v10512_v36 = vld [vmem:[%s15860_s1 + $0x8d4] ss:$24 sps:$4 sm:$0xff]  }
  0x8c   :  { %7460 = vmatpush1.bf16.msra.mxu0 %v10435_v37  ;;  %7203 = vmatprep.subr.bf16.mxu1 %v10440_v38  ;;  %v10515_v37 = vld [vmem:[%s15860_s1 + $0x1ad4] ss:$24 sps:$4 sm:$0xff]   ;;  %v10510_v38 = vld [vmem:[%s15860_s1 + $0x8d0] ss:$24 sps:$4 sm:$0xff]  }
  0x8d   :  { %7461 = vmatprep.subr.bf16.mxu0 %v10443_v39  ;;  %v10513_v39 = vld [vmem:[%s15860_s1 + $0x1ad0] ss:$24 sps:$4 sm:$0xff]  }
  0x8f   :  { %7204 = vmatpush1.bf16.msra.mxu1 %v10438_v41  ;;  %v10518_v41 = vld [vmem:[%s15860_s1 + $0x904] ss:$24 sps:$4 sm:$0xff]  }
  0x90   :  { %7462 = vmatpush1.bf16.msra.mxu0 %v10441_v42  ;;  %7205 = vmatprep.subr.bf16.mxu1 %v10446_v44  ;;  %v10521_v42 = vld [vmem:[%s15860_s1 + $0x1b04] ss:$24 sps:$4 sm:$0xff]   ;;  %v10516_v44 = vld [vmem:[%s15860_s1 + $0x900] ss:$24 sps:$4 sm:$0xff]  }
  0x91   :  { %7463 = vmatprep.subr.bf16.mxu0 %v10449_v45  ;;  %v10519_v45 = vld [vmem:[%s15860_s1 + $0x1b00] ss:$24 sps:$4 sm:$0xff]  }
  0x93   :  { %7206 = vmatpush1.bf16.msra.mxu1 %v10444_v46  ;;  %v12681_v46 = vld [vmem:[%s15861_s0 + $0x18] sm:$0xff] }
  0x94   :  { %7464 = vmatpush1.bf16.msra.mxu0 %v10447_v47  ;;  %7207 = vmatprep.subr.bf16.mxu1 %v10452_v48  ;;  %v12686_v47 = vld [vmem:[%s15861_s0 + $0x78] sm:$0xff]  ;;  %v12690_v48 = vcombine.low %v12469_v28, %v12476_v29  ;;  %v10524_v28 = vld [vmem:[%s15860_s1 + $0x934] ss:$24 sps:$4 sm:$0xff]  }
  0x95   :  { %7465 = vmatprep.subr.bf16.mxu0 %v10455_v49  ;;  %v12694_v49 = vcombine.low %v12491_v33, %v12496_v34  ;;  %v10527_v29 = vld [vmem:[%s15860_s1 + $0x1b34] ss:$24 sps:$4 sm:$0xff]   ;;  %v12714_v33 = vcombine.high %v12681_v46, %v12686_v47 }
  0x97   :  { %7208 = vmatpush1.bf16.msra.mxu1 %v10450_v50  ;;  %v12699_v50 = vld [vmem:[%s15861_s0 + $0x48] sm:$0xff] }
  0x98   :  { %7466 = vmatpush1.bf16.msra.mxu0 %v10453_v51  ;;  %7209 = vmatprep.subr.bf16.mxu1 %v10458_v53  ;;  %v12704_v51 = vld [vmem:[%s15861_s0 + $0xa8] sm:$0xff] }
  0x99   :  { %7467 = vmatprep.subr.bf16.mxu0 %v10461_v54  ;;  %v12718_v34 = vcombine.high %v12699_v50, %v12704_v51  ;;  %v10522_v53 = vld [vmem:[%s15860_s1 + $0x930] ss:$24 sps:$4 sm:$0xff]  }
  0x9a   :  { %v10525_v54 = vld [vmem:[%s15860_s1 + $0x1b30] ss:$24 sps:$4 sm:$0xff]  }
  0x9b   :  { %7210 = vmatpush1.bf16.msra.mxu1 %v10456_v56  ;;  %v10530_v56 = vld [vmem:[%s15860_s1 + $0x964] ss:$24 sps:$4 sm:$0xff]  }
  0x9c   :  { %7468 = vmatpush1.bf16.msra.mxu0 %v10459_v57  ;;  %7211 = vmatprep.subr.bf16.mxu1 %v10464_v58  ;;  %v10533_v57 = vld [vmem:[%s15860_s1 + $0x1b64] ss:$24 sps:$4 sm:$0xff]   ;;  %v10528_v58 = vld [vmem:[%s15860_s1 + $0x960] ss:$24 sps:$4 sm:$0xff]  }
  0x9d   :  { %7469 = vmatprep.subr.bf16.mxu0 %v10467_v59  ;;  %v10531_v59 = vld [vmem:[%s15860_s1 + $0x1b60] ss:$24 sps:$4 sm:$0xff]  }
  0x9f   :  { %7212 = vmatpush1.bf16.msra.mxu1 %v10462_v60  ;;  %v10536_v60 = vld [vmem:[%s15860_s1 + $0x994] ss:$24 sps:$4 sm:$0xff]  }
  0xa0   :  { %7470 = vmatpush1.bf16.msra.mxu0 %v10465_v61  ;;  %7213 = vmatprep.subr.bf16.mxu1 %v10470_v62  ;;  %v10539_v61 = vld [vmem:[%s15860_s1 + $0x1b94] ss:$24 sps:$4 sm:$0xff]   ;;  %v10534_v62 = vld [vmem:[%s15860_s1 + $0x990] ss:$24 sps:$4 sm:$0xff]  }
  0xa1   :  { %7471 = vmatprep.subr.bf16.mxu0 %v10473_v63  ;;  %v10537_v63 = vld [vmem:[%s15860_s1 + $0x1b90] ss:$24 sps:$4 sm:$0xff]  }
  0xa3   :  { %7214 = vmatpush1.bf16.msra.mxu1 %v10468_v0  ;;  %v10542_v0 = vld [vmem:[%s15860_s1 + $0x9c4] ss:$24 sps:$4 sm:$0xff]  }
  0xa4   :  { %7472 = vmatpush1.bf16.msra.mxu0 %v10471_v1  ;;  %7215 = vmatprep.subr.bf16.mxu1 %v10476_v2  ;;  %v10545_v1 = vld [vmem:[%s15860_s1 + $0x1bc4] ss:$24 sps:$4 sm:$0xff]   ;;  %v10540_v2 = vld [vmem:[%s15860_s1 + $0x9c0] ss:$24 sps:$4 sm:$0xff]  }
  0xa5   :  { %7473 = vmatprep.subr.bf16.mxu0 %v10479_v3  ;;  %v10543_v3 = vld [vmem:[%s15860_s1 + $0x1bc0] ss:$24 sps:$4 sm:$0xff]  }
  0xa7   :  { %7216 = vmatpush1.bf16.msra.mxu1 %v10474_v4  ;;  %v10548_v4 = vld [vmem:[%s15860_s1 + $0x9f4] ss:$24 sps:$4 sm:$0xff]  }
  0xa8   :  { %7474 = vmatpush1.bf16.msra.mxu0 %v10477_v5  ;;  %7217 = vmatprep.subr.bf16.mxu1 %v10482_v6  ;;  %v10551_v5 = vld [vmem:[%s15860_s1 + $0x1bf4] ss:$24 sps:$4 sm:$0xff]   ;;  %v10546_v6 = vld [vmem:[%s15860_s1 + $0x9f0] ss:$24 sps:$4 sm:$0xff]  }
  0xa9   :  { %7475 = vmatprep.subr.bf16.mxu0 %v10485_v7  ;;  %v10549_v7 = vld [vmem:[%s15860_s1 + $0x1bf0] ss:$24 sps:$4 sm:$0xff]  }
  0xab   :  { %7218 = vmatpush1.bf16.msra.mxu1 %v10480_v8  ;;  %v10554_v8 = vld [vmem:[%s15860_s1 + $0xa24] ss:$24 sps:$4 sm:$0xff]  }
  0xac   :  { %7476 = vmatpush1.bf16.msra.mxu0 %v10483_v9  ;;  %7219 = vmatprep.subr.bf16.mxu1 %v10488_v12  ;;  %v10557_v9 = vld [vmem:[%s15860_s1 + $0x1c24] ss:$24 sps:$4 sm:$0xff]   ;;  %v10552_v12 = vld [vmem:[%s15860_s1 + $0xa20] ss:$24 sps:$4 sm:$0xff]  }
  0xad   :  { %7477 = vmatprep.subr.bf16.mxu0 %v10491_v13  ;;  %v10555_v13 = vld [vmem:[%s15860_s1 + $0x1c20] ss:$24 sps:$4 sm:$0xff]  }
  0xaf   :  { %7220 = vmatpush1.bf16.msra.mxu1 %v10486_v14  ;;  %v10560_v14 = vld [vmem:[%s15860_s1 + $0xa54] ss:$24 sps:$4 sm:$0xff]  }
  0xb0   :  { %7478 = vmatpush1.bf16.msra.mxu0 %v10489_v15  ;;  %7221 = vmatprep.subr.bf16.mxu1 %v10494_v16  ;;  %v10563_v15 = vld [vmem:[%s15860_s1 + $0x1c54] ss:$24 sps:$4 sm:$0xff]   ;;  %v10558_v16 = vld [vmem:[%s15860_s1 + $0xa50] ss:$24 sps:$4 sm:$0xff]  }
  0xb1   :  { %7479 = vmatprep.subr.bf16.mxu0 %v10497_v17  ;;  %v10561_v17 = vld [vmem:[%s15860_s1 + $0x1c50] ss:$24 sps:$4 sm:$0xff]  }
  0xb3   :  { %7222 = vmatpush1.bf16.msra.mxu1 %v10492_v18  ;;  %v10566_v18 = vld [vmem:[%s15860_s1 + $0xa84] ss:$24 sps:$4 sm:$0xff]  }
  0xb4   :  { %7480 = vmatpush1.bf16.msra.mxu0 %v10495_v19  ;;  %7223 = vmatprep.subr.bf16.mxu1 %v10500_v21  ;;  %v10569_v19 = vld [vmem:[%s15860_s1 + $0x1c84] ss:$24 sps:$4 sm:$0xff]   ;;  %v10564_v21 = vld [vmem:[%s15860_s1 + $0xa80] ss:$24 sps:$4 sm:$0xff]  }
  0xb5   :  { %7481 = vmatprep.subr.bf16.mxu0 %v10503_v23  ;;  %v10567_v23 = vld [vmem:[%s15860_s1 + $0x1c80] ss:$24 sps:$4 sm:$0xff]  }
  0xb7   :  { %7224 = vmatpush1.bf16.msra.mxu1 %v10498_v24  ;;  %v10572_v24 = vld [vmem:[%s15860_s1 + $0xab4] ss:$24 sps:$4 sm:$0xff]  }
  0xb8   :  { %7482 = vmatpush1.bf16.msra.mxu0 %v10501_v25  ;;  %7225 = vmatprep.subr.bf16.mxu1 %v10506_v26  ;;  %v10575_v25 = vld [vmem:[%s15860_s1 + $0x1cb4] ss:$24 sps:$4 sm:$0xff]   ;;  %v10570_v26 = vld [vmem:[%s15860_s1 + $0xab0] ss:$24 sps:$4 sm:$0xff]  }
  0xb9   :  { %7483 = vmatprep.subr.bf16.mxu0 %v10509_v27  ;;  %v10573_v27 = vld [vmem:[%s15860_s1 + $0x1cb0] ss:$24 sps:$4 sm:$0xff]  }
  0xbb   :  { %7226 = vmatpush1.bf16.msra.mxu1 %v10504_v30  ;;  %v10578_v30 = vld [vmem:[%s15860_s1 + $0xae4] ss:$24 sps:$4 sm:$0xff]  }
  0xbc   :  { %7484 = vmatpush1.bf16.msra.mxu0 %v10507_v31  ;;  %7227 = vmatprep.subr.bf16.mxu1 %v10512_v36  ;;  %v10581_v31 = vld [vmem:[%s15860_s1 + $0x1ce4] ss:$24 sps:$4 sm:$0xff]   ;;  %v10576_v36 = vld [vmem:[%s15860_s1 + $0xae0] ss:$24 sps:$4 sm:$0xff]  }
  0xbd   :  { %7485 = vmatprep.subr.bf16.mxu0 %v10515_v37  ;;  %v10579_v37 = vld [vmem:[%s15860_s1 + $0x1ce0] ss:$24 sps:$4 sm:$0xff]  }
  0xbf   :  { %7228 = vmatpush1.bf16.msra.mxu1 %v10510_v38  ;;  %v10584_v38 = vld [vmem:[%s15860_s1 + $0xb14] ss:$24 sps:$4 sm:$0xff]  }
  0xc0   :  { %7486 = vmatpush1.bf16.msra.mxu0 %v10513_v39  ;;  %7240 = vmatprep.subr.bf16.mxu1 %v10518_v41  ;;  %v10587_v39 = vld [vmem:[%s15860_s1 + $0x1d14] ss:$24 sps:$4 sm:$0xff]   ;;  %v10582_v41 = vld [vmem:[%s15860_s1 + $0xb10] ss:$24 sps:$4 sm:$0xff]  }
  0xc1   :  { %7498 = vmatprep.subr.bf16.mxu0 %v10521_v42  ;;  %v10585_v42 = vld [vmem:[%s15860_s1 + $0x1d10] ss:$24 sps:$4 sm:$0xff]  }
  0xc2   :  { %7230 = vmatmul.mubr.bf16.vlgmr.msra.gmra.mrb[0].mxu1 %v12690_v48 }
  0xc3   :  { %7488 = vmatmul.mubr.bf16.vlgmr.msra.gmra.mrb[0].mxu0 %v12694_v49  ;;  %7241 = vmatpush1.bf16.msra.mxu1 %v10516_v44  ;;  %v10590_v44 = vld [vmem:[%s15860_s1 + $0xb44] ss:$24 sps:$4 sm:$0xff]  }
  0xc4   :  { %7499 = vmatpush1.bf16.msra.mxu0 %v10519_v45  ;;  %7242 = vmatprep.subr.bf16.mxu1 %v10524_v28  ;;  %v10593_v45 = vld [vmem:[%s15860_s1 + $0x1d44] ss:$24 sps:$4 sm:$0xff]   ;;  %v10588_v28 = vld [vmem:[%s15860_s1 + $0xb40] ss:$24 sps:$4 sm:$0xff]  }
  0xc5   :  { %7500 = vmatprep.subr.bf16.mxu0 %v10527_v29  ;;  %7272 = vmatprep.mubr.bf16.mxu1 %v12714_v33  ;;  %v10591_v29 = vld [vmem:[%s15860_s1 + $0x1d40] ss:$24 sps:$4 sm:$0xff]  }
  0xc6   :  { %7530 = vmatprep.mubr.bf16.mxu0 %v12718_v34 }
  0xc7   :  { %7243 = vmatpush1.bf16.msra.mxu1 %v10522_v53  ;;  %v10596_v53 = vld [vmem:[%s15860_s1 + $0xb74] ss:$24 sps:$4 sm:$0xff]  }
  0xc8   :  { %7501 = vmatpush1.bf16.msra.mxu0 %v10525_v54  ;;  %7244 = vmatprep.subr.bf16.mxu1 %v10530_v56  ;;  %v10599_v54 = vld [vmem:[%s15860_s1 + $0x1d74] ss:$24 sps:$4 sm:$0xff]   ;;  %v10594_v56 = vld [vmem:[%s15860_s1 + $0xb70] ss:$24 sps:$4 sm:$0xff]  }
  0xc9   :  { %7502 = vmatprep.subr.bf16.mxu0 %v10533_v57  ;;  %v10597_v57 = vld [vmem:[%s15860_s1 + $0x1d70] ss:$24 sps:$4 sm:$0xff]  }
  0xcb   :  { %7245 = vmatpush1.bf16.msra.mxu1 %v10528_v58  ;;  %v10602_v58 = vld [vmem:[%s15860_s1 + $0xba4] ss:$24 sps:$4 sm:$0xff]  }
  0xcc   :  { %7503 = vmatpush1.bf16.msra.mxu0 %v10531_v59  ;;  %7246 = vmatprep.subr.bf16.mxu1 %v10536_v60  ;;  %v10605_v59 = vld [vmem:[%s15860_s1 + $0x1da4] ss:$24 sps:$4 sm:$0xff]   ;;  %v10600_v60 = vld [vmem:[%s15860_s1 + $0xba0] ss:$24 sps:$4 sm:$0xff]  }
  0xcd   :  { %7504 = vmatprep.subr.bf16.mxu0 %v10539_v61  ;;  %v10603_v61 = vld [vmem:[%s15860_s1 + $0x1da0] ss:$24 sps:$4 sm:$0xff]  }
  0xcf   :  { %7247 = vmatpush1.bf16.msra.mxu1 %v10534_v62  ;;  %v10608_v62 = vld [vmem:[%s15860_s1 + $0xbd4] ss:$24 sps:$4 sm:$0xff]  }
  0xd0   :  { %7505 = vmatpush1.bf16.msra.mxu0 %v10537_v63  ;;  %7248 = vmatprep.subr.bf16.mxu1 %v10542_v0  ;;  %v10611_v63 = vld [vmem:[%s15860_s1 + $0x1dd4] ss:$24 sps:$4 sm:$0xff]   ;;  %v10606_v0 = vld [vmem:[%s15860_s1 + $0xbd0] ss:$24 sps:$4 sm:$0xff]  }
  0xd1   :  { %7506 = vmatprep.subr.bf16.mxu0 %v10545_v1  ;;  %v10609_v1 = vld [vmem:[%s15860_s1 + $0x1dd0] ss:$24 sps:$4 sm:$0xff]  }
  0xd3   :  { %7249 = vmatpush1.bf16.msra.mxu1 %v10540_v2  ;;  %v10614_v2 = vld [vmem:[%s15860_s1 + $0xc04] ss:$24 sps:$4 sm:$0xff]  }
  0xd4   :  { %7507 = vmatpush1.bf16.msra.mxu0 %v10543_v3  ;;  %7250 = vmatprep.subr.bf16.mxu1 %v10548_v4  ;;  %v10617_v3 = vld [vmem:[%s15860_s1 + $0x1e04] ss:$24 sps:$4 sm:$0xff]   ;;  %v10612_v4 = vld [vmem:[%s15860_s1 + $0xc00] ss:$24 sps:$4 sm:$0xff]  }
  0xd5   :  { %7508 = vmatprep.subr.bf16.mxu0 %v10551_v5  ;;  %v10615_v5 = vld [vmem:[%s15860_s1 + $0x1e00] ss:$24 sps:$4 sm:$0xff]  }
  0xd7   :  { %7251 = vmatpush1.bf16.msra.mxu1 %v10546_v6  ;;  %v12913_v6 = vld [vmem:[%s15861_s0 + $0x20] sm:$0xff] }
  0xd8   :  { %7509 = vmatpush1.bf16.msra.mxu0 %v10549_v7  ;;  %7252 = vmatprep.subr.bf16.mxu1 %v10554_v8  ;;  %v12918_v7 = vld [vmem:[%s15861_s0 + $0x80] sm:$0xff]  ;;  %v12922_v8 = vcombine.low %v12681_v46, %v12686_v47  ;;  %v10620_v46 = vld [vmem:[%s15860_s1 + $0xc34] ss:$24 sps:$4 sm:$0xff]  }
  0xd9   :  { %7510 = vmatprep.subr.bf16.mxu0 %v10557_v9  ;;  %v12926_v9 = vcombine.low %v12699_v50, %v12704_v51  ;;  %v10623_v47 = vld [vmem:[%s15860_s1 + $0x1e34] ss:$24 sps:$4 sm:$0xff]   ;;  %v12946_v50 = vcombine.high %v12913_v6, %v12918_v7 }
  0xdb   :  { %7253 = vmatpush1.bf16.msra.mxu1 %v10552_v12  ;;  %v12931_v12 = vld [vmem:[%s15861_s0 + $0x50] sm:$0xff] }
  0xdc   :  { %7511 = vmatpush1.bf16.msra.mxu0 %v10555_v13  ;;  %7254 = vmatprep.subr.bf16.mxu1 %v10560_v14  ;;  %v12936_v13 = vld [vmem:[%s15861_s0 + $0xb0] sm:$0xff] }
  0xdd   :  { %7512 = vmatprep.subr.bf16.mxu0 %v10563_v15  ;;  %v12950_v51 = vcombine.high %v12931_v12, %v12936_v13  ;;  %v10618_v14 = vld [vmem:[%s15860_s1 + $0xc30] ss:$24 sps:$4 sm:$0xff]  }
  0xde   :  { %v10621_v15 = vld [vmem:[%s15860_s1 + $0x1e30] ss:$24 sps:$4 sm:$0xff]  }
  0xdf   :  { %7255 = vmatpush1.bf16.msra.mxu1 %v10558_v16  ;;  %v10626_v16 = vld [vmem:[%s15860_s1 + $0xc64] ss:$24 sps:$4 sm:$0xff]  }
  0xe0   :  { %7513 = vmatpush1.bf16.msra.mxu0 %v10561_v17  ;;  %7256 = vmatprep.subr.bf16.mxu1 %v10566_v18  ;;  %v10629_v17 = vld [vmem:[%s15860_s1 + $0x1e64] ss:$24 sps:$4 sm:$0xff]   ;;  %v10624_v18 = vld [vmem:[%s15860_s1 + $0xc60] ss:$24 sps:$4 sm:$0xff]  }
  0xe1   :  { %7514 = vmatprep.subr.bf16.mxu0 %v10569_v19  ;;  %v10627_v19 = vld [vmem:[%s15860_s1 + $0x1e60] ss:$24 sps:$4 sm:$0xff]  }
  0xe3   :  { %7257 = vmatpush1.bf16.msra.mxu1 %v10564_v21  ;;  %v10632_v21 = vld [vmem:[%s15860_s1 + $0xc94] ss:$24 sps:$4 sm:$0xff]  }
  0xe4   :  { %7515 = vmatpush1.bf16.msra.mxu0 %v10567_v23  ;;  %7258 = vmatprep.subr.bf16.mxu1 %v10572_v24  ;;  %v10635_v23 = vld [vmem:[%s15860_s1 + $0x1e94] ss:$24 sps:$4 sm:$0xff]   ;;  %v10630_v24 = vld [vmem:[%s15860_s1 + $0xc90] ss:$24 sps:$4 sm:$0xff]  }
  0xe5   :  { %7516 = vmatprep.subr.bf16.mxu0 %v10575_v25  ;;  %v10633_v25 = vld [vmem:[%s15860_s1 + $0x1e90] ss:$24 sps:$4 sm:$0xff]  }
  0xe7   :  { %7259 = vmatpush1.bf16.msra.mxu1 %v10570_v26  ;;  %v10638_v26 = vld [vmem:[%s15860_s1 + $0xcc4] ss:$24 sps:$4 sm:$0xff]  }
  0xe8   :  { %7517 = vmatpush1.bf16.msra.mxu0 %v10573_v27  ;;  %7260 = vmatprep.subr.bf16.mxu1 %v10578_v30  ;;  %v10641_v27 = vld [vmem:[%s15860_s1 + $0x1ec4] ss:$24 sps:$4 sm:$0xff]   ;;  %v10636_v30 = vld [vmem:[%s15860_s1 + $0xcc0] ss:$24 sps:$4 sm:$0xff]  }
  0xe9   :  { %7518 = vmatprep.subr.bf16.mxu0 %v10581_v31  ;;  %v10639_v31 = vld [vmem:[%s15860_s1 + $0x1ec0] ss:$24 sps:$4 sm:$0xff]  }
  0xeb   :  { %7261 = vmatpush1.bf16.msra.mxu1 %v10576_v36  ;;  %v10644_v36 = vld [vmem:[%s15860_s1 + $0xcf4] ss:$24 sps:$4 sm:$0xff]  }
  0xec   :  { %7519 = vmatpush1.bf16.msra.mxu0 %v10579_v37  ;;  %7262 = vmatprep.subr.bf16.mxu1 %v10584_v38  ;;  %v10647_v37 = vld [vmem:[%s15860_s1 + $0x1ef4] ss:$24 sps:$4 sm:$0xff]   ;;  %v10642_v38 = vld [vmem:[%s15860_s1 + $0xcf0] ss:$24 sps:$4 sm:$0xff]  }
  0xed   :  { %7520 = vmatprep.subr.bf16.mxu0 %v10587_v39  ;;  %v10645_v39 = vld [vmem:[%s15860_s1 + $0x1ef0] ss:$24 sps:$4 sm:$0xff]  }
  0xef   :  { %7263 = vmatpush1.bf16.msra.mxu1 %v10582_v41  ;;  %v10650_v41 = vld [vmem:[%s15860_s1 + $0xd24] ss:$24 sps:$4 sm:$0xff]  }
  0xf0   :  { %7521 = vmatpush1.bf16.msra.mxu0 %v10585_v42  ;;  %7264 = vmatprep.subr.bf16.mxu1 %v10590_v44  ;;  %v10653_v42 = vld [vmem:[%s15860_s1 + $0x1f24] ss:$24 sps:$4 sm:$0xff]   ;;  %v10648_v44 = vld [vmem:[%s15860_s1 + $0xd20] ss:$24 sps:$4 sm:$0xff]  }
  0xf1   :  { %7522 = vmatprep.subr.bf16.mxu0 %v10593_v45  ;;  %v10651_v45 = vld [vmem:[%s15860_s1 + $0x1f20] ss:$24 sps:$4 sm:$0xff]  }
  0xf3   :  { %7265 = vmatpush1.bf16.msra.mxu1 %v10588_v28  ;;  %v10656_v28 = vld [vmem:[%s15860_s1 + $0xd54] ss:$24 sps:$4 sm:$0xff]  }
  0xf4   :  { %7523 = vmatpush1.bf16.msra.mxu0 %v10591_v29  ;;  %7266 = vmatprep.subr.bf16.mxu1 %v10596_v53  ;;  %v10659_v29 = vld [vmem:[%s15860_s1 + $0x1f54] ss:$24 sps:$4 sm:$0xff]   ;;  %v10654_v53 = vld [vmem:[%s15860_s1 + $0xd50] ss:$24 sps:$4 sm:$0xff]  }
  0xf5   :  { %7524 = vmatprep.subr.bf16.mxu0 %v10599_v54  ;;  %v10657_v54 = vld [vmem:[%s15860_s1 + $0x1f50] ss:$24 sps:$4 sm:$0xff]  }
  0xf7   :  { %7267 = vmatpush1.bf16.msra.mxu1 %v10594_v56  ;;  %v10662_v56 = vld [vmem:[%s15860_s1 + $0xd84] ss:$24 sps:$4 sm:$0xff]  }
  0xf8   :  { %7525 = vmatpush1.bf16.msra.mxu0 %v10597_v57  ;;  %7268 = vmatprep.subr.bf16.mxu1 %v10602_v58  ;;  %v10665_v57 = vld [vmem:[%s15860_s1 + $0x1f84] ss:$24 sps:$4 sm:$0xff]   ;;  %v10660_v58 = vld [vmem:[%s15860_s1 + $0xd80] ss:$24 sps:$4 sm:$0xff]  }
  0xf9   :  { %7526 = vmatprep.subr.bf16.mxu0 %v10605_v59  ;;  %v10663_v59 = vld [vmem:[%s15860_s1 + $0x1f80] ss:$24 sps:$4 sm:$0xff]  }
  0xfb   :  { %7269 = vmatpush1.bf16.msra.mxu1 %v10600_v60  ;;  %v10668_v60 = vld [vmem:[%s15860_s1 + $0xdb4] ss:$24 sps:$4 sm:$0xff]  }
  0xfc   :  { %7527 = vmatpush1.bf16.msra.mxu0 %v10603_v61  ;;  %7270 = vmatprep.subr.bf16.mxu1 %v10608_v62  ;;  %v10671_v61 = vld [vmem:[%s15860_s1 + $0x1fb4] ss:$24 sps:$4 sm:$0xff]   ;;  %v10666_v62 = vld [vmem:[%s15860_s1 + $0xdb0] ss:$24 sps:$4 sm:$0xff]  }
  0xfd   :  { %7528 = vmatprep.subr.bf16.mxu0 %v10611_v63  ;;  %v10669_v63 = vld [vmem:[%s15860_s1 + $0x1fb0] ss:$24 sps:$4 sm:$0xff]  }
  0xff   :  { %7271 = vmatpush1.bf16.msra.mxu1 %v10606_v0  ;;  %v10674_v0 = vld [vmem:[%s15860_s1 + $0xde4] ss:$24 sps:$4 sm:$0xff]  }
 0x100   :  { %7529 = vmatpush1.bf16.msra.mxu0 %v10609_v1  ;;  %7283 = vmatprep.subr.bf16.mxu1 %v10614_v2  ;;  %v10677_v1 = vld [vmem:[%s15860_s1 + $0x1fe4] ss:$24 sps:$4 sm:$0xff]   ;;  %v10672_v2 = vld [vmem:[%s15860_s1 + $0xde0] ss:$24 sps:$4 sm:$0xff]  }
 0x101   :  { %7541 = vmatprep.subr.bf16.mxu0 %v10617_v3  ;;  %v10675_v3 = vld [vmem:[%s15860_s1 + $0x1fe0] ss:$24 sps:$4 sm:$0xff]  }
 0x102   :  { %7273 = vmatmul.mubr.bf16.vlgmr.msra.gmra.mrb[0].mxu1 %v12922_v8 }
 0x103   :  { %7531 = vmatmul.mubr.bf16.vlgmr.msra.gmra.mrb[0].mxu0 %v12926_v9  ;;  %7284 = vmatpush1.bf16.msra.mxu1 %v10612_v4  ;;  %v10680_v4 = vld [vmem:[%s15860_s1 + $0xe14] ss:$24 sps:$4 sm:$0xff]  }
 0x104   :  { %7542 = vmatpush1.bf16.msra.mxu0 %v10615_v5  ;;  %7285 = vmatprep.subr.bf16.mxu1 %v10620_v46  ;;  %v10683_v5 = vld [vmem:[%s15860_s1 + $0x2014] ss:$24 sps:$4 sm:$0xff]   ;;  %v10678_v46 = vld [vmem:[%s15860_s1 + $0xe10] ss:$24 sps:$4 sm:$0xff]  }
 0x105   :  { %7543 = vmatprep.subr.bf16.mxu0 %v10623_v47  ;;  %7315 = vmatprep.mubr.bf16.mxu1 %v12946_v50  ;;  %v10681_v47 = vld [vmem:[%s15860_s1 + $0x2010] ss:$24 sps:$4 sm:$0xff]  }
 0x106   :  { %7573 = vmatprep.mubr.bf16.mxu0 %v12950_v51 }
 0x107   :  { %7286 = vmatpush1.bf16.msra.mxu1 %v10618_v14  ;;  %v10686_v14 = vld [vmem:[%s15860_s1 + $0xe44] ss:$24 sps:$4 sm:$0xff]  }
 0x108   :  { %7544 = vmatpush1.bf16.msra.mxu0 %v10621_v15  ;;  %7287 = vmatprep.subr.bf16.mxu1 %v10626_v16  ;;  %v10689_v15 = vld [vmem:[%s15860_s1 + $0x2044] ss:$24 sps:$4 sm:$0xff]   ;;  %v10684_v16 = vld [vmem:[%s15860_s1 + $0xe40] ss:$24 sps:$4 sm:$0xff]  }
 0x109   :  { %7545 = vmatprep.subr.bf16.mxu0 %v10629_v17  ;;  %v10687_v17 = vld [vmem:[%s15860_s1 + $0x2040] ss:$24 sps:$4 sm:$0xff]  }
 0x10b   :  { %7288 = vmatpush1.bf16.msra.mxu1 %v10624_v18  ;;  %v10692_v18 = vld [vmem:[%s15860_s1 + $0xe74] ss:$24 sps:$4 sm:$0xff]  }
 0x10c   :  { %7546 = vmatpush1.bf16.msra.mxu0 %v10627_v19  ;;  %7289 = vmatprep.subr.bf16.mxu1 %v10632_v21  ;;  %v10695_v19 = vld [vmem:[%s15860_s1 + $0x2074] ss:$24 sps:$4 sm:$0xff]   ;;  %v10690_v21 = vld [vmem:[%s15860_s1 + $0xe70] ss:$24 sps:$4 sm:$0xff]  }
 0x10d   :  { %7547 = vmatprep.subr.bf16.mxu0 %v10635_v23  ;;  %v10693_v23 = vld [vmem:[%s15860_s1 + $0x2070] ss:$24 sps:$4 sm:$0xff]  }
 0x10f   :  { %7290 = vmatpush1.bf16.msra.mxu1 %v10630_v24  ;;  %v10698_v24 = vld [vmem:[%s15860_s1 + $0xea4] ss:$24 sps:$4 sm:$0xff]  }
 0x110   :  { %7548 = vmatpush1.bf16.msra.mxu0 %v10633_v25  ;;  %7291 = vmatprep.subr.bf16.mxu1 %v10638_v26  ;;  %v10701_v25 = vld [vmem:[%s15860_s1 + $0x20a4] ss:$24 sps:$4 sm:$0xff]   ;;  %v10696_v26 = vld [vmem:[%s15860_s1 + $0xea0] ss:$24 sps:$4 sm:$0xff]  }
 0x111   :  { %7549 = vmatprep.subr.bf16.mxu0 %v10641_v27  ;;  %v10699_v27 = vld [vmem:[%s15860_s1 + $0x20a0] ss:$24 sps:$4 sm:$0xff]  }
 0x113   :  { %7292 = vmatpush1.bf16.msra.mxu1 %v10636_v30  ;;  %v10704_v30 = vld [vmem:[%s15860_s1 + $0xed4] ss:$24 sps:$4 sm:$0xff]  }
 0x114   :  { %7550 = vmatpush1.bf16.msra.mxu0 %v10639_v31  ;;  %7293 = vmatprep.subr.bf16.mxu1 %v10644_v36  ;;  %v10707_v31 = vld [vmem:[%s15860_s1 + $0x20d4] ss:$24 sps:$4 sm:$0xff]   ;;  %v10702_v36 = vld [vmem:[%s15860_s1 + $0xed0] ss:$24 sps:$4 sm:$0xff]  }
 0x115   :  { %7551 = vmatprep.subr.bf16.mxu0 %v10647_v37  ;;  %v10705_v37 = vld [vmem:[%s15860_s1 + $0x20d0] ss:$24 sps:$4 sm:$0xff]  }
 0x117   :  { %7294 = vmatpush1.bf16.msra.mxu1 %v10642_v38  ;;  %v10710_v38 = vld [vmem:[%s15860_s1 + $0xf04] ss:$24 sps:$4 sm:$0xff]  }
 0x118   :  { %7552 = vmatpush1.bf16.msra.mxu0 %v10645_v39  ;;  %7295 = vmatprep.subr.bf16.mxu1 %v10650_v41  ;;  %v10713_v39 = vld [vmem:[%s15860_s1 + $0x2104] ss:$24 sps:$4 sm:$0xff]   ;;  %v13139_v41 = vld [vmem:[%s15861_s0 + $0x28] sm:$0xff] }
 0x119   :  { %7553 = vmatprep.subr.bf16.mxu0 %v10653_v42  ;;  %v13144_v42 = vld [vmem:[%s15861_s0 + $0x88] sm:$0xff] }
 0x11b   :  { %7296 = vmatpush1.bf16.msra.mxu1 %v10648_v44  ;;  %v13149_v44 = vld [vmem:[%s15861_s0 + $0x58] sm:$0xff] }
 0x11c   :  { %7554 = vmatpush1.bf16.msra.mxu0 %v10651_v45  ;;  %7297 = vmatprep.subr.bf16.mxu1 %v10656_v28  ;;  %v13154_v45 = vld [vmem:[%s15861_s0 + $0xb8] sm:$0xff]  ;;  %v13158_v28 = vcombine.low %v12913_v6, %v12918_v7  ;;  %v10716_v6 = vld [vmem:[%s15860_s1 + $0xf34] ss:$24 sps:$4 sm:$0xff]  }
 0x11d   :  { %7555 = vmatprep.subr.bf16.mxu0 %v10659_v29  ;;  %v13162_v29 = vcombine.low %v12931_v12, %v12936_v13  ;;  %v10719_v7 = vld [vmem:[%s15860_s1 + $0x2134] ss:$24 sps:$4 sm:$0xff]   ;;  %v13178_v12 = vcombine.high %v13139_v41, %v13144_v42  ;;  %v13182_v13 = vcombine.high %v13149_v44, %v13154_v45 }
 0x11f   :  { %7298 = vmatpush1.bf16.msra.mxu1 %v10654_v53  ;;  %v10708_v53 = vld [vmem:[%s15860_s1 + $0xf00] ss:$24 sps:$4 sm:$0xff]  }
 0x120   :  { %7556 = vmatpush1.bf16.msra.mxu0 %v10657_v54  ;;  %7299 = vmatprep.subr.bf16.mxu1 %v10662_v56  ;;  %v10711_v54 = vld [vmem:[%s15860_s1 + $0x2100] ss:$24 sps:$4 sm:$0xff]   ;;  %v10714_v56 = vld [vmem:[%s15860_s1 + $0xf30] ss:$24 sps:$4 sm:$0xff]  }
 0x121   :  { %7557 = vmatprep.subr.bf16.mxu0 %v10665_v57  ;;  %v10717_v57 = vld [vmem:[%s15860_s1 + $0x2130] ss:$24 sps:$4 sm:$0xff]  }
 0x123   :  { %7300 = vmatpush1.bf16.msra.mxu1 %v10660_v58  ;;  %v10722_v58 = vld [vmem:[%s15860_s1 + $0xf64] ss:$24 sps:$4 sm:$0xff]  }
 0x124   :  { %7558 = vmatpush1.bf16.msra.mxu0 %v10663_v59  ;;  %7301 = vmatprep.subr.bf16.mxu1 %v10668_v60  ;;  %v10725_v59 = vld [vmem:[%s15860_s1 + $0x2164] ss:$24 sps:$4 sm:$0xff]   ;;  %v10720_v60 = vld [vmem:[%s15860_s1 + $0xf60] ss:$24 sps:$4 sm:$0xff]  }
 0x125   :  { %7559 = vmatprep.subr.bf16.mxu0 %v10671_v61  ;;  %v10723_v61 = vld [vmem:[%s15860_s1 + $0x2160] ss:$24 sps:$4 sm:$0xff]  }
 0x127   :  { %7302 = vmatpush1.bf16.msra.mxu1 %v10666_v62  ;;  %v10728_v62 = vld [vmem:[%s15860_s1 + $0xf94] ss:$24 sps:$4 sm:$0xff]  }
 0x128   :  { %7560 = vmatpush1.bf16.msra.mxu0 %v10669_v63  ;;  %7303 = vmatprep.subr.bf16.mxu1 %v10674_v0  ;;  %v10731_v63 = vld [vmem:[%s15860_s1 + $0x2194] ss:$24 sps:$4 sm:$0xff]   ;;  %v10726_v0 = vld [vmem:[%s15860_s1 + $0xf90] ss:$24 sps:$4 sm:$0xff]  }
 0x129   :  { %7561 = vmatprep.subr.bf16.mxu0 %v10677_v1  ;;  %v10729_v1 = vld [vmem:[%s15860_s1 + $0x2190] ss:$24 sps:$4 sm:$0xff]  }
 0x12b   :  { %7304 = vmatpush1.bf16.msra.mxu1 %v10672_v2  ;;  %v10734_v2 = vld [vmem:[%s15860_s1 + $0xfc4] ss:$24 sps:$4 sm:$0xff]  }
 0x12c   :  { %7562 = vmatpush1.bf16.msra.mxu0 %v10675_v3  ;;  %7305 = vmatprep.subr.bf16.mxu1 %v10680_v4  ;;  %v10737_v3 = vld [vmem:[%s15860_s1 + $0x21c4] ss:$24 sps:$4 sm:$0xff]   ;;  %v10732_v4 = vld [vmem:[%s15860_s1 + $0xfc0] ss:$24 sps:$4 sm:$0xff]  }
 0x12d   :  { %7563 = vmatprep.subr.bf16.mxu0 %v10683_v5  ;;  %v10735_v5 = vld [vmem:[%s15860_s1 + $0x21c0] ss:$24 sps:$4 sm:$0xff]  }
 0x12f   :  { %7306 = vmatpush1.bf16.msra.mxu1 %v10678_v46  ;;  %v10740_v46 = vld [vmem:[%s15860_s1 + $0xff4] ss:$24 sps:$4 sm:$0xff]  }
 0x130   :  { %7564 = vmatpush1.bf16.msra.mxu0 %v10681_v47  ;;  %7307 = vmatprep.subr.bf16.mxu1 %v10686_v14  ;;  %v10743_v47 = vld [vmem:[%s15860_s1 + $0x21f4] ss:$24 sps:$4 sm:$0xff]   ;;  %v10738_v14 = vld [vmem:[%s15860_s1 + $0xff0] ss:$24 sps:$4 sm:$0xff]  }
 0x131   :  { %7565 = vmatprep.subr.bf16.mxu0 %v10689_v15  ;;  %v10741_v15 = vld [vmem:[%s15860_s1 + $0x21f0] ss:$24 sps:$4 sm:$0xff]  }
 0x133   :  { %7308 = vmatpush1.bf16.msra.mxu1 %v10684_v16  ;;  %v10746_v16 = vld [vmem:[%s15860_s1 + $0x1024] ss:$24 sps:$4 sm:$0xff]  }
 0x134   :  { %7566 = vmatpush1.bf16.msra.mxu0 %v10687_v17  ;;  %7309 = vmatprep.subr.bf16.mxu1 %v10692_v18  ;;  %v10749_v17 = vld [vmem:[%s15860_s1 + $0x2224] ss:$24 sps:$4 sm:$0xff]   ;;  %v10744_v18 = vld [vmem:[%s15860_s1 + $0x1020] ss:$24 sps:$4 sm:$0xff]  }
 0x135   :  { %7567 = vmatprep.subr.bf16.mxu0 %v10695_v19  ;;  %v10747_v19 = vld [vmem:[%s15860_s1 + $0x2220] ss:$24 sps:$4 sm:$0xff]  }
 0x137   :  { %7310 = vmatpush1.bf16.msra.mxu1 %v10690_v21  ;;  %v10752_v21 = vld [vmem:[%s15860_s1 + $0x1054] ss:$24 sps:$4 sm:$0xff]  }
 0x138   :  { %7568 = vmatpush1.bf16.msra.mxu0 %v10693_v23  ;;  %7311 = vmatprep.subr.bf16.mxu1 %v10698_v24  ;;  %v10755_v23 = vld [vmem:[%s15860_s1 + $0x2254] ss:$24 sps:$4 sm:$0xff]   ;;  %v10750_v24 = vld [vmem:[%s15860_s1 + $0x1050] ss:$24 sps:$4 sm:$0xff]  }
 0x139   :  { %7569 = vmatprep.subr.bf16.mxu0 %v10701_v25  ;;  %v10753_v25 = vld [vmem:[%s15860_s1 + $0x2250] ss:$24 sps:$4 sm:$0xff]  }
 0x13b   :  { %7312 = vmatpush1.bf16.msra.mxu1 %v10696_v26  ;;  %v10758_v26 = vld [vmem:[%s15860_s1 + $0x1084] ss:$24 sps:$4 sm:$0xff]  }
 0x13c   :  { %7570 = vmatpush1.bf16.msra.mxu0 %v10699_v27  ;;  %7313 = vmatprep.subr.bf16.mxu1 %v10704_v30  ;;  %v10761_v27 = vld [vmem:[%s15860_s1 + $0x2284] ss:$24 sps:$4 sm:$0xff]   ;;  %v10756_v30 = vld [vmem:[%s15860_s1 + $0x1080] ss:$24 sps:$4 sm:$0xff]  }
 0x13d   :  { %7571 = vmatprep.subr.bf16.mxu0 %v10707_v31  ;;  %v10759_v31 = vld [vmem:[%s15860_s1 + $0x2280] ss:$24 sps:$4 sm:$0xff]  }
 0x13f   :  { %7314 = vmatpush1.bf16.msra.mxu1 %v10702_v36  ;;  %v10764_v36 = vld [vmem:[%s15860_s1 + $0x10b4] ss:$24 sps:$4 sm:$0xff]  }
 0x140   :  { %7572 = vmatpush1.bf16.msra.mxu0 %v10705_v37  ;;  %7326 = vmatprep.subr.bf16.mxu1 %v10710_v38  ;;  %v10767_v37 = vld [vmem:[%s15860_s1 + $0x22b4] ss:$24 sps:$4 sm:$0xff]   ;;  %v10762_v38 = vld [vmem:[%s15860_s1 + $0x10b0] ss:$24 sps:$4 sm:$0xff]  }
 0x141   :  { %7584 = vmatprep.subr.bf16.mxu0 %v10713_v39  ;;  %v10765_v39 = vld [vmem:[%s15860_s1 + $0x22b0] ss:$24 sps:$4 sm:$0xff]  }
 0x142   :  { %7316 = vmatmul.mubr.bf16.vlgmr.msra.gmra.mrb[0].mxu1 %v13158_v28 }
 0x143   :  { %7574 = vmatmul.mubr.bf16.vlgmr.msra.gmra.mrb[0].mxu0 %v13162_v29  ;;  %7327 = vmatpush1.bf16.msra.mxu1 %v10708_v53  ;;  %v10770_v53 = vld [vmem:[%s15860_s1 + $0x10e4] ss:$24 sps:$4 sm:$0xff]  }
 0x144   :  { %7585 = vmatpush1.bf16.msra.mxu0 %v10711_v54  ;;  %7328 = vmatprep.subr.bf16.mxu1 %v10716_v6  ;;  %v10773_v54 = vld [vmem:[%s15860_s1 + $0x22e4] ss:$24 sps:$4 sm:$0xff]   ;;  %v10768_v6 = vld [vmem:[%s15860_s1 + $0x10e0] ss:$24 sps:$4 sm:$0xff]  }
 0x145   :  { %7586 = vmatprep.subr.bf16.mxu0 %v10719_v7  ;;  %7358 = vmatprep.mubr.bf16.mxu1 %v13178_v12  ;;  %v10771_v7 = vld [vmem:[%s15860_s1 + $0x22e0] ss:$24 sps:$4 sm:$0xff]  }
 0x146   :  { %7616 = vmatprep.mubr.bf16.mxu0 %v13182_v13 }
 0x147   :  { %7329 = vmatpush1.bf16.msra.mxu1 %v10714_v56  ;;  %v10776_v56 = vld [vmem:[%s15860_s1 + $0x1114] ss:$24 sps:$4 sm:$0xff]  }
 0x148   :  { %7587 = vmatpush1.bf16.msra.mxu0 %v10717_v57  ;;  %7330 = vmatprep.subr.bf16.mxu1 %v10722_v58  ;;  %v10779_v57 = vld [vmem:[%s15860_s1 + $0x2314] ss:$24 sps:$4 sm:$0xff]   ;;  %v10774_v58 = vld [vmem:[%s15860_s1 + $0x1110] ss:$24 sps:$4 sm:$0xff]  }
 0x149   :  { %7588 = vmatprep.subr.bf16.mxu0 %v10725_v59  ;;  %v10777_v59 = vld [vmem:[%s15860_s1 + $0x2310] ss:$24 sps:$4 sm:$0xff]  }
 0x14b   :  { %7331 = vmatpush1.bf16.msra.mxu1 %v10720_v60  ;;  %v10782_v60 = vld [vmem:[%s15860_s1 + $0x1144] ss:$24 sps:$4 sm:$0xff]  }
 0x14c   :  { %7589 = vmatpush1.bf16.msra.mxu0 %v10723_v61  ;;  %7332 = vmatprep.subr.bf16.mxu1 %v10728_v62  ;;  %v10785_v61 = vld [vmem:[%s15860_s1 + $0x2344] ss:$24 sps:$4 sm:$0xff]   ;;  %v10780_v62 = vld [vmem:[%s15860_s1 + $0x1140] ss:$24 sps:$4 sm:$0xff]  }
 0x14d   :  { %7590 = vmatprep.subr.bf16.mxu0 %v10731_v63  ;;  %v10783_v63 = vld [vmem:[%s15860_s1 + $0x2340] ss:$24 sps:$4 sm:$0xff]  }
 0x14f   :  { %7333 = vmatpush1.bf16.msra.mxu1 %v10726_v0  ;;  %v10788_v0 = vld [vmem:[%s15860_s1 + $0x1174] ss:$24 sps:$4 sm:$0xff]  }
 0x150   :  { %7591 = vmatpush1.bf16.msra.mxu0 %v10729_v1  ;;  %7334 = vmatprep.subr.bf16.mxu1 %v10734_v2  ;;  %v10791_v1 = vld [vmem:[%s15860_s1 + $0x2374] ss:$24 sps:$4 sm:$0xff]   ;;  %v10786_v2 = vld [vmem:[%s15860_s1 + $0x1170] ss:$24 sps:$4 sm:$0xff]  }
 0x151   :  { %7592 = vmatprep.subr.bf16.mxu0 %v10737_v3  ;;  %v10789_v3 = vld [vmem:[%s15860_s1 + $0x2370] ss:$24 sps:$4 sm:$0xff]  }
 0x153   :  { %7335 = vmatpush1.bf16.msra.mxu1 %v10732_v4  ;;  %v10794_v4 = vld [vmem:[%s15860_s1 + $0x11a4] ss:$24 sps:$4 sm:$0xff]  }
 0x154   :  { %7593 = vmatpush1.bf16.msra.mxu0 %v10735_v5  ;;  %7336 = vmatprep.subr.bf16.mxu1 %v10740_v46  ;;  %v10797_v5 = vld [vmem:[%s15860_s1 + $0x23a4] ss:$24 sps:$4 sm:$0xff]   ;;  %v10792_v46 = vld [vmem:[%s15860_s1 + $0x11a0] ss:$24 sps:$4 sm:$0xff]  }
 0x155   :  { %7594 = vmatprep.subr.bf16.mxu0 %v10743_v47  ;;  %v10795_v47 = vld [vmem:[%s15860_s1 + $0x23a0] ss:$24 sps:$4 sm:$0xff]  }
 0x157   :  { %7337 = vmatpush1.bf16.msra.mxu1 %v10738_v14  ;;  %v10800_v14 = vld [vmem:[%s15860_s1 + $0x11d4] ss:$24 sps:$4 sm:$0xff]  }
 0x158   :  { %7595 = vmatpush1.bf16.msra.mxu0 %v10741_v15  ;;  %7338 = vmatprep.subr.bf16.mxu1 %v10746_v16  ;;  %v10803_v15 = vld [vmem:[%s15860_s1 + $0x23d4] ss:$24 sps:$4 sm:$0xff]   ;;  %v10798_v16 = vld [vmem:[%s15860_s1 + $0x11d0] ss:$24 sps:$4 sm:$0xff]  }
 0x159   :  { %7596 = vmatprep.subr.bf16.mxu0 %v10749_v17  ;;  %v10801_v17 = vld [vmem:[%s15860_s1 + $0x23d0] ss:$24 sps:$4 sm:$0xff]  }
 0x15b   :  { %7339 = vmatpush1.bf16.msra.mxu1 %v10744_v18  ;;  %v10806_v18 = vld [vmem:[%s15860_s1 + $0xc] ss:$24 sps:$4 sm:$0xff]  }
 0x15c   :  { %7597 = vmatpush1.bf16.msra.mxu0 %v10747_v19  ;;  %7340 = vmatprep.subr.bf16.mxu1 %v10752_v21  ;;  %v10809_v19 = vld [vmem:[%s15860_s1 + $0x14] ss:$24 sps:$4 sm:$0xff]   ;;  %v13370_v21 = vcombine.low %v13139_v41, %v13144_v42  ;;  %v10815_v42 = vld [vmem:[%s15860_s1 + $0x44] ss:$24 sps:$4 sm:$0xff]  }
 0x15d   :  { %7598 = vmatprep.subr.bf16.mxu0 %v10755_v23  ;;  %v13374_v23 = vcombine.low %v13149_v44, %v13154_v45  ;;  %v10812_v41 = vld [vmem:[%s15860_s1 + $0x3c] ss:$24 sps:$4 sm:$0xff]   ;;  %v10810_v44 = vld [vmem:[%s15860_s1 + $0x38] ss:$24 sps:$4 sm:$0xff]  }
 0x15e   :  { %v10813_v45 = vld [vmem:[%s15860_s1 + $0x40] ss:$24 sps:$4 sm:$0xff]  }
 0x15f   :  { %7341 = vmatpush1.bf16.msra.mxu1 %v10750_v24  ;;  %v10804_v24 = vld [vmem:[%s15860_s1 + $0x8] ss:$24 sps:$4 sm:$0xff]  }
 0x160   :  { %7599 = vmatpush1.bf16.msra.mxu0 %v10753_v25  ;;  %7342 = vmatprep.subr.bf16.mxu1 %v10758_v26  ;;  %v10807_v25 = vld [vmem:[%s15860_s1 + $0x10] ss:$24 sps:$4 sm:$0xff]   ;;  %v10818_v26 = vld [vmem:[%s15860_s1 + $0x6c] ss:$24 sps:$4 sm:$0xff]  }
 0x161   :  { %7600 = vmatprep.subr.bf16.mxu0 %v10761_v27  ;;  %v10821_v27 = vld [vmem:[%s15860_s1 + $0x74] ss:$24 sps:$4 sm:$0xff]  }
 0x163   :  { %7343 = vmatpush1.bf16.msra.mxu1 %v10756_v30  ;;  %v10816_v30 = vld [vmem:[%s15860_s1 + $0x68] ss:$24 sps:$4 sm:$0xff]  }
 0x164   :  { %7601 = vmatpush1.bf16.msra.mxu0 %v10759_v31  ;;  %7344 = vmatprep.subr.bf16.mxu1 %v10764_v36  ;;  %v10819_v31 = vld [vmem:[%s15860_s1 + $0x70] ss:$24 sps:$4 sm:$0xff]   ;;  %v10824_v36 = vld [vmem:[%s15860_s1 + $0x9c] ss:$24 sps:$4 sm:$0xff]  }
 0x165   :  { %7602 = vmatprep.subr.bf16.mxu0 %v10767_v37  ;;  %v10822_v37 = vld [vmem:[%s15860_s1 + $0x98] ss:$24 sps:$4 sm:$0xff]  }
 0x167   :  { %7345 = vmatpush1.bf16.msra.mxu1 %v10762_v38  ;;  %v10825_v38 = vld [vmem:[%s15860_s1 + $0xa0] ss:$24 sps:$4 sm:$0xff]  }
 0x168   :  { %7603 = vmatpush1.bf16.msra.mxu0 %v10765_v39  ;;  %7346 = vmatprep.subr.bf16.mxu1 %v10770_v53  ;;  %v10830_v39 = vld [vmem:[%s15860_s1 + $0xcc] ss:$24 sps:$4 sm:$0xff]  }
 0x169   :  { %7604 = vmatprep.subr.bf16.mxu0 %v10773_v54  ;;  %v10833_v53 = vld [vmem:[%s15860_s1 + $0xd4] ss:$24 sps:$4 sm:$0xff]   ;;  %v10828_v54 = vld [vmem:[%s15860_s1 + $0xc8] ss:$24 sps:$4 sm:$0xff]  }
 0x16b   :  { %7347 = vmatpush1.bf16.msra.mxu1 %v10768_v6  ;;  %v10831_v6 = vld [vmem:[%s15860_s1 + $0xd0] ss:$24 sps:$4 sm:$0xff]  }
 0x16c   :  { %7605 = vmatpush1.bf16.msra.mxu0 %v10771_v7  ;;  %7348 = vmatprep.subr.bf16.mxu1 %v10776_v56  ;;  %v10836_v7 = vld [vmem:[%s15860_s1 + $0xfc] ss:$24 sps:$4 sm:$0xff]  }
 0x16d   :  { %7606 = vmatprep.subr.bf16.mxu0 %v10779_v57  ;;  %v10839_v56 = vld [vmem:[%s15860_s1 + $0x104] ss:$24 sps:$4 sm:$0xff]   ;;  %v10834_v57 = vld [vmem:[%s15860_s1 + $0xf8] ss:$24 sps:$4 sm:$0xff]  }
 0x16f   :  { %7349 = vmatpush1.bf16.msra.mxu1 %v10774_v58  ;;  %v10837_v58 = vld [vmem:[%s15860_s1 + $0x100] ss:$24 sps:$4 sm:$0xff]  }
 0x170   :  { %7607 = vmatpush1.bf16.msra.mxu0 %v10777_v59  ;;  %7350 = vmatprep.subr.bf16.mxu1 %v10782_v60  ;;  %v10842_v59 = vld [vmem:[%s15860_s1 + $0x12c] ss:$24 sps:$4 sm:$0xff]  }
 0x171   :  { %7608 = vmatprep.subr.bf16.mxu0 %v10785_v61  ;;  %v10845_v60 = vld [vmem:[%s15860_s1 + $0x134] ss:$24 sps:$4 sm:$0xff]   ;;  %v10840_v61 = vld [vmem:[%s15860_s1 + $0x128] ss:$24 sps:$4 sm:$0xff]  }
 0x173   :  { %7351 = vmatpush1.bf16.msra.mxu1 %v10780_v62  ;;  %v10843_v62 = vld [vmem:[%s15860_s1 + $0x130] ss:$24 sps:$4 sm:$0xff]  }
 0x174   :  { %7609 = vmatpush1.bf16.msra.mxu0 %v10783_v63  ;;  %7352 = vmatprep.subr.bf16.mxu1 %v10788_v0  ;;  %v10848_v63 = vld [vmem:[%s15860_s1 + $0x15c] ss:$24 sps:$4 sm:$0xff]  }
 0x175   :  { %7610 = vmatprep.subr.bf16.mxu0 %v10791_v1  ;;  %v10851_v0 = vld [vmem:[%s15860_s1 + $0x164] ss:$24 sps:$4 sm:$0xff]   ;;  %v10846_v1 = vld [vmem:[%s15860_s1 + $0x158] ss:$24 sps:$4 sm:$0xff]  }
 0x177   :  { %7353 = vmatpush1.bf16.msra.mxu1 %v10786_v2  ;;  %v10849_v2 = vld [vmem:[%s15860_s1 + $0x160] ss:$24 sps:$4 sm:$0xff]  }
 0x178   :  { %7611 = vmatpush1.bf16.msra.mxu0 %v10789_v3  ;;  %7354 = vmatprep.subr.bf16.mxu1 %v10794_v4  ;;  %v10854_v3 = vld [vmem:[%s15860_s1 + $0x18c] ss:$24 sps:$4 sm:$0xff]  }
 0x179   :  { %7612 = vmatprep.subr.bf16.mxu0 %v10797_v5  ;;  %v10857_v4 = vld [vmem:[%s15860_s1 + $0x194] ss:$24 sps:$4 sm:$0xff]   ;;  %v10852_v5 = vld [vmem:[%s15860_s1 + $0x188] ss:$24 sps:$4 sm:$0xff]  }
 0x17b   :  { %7355 = vmatpush1.bf16.msra.mxu1 %v10792_v46  ;;  %v10855_v46 = vld [vmem:[%s15860_s1 + $0x190] ss:$24 sps:$4 sm:$0xff]  }
 0x17c   :  { %7613 = vmatpush1.bf16.msra.mxu0 %v10795_v47  ;;  %7356 = vmatprep.subr.bf16.mxu1 %v10800_v14  ;;  %v10860_v47 = vld [vmem:[%s15860_s1 + $0x1bc] ss:$24 sps:$4 sm:$0xff]  }
 0x17d   :  { %7614 = vmatprep.subr.bf16.mxu0 %v10803_v15  ;;  %v10863_v14 = vld [vmem:[%s15860_s1 + $0x1c4] ss:$24 sps:$4 sm:$0xff]   ;;  %v10858_v15 = vld [vmem:[%s15860_s1 + $0x1b8] ss:$24 sps:$4 sm:$0xff]  }
 0x17f   :  { %7357 = vmatpush1.bf16.msra.mxu1 %v10798_v16  ;;  %v10861_v16 = vld [vmem:[%s15860_s1 + $0x1c0] ss:$24 sps:$4 sm:$0xff]  }
 0x180   :  { %7615 = vmatpush1.bf16.msra.mxu0 %v10801_v17  ;;  %7627 = vmatprep.subr.bf16.mxu1 %v10806_v18  ;;  %v10866_v17 = vld [vmem:[%s15860_s1 + $0x1ec] ss:$24 sps:$4 sm:$0xff]  }
 0x181   :  { %8143 = vmatprep.subr.bf16.mxu0 %v10809_v19  ;;  %v10869_v18 = vld [vmem:[%s15860_s1 + $0x1f4] ss:$24 sps:$4 sm:$0xff]   ;;  %v10864_v19 = vld [vmem:[%s15860_s1 + $0x1e8] ss:$24 sps:$4 sm:$0xff]  }
 0x182   :  { %7359 = vmatmul.mubr.bf16.vlgmr.msra.gmra.mrb[0].mxu1 %v13370_v21 }
 0x183   :  { %7617 = vmatmul.mubr.bf16.vlgmr.msra.gmra.mrb[0].mxu0 %v13374_v23  ;;  %7628 = vmatpush1.bf16.msra.mxu1 %v10804_v24  ;;  %v10867_v24 = vld [vmem:[%s15860_s1 + $0x1f0] ss:$24 sps:$4 sm:$0xff]  }
 0x184   :  { %8144 = vmatpush1.bf16.msra.mxu0 %v10807_v25  ;;  %7629 = vmatprep.subr.bf16.mxu1 %v10812_v41  ;;  %v10872_v25 = vld [vmem:[%s15860_s1 + $0x21c] ss:$24 sps:$4 sm:$0xff]  }
 0x185   :  { %8145 = vmatprep.subr.bf16.mxu0 %v10815_v42  ;;  %7659 = vmatprep.mubr.bf16.mxu1 %v12152_v52  ;;  %v10875_v41 = vld [vmem:[%s15860_s1 + $0x224] ss:$24 sps:$4 sm:$0xff]   ;;  %v10870_v42 = vld [vmem:[%s15860_s1 + $0x218] ss:$24 sps:$4 sm:$0xff]  }
 0x186   :  { %8175 = vmatprep.mubr.bf16.mxu0 %v12152_v52  ;;  %v10827_v52 = vld [vmem:[%s15860_s1 + $0xa4] ss:$24 sps:$4 sm:$0xff]  }
 0x187   :  { %7630 = vmatpush1.bf16.msra.mxu1 %v10810_v44  ;;  %v10873_v44 = vld [vmem:[%s15860_s1 + $0x220] ss:$24 sps:$4 sm:$0xff]  }
 0x188   :  { %8146 = vmatpush1.bf16.msra.mxu0 %v10813_v45  ;;  %7631 = vmatprep.subr.bf16.mxu1 %v10818_v26  ;;  %v10878_v45 = vld [vmem:[%s15860_s1 + $0x24c] ss:$24 sps:$4 sm:$0xff]  }
 0x189   :  { %8147 = vmatprep.subr.bf16.mxu0 %v10821_v27  ;;  %v10881_v26 = vld [vmem:[%s15860_s1 + $0x254] ss:$24 sps:$4 sm:$0xff]   ;;  %v10876_v27 = vld [vmem:[%s15860_s1 + $0x248] ss:$24 sps:$4 sm:$0xff]  }
 0x18b   :  { %7632 = vmatpush1.bf16.msra.mxu1 %v10816_v30  ;;  %v10879_v30 = vld [vmem:[%s15860_s1 + $0x250] ss:$24 sps:$4 sm:$0xff]  }
 0x18c   :  { %8148 = vmatpush1.bf16.msra.mxu0 %v10819_v31  ;;  %7633 = vmatprep.subr.bf16.mxu1 %v10824_v36  ;;  %v10884_v31 = vld [vmem:[%s15860_s1 + $0x27c] ss:$24 sps:$4 sm:$0xff]  }
 0x18d   :  { %8149 = vmatprep.subr.bf16.mxu0 %v10827_v52  ;;  %v10887_v36 = vld [vmem:[%s15860_s1 + $0x284] ss:$24 sps:$4 sm:$0xff]   ;;  %v10882_v52 = vld [vmem:[%s15860_s1 + $0x278] ss:$24 sps:$4 sm:$0xff]  }
 0x18f   :  { %7634 = vmatpush1.bf16.msra.mxu1 %v10822_v37  ;;  %v10885_v37 = vld [vmem:[%s15860_s1 + $0x280] ss:$24 sps:$4 sm:$0xff]  }
 0x190   :  { %8150 = vmatpush1.bf16.msra.mxu0 %v10825_v38  ;;  %7635 = vmatprep.subr.bf16.mxu1 %v10830_v39  ;;  %v10890_v38 = vld [vmem:[%s15860_s1 + $0x2ac] ss:$24 sps:$4 sm:$0xff]  }
 0x191   :  { %8151 = vmatprep.subr.bf16.mxu0 %v10833_v53  ;;  %v10893_v39 = vld [vmem:[%s15860_s1 + $0x2b4] ss:$24 sps:$4 sm:$0xff]   ;;  %v10888_v53 = vld [vmem:[%s15860_s1 + $0x2a8] ss:$24 sps:$4 sm:$0xff]  }
 0x193   :  { %7636 = vmatpush1.bf16.msra.mxu1 %v10828_v54  ;;  %v10891_v54 = vld [vmem:[%s15860_s1 + $0x2b0] ss:$24 sps:$4 sm:$0xff]  }
 0x194   :  { %8152 = vmatpush1.bf16.msra.mxu0 %v10831_v6  ;;  %7637 = vmatprep.subr.bf16.mxu1 %v10836_v7  ;;  %v10896_v6 = vld [vmem:[%s15860_s1 + $0x2dc] ss:$24 sps:$4 sm:$0xff]  }
 0x195   :  { %8153 = vmatprep.subr.bf16.mxu0 %v10839_v56  ;;  %v10899_v7 = vld [vmem:[%s15860_s1 + $0x2e4] ss:$24 sps:$4 sm:$0xff]   ;;  %v10894_v56 = vld [vmem:[%s15860_s1 + $0x2d8] ss:$24 sps:$4 sm:$0xff]  }
 0x197   :  { %7638 = vmatpush1.bf16.msra.mxu1 %v10834_v57  ;;  %v10897_v57 = vld [vmem:[%s15860_s1 + $0x2e0] ss:$24 sps:$4 sm:$0xff]  }
 0x198   :  { %8154 = vmatpush1.bf16.msra.mxu0 %v10837_v58  ;;  %7639 = vmatprep.subr.bf16.mxu1 %v10842_v59  ;;  %v10902_v58 = vld [vmem:[%s15860_s1 + $0x30c] ss:$24 sps:$4 sm:$0xff]  }
 0x199   :  { %8155 = vmatprep.subr.bf16.mxu0 %v10845_v60  ;;  %v10905_v59 = vld [vmem:[%s15860_s1 + $0x314] ss:$24 sps:$4 sm:$0xff]   ;;  %v10900_v60 = vld [vmem:[%s15860_s1 + $0x308] ss:$24 sps:$4 sm:$0xff]  }
 0x19b   :  { %7640 = vmatpush1.bf16.msra.mxu1 %v10840_v61  ;;  %v10903_v61 = vld [vmem:[%s15860_s1 + $0x310] ss:$24 sps:$4 sm:$0xff]  }
 0x19c   :  { %8156 = vmatpush1.bf16.msra.mxu0 %v10843_v62  ;;  %7641 = vmatprep.subr.bf16.mxu1 %v10848_v63  ;;  %v10908_v62 = vld [vmem:[%s15860_s1 + $0x33c] ss:$24 sps:$4 sm:$0xff]  }
 0x19d   :  { %8157 = vmatprep.subr.bf16.mxu0 %v10851_v0  ;;  %v10911_v63 = vld [vmem:[%s15860_s1 + $0x344] ss:$24 sps:$4 sm:$0xff]   ;;  %v10906_v0 = vld [vmem:[%s15860_s1 + $0x338] ss:$24 sps:$4 sm:$0xff]  }
 0x19f   :  { %7642 = vmatpush1.bf16.msra.mxu1 %v10846_v1  ;;  %v10909_v1 = vld [vmem:[%s15860_s1 + $0x340] ss:$24 sps:$4 sm:$0xff]  }
 0x1a0   :  { %8158 = vmatpush1.bf16.msra.mxu0 %v10849_v2  ;;  %7643 = vmatprep.subr.bf16.mxu1 %v10854_v3  ;;  %v10914_v2 = vld [vmem:[%s15860_s1 + $0x36c] ss:$24 sps:$4 sm:$0xff]   ;;  %v10912_v3 = vld [vmem:[%s15860_s1 + $0x368] ss:$24 sps:$4 sm:$0xff]  }
 0x1a1   :  { %8159 = vmatprep.subr.bf16.mxu0 %v10857_v4  ;;  %v10915_v4 = vld [vmem:[%s15860_s1 + $0x370] ss:$24 sps:$4 sm:$0xff]  }
 0x1a3   :  { %7644 = vmatpush1.bf16.msra.mxu1 %v10852_v5  ;;  %v10920_v5 = vld [vmem:[%s15860_s1 + $0x39c] ss:$24 sps:$4 sm:$0xff]  }
 0x1a4   :  { %8160 = vmatpush1.bf16.msra.mxu0 %v10855_v46  ;;  %7645 = vmatprep.subr.bf16.mxu1 %v10860_v47  ;;  %v10918_v46 = vld [vmem:[%s15860_s1 + $0x398] ss:$24 sps:$4 sm:$0xff]  }
 0x1a5   :  { %8161 = vmatprep.subr.bf16.mxu0 %v10863_v14  ;;  %v10921_v47 = vld [vmem:[%s15860_s1 + $0x3a0] ss:$24 sps:$4 sm:$0xff]   ;;  %v10926_v14 = vld [vmem:[%s15860_s1 + $0x3cc] ss:$24 sps:$4 sm:$0xff]  }
 0x1a7   :  { %7646 = vmatpush1.bf16.msra.mxu1 %v10858_v15  ;;  %v10929_v15 = vld [vmem:[%s15860_s1 + $0x3d4] ss:$24 sps:$4 sm:$0xff]  }
 0x1a8   :  { %8162 = vmatpush1.bf16.msra.mxu0 %v10861_v16  ;;  %7647 = vmatprep.subr.bf16.mxu1 %v10866_v17  ;;  %v10924_v16 = vld [vmem:[%s15860_s1 + $0x3c8] ss:$24 sps:$4 sm:$0xff]  }
 0x1a9   :  { %8163 = vmatprep.subr.bf16.mxu0 %v10869_v18  ;;  %v10927_v17 = vld [vmem:[%s15860_s1 + $0x3d0] ss:$24 sps:$4 sm:$0xff]   ;;  %v10932_v18 = vld [vmem:[%s15860_s1 + $0x3fc] ss:$24 sps:$4 sm:$0xff]  }
 0x1ab   :  { %7648 = vmatpush1.bf16.msra.mxu1 %v10864_v19  ;;  %v10935_v19 = vld [vmem:[%s15860_s1 + $0x404] ss:$24 sps:$4 sm:$0xff]  }
 0x1ac   :  { %8164 = vmatpush1.bf16.msra.mxu0 %v10867_v24  ;;  %7649 = vmatprep.subr.bf16.mxu1 %v10872_v25  ;;  %v10930_v24 = vld [vmem:[%s15860_s1 + $0x3f8] ss:$24 sps:$4 sm:$0xff]  }
 0x1ad   :  { %8165 = vmatprep.subr.bf16.mxu0 %v10875_v41  ;;  %v10933_v25 = vld [vmem:[%s15860_s1 + $0x400] ss:$24 sps:$4 sm:$0xff]   ;;  %v10938_v41 = vld [vmem:[%s15860_s1 + $0x42c] ss:$24 sps:$4 sm:$0xff]  }
 0x1af   :  { %7650 = vmatpush1.bf16.msra.mxu1 %v10870_v42  ;;  %v10941_v42 = vld [vmem:[%s15860_s1 + $0x434] ss:$24 sps:$4 sm:$0xff]  }
 0x1b0   :  { %8166 = vmatpush1.bf16.msra.mxu0 %v10873_v44  ;;  %7651 = vmatprep.subr.bf16.mxu1 %v10878_v45  ;;  %v10936_v44 = vld [vmem:[%s15860_s1 + $0x428] ss:$24 sps:$4 sm:$0xff]  }
 0x1b1   :  { %8167 = vmatprep.subr.bf16.mxu0 %v10881_v26  ;;  %v10939_v45 = vld [vmem:[%s15860_s1 + $0x430] ss:$24 sps:$4 sm:$0xff]   ;;  %v10944_v26 = vld [vmem:[%s15860_s1 + $0x45c] ss:$24 sps:$4 sm:$0xff]  }
 0x1b3   :  { %7652 = vmatpush1.bf16.msra.mxu1 %v10876_v27  ;;  %v10947_v27 = vld [vmem:[%s15860_s1 + $0x464] ss:$24 sps:$4 sm:$0xff]  }
 0x1b4   :  { %8168 = vmatpush1.bf16.msra.mxu0 %v10879_v30  ;;  %7653 = vmatprep.subr.bf16.mxu1 %v10884_v31  ;;  %v10942_v30 = vld [vmem:[%s15860_s1 + $0x458] ss:$24 sps:$4 sm:$0xff]  }
 0x1b5   :  { %8169 = vmatprep.subr.bf16.mxu0 %v10887_v36  ;;  %v10945_v31 = vld [vmem:[%s15860_s1 + $0x460] ss:$24 sps:$4 sm:$0xff]   ;;  %v10950_v36 = vld [vmem:[%s15860_s1 + $0x48c] ss:$24 sps:$4 sm:$0xff]  }
 0x1b7   :  { %7654 = vmatpush1.bf16.msra.mxu1 %v10882_v52  ;;  %v10953_v52 = vld [vmem:[%s15860_s1 + $0x494] ss:$24 sps:$4 sm:$0xff]  }
 0x1b8   :  { %8170 = vmatpush1.bf16.msra.mxu0 %v10885_v37  ;;  %7655 = vmatprep.subr.bf16.mxu1 %v10890_v38  ;;  %v10948_v37 = vld [vmem:[%s15860_s1 + $0x488] ss:$24 sps:$4 sm:$0xff]  }
 0x1b9   :  { %8171 = vmatprep.subr.bf16.mxu0 %v10893_v39  ;;  %v10951_v38 = vld [vmem:[%s15860_s1 + $0x490] ss:$24 sps:$4 sm:$0xff]   ;;  %v10956_v39 = vld [vmem:[%s15860_s1 + $0x4bc] ss:$24 sps:$4 sm:$0xff]  }
 0x1bb   :  { %7656 = vmatpush1.bf16.msra.mxu1 %v10888_v53  ;;  %v10959_v53 = vld [vmem:[%s15860_s1 + $0x4c4] ss:$24 sps:$4 sm:$0xff]  }
 0x1bc   :  { %8172 = vmatpush1.bf16.msra.mxu0 %v10891_v54  ;;  %7657 = vmatprep.subr.bf16.mxu1 %v10896_v6  ;;  %v10954_v54 = vld [vmem:[%s15860_s1 + $0x4b8] ss:$24 sps:$4 sm:$0xff]  }
 0x1bd   :  { %8173 = vmatprep.subr.bf16.mxu0 %v10899_v7  ;;  %v10957_v6 = vld [vmem:[%s15860_s1 + $0x4c0] ss:$24 sps:$4 sm:$0xff]   ;;  %v10962_v7 = vld [vmem:[%s15860_s1 + $0x4ec] ss:$24 sps:$4 sm:$0xff]  }
 0x1bf   :  { %7658 = vmatpush1.bf16.msra.mxu1 %v10894_v56  ;;  %v10965_v56 = vld [vmem:[%s15860_s1 + $0x4f4] ss:$24 sps:$4 sm:$0xff]  }
 0x1c0   :  { %8174 = vmatpush1.bf16.msra.mxu0 %v10897_v57  ;;  %7670 = vmatprep.subr.bf16.mxu1 %v10902_v58  ;;  %v10960_v57 = vld [vmem:[%s15860_s1 + $0x4e8] ss:$24 sps:$4 sm:$0xff]  }
 0x1c1   :  { %8186 = vmatprep.subr.bf16.mxu0 %v10905_v59  ;;  %v10963_v58 = vld [vmem:[%s15860_s1 + $0x4f0] ss:$24 sps:$4 sm:$0xff]   ;;  %v10968_v59 = vld [vmem:[%s15860_s1 + $0x51c] ss:$24 sps:$4 sm:$0xff]  }
 0x1c2   :  { %7660 = vmatmul.mubr.bf16.vlgmr.msra.gmra.mrb[4].mxu1 %v12218_v10 }
 0x1c3   :  { %8176 = vmatmul.mubr.bf16.vlgmr.msra.gmra.mrb[4].mxu0 %v12218_v10  ;;  %7671 = vmatpush1.bf16.msra.mxu1 %v10900_v60  ;;  %v10917_v10 = vld [vmem:[%s15860_s1 + $0x374] ss:$24 sps:$4 sm:$0xff]   ;;  %v10971_v60 = vld [vmem:[%s15860_s1 + $0x524] ss:$24 sps:$4 sm:$0xff]  }
 0x1c4   :  { %8187 = vmatpush1.bf16.msra.mxu0 %v10903_v61  ;;  %7672 = vmatprep.subr.bf16.mxu1 %v10908_v62  ;;  %v10966_v61 = vld [vmem:[%s15860_s1 + $0x518] ss:$24 sps:$4 sm:$0xff]  }
 0x1c5   :  { %8188 = vmatprep.subr.bf16.mxu0 %v10911_v63  ;;  %7702 = vmatprep.mubr.bf16.mxu1 %v12314_v40  ;;  %v10969_v62 = vld [vmem:[%s15860_s1 + $0x520] ss:$24 sps:$4 sm:$0xff]   ;;  %v10974_v63 = vld [vmem:[%s15860_s1 + $0x54c] ss:$24 sps:$4 sm:$0xff]  }
 0x1c6   :  { %8218 = vmatprep.mubr.bf16.mxu0 %v12314_v40  ;;  %v10923_v40 = vld [vmem:[%s15860_s1 + $0x3a4] ss:$24 sps:$4 sm:$0xff]  }
 0x1c7   :  { %7673 = vmatpush1.bf16.msra.mxu1 %v10906_v0  ;;  %v10977_v0 = vld [vmem:[%s15860_s1 + $0x554] ss:$24 sps:$4 sm:$0xff]  }
 0x1c8   :  { %8189 = vmatpush1.bf16.msra.mxu0 %v10909_v1  ;;  %7674 = vmatprep.subr.bf16.mxu1 %v10914_v2  ;;  %v10972_v1 = vld [vmem:[%s15860_s1 + $0x548] ss:$24 sps:$4 sm:$0xff]  }
 0x1c9   :  { %8190 = vmatprep.subr.bf16.mxu0 %v10917_v10  ;;  %v10975_v2 = vld [vmem:[%s15860_s1 + $0x550] ss:$24 sps:$4 sm:$0xff]   ;;  %v10980_v10 = vld [vmem:[%s15860_s1 + $0x57c] ss:$24 sps:$4 sm:$0xff]  }
 0x1cb   :  { %7675 = vmatpush1.bf16.msra.mxu1 %v10912_v3  ;;  %v10983_v3 = vld [vmem:[%s15860_s1 + $0x584] ss:$24 sps:$4 sm:$0xff]  }
 0x1cc   :  { %8191 = vmatpush1.bf16.msra.mxu0 %v10915_v4  ;;  %7676 = vmatprep.subr.bf16.mxu1 %v10920_v5  ;;  %v10978_v4 = vld [vmem:[%s15860_s1 + $0x578] ss:$24 sps:$4 sm:$0xff]  }
 0x1cd   :  { %8192 = vmatprep.subr.bf16.mxu0 %v10923_v40  ;;  %v10981_v5 = vld [vmem:[%s15860_s1 + $0x580] ss:$24 sps:$4 sm:$0xff]   ;;  %v10986_v40 = vld [vmem:[%s15860_s1 + $0x5ac] ss:$24 sps:$4 sm:$0xff]  }
 0x1cf   :  { %7677 = vmatpush1.bf16.msra.mxu1 %v10918_v46  ;;  %v10989_v46 = vld [vmem:[%s15860_s1 + $0x5b4] ss:$24 sps:$4 sm:$0xff]  }
 0x1d0   :  { %8193 = vmatpush1.bf16.msra.mxu0 %v10921_v47  ;;  %7678 = vmatprep.subr.bf16.mxu1 %v10926_v14  ;;  %v10984_v47 = vld [vmem:[%s15860_s1 + $0x5a8] ss:$24 sps:$4 sm:$0xff]  }
 0x1d1   :  { %8194 = vmatprep.subr.bf16.mxu0 %v10929_v15  ;;  %v10987_v14 = vld [vmem:[%s15860_s1 + $0x5b0] ss:$24 sps:$4 sm:$0xff]   ;;  %v10992_v15 = vld [vmem:[%s15860_s1 + $0x5dc] ss:$24 sps:$4 sm:$0xff]  }
 0x1d3   :  { %7679 = vmatpush1.bf16.msra.mxu1 %v10924_v16  ;;  %v10995_v16 = vld [vmem:[%s15860_s1 + $0x5e4] ss:$24 sps:$4 sm:$0xff]  }
 0x1d4   :  { %8195 = vmatpush1.bf16.msra.mxu0 %v10927_v17  ;;  %7680 = vmatprep.subr.bf16.mxu1 %v10932_v18  ;;  %v10990_v17 = vld [vmem:[%s15860_s1 + $0x5d8] ss:$24 sps:$4 sm:$0xff]  }
 0x1d5   :  { %8196 = vmatprep.subr.bf16.mxu0 %v10935_v19  ;;  %v10993_v18 = vld [vmem:[%s15860_s1 + $0x5e0] ss:$24 sps:$4 sm:$0xff]   ;;  %v10998_v19 = vld [vmem:[%s15860_s1 + $0x60c] ss:$24 sps:$4 sm:$0xff]  }
 0x1d7   :  { %7681 = vmatpush1.bf16.msra.mxu1 %v10930_v24  ;;  %v11001_v24 = vld [vmem:[%s15860_s1 + $0x614] ss:$24 sps:$4 sm:$0xff]  }
 0x1d8   :  { %8197 = vmatpush1.bf16.msra.mxu0 %v10933_v25  ;;  %7682 = vmatprep.subr.bf16.mxu1 %v10938_v41  ;;  %v10996_v25 = vld [vmem:[%s15860_s1 + $0x608] ss:$24 sps:$4 sm:$0xff]  }
 0x1d9   :  { %8198 = vmatprep.subr.bf16.mxu0 %v10941_v42  ;;  %v10999_v41 = vld [vmem:[%s15860_s1 + $0x610] ss:$24 sps:$4 sm:$0xff]   ;;  %v11004_v42 = vld [vmem:[%s15860_s1 + $0x63c] ss:$24 sps:$4 sm:$0xff]  }
 0x1db   :  { %7683 = vmatpush1.bf16.msra.mxu1 %v10936_v44  ;;  %v11007_v44 = vld [vmem:[%s15860_s1 + $0x644] ss:$24 sps:$4 sm:$0xff]  }
 0x1dc   :  { %8199 = vmatpush1.bf16.msra.mxu0 %v10939_v45  ;;  %7684 = vmatprep.subr.bf16.mxu1 %v10944_v26  ;;  %v11002_v45 = vld [vmem:[%s15860_s1 + $0x638] ss:$24 sps:$4 sm:$0xff]  }
 0x1dd   :  { %8200 = vmatprep.subr.bf16.mxu0 %v10947_v27  ;;  %v11005_v26 = vld [vmem:[%s15860_s1 + $0x640] ss:$24 sps:$4 sm:$0xff]   ;;  %v11010_v27 = vld [vmem:[%s15860_s1 + $0x66c] ss:$24 sps:$4 sm:$0xff]  }
 0x1df   :  { %7685 = vmatpush1.bf16.msra.mxu1 %v10942_v30  ;;  %v11008_v30 = vld [vmem:[%s15860_s1 + $0x668] ss:$24 sps:$4 sm:$0xff]  }
 0x1e0   :  { %8201 = vmatpush1.bf16.msra.mxu0 %v10945_v31  ;;  %7686 = vmatprep.subr.bf16.mxu1 %v10950_v36  ;;  %v11011_v31 = vld [vmem:[%s15860_s1 + $0x670] ss:$24 sps:$4 sm:$0xff]   ;;  %v11016_v36 = vld [vmem:[%s15860_s1 + $0x69c] ss:$24 sps:$4 sm:$0xff]  }
 0x1e1   :  { %8202 = vmatprep.subr.bf16.mxu0 %v10953_v52  ;;  %v11014_v52 = vld [vmem:[%s15860_s1 + $0x698] ss:$24 sps:$4 sm:$0xff]  }
 0x1e3   :  { %7687 = vmatpush1.bf16.msra.mxu1 %v10948_v37  ;;  %v11017_v37 = vld [vmem:[%s15860_s1 + $0x6a0] ss:$24 sps:$4 sm:$0xff]  }
 0x1e4   :  { %8203 = vmatpush1.bf16.msra.mxu0 %v10951_v38  ;;  %7688 = vmatprep.subr.bf16.mxu1 %v10956_v39  ;;  %v11022_v38 = vld [vmem:[%s15860_s1 + $0x6cc] ss:$24 sps:$4 sm:$0xff]  }
 0x1e5   :  { %8204 = vmatprep.subr.bf16.mxu0 %v10959_v53  ;;  %v11025_v39 = vld [vmem:[%s15860_s1 + $0x6d4] ss:$24 sps:$4 sm:$0xff]   ;;  %v11020_v53 = vld [vmem:[%s15860_s1 + $0x6c8] ss:$24 sps:$4 sm:$0xff]  }
 0x1e7   :  { %7689 = vmatpush1.bf16.msra.mxu1 %v10954_v54  ;;  %v11023_v54 = vld [vmem:[%s15860_s1 + $0x6d0] ss:$24 sps:$4 sm:$0xff]  }
 0x1e8   :  { %8205 = vmatpush1.bf16.msra.mxu0 %v10957_v6  ;;  %7690 = vmatprep.subr.bf16.mxu1 %v10962_v7  ;;  %v11028_v6 = vld [vmem:[%s15860_s1 + $0x6fc] ss:$24 sps:$4 sm:$0xff]  }
 0x1e9   :  { %8206 = vmatprep.subr.bf16.mxu0 %v10965_v56  ;;  %v11031_v7 = vld [vmem:[%s15860_s1 + $0x704] ss:$24 sps:$4 sm:$0xff]   ;;  %v11026_v56 = vld [vmem:[%s15860_s1 + $0x6f8] ss:$24 sps:$4 sm:$0xff]  }
 0x1eb   :  { %7691 = vmatpush1.bf16.msra.mxu1 %v10960_v57  ;;  %v11029_v57 = vld [vmem:[%s15860_s1 + $0x700] ss:$24 sps:$4 sm:$0xff]  }
 0x1ec   :  { %8207 = vmatpush1.bf16.msra.mxu0 %v10963_v58  ;;  %7692 = vmatprep.subr.bf16.mxu1 %v10968_v59  ;;  %v11034_v58 = vld [vmem:[%s15860_s1 + $0x72c] ss:$24 sps:$4 sm:$0xff]  }
 0x1ed   :  { %8208 = vmatprep.subr.bf16.mxu0 %v10971_v60  ;;  %v11037_v59 = vld [vmem:[%s15860_s1 + $0x734] ss:$24 sps:$4 sm:$0xff]   ;;  %v11032_v60 = vld [vmem:[%s15860_s1 + $0x728] ss:$24 sps:$4 sm:$0xff]  }
 0x1ef   :  { %7693 = vmatpush1.bf16.msra.mxu1 %v10966_v61  ;;  %v11035_v61 = vld [vmem:[%s15860_s1 + $0x730] ss:$24 sps:$4 sm:$0xff]  }
 0x1f0   :  { %8209 = vmatpush1.bf16.msra.mxu0 %v10969_v62  ;;  %7694 = vmatprep.subr.bf16.mxu1 %v10974_v63  ;;  %v11040_v62 = vld [vmem:[%s15860_s1 + $0x75c] ss:$24 sps:$4 sm:$0xff]  }
 0x1f1   :  { %8210 = vmatprep.subr.bf16.mxu0 %v10977_v0  ;;  %v11043_v63 = vld [vmem:[%s15860_s1 + $0x764] ss:$24 sps:$4 sm:$0xff]   ;;  %v11038_v0 = vld [vmem:[%s15860_s1 + $0x758] ss:$24 sps:$4 sm:$0xff]  }
 0x1f3   :  { %7695 = vmatpush1.bf16.msra.mxu1 %v10972_v1  ;;  %v11041_v1 = vld [vmem:[%s15860_s1 + $0x760] ss:$24 sps:$4 sm:$0xff]  }
 0x1f4   :  { %8211 = vmatpush1.bf16.msra.mxu0 %v10975_v2  ;;  %7696 = vmatprep.subr.bf16.mxu1 %v10980_v10  ;;  %v11046_v2 = vld [vmem:[%s15860_s1 + $0x78c] ss:$24 sps:$4 sm:$0xff]  }
 0x1f5   :  { %8212 = vmatprep.subr.bf16.mxu0 %v10983_v3  ;;  %v11049_v10 = vld [vmem:[%s15860_s1 + $0x794] ss:$24 sps:$4 sm:$0xff]   ;;  %v11044_v3 = vld [vmem:[%s15860_s1 + $0x788] ss:$24 sps:$4 sm:$0xff]  }
 0x1f7   :  { %7697 = vmatpush1.bf16.msra.mxu1 %v10978_v4  ;;  %v11047_v4 = vld [vmem:[%s15860_s1 + $0x790] ss:$24 sps:$4 sm:$0xff]  }
 0x1f8   :  { %8213 = vmatpush1.bf16.msra.mxu0 %v10981_v5  ;;  %7698 = vmatprep.subr.bf16.mxu1 %v10986_v40  ;;  %v11052_v5 = vld [vmem:[%s15860_s1 + $0x7bc] ss:$24 sps:$4 sm:$0xff]  }
 0x1f9   :  { %8214 = vmatprep.subr.bf16.mxu0 %v10989_v46  ;;  %v11055_v40 = vld [vmem:[%s15860_s1 + $0x7c4] ss:$24 sps:$4 sm:$0xff]   ;;  %v11050_v46 = vld [vmem:[%s15860_s1 + $0x7b8] ss:$24 sps:$4 sm:$0xff]  }
 0x1fb   :  { %7699 = vmatpush1.bf16.msra.mxu1 %v10984_v47  ;;  %v11053_v47 = vld [vmem:[%s15860_s1 + $0x7c0] ss:$24 sps:$4 sm:$0xff]  }
 0x1fc   :  { %8215 = vmatpush1.bf16.msra.mxu0 %v10987_v14  ;;  %7700 = vmatprep.subr.bf16.mxu1 %v10992_v15  ;;  %v11058_v14 = vld [vmem:[%s15860_s1 + $0x7ec] ss:$24 sps:$4 sm:$0xff]  }
 0x1fd   :  { %8216 = vmatprep.subr.bf16.mxu0 %v10995_v16  ;;  %v11061_v15 = vld [vmem:[%s15860_s1 + $0x7f4] ss:$24 sps:$4 sm:$0xff]   ;;  %v11056_v16 = vld [vmem:[%s15860_s1 + $0x7e8] ss:$24 sps:$4 sm:$0xff]  }
 0x1ff   :  { %7701 = vmatpush1.bf16.msra.mxu1 %v10990_v17  ;;  %v11059_v17 = vld [vmem:[%s15860_s1 + $0x7f0] ss:$24 sps:$4 sm:$0xff]  }
 0x200   :  { %8217 = vmatpush1.bf16.msra.mxu0 %v10993_v18  ;;  %7713 = vmatprep.subr.bf16.mxu1 %v10998_v19  ;;  %v11064_v18 = vld [vmem:[%s15860_s1 + $0x81c] ss:$24 sps:$4 sm:$0xff]  }
 0x201   :  { %8229 = vmatprep.subr.bf16.mxu0 %v11001_v24  ;;  %v11067_v19 = vld [vmem:[%s15860_s1 + $0x824] ss:$24 sps:$4 sm:$0xff]   ;;  %v11062_v24 = vld [vmem:[%s15860_s1 + $0x818] ss:$24 sps:$4 sm:$0xff]  }
 0x202   :  { %7703 = vmatmul.mubr.bf16.vlgmr.msra.gmra.mrb[4].mxu1 %v12442_v20 }
 0x203   :  { %8219 = vmatmul.mubr.bf16.vlgmr.msra.gmra.mrb[4].mxu0 %v12442_v20  ;;  %7714 = vmatpush1.bf16.msra.mxu1 %v10996_v25  ;;  %v11013_v20 = vld [vmem:[%s15860_s1 + $0x674] ss:$24 sps:$4 sm:$0xff]   ;;  %v11065_v25 = vld [vmem:[%s15860_s1 + $0x820] ss:$24 sps:$4 sm:$0xff]  }
 0x204   :  { %8230 = vmatpush1.bf16.msra.mxu0 %v10999_v41  ;;  %7715 = vmatprep.subr.bf16.mxu1 %v11004_v42  ;;  %v11070_v41 = vld [vmem:[%s15860_s1 + $0x84c] ss:$24 sps:$4 sm:$0xff]  }
 0x205   :  { %8231 = vmatprep.subr.bf16.mxu0 %v11007_v44  ;;  %7745 = vmatprep.mubr.bf16.mxu1 %v12486_v32  ;;  %v11073_v42 = vld [vmem:[%s15860_s1 + $0x854] ss:$24 sps:$4 sm:$0xff]   ;;  %v11068_v44 = vld [vmem:[%s15860_s1 + $0x848] ss:$24 sps:$4 sm:$0xff]  }
 0x206   :  { %8261 = vmatprep.mubr.bf16.mxu0 %v12486_v32  ;;  %v11019_v32 = vld [vmem:[%s15860_s1 + $0x6a4] ss:$24 sps:$4 sm:$0xff]  }
 0x207   :  { %7716 = vmatpush1.bf16.msra.mxu1 %v11002_v45  ;;  %v11071_v45 = vld [vmem:[%s15860_s1 + $0x850] ss:$24 sps:$4 sm:$0xff]  }
 0x208   :  { %8232 = vmatpush1.bf16.msra.mxu0 %v11005_v26  ;;  %7717 = vmatprep.subr.bf16.mxu1 %v11010_v27  ;;  %v11076_v26 = vld [vmem:[%s15860_s1 + $0x87c] ss:$24 sps:$4 sm:$0xff]  }
 0x209   :  { %8233 = vmatprep.subr.bf16.mxu0 %v11013_v20  ;;  %v11079_v27 = vld [vmem:[%s15860_s1 + $0x884] ss:$24 sps:$4 sm:$0xff]   ;;  %v11074_v20 = vld [vmem:[%s15860_s1 + $0x878] ss:$24 sps:$4 sm:$0xff]  }
 0x20b   :  { %7718 = vmatpush1.bf16.msra.mxu1 %v11008_v30  ;;  %v11077_v30 = vld [vmem:[%s15860_s1 + $0x880] ss:$24 sps:$4 sm:$0xff]  }
 0x20c   :  { %8234 = vmatpush1.bf16.msra.mxu0 %v11011_v31  ;;  %7719 = vmatprep.subr.bf16.mxu1 %v11016_v36  ;;  %v11082_v31 = vld [vmem:[%s15860_s1 + $0x8ac] ss:$24 sps:$4 sm:$0xff]  }
 0x20d   :  { %8235 = vmatprep.subr.bf16.mxu0 %v11019_v32  ;;  %v11085_v36 = vld [vmem:[%s15860_s1 + $0x8b4] ss:$24 sps:$4 sm:$0xff]   ;;  %v11080_v32 = vld [vmem:[%s15860_s1 + $0x8a8] ss:$24 sps:$4 sm:$0xff]  }
 0x20f   :  { %7720 = vmatpush1.bf16.msra.mxu1 %v11014_v52  ;;  %v11083_v52 = vld [vmem:[%s15860_s1 + $0x8b0] ss:$24 sps:$4 sm:$0xff]  }
 0x210   :  { %8236 = vmatpush1.bf16.msra.mxu0 %v11017_v37  ;;  %7721 = vmatprep.subr.bf16.mxu1 %v11022_v38  ;;  %v11088_v37 = vld [vmem:[%s15860_s1 + $0x8dc] ss:$24 sps:$4 sm:$0xff]  }
 0x211   :  { %8237 = vmatprep.subr.bf16.mxu0 %v11025_v39  ;;  %v11091_v38 = vld [vmem:[%s15860_s1 + $0x8e4] ss:$24 sps:$4 sm:$0xff]   ;;  %v11086_v39 = vld [vmem:[%s15860_s1 + $0x8d8] ss:$24 sps:$4 sm:$0xff]  }
 0x213   :  { %7722 = vmatpush1.bf16.msra.mxu1 %v11020_v53  ;;  %v11089_v53 = vld [vmem:[%s15860_s1 + $0x8e0] ss:$24 sps:$4 sm:$0xff]  }
 0x214   :  { %8238 = vmatpush1.bf16.msra.mxu0 %v11023_v54  ;;  %7723 = vmatprep.subr.bf16.mxu1 %v11028_v6  ;;  %v11094_v54 = vld [vmem:[%s15860_s1 + $0x90c] ss:$24 sps:$4 sm:$0xff]  }
 0x215   :  { %8239 = vmatprep.subr.bf16.mxu0 %v11031_v7  ;;  %v11097_v6 = vld [vmem:[%s15860_s1 + $0x914] ss:$24 sps:$4 sm:$0xff]   ;;  %v11092_v7 = vld [vmem:[%s15860_s1 + $0x908] ss:$24 sps:$4 sm:$0xff]  }
 0x217   :  { %7724 = vmatpush1.bf16.msra.mxu1 %v11026_v56  ;;  %v11095_v56 = vld [vmem:[%s15860_s1 + $0x910] ss:$24 sps:$4 sm:$0xff]  }
 0x218   :  { %8240 = vmatpush1.bf16.msra.mxu0 %v11029_v57  ;;  %7725 = vmatprep.subr.bf16.mxu1 %v11034_v58  ;;  %v11100_v57 = vld [vmem:[%s15860_s1 + $0x93c] ss:$24 sps:$4 sm:$0xff]  }
 0x219   :  { %8241 = vmatprep.subr.bf16.mxu0 %v11037_v59  ;;  %v11103_v58 = vld [vmem:[%s15860_s1 + $0x944] ss:$24 sps:$4 sm:$0xff]   ;;  %v11098_v59 = vld [vmem:[%s15860_s1 + $0x938] ss:$24 sps:$4 sm:$0xff]  }
 0x21b   :  { %7726 = vmatpush1.bf16.msra.mxu1 %v11032_v60  ;;  %v11101_v60 = vld [vmem:[%s15860_s1 + $0x940] ss:$24 sps:$4 sm:$0xff]  }
 0x21c   :  { %8242 = vmatpush1.bf16.msra.mxu0 %v11035_v61  ;;  %7727 = vmatprep.subr.bf16.mxu1 %v11040_v62  ;;  %v11106_v61 = vld [vmem:[%s15860_s1 + $0x96c] ss:$24 sps:$4 sm:$0xff]   ;;  %v1201_v62 = vlaneseq }
 0x21d   :  { %8243 = vmatprep.subr.bf16.mxu0 %v11043_v63  ;;  %v11104_v63 = vld [vmem:[%s15860_s1 + $0x968] ss:$24 sps:$4 sm:$0xff]  }
 0x21f   :  { %7728 = vmatpush1.bf16.msra.mxu1 %v11038_v0  ;;  %v11107_v0 = vld [vmem:[%s15860_s1 + $0x970] ss:$24 sps:$4 sm:$0xff]  }
 0x220   :  { %8244 = vmatpush1.bf16.msra.mxu0 %v11041_v1  ;;  %7729 = vmatprep.subr.bf16.mxu1 %v11046_v2  ;;  %v11112_v1 = vld [vmem:[%s15860_s1 + $0x99c] ss:$24 sps:$4 sm:$0xff]   ;;  %v14004_v2 = vshrl.u32 %v1201_v62, 7  ;;  %v11140_v62 = vld [vmem:[%s15860_s1 + $0xa88] ss:$24 sps:$4 sm:$0xff]  }
 0x221   :  { %8245 = vmatprep.subr.bf16.mxu0 %v11049_v10  ;;  %v11110_v10 = vld [vmem:[%s15860_s1 + $0x998] ss:$24 sps:$4 sm:$0xff]  }
 0x223   :  { %7730 = vmatpush1.bf16.msra.mxu1 %v11044_v3  ;;  %v11113_v3 = vld [vmem:[%s15860_s1 + $0x9a0] ss:$24 sps:$4 sm:$0xff]  }
 0x224   :  { %8246 = vmatpush1.bf16.msra.mxu0 %v11047_v4  ;;  %7731 = vmatprep.subr.bf16.mxu1 %v11052_v5  ;;  %v11118_v4 = vld [vmem:[%s15860_s1 + $0x9cc] ss:$24 sps:$4 sm:$0xff]  }
 0x225   :  { %8247 = vmatprep.subr.bf16.mxu0 %v11055_v40  ;;  %v11121_v5 = vld [vmem:[%s15860_s1 + $0x9d4] ss:$24 sps:$4 sm:$0xff]   ;;  %v11116_v40 = vld [vmem:[%s15860_s1 + $0x9c8] ss:$24 sps:$4 sm:$0xff]  }
 0x227   :  { %7732 = vmatpush1.bf16.msra.mxu1 %v11050_v46  ;;  %v14022_v46 = vsub.s32 0, %v14004_v2 }
 0x228   :  { %8248 = vmatpush1.bf16.msra.mxu0 %v11053_v47  ;;  %7733 = vmatprep.subr.bf16.mxu1 %v11058_v14  ;;  %v11119_v47 = vld [vmem:[%s15860_s1 + $0x9d0] ss:$24 sps:$4 sm:$0xff]   ;;  %v1199_v14 = vld [vmem:[%s15862_s2] sm:$0x3f] }
 0x229   :  { %8249 = vmatprep.subr.bf16.mxu0 %v11061_v15  ;;  %v14031_v15 = vsub.s32 1, %v14004_v2 }
 0x22b   :  { %7734 = vmatpush1.bf16.msra.mxu1 %v11056_v16  ;;  %v11124_v16 = vld [vmem:[%s15860_s1 + $0x9fc] ss:$24 sps:$4 sm:$0xff]  }
 0x22c   :  { %8250 = vmatpush1.bf16.msra.mxu0 %v11059_v17  ;;  %7735 = vmatprep.subr.bf16.mxu1 %v11064_v18  ;;  %v11127_v17 = vld [vmem:[%s15860_s1 + $0xa04] ss:$24 sps:$4 sm:$0xff]   ;;  %v1204_v18 = vrot.slane %v1199_v14, %v14022_v46 }
 0x22d   :  { %8251 = vmatprep.subr.bf16.mxu0 %v11067_v19  ;;  %v1208_v19 = vrot.slane %v1199_v14, %v14031_v15  ;;  %v11163_v14 = vld [vmem:[%s15860_s1 + $0xb24] ss:$24 sps:$4 sm:$0xff]  }
 0x22f   :  { %7736 = vmatpush1.bf16.msra.mxu1 %v11062_v24  ;;  %v11122_v24 = vld [vmem:[%s15860_s1 + $0x9f8] ss:$24 sps:$4 sm:$0xff]  }
 0x230   :  { %8252 = vmatpush1.bf16.msra.mxu0 %v11065_v25  ;;  %7737 = vmatprep.subr.bf16.mxu1 %v11070_v41  ;;  %v11125_v25 = vld [vmem:[%s15860_s1 + $0xa00] ss:$24 sps:$4 sm:$0xff]   ;;  %v11130_v41 = vld [vmem:[%s15860_s1 + $0xa2c] ss:$24 sps:$4 sm:$0xff]  }
 0x231   :  { %8253 = vmatprep.subr.bf16.mxu0 %v11073_v42  ;;  %v11133_v42 = vld [vmem:[%s15860_s1 + $0xa34] ss:$24 sps:$4 sm:$0xff]  }
 0x233   :  { %7738 = vmatpush1.bf16.msra.mxu1 %v11068_v44 }
 0x234   :  { %8254 = vmatpush1.bf16.msra.mxu0 %v11071_v45  ;;  %7739 = vmatprep.subr.bf16.mxu1 %v11076_v26 }
 0x235   :  { %8255 = vmatprep.subr.bf16.mxu0 %v11079_v27 }
 0x237   :  { %7740 = vmatpush1.bf16.msra.mxu1 %v11074_v20 }
 0x238   :  { %8256 = vmatpush1.bf16.msra.mxu0 %v11077_v30  ;;  %7741 = vmatprep.subr.bf16.mxu1 %v11082_v31 }
 0x239   :  { %8257 = vmatprep.subr.bf16.mxu0 %v11085_v36 }
 0x23b   :  { %7742 = vmatpush1.bf16.msra.mxu1 %v11080_v32  ;;  %v11128_v32 = vld [vmem:[%s15860_s1 + $0xa28] ss:$24 sps:$4 sm:$0xff]  }
 0x23c   :  { %8258 = vmatpush1.bf16.msra.mxu0 %v11083_v52  ;;  %7743 = vmatprep.subr.bf16.mxu1 %v11088_v37  ;;  %v11131_v52 = vld [vmem:[%s15860_s1 + $0xa30] ss:$24 sps:$4 sm:$0xff]  }
 0x23d   :  { %8259 = vmatprep.subr.bf16.mxu0 %v11091_v38 }
 0x23f   :  { %7744 = vmatpush1.bf16.msra.mxu1 %v11086_v39 }
 0x240   :  { %8260 = vmatpush1.bf16.msra.mxu0 %v11089_v53  ;;  %7756 = vmatprep.subr.bf16.mxu1 %v11094_v54  ;;  %v11136_v54 = vld [vmem:[%s15860_s1 + $0xa5c] ss:$24 sps:$4 sm:$0xff]  }
 0x241   :  { %8272 = vmatprep.subr.bf16.mxu0 %v11097_v6  ;;  %v11139_v6 = vld [vmem:[%s15860_s1 + $0xa64] ss:$24 sps:$4 sm:$0xff]  }
 0x242   :  { %7746 = vmatmul.mubr.bf16.vlgmr.msra.gmra.mrb[4].mxu1 %v12690_v48 }
 0x243   :  { %8262 = vmatmul.mubr.bf16.vlgmr.msra.gmra.mrb[4].mxu0 %v12690_v48  ;;  %7757 = vmatpush1.bf16.msra.mxu1 %v11092_v7  ;;  %v11109_v48 = vld [vmem:[%s15860_s1 + $0x974] ss:$24 sps:$4 sm:$0xff]  }
 0x244   :  { %8273 = vmatpush1.bf16.msra.mxu0 %v11095_v56  ;;  %7758 = vmatprep.subr.bf16.mxu1 %v11100_v57 }
 0x245   :  { %8274 = vmatprep.subr.bf16.mxu0 %v11103_v58  ;;  %7788 = vmatprep.mubr.bf16.mxu1 %v12714_v33 }
 0x246   :  { %8304 = vmatprep.mubr.bf16.mxu0 %v12714_v33  ;;  %v11115_v33 = vld [vmem:[%s15860_s1 + $0x9a4] ss:$24 sps:$4 sm:$0xff]  }
 0x247   :  { %7759 = vmatpush1.bf16.msra.mxu1 %v11098_v59  ;;  %v11134_v59 = vld [vmem:[%s15860_s1 + $0xa58] ss:$24 sps:$4 sm:$0xff]  }
 0x248   :  { %8275 = vmatpush1.bf16.msra.mxu0 %v11101_v60  ;;  %7760 = vmatprep.subr.bf16.mxu1 %v11106_v61  ;;  %v11137_v60 = vld [vmem:[%s15860_s1 + $0xa60] ss:$24 sps:$4 sm:$0xff]   ;;  %v11142_v61 = vld [vmem:[%s15860_s1 + $0xa8c] ss:$24 sps:$4 sm:$0xff]  }
 0x249   :  { %8276 = vmatprep.subr.bf16.mxu0 %v11109_v48  ;;  %v11145_v48 = vld [vmem:[%s15860_s1 + $0xa94] ss:$24 sps:$4 sm:$0xff]  }
 0x24b   :  { %7761 = vmatpush1.bf16.msra.mxu1 %v11104_v63  ;;  %v11143_v63 = vld [vmem:[%s15860_s1 + $0xa90] ss:$24 sps:$4 sm:$0xff]  }
 0x24c   :  { %8277 = vmatpush1.bf16.msra.mxu0 %v11107_v0  ;;  %7762 = vmatprep.subr.bf16.mxu1 %v11112_v1  ;;  %v11148_v0 = vld [vmem:[%s15860_s1 + $0xabc] ss:$24 sps:$4 sm:$0xff]  }
 0x24d   :  { %8278 = vmatprep.subr.bf16.mxu0 %v11115_v33  ;;  %v11151_v1 = vld [vmem:[%s15860_s1 + $0xac4] ss:$24 sps:$4 sm:$0xff]   ;;  %v11146_v33 = vld [vmem:[%s15860_s1 + $0xab8] ss:$24 sps:$4 sm:$0xff]  }
 0x24f   :  { %7763 = vmatpush1.bf16.msra.mxu1 %v11110_v10  ;;  %v11149_v10 = vld [vmem:[%s15860_s1 + $0xac0] ss:$24 sps:$4 sm:$0xff]  }
 0x250   :  { %8279 = vmatpush1.bf16.msra.mxu0 %v11113_v3  ;;  %7764 = vmatprep.subr.bf16.mxu1 %v11118_v4  ;;  %v11154_v3 = vld [vmem:[%s15860_s1 + $0xaec] ss:$24 sps:$4 sm:$0xff]  }
 0x251   :  { %8280 = vmatprep.subr.bf16.mxu0 %v11121_v5  ;;  %v11157_v4 = vld [vmem:[%s15860_s1 + $0xaf4] ss:$24 sps:$4 sm:$0xff]   ;;  %v11152_v5 = vld [vmem:[%s15860_s1 + $0xae8] ss:$24 sps:$4 sm:$0xff]  }
 0x253   :  { %7765 = vmatpush1.bf16.msra.mxu1 %v11116_v40  ;;  %v11155_v40 = vld [vmem:[%s15860_s1 + $0xaf0] ss:$24 sps:$4 sm:$0xff]  }
 0x254   :  { %8281 = vmatpush1.bf16.msra.mxu0 %v11119_v47  ;;  %7766 = vmatprep.subr.bf16.mxu1 %v11124_v16  ;;  %v11160_v47 = vld [vmem:[%s15860_s1 + $0xb1c] ss:$24 sps:$4 sm:$0xff]   ;;  %v11158_v16 = vld [vmem:[%s15860_s1 + $0xb18] ss:$24 sps:$4 sm:$0xff]  }
 0x255   :  { %8282 = vmatprep.subr.bf16.mxu0 %v11127_v17  ;;  %v7360_v44 = vpop.f32.mrb[0].mxu1  ;;  %v11161_v17 = vld [vmem:[%s15860_s1 + $0xb20] ss:$24 sps:$4 sm:$0xff]  }
 0x256   :  { %v7618_v45 = vpop.f32.mrb[0].mxu0  ;;  %v10084_v26 = vadd.f32 %v7360_v44, %v1204_v18  ;;  %v7362_v27 = vpop.f32.mrb[1].mxu1  ;;  %v11170_v44 = vld [vmem:[%s15860_s1 + $0xb78] ss:$24 sps:$4 sm:$0xff]  }
 0x257   :  { %v7620_v20 = vpop.f32.mrb[1].mxu0  ;;  %v10086_v30 = vadd.f32 %v7362_v27, %v1208_v19  ;;  %v7364_v31 = vpop.f32.mrb[2].mxu1  ;;  %7767 = vmatpush1.bf16.msra.mxu1 %v11122_v24  ;;  %v11164_v24 = vld [vmem:[%s15860_s1 + $0xb48] ss:$24 sps:$4 sm:$0xff]   ;;  %v11181_v27 = vld [vmem:[%s15860_s1 + $0xbb4] ss:$24 sps:$4 sm:$0xff]  }
 0x258   :  { %v7622_v36 = vpop.f32.mrb[2].mxu0  ;;  %8283 = vmatpush1.bf16.msra.mxu0 %v11125_v25  ;;  %v14059_v37 = vadd.f32 %v10084_v26, %v7618_v45  ;;  %v10088_v38 = vadd.f32 %v7364_v31, %v1204_v18  ;;  %v7366_v39 = vpop.f32.mrb[3].mxu1  ;;  %7768 = vmatprep.subr.bf16.mxu1 %v11130_v41  ;;  %v11166_v18 = vld [vmem:[%s15860_s1 + $0xb4c] ss:$24 sps:$4 sm:$0xff]   ;;  %v11167_v25 = vld [vmem:[%s15860_s1 + $0xb50] ss:$24 sps:$4 sm:$0xff]  }
 0x259   :  { %v7624_v53 = vpop.f32.mrb[3].mxu0  ;;  %8284 = vmatprep.subr.bf16.mxu0 %v11133_v42  ;;  %v14067_v7 = vadd.f32 %v10086_v30, %v7620_v20  ;;  %v10090_v56 = vadd.f32 %v7366_v39, %v1208_v19  ;;  %v11169_v19 = vld [vmem:[%s15860_s1 + $0xb54] ss:$24 sps:$4 sm:$0xff]   ;;  %v11175_v42 = vld [vmem:[%s15860_s1 + $0xb84] ss:$24 sps:$4 sm:$0xff]  }
 0x25a   :  { %v14069_v57 = vadd.f32 %v10088_v38, %v7622_v36  ;;  %v11172_v41 = vld [vmem:[%s15860_s1 + $0xb7c] ss:$24 sps:$4 sm:$0xff]   ;;  %v11173_v45 = vld [vmem:[%s15860_s1 + $0xb80] ss:$24 sps:$4 sm:$0xff]   ;;  %v11178_v26 = vld [vmem:[%s15860_s1 + $0xbac] ss:$24 sps:$4 sm:$0xff]  }
 0x25b   :  { %v14071_v58 = vadd.f32 %v10090_v56, %v7624_v53  ;;  %7769 = vmatpush1.bf16.msra.mxu1 %v11128_v32  ;;  %v11176_v20 = vld [vmem:[%s15860_s1 + $0xba8] ss:$24 sps:$4 sm:$0xff]   ;;  %v11184_v31 = vld [vmem:[%s15860_s1 + $0xbdc] ss:$24 sps:$4 sm:$0xff]   ;;  %v11182_v32 = vld [vmem:[%s15860_s1 + $0xbd8] ss:$24 sps:$4 sm:$0xff]  }
 0x25c   :  { %8285 = vmatpush1.bf16.msra.mxu0 %v11131_v52  ;;  %7770 = vmatprep.subr.bf16.mxu1 %v11136_v54  ;;  %v11179_v30 = vld [vmem:[%s15860_s1 + $0xbb0] ss:$24 sps:$4 sm:$0xff]   ;;  %v11187_v36 = vld [vmem:[%s15860_s1 + $0xbe4] ss:$24 sps:$4 sm:$0xff]   ;;  %v11185_v52 = vld [vmem:[%s15860_s1 + $0xbe0] ss:$24 sps:$4 sm:$0xff]  }
 0x25d   :  { %8286 = vmatprep.subr.bf16.mxu0 %v11139_v6  ;;  %v11190_v38 = vld [vmem:[%s15860_s1 + $0xc0c] ss:$24 sps:$4 sm:$0xff]   ;;  %v11188_v53 = vld [vmem:[%s15860_s1 + $0xc08] ss:$24 sps:$4 sm:$0xff]   ;;  %v11196_v6 = vld [vmem:[%s15860_s1 + $0xc3c] ss:$24 sps:$4 sm:$0xff]  }
 0x25e   :  { %v11193_v39 = vld [vmem:[%s15860_s1 + $0xc14] ss:$24 sps:$4 sm:$0xff]   ;;  %v11191_v54 = vld [vmem:[%s15860_s1 + $0xc10] ss:$24 sps:$4 sm:$0xff]   ;;  %v11199_v56 = vld [vmem:[%s15860_s1 + $0xc44] ss:$24 sps:$4 sm:$0xff]  }
 0x25f   :  { %7771 = vmatpush1.bf16.msra.mxu1 %v11134_v59  ;;  %v11194_v59 = vld [vmem:[%s15860_s1 + $0xc38] ss:$24 sps:$4 sm:$0xff]  }
 0x260   :  { %8287 = vmatpush1.bf16.msra.mxu0 %v11137_v60  ;;  %7772 = vmatprep.subr.bf16.mxu1 %v11142_v61  ;;  %v11197_v60 = vld [vmem:[%s15860_s1 + $0xc40] ss:$24 sps:$4 sm:$0xff]   ;;  %v11202_v61 = vld [vmem:[%s15860_s1 + $0xc6c] ss:$24 sps:$4 sm:$0xff]  }
 0x261   :  { %8288 = vmatprep.subr.bf16.mxu0 %v11145_v48  ;;  %v11200_v48 = vld [vmem:[%s15860_s1 + $0xc68] ss:$24 sps:$4 sm:$0xff]  }
 0x263   :  { %7773 = vmatpush1.bf16.msra.mxu1 %v11140_v62  ;;  %v11203_v62 = vld [vmem:[%s15860_s1 + $0xc70] ss:$24 sps:$4 sm:$0xff]  }
 0x264   :  { %8289 = vmatpush1.bf16.msra.mxu0 %v11143_v63  ;;  %7774 = vmatprep.subr.bf16.mxu1 %v11148_v0  ;;  %v11208_v63 = vld [vmem:[%s15860_s1 + $0xc9c] ss:$24 sps:$4 sm:$0xff]   ;;  %v11206_v0 = vld [vmem:[%s15860_s1 + $0xc98] ss:$24 sps:$4 sm:$0xff]  }
 0x265   :  { %8290 = vmatprep.subr.bf16.mxu0 %v11151_v1  ;;  %v11209_v1 = vld [vmem:[%s15860_s1 + $0xca0] ss:$24 sps:$4 sm:$0xff]  }
 0x267   :  { %7775 = vmatpush1.bf16.msra.mxu1 %v11146_v33  ;;  %v11214_v33 = vld [vmem:[%s15860_s1 + $0xccc] ss:$24 sps:$4 sm:$0xff]  }
 0x268   :  { %8291 = vmatpush1.bf16.msra.mxu0 %v11149_v10  ;;  %7776 = vmatprep.subr.bf16.mxu1 %v11154_v3  ;;  %v11217_v10 = vld [vmem:[%s15860_s1 + $0xcd4] ss:$24 sps:$4 sm:$0xff]   ;;  %v11212_v3 = vld [vmem:[%s15860_s1 + $0xcc8] ss:$24 sps:$4 sm:$0xff]  }
 0x269   :  { %8292 = vmatprep.subr.bf16.mxu0 %v11157_v4  ;;  %v11215_v4 = vld [vmem:[%s15860_s1 + $0xcd0] ss:$24 sps:$4 sm:$0xff]  }
 0x26b   :  { %7777 = vmatpush1.bf16.msra.mxu1 %v11152_v5  ;;  %v11220_v5 = vld [vmem:[%s15860_s1 + $0xcfc] ss:$24 sps:$4 sm:$0xff]  }
 0x26c   :  { %8293 = vmatpush1.bf16.msra.mxu0 %v11155_v40  ;;  %7778 = vmatprep.subr.bf16.mxu1 %v11160_v47  ;;  %v11223_v40 = vld [vmem:[%s15860_s1 + $0xd04] ss:$24 sps:$4 sm:$0xff]   ;;  %v11218_v47 = vld [vmem:[%s15860_s1 + $0xcf8] ss:$24 sps:$4 sm:$0xff]  }
 0x26d   :  { %8294 = vmatprep.subr.bf16.mxu0 %v11163_v14  ;;  %v11221_v14 = vld [vmem:[%s15860_s1 + $0xd00] ss:$24 sps:$4 sm:$0xff]  }
 0x26f   :  { %7779 = vmatpush1.bf16.msra.mxu1 %v11158_v16  ;;  %v11226_v16 = vld [vmem:[%s15860_s1 + $0xd2c] ss:$24 sps:$4 sm:$0xff]  }
 0x270   :  { %8295 = vmatpush1.bf16.msra.mxu0 %v11161_v17  ;;  %7780 = vmatprep.subr.bf16.mxu1 %v11166_v18  ;;  %v11229_v17 = vld [vmem:[%s15860_s1 + $0xd34] ss:$24 sps:$4 sm:$0xff]   ;;  %v11224_v18 = vld [vmem:[%s15860_s1 + $0xd28] ss:$24 sps:$4 sm:$0xff]  }
 0x271   :  { %8296 = vmatprep.subr.bf16.mxu0 %v11169_v19  ;;  %v11227_v19 = vld [vmem:[%s15860_s1 + $0xd30] ss:$24 sps:$4 sm:$0xff]  }
 0x273   :  { %7781 = vmatpush1.bf16.msra.mxu1 %v11164_v24  ;;  %v11232_v24 = vld [vmem:[%s15860_s1 + $0xd5c] ss:$24 sps:$4 sm:$0xff]  }
 0x274   :  { %8297 = vmatpush1.bf16.msra.mxu0 %v11167_v25  ;;  %7782 = vmatprep.subr.bf16.mxu1 %v11172_v41  ;;  %v11235_v25 = vld [vmem:[%s15860_s1 + $0xd64] ss:$24 sps:$4 sm:$0xff]   ;;  %v11230_v41 = vld [vmem:[%s15860_s1 + $0xd58] ss:$24 sps:$4 sm:$0xff]  }
 0x275   :  { %8298 = vmatprep.subr.bf16.mxu0 %v11175_v42  ;;  %v11233_v42 = vld [vmem:[%s15860_s1 + $0xd60] ss:$24 sps:$4 sm:$0xff]  }
 0x277   :  { %7783 = vmatpush1.bf16.msra.mxu1 %v11170_v44  ;;  %v11238_v44 = vld [vmem:[%s15860_s1 + $0xd8c] ss:$24 sps:$4 sm:$0xff]  }
 0x278   :  { %8299 = vmatpush1.bf16.msra.mxu0 %v11173_v45  ;;  %7784 = vmatprep.subr.bf16.mxu1 %v11178_v26  ;;  %v11241_v45 = vld [vmem:[%s15860_s1 + $0xd94] ss:$24 sps:$4 sm:$0xff]   ;;  %v11236_v26 = vld [vmem:[%s15860_s1 + $0xd88] ss:$24 sps:$4 sm:$0xff]  }
 0x279   :  { %8300 = vmatprep.subr.bf16.mxu0 %v11181_v27  ;;  %v11239_v27 = vld [vmem:[%s15860_s1 + $0xd90] ss:$24 sps:$4 sm:$0xff]  }
 0x27b   :  { %7785 = vmatpush1.bf16.msra.mxu1 %v11176_v20  ;;  %v11244_v20 = vld [vmem:[%s15860_s1 + $0xdbc] ss:$24 sps:$4 sm:$0xff]  }
 0x27c   :  { %8301 = vmatpush1.bf16.msra.mxu0 %v11179_v30  ;;  %7786 = vmatprep.subr.bf16.mxu1 %v11184_v31  ;;  %v11247_v30 = vld [vmem:[%s15860_s1 + $0xdc4] ss:$24 sps:$4 sm:$0xff]   ;;  %v11242_v31 = vld [vmem:[%s15860_s1 + $0xdb8] ss:$24 sps:$4 sm:$0xff]  }
 0x27d   :  { %8302 = vmatprep.subr.bf16.mxu0 %v11187_v36  ;;  %v11245_v36 = vld [vmem:[%s15860_s1 + $0xdc0] ss:$24 sps:$4 sm:$0xff]  }
 0x27f   :  { %7787 = vmatpush1.bf16.msra.mxu1 %v11182_v32  ;;  %v11250_v32 = vld [vmem:[%s15860_s1 + $0xdec] ss:$24 sps:$4 sm:$0xff]  }
 0x280   :  { %8303 = vmatpush1.bf16.msra.mxu0 %v11185_v52  ;;  %7799 = vmatprep.subr.bf16.mxu1 %v11190_v38  ;;  %v11253_v52 = vld [vmem:[%s15860_s1 + $0xdf4] ss:$24 sps:$4 sm:$0xff]   ;;  %v11248_v38 = vld [vmem:[%s15860_s1 + $0xde8] ss:$24 sps:$4 sm:$0xff]  }
 0x281   :  { %8315 = vmatprep.subr.bf16.mxu0 %v11193_v39  ;;  %v11251_v39 = vld [vmem:[%s15860_s1 + $0xdf0] ss:$24 sps:$4 sm:$0xff]  }
 0x282   :  { %7789 = vmatmul.mubr.bf16.vlgmr.msra.gmra.mrb[4].mxu1 %v12922_v8 }
 0x283   :  { %8305 = vmatmul.mubr.bf16.vlgmr.msra.gmra.mrb[4].mxu0 %v12922_v8  ;;  %7800 = vmatpush1.bf16.msra.mxu1 %v11188_v53  ;;  %v11205_v8 = vld [vmem:[%s15860_s1 + $0xc74] ss:$24 sps:$4 sm:$0xff]  }
 0x284   :  { %8316 = vmatpush1.bf16.msra.mxu0 %v11191_v54  ;;  %7801 = vmatprep.subr.bf16.mxu1 %v11196_v6  ;;  %v11256_v53 = vld [vmem:[%s15860_s1 + $0xe1c] ss:$24 sps:$4 sm:$0xff]   ;;  %v11254_v6 = vld [vmem:[%s15860_s1 + $0xe18] ss:$24 sps:$4 sm:$0xff]  }
 0x285   :  { %8317 = vmatprep.subr.bf16.mxu0 %v11199_v56  ;;  %7831 = vmatprep.mubr.bf16.mxu1 %v12946_v50  ;;  %v11259_v54 = vld [vmem:[%s15860_s1 + $0xe24] ss:$24 sps:$4 sm:$0xff]   ;;  %v11257_v56 = vld [vmem:[%s15860_s1 + $0xe20] ss:$24 sps:$4 sm:$0xff]  }
 0x286   :  { %8347 = vmatprep.mubr.bf16.mxu0 %v12946_v50  ;;  %v11211_v50 = vld [vmem:[%s15860_s1 + $0xca4] ss:$24 sps:$4 sm:$0xff]  }
 0x287   :  { %7802 = vmatpush1.bf16.msra.mxu1 %v11194_v59  ;;  %v11262_v59 = vld [vmem:[%s15860_s1 + $0xe4c] ss:$24 sps:$4 sm:$0xff]  }
 0x288   :  { %8318 = vmatpush1.bf16.msra.mxu0 %v11197_v60  ;;  %7803 = vmatprep.subr.bf16.mxu1 %v11202_v61  ;;  %v11265_v60 = vld [vmem:[%s15860_s1 + $0xe54] ss:$24 sps:$4 sm:$0xff]   ;;  %v11260_v61 = vld [vmem:[%s15860_s1 + $0xe48] ss:$24 sps:$4 sm:$0xff]  }
 0x289   :  { %8319 = vmatprep.subr.bf16.mxu0 %v11205_v8  ;;  %v11263_v8 = vld [vmem:[%s15860_s1 + $0xe50] ss:$24 sps:$4 sm:$0xff]  }
 0x28b   :  { %7804 = vmatpush1.bf16.msra.mxu1 %v11200_v48  ;;  %v11268_v48 = vld [vmem:[%s15860_s1 + $0xe7c] ss:$24 sps:$4 sm:$0xff]  }
 0x28c   :  { %8320 = vmatpush1.bf16.msra.mxu0 %v11203_v62  ;;  %7805 = vmatprep.subr.bf16.mxu1 %v11208_v63  ;;  %v11271_v62 = vld [vmem:[%s15860_s1 + $0xe84] ss:$24 sps:$4 sm:$0xff]   ;;  %v11266_v63 = vld [vmem:[%s15860_s1 + $0xe78] ss:$24 sps:$4 sm:$0xff]  }
 0x28d   :  { %8321 = vmatprep.subr.bf16.mxu0 %v11211_v50  ;;  %v11269_v50 = vld [vmem:[%s15860_s1 + $0xe80] ss:$24 sps:$4 sm:$0xff]  }
 0x28f   :  { %7806 = vmatpush1.bf16.msra.mxu1 %v11206_v0  ;;  %v11274_v0 = vld [vmem:[%s15860_s1 + $0xeac] ss:$24 sps:$4 sm:$0xff]  }
 0x290   :  { %8322 = vmatpush1.bf16.msra.mxu0 %v11209_v1  ;;  %7807 = vmatprep.subr.bf16.mxu1 %v11214_v33  ;;  %v11277_v1 = vld [vmem:[%s15860_s1 + $0xeb4] ss:$24 sps:$4 sm:$0xff]   ;;  %v11272_v33 = vld [vmem:[%s15860_s1 + $0xea8] ss:$24 sps:$4 sm:$0xff]  }
 0x291   :  { %8323 = vmatprep.subr.bf16.mxu0 %v11217_v10  ;;  %v11275_v10 = vld [vmem:[%s15860_s1 + $0xeb0] ss:$24 sps:$4 sm:$0xff]  }
 0x293   :  { %7808 = vmatpush1.bf16.msra.mxu1 %v11212_v3  ;;  %v11280_v3 = vld [vmem:[%s15860_s1 + $0xedc] ss:$24 sps:$4 sm:$0xff]  }
 0x294   :  { %8324 = vmatpush1.bf16.msra.mxu0 %v11215_v4  ;;  %7809 = vmatprep.subr.bf16.mxu1 %v11220_v5  ;;  %v11283_v4 = vld [vmem:[%s15860_s1 + $0xee4] ss:$24 sps:$4 sm:$0xff]   ;;  %v11278_v5 = vld [vmem:[%s15860_s1 + $0xed8] ss:$24 sps:$4 sm:$0xff]  }
 0x295   :  { %8325 = vmatprep.subr.bf16.mxu0 %v11223_v40  ;;  %v11281_v40 = vld [vmem:[%s15860_s1 + $0xee0] ss:$24 sps:$4 sm:$0xff]  }
 0x297   :  { %7810 = vmatpush1.bf16.msra.mxu1 %v11218_v47  ;;  %v11286_v47 = vld [vmem:[%s15860_s1 + $0xf0c] ss:$24 sps:$4 sm:$0xff]  }
 0x298   :  { %8326 = vmatpush1.bf16.msra.mxu0 %v11221_v14  ;;  %7811 = vmatprep.subr.bf16.mxu1 %v11226_v16  ;;  %v11289_v14 = vld [vmem:[%s15860_s1 + $0xf14] ss:$24 sps:$4 sm:$0xff]   ;;  %v11284_v16 = vld [vmem:[%s15860_s1 + $0xf08] ss:$24 sps:$4 sm:$0xff]  }
 0x299   :  { %8327 = vmatprep.subr.bf16.mxu0 %v11229_v17  ;;  %v11287_v17 = vld [vmem:[%s15860_s1 + $0xf10] ss:$24 sps:$4 sm:$0xff]  }
 0x29b   :  { %7812 = vmatpush1.bf16.msra.mxu1 %v11224_v18  ;;  %v11292_v18 = vld [vmem:[%s15860_s1 + $0xf3c] ss:$24 sps:$4 sm:$0xff]  }
 0x29c   :  { %8328 = vmatpush1.bf16.msra.mxu0 %v11227_v19  ;;  %7813 = vmatprep.subr.bf16.mxu1 %v11232_v24  ;;  %v11295_v19 = vld [vmem:[%s15860_s1 + $0xf44] ss:$24 sps:$4 sm:$0xff]   ;;  %v11290_v24 = vld [vmem:[%s15860_s1 + $0xf38] ss:$24 sps:$4 sm:$0xff]  }
 0x29d   :  { %8329 = vmatprep.subr.bf16.mxu0 %v11235_v25  ;;  %v11293_v25 = vld [vmem:[%s15860_s1 + $0xf40] ss:$24 sps:$4 sm:$0xff]  }
 0x29f   :  { %7814 = vmatpush1.bf16.msra.mxu1 %v11230_v41  ;;  %v11298_v41 = vld [vmem:[%s15860_s1 + $0xf6c] ss:$24 sps:$4 sm:$0xff]  }
 0x2a0   :  { %8330 = vmatpush1.bf16.msra.mxu0 %v11233_v42  ;;  %7815 = vmatprep.subr.bf16.mxu1 %v11238_v44  ;;  %v11296_v42 = vld [vmem:[%s15860_s1 + $0xf68] ss:$24 sps:$4 sm:$0xff]  }
 0x2a1   :  { %8331 = vmatprep.subr.bf16.mxu0 %v11241_v45  ;;  %v11299_v44 = vld [vmem:[%s15860_s1 + $0xf70] ss:$24 sps:$4 sm:$0xff]   ;;  %v11304_v45 = vld [vmem:[%s15860_s1 + $0xf9c] ss:$24 sps:$4 sm:$0xff]  }
 0x2a3   :  { %7816 = vmatpush1.bf16.msra.mxu1 %v11236_v26  ;;  %v11302_v26 = vld [vmem:[%s15860_s1 + $0xf98] ss:$24 sps:$4 sm:$0xff]  }
 0x2a4   :  { %8332 = vmatpush1.bf16.msra.mxu0 %v11239_v27  ;;  %7817 = vmatprep.subr.bf16.mxu1 %v11244_v20  ;;  %v11305_v27 = vld [vmem:[%s15860_s1 + $0xfa0] ss:$24 sps:$4 sm:$0xff]   ;;  %v11310_v20 = vld [vmem:[%s15860_s1 + $0xfcc] ss:$24 sps:$4 sm:$0xff]  }
 0x2a5   :  { %8333 = vmatprep.subr.bf16.mxu0 %v11247_v30  ;;  %v11313_v30 = vld [vmem:[%s15860_s1 + $0xfd4] ss:$24 sps:$4 sm:$0xff]  }
 0x2a7   :  { %7818 = vmatpush1.bf16.msra.mxu1 %v11242_v31  ;;  %v11308_v31 = vld [vmem:[%s15860_s1 + $0xfc8] ss:$24 sps:$4 sm:$0xff]  }
 0x2a8   :  { %8334 = vmatpush1.bf16.msra.mxu0 %v11245_v36  ;;  %7819 = vmatprep.subr.bf16.mxu1 %v11250_v32  ;;  %v11311_v36 = vld [vmem:[%s15860_s1 + $0xfd0] ss:$24 sps:$4 sm:$0xff]   ;;  %v11316_v32 = vld [vmem:[%s15860_s1 + $0xffc] ss:$24 sps:$4 sm:$0xff]  }
 0x2a9   :  { %8335 = vmatprep.subr.bf16.mxu0 %v11253_v52  ;;  %v11319_v52 = vld [vmem:[%s15860_s1 + $0x1004] ss:$24 sps:$4 sm:$0xff]  }
 0x2ab   :  { %7820 = vmatpush1.bf16.msra.mxu1 %v11248_v38  ;;  %v11314_v38 = vld [vmem:[%s15860_s1 + $0xff8] ss:$24 sps:$4 sm:$0xff]  }
 0x2ac   :  { %8336 = vmatpush1.bf16.msra.mxu0 %v11251_v39  ;;  %7821 = vmatprep.subr.bf16.mxu1 %v11256_v53  ;;  %v11317_v39 = vld [vmem:[%s15860_s1 + $0x1000] ss:$24 sps:$4 sm:$0xff]   ;;  %v11322_v53 = vld [vmem:[%s15860_s1 + $0x102c] ss:$24 sps:$4 sm:$0xff]  }
 0x2ad   :  { %8337 = vmatprep.subr.bf16.mxu0 %v11259_v54  ;;  %v11325_v54 = vld [vmem:[%s15860_s1 + $0x1034] ss:$24 sps:$4 sm:$0xff]  }
 0x2af   :  { %7822 = vmatpush1.bf16.msra.mxu1 %v11254_v6  ;;  %v11320_v6 = vld [vmem:[%s15860_s1 + $0x1028] ss:$24 sps:$4 sm:$0xff]  }
 0x2b0   :  { %8338 = vmatpush1.bf16.msra.mxu0 %v11257_v56  ;;  %7823 = vmatprep.subr.bf16.mxu1 %v11262_v59  ;;  %v11323_v56 = vld [vmem:[%s15860_s1 + $0x1030] ss:$24 sps:$4 sm:$0xff]   ;;  %v11328_v59 = vld [vmem:[%s15860_s1 + $0x105c] ss:$24 sps:$4 sm:$0xff]  }
 0x2b1   :  { %8339 = vmatprep.subr.bf16.mxu0 %v11265_v60  ;;  %v11331_v60 = vld [vmem:[%s15860_s1 + $0x1064] ss:$24 sps:$4 sm:$0xff]  }
 0x2b3   :  { %7824 = vmatpush1.bf16.msra.mxu1 %v11260_v61  ;;  %v11326_v61 = vld [vmem:[%s15860_s1 + $0x1058] ss:$24 sps:$4 sm:$0xff]  }
 0x2b4   :  { %8340 = vmatpush1.bf16.msra.mxu0 %v11263_v8  ;;  %7825 = vmatprep.subr.bf16.mxu1 %v11268_v48  ;;  %v11329_v8 = vld [vmem:[%s15860_s1 + $0x1060] ss:$24 sps:$4 sm:$0xff]   ;;  %v11334_v48 = vld [vmem:[%s15860_s1 + $0x108c] ss:$24 sps:$4 sm:$0xff]  }
 0x2b5   :  { %8341 = vmatprep.subr.bf16.mxu0 %v11271_v62  ;;  %v11337_v62 = vld [vmem:[%s15860_s1 + $0x1094] ss:$24 sps:$4 sm:$0xff]  }
 0x2b7   :  { %7826 = vmatpush1.bf16.msra.mxu1 %v11266_v63  ;;  %v11332_v63 = vld [vmem:[%s15860_s1 + $0x1088] ss:$24 sps:$4 sm:$0xff]  }
 0x2b8   :  { %8342 = vmatpush1.bf16.msra.mxu0 %v11269_v50  ;;  %7827 = vmatprep.subr.bf16.mxu1 %v11274_v0  ;;  %v11335_v50 = vld [vmem:[%s15860_s1 + $0x1090] ss:$24 sps:$4 sm:$0xff]   ;;  %v11340_v0 = vld [vmem:[%s15860_s1 + $0x10bc] ss:$24 sps:$4 sm:$0xff]  }
 0x2b9   :  { %8343 = vmatprep.subr.bf16.mxu0 %v11277_v1  ;;  %v11343_v1 = vld [vmem:[%s15860_s1 + $0x10c4] ss:$24 sps:$4 sm:$0xff]  }
 0x2bb   :  { %7828 = vmatpush1.bf16.msra.mxu1 %v11272_v33  ;;  %v11338_v33 = vld [vmem:[%s15860_s1 + $0x10b8] ss:$24 sps:$4 sm:$0xff]  }
 0x2bc   :  { %8344 = vmatpush1.bf16.msra.mxu0 %v11275_v10  ;;  %7829 = vmatprep.subr.bf16.mxu1 %v11280_v3  ;;  %v11341_v10 = vld [vmem:[%s15860_s1 + $0x10c0] ss:$24 sps:$4 sm:$0xff]   ;;  %v11346_v3 = vld [vmem:[%s15860_s1 + $0x10ec] ss:$24 sps:$4 sm:$0xff]  }
 0x2bd   :  { %8345 = vmatprep.subr.bf16.mxu0 %v11283_v4  ;;  %v11349_v4 = vld [vmem:[%s15860_s1 + $0x10f4] ss:$24 sps:$4 sm:$0xff]  }
 0x2bf   :  { %7830 = vmatpush1.bf16.msra.mxu1 %v11278_v5  ;;  %v11344_v5 = vld [vmem:[%s15860_s1 + $0x10e8] ss:$24 sps:$4 sm:$0xff]  }
 0x2c0   :  { %8346 = vmatpush1.bf16.msra.mxu0 %v11281_v40  ;;  %7842 = vmatprep.subr.bf16.mxu1 %v11286_v47  ;;  %v11347_v40 = vld [vmem:[%s15860_s1 + $0x10f0] ss:$24 sps:$4 sm:$0xff]   ;;  %v11352_v47 = vld [vmem:[%s15860_s1 + $0x111c] ss:$24 sps:$4 sm:$0xff]  }
 0x2c1   :  { %8358 = vmatprep.subr.bf16.mxu0 %v11289_v14  ;;  %v11355_v14 = vld [vmem:[%s15860_s1 + $0x1124] ss:$24 sps:$4 sm:$0xff]  }
 0x2c2   :  { %7832 = vmatmul.mubr.bf16.vlgmr.msra.gmra.mrb[4].mxu1 %v13158_v28 }
 0x2c3   :  { %8348 = vmatmul.mubr.bf16.vlgmr.msra.gmra.mrb[4].mxu0 %v13158_v28  ;;  %7843 = vmatpush1.bf16.msra.mxu1 %v11284_v16  ;;  %v11301_v28 = vld [vmem:[%s15860_s1 + $0xf74] ss:$24 sps:$4 sm:$0xff]   ;;  %v11350_v16 = vld [vmem:[%s15860_s1 + $0x1118] ss:$24 sps:$4 sm:$0xff]  }
 0x2c4   :  { %8359 = vmatpush1.bf16.msra.mxu0 %v11287_v17  ;;  %7844 = vmatprep.subr.bf16.mxu1 %v11292_v18  ;;  %v11353_v17 = vld [vmem:[%s15860_s1 + $0x1120] ss:$24 sps:$4 sm:$0xff]   ;;  %v11358_v18 = vld [vmem:[%s15860_s1 + $0x114c] ss:$24 sps:$4 sm:$0xff]  }
 0x2c5   :  { %8360 = vmatprep.subr.bf16.mxu0 %v11295_v19  ;;  %7874 = vmatprep.mubr.bf16.mxu1 %v13178_v12  ;;  %v11361_v19 = vld [vmem:[%s15860_s1 + $0x1154] ss:$24 sps:$4 sm:$0xff]  }
 0x2c6   :  { %8390 = vmatprep.mubr.bf16.mxu0 %v13178_v12  ;;  %v11307_v12 = vld [vmem:[%s15860_s1 + $0xfa4] ss:$24 sps:$4 sm:$0xff]  }
 0x2c7   :  { %7845 = vmatpush1.bf16.msra.mxu1 %v11290_v24  ;;  %v11356_v24 = vld [vmem:[%s15860_s1 + $0x1148] ss:$24 sps:$4 sm:$0xff]  }
 0x2c8   :  { %8361 = vmatpush1.bf16.msra.mxu0 %v11293_v25  ;;  %7846 = vmatprep.subr.bf16.mxu1 %v11298_v41  ;;  %v11359_v25 = vld [vmem:[%s15860_s1 + $0x1150] ss:$24 sps:$4 sm:$0xff]   ;;  %v11364_v41 = vld [vmem:[%s15860_s1 + $0x117c] ss:$24 sps:$4 sm:$0xff]  }
 0x2c9   :  { %8362 = vmatprep.subr.bf16.mxu0 %v11301_v28  ;;  %v11367_v28 = vld [vmem:[%s15860_s1 + $0x1184] ss:$24 sps:$4 sm:$0xff]  }
 0x2cb   :  { %7847 = vmatpush1.bf16.msra.mxu1 %v11296_v42  ;;  %v11362_v42 = vld [vmem:[%s15860_s1 + $0x1178] ss:$24 sps:$4 sm:$0xff]  }
 0x2cc   :  { %8363 = vmatpush1.bf16.msra.mxu0 %v11299_v44  ;;  %7848 = vmatprep.subr.bf16.mxu1 %v11304_v45  ;;  %v11365_v44 = vld [vmem:[%s15860_s1 + $0x1180] ss:$24 sps:$4 sm:$0xff]   ;;  %v11370_v45 = vld [vmem:[%s15860_s1 + $0x11ac] ss:$24 sps:$4 sm:$0xff]  }
 0x2cd   :  { %8364 = vmatprep.subr.bf16.mxu0 %v11307_v12  ;;  %v11373_v12 = vld [vmem:[%s15860_s1 + $0x11b4] ss:$24 sps:$4 sm:$0xff]  }
 0x2cf   :  { %7849 = vmatpush1.bf16.msra.mxu1 %v11302_v26  ;;  %v11368_v26 = vld [vmem:[%s15860_s1 + $0x11a8] ss:$24 sps:$4 sm:$0xff]  }
 0x2d0   :  { %8365 = vmatpush1.bf16.msra.mxu0 %v11305_v27  ;;  %7850 = vmatprep.subr.bf16.mxu1 %v11310_v20  ;;  %v11371_v27 = vld [vmem:[%s15860_s1 + $0x11b0] ss:$24 sps:$4 sm:$0xff]   ;;  %v11376_v20 = vld [vmem:[%s15860_s1 + $0x11dc] ss:$24 sps:$4 sm:$0xff]  }
 0x2d1   :  { %8366 = vmatprep.subr.bf16.mxu0 %v11313_v30  ;;  %v11379_v30 = vld [vmem:[%s15860_s1 + $0x11e4] ss:$24 sps:$4 sm:$0xff]  }
 0x2d3   :  { %7851 = vmatpush1.bf16.msra.mxu1 %v11308_v31  ;;  %v11374_v31 = vld [vmem:[%s15860_s1 + $0x11d8] ss:$24 sps:$4 sm:$0xff]  }
 0x2d4   :  { %8367 = vmatpush1.bf16.msra.mxu0 %v11311_v36  ;;  %7852 = vmatprep.subr.bf16.mxu1 %v11316_v32  ;;  %v11377_v36 = vld [vmem:[%s15860_s1 + $0x11e0] ss:$24 sps:$4 sm:$0xff]   ;;  %v11382_v32 = vld [vmem:[%s15860_s1 + $0x120c] ss:$24 sps:$4 sm:$0xff]  }
 0x2d5   :  { %8368 = vmatprep.subr.bf16.mxu0 %v11319_v52  ;;  %v11385_v52 = vld [vmem:[%s15860_s1 + $0x1214] ss:$24 sps:$4 sm:$0xff]  }
 0x2d7   :  { %7853 = vmatpush1.bf16.msra.mxu1 %v11314_v38  ;;  %v11380_v38 = vld [vmem:[%s15860_s1 + $0x1208] ss:$24 sps:$4 sm:$0xff]  }
 0x2d8   :  { %8369 = vmatpush1.bf16.msra.mxu0 %v11317_v39  ;;  %7854 = vmatprep.subr.bf16.mxu1 %v11322_v53  ;;  %v11383_v39 = vld [vmem:[%s15860_s1 + $0x1210] ss:$24 sps:$4 sm:$0xff]   ;;  %v11388_v53 = vld [vmem:[%s15860_s1 + $0x123c] ss:$24 sps:$4 sm:$0xff]  }
 0x2d9   :  { %8370 = vmatprep.subr.bf16.mxu0 %v11325_v54  ;;  %v11391_v54 = vld [vmem:[%s15860_s1 + $0x1244] ss:$24 sps:$4 sm:$0xff]  }
 0x2db   :  { %7855 = vmatpush1.bf16.msra.mxu1 %v11320_v6  ;;  %v11386_v6 = vld [vmem:[%s15860_s1 + $0x1238] ss:$24 sps:$4 sm:$0xff]  }
 0x2dc   :  { %8371 = vmatpush1.bf16.msra.mxu0 %v11323_v56  ;;  %7856 = vmatprep.subr.bf16.mxu1 %v11328_v59  ;;  %v11389_v56 = vld [vmem:[%s15860_s1 + $0x1240] ss:$24 sps:$4 sm:$0xff]   ;;  %v11394_v59 = vld [vmem:[%s15860_s1 + $0x126c] ss:$24 sps:$4 sm:$0xff]  }
 0x2dd   :  { %8372 = vmatprep.subr.bf16.mxu0 %v11331_v60  ;;  %v11392_v60 = vld [vmem:[%s15860_s1 + $0x1268] ss:$24 sps:$4 sm:$0xff]  }
 0x2df   :  { %7857 = vmatpush1.bf16.msra.mxu1 %v11326_v61  ;;  %v11395_v61 = vld [vmem:[%s15860_s1 + $0x1270] ss:$24 sps:$4 sm:$0xff]  }
 0x2e0   :  { %8373 = vmatpush1.bf16.msra.mxu0 %v11329_v8  ;;  %7858 = vmatprep.subr.bf16.mxu1 %v11334_v48  ;;  %v11400_v8 = vld [vmem:[%s15860_s1 + $0x129c] ss:$24 sps:$4 sm:$0xff]   ;;  %v11398_v48 = vld [vmem:[%s15860_s1 + $0x1298] ss:$24 sps:$4 sm:$0xff]  }
 0x2e1   :  { %8374 = vmatprep.subr.bf16.mxu0 %v11337_v62  ;;  %v11401_v62 = vld [vmem:[%s15860_s1 + $0x12a0] ss:$24 sps:$4 sm:$0xff]  }
 0x2e3   :  { %7859 = vmatpush1.bf16.msra.mxu1 %v11332_v63  ;;  %v11406_v63 = vld [vmem:[%s15860_s1 + $0x12cc] ss:$24 sps:$4 sm:$0xff]  }
 0x2e4   :  { %8375 = vmatpush1.bf16.msra.mxu0 %v11335_v50  ;;  %7860 = vmatprep.subr.bf16.mxu1 %v11340_v0  ;;  %v11409_v50 = vld [vmem:[%s15860_s1 + $0x12d4] ss:$24 sps:$4 sm:$0xff]   ;;  %v11404_v0 = vld [vmem:[%s15860_s1 + $0x12c8] ss:$24 sps:$4 sm:$0xff]  }
 0x2e5   :  { %8376 = vmatprep.subr.bf16.mxu0 %v11343_v1  ;;  %v11407_v1 = vld [vmem:[%s15860_s1 + $0x12d0] ss:$24 sps:$4 sm:$0xff]  }
 0x2e7   :  { %7861 = vmatpush1.bf16.msra.mxu1 %v11338_v33  ;;  %v11412_v33 = vld [vmem:[%s15860_s1 + $0x12fc] ss:$24 sps:$4 sm:$0xff]  }
 0x2e8   :  { %8377 = vmatpush1.bf16.msra.mxu0 %v11341_v10  ;;  %7862 = vmatprep.subr.bf16.mxu1 %v11346_v3  ;;  %v11415_v10 = vld [vmem:[%s15860_s1 + $0x1304] ss:$24 sps:$4 sm:$0xff]   ;;  %v11410_v3 = vld [vmem:[%s15860_s1 + $0x12f8] ss:$24 sps:$4 sm:$0xff]  }
 0x2e9   :  { %8378 = vmatprep.subr.bf16.mxu0 %v11349_v4  ;;  %v11413_v4 = vld [vmem:[%s15860_s1 + $0x1300] ss:$24 sps:$4 sm:$0xff]  }
 0x2eb   :  { %7863 = vmatpush1.bf16.msra.mxu1 %v11344_v5  ;;  %v11418_v5 = vld [vmem:[%s15860_s1 + $0x132c] ss:$24 sps:$4 sm:$0xff]  }
 0x2ec   :  { %8379 = vmatpush1.bf16.msra.mxu0 %v11347_v40  ;;  %7864 = vmatprep.subr.bf16.mxu1 %v11352_v47  ;;  %v11421_v40 = vld [vmem:[%s15860_s1 + $0x1334] ss:$24 sps:$4 sm:$0xff]   ;;  %v11416_v47 = vld [vmem:[%s15860_s1 + $0x1328] ss:$24 sps:$4 sm:$0xff]  }
 0x2ed   :  { %8380 = vmatprep.subr.bf16.mxu0 %v11355_v14  ;;  %v11419_v14 = vld [vmem:[%s15860_s1 + $0x1330] ss:$24 sps:$4 sm:$0xff]  }
 0x2ef   :  { %7865 = vmatpush1.bf16.msra.mxu1 %v11350_v16  ;;  %v11424_v16 = vld [vmem:[%s15860_s1 + $0x135c] ss:$24 sps:$4 sm:$0xff]  }
 0x2f0   :  { %8381 = vmatpush1.bf16.msra.mxu0 %v11353_v17  ;;  %7866 = vmatprep.subr.bf16.mxu1 %v11358_v18  ;;  %v11427_v17 = vld [vmem:[%s15860_s1 + $0x1364] ss:$24 sps:$4 sm:$0xff]   ;;  %v11422_v18 = vld [vmem:[%s15860_s1 + $0x1358] ss:$24 sps:$4 sm:$0xff]  }
 0x2f1   :  { %8382 = vmatprep.subr.bf16.mxu0 %v11361_v19  ;;  %v11425_v19 = vld [vmem:[%s15860_s1 + $0x1360] ss:$24 sps:$4 sm:$0xff]  }
 0x2f3   :  { %7867 = vmatpush1.bf16.msra.mxu1 %v11356_v24  ;;  %v11430_v24 = vld [vmem:[%s15860_s1 + $0x138c] ss:$24 sps:$4 sm:$0xff]  }
 0x2f4   :  { %8383 = vmatpush1.bf16.msra.mxu0 %v11359_v25  ;;  %7868 = vmatprep.subr.bf16.mxu1 %v11364_v41  ;;  %v11433_v25 = vld [vmem:[%s15860_s1 + $0x1394] ss:$24 sps:$4 sm:$0xff]   ;;  %v11428_v41 = vld [vmem:[%s15860_s1 + $0x1388] ss:$24 sps:$4 sm:$0xff]  }
 0x2f5   :  { %8384 = vmatprep.subr.bf16.mxu0 %v11367_v28  ;;  %v11431_v28 = vld [vmem:[%s15860_s1 + $0x1390] ss:$24 sps:$4 sm:$0xff]  }
 0x2f7   :  { %7869 = vmatpush1.bf16.msra.mxu1 %v11362_v42  ;;  %v11436_v42 = vld [vmem:[%s15860_s1 + $0x13bc] ss:$24 sps:$4 sm:$0xff]  }
 0x2f8   :  { %8385 = vmatpush1.bf16.msra.mxu0 %v11365_v44  ;;  %7870 = vmatprep.subr.bf16.mxu1 %v11370_v45  ;;  %v11439_v44 = vld [vmem:[%s15860_s1 + $0x13c4] ss:$24 sps:$4 sm:$0xff]   ;;  %v11434_v45 = vld [vmem:[%s15860_s1 + $0x13b8] ss:$24 sps:$4 sm:$0xff]  }
 0x2f9   :  { %8386 = vmatprep.subr.bf16.mxu0 %v11373_v12  ;;  %v11437_v12 = vld [vmem:[%s15860_s1 + $0x13c0] ss:$24 sps:$4 sm:$0xff]  }
 0x2fb   :  { %7871 = vmatpush1.bf16.msra.mxu1 %v11368_v26  ;;  %v11442_v26 = vld [vmem:[%s15860_s1 + $0x13ec] ss:$24 sps:$4 sm:$0xff]  }
 0x2fc   :  { %8387 = vmatpush1.bf16.msra.mxu0 %v11371_v27  ;;  %7872 = vmatprep.subr.bf16.mxu1 %v11376_v20  ;;  %v11445_v27 = vld [vmem:[%s15860_s1 + $0x13f4] ss:$24 sps:$4 sm:$0xff]   ;;  %v11440_v20 = vld [vmem:[%s15860_s1 + $0x13e8] ss:$24 sps:$4 sm:$0xff]  }
 0x2fd   :  { %8388 = vmatprep.subr.bf16.mxu0 %v11379_v30  ;;  %v11443_v30 = vld [vmem:[%s15860_s1 + $0x13f0] ss:$24 sps:$4 sm:$0xff]  }
 0x2ff   :  { %7873 = vmatpush1.bf16.msra.mxu1 %v11374_v31  ;;  %v11448_v31 = vld [vmem:[%s15860_s1 + $0x141c] ss:$24 sps:$4 sm:$0xff]  }
 0x300   :  { %8389 = vmatpush1.bf16.msra.mxu0 %v11377_v36  ;;  %7885 = vmatprep.subr.bf16.mxu1 %v11382_v32  ;;  %v11451_v36 = vld [vmem:[%s15860_s1 + $0x1424] ss:$24 sps:$4 sm:$0xff]   ;;  %v11446_v32 = vld [vmem:[%s15860_s1 + $0x1418] ss:$24 sps:$4 sm:$0xff]  }
 0x301   :  { %8401 = vmatprep.subr.bf16.mxu0 %v11385_v52  ;;  %v11449_v52 = vld [vmem:[%s15860_s1 + $0x1420] ss:$24 sps:$4 sm:$0xff]  }
 0x302   :  { %7875 = vmatmul.mubr.bf16.vlgmr.msra.gmra.mrb[4].mxu1 %v13370_v21 }
 0x303   :  { %8391 = vmatmul.mubr.bf16.vlgmr.msra.gmra.mrb[4].mxu0 %v13370_v21  ;;  %7886 = vmatpush1.bf16.msra.mxu1 %v11380_v38  ;;  %v11397_v21 = vld [vmem:[%s15860_s1 + $0x1274] ss:$24 sps:$4 sm:$0xff]  }
 0x304   :  { %8402 = vmatpush1.bf16.msra.mxu0 %v11383_v39  ;;  %7887 = vmatprep.subr.bf16.mxu1 %v11388_v53  ;;  %v11454_v38 = vld [vmem:[%s15860_s1 + $0x144c] ss:$24 sps:$4 sm:$0xff]   ;;  %v11452_v53 = vld [vmem:[%s15860_s1 + $0x1448] ss:$24 sps:$4 sm:$0xff]  }
 0x305   :  { %8403 = vmatprep.subr.bf16.mxu0 %v11391_v54  ;;  %7917 = vmatprep.mubr.bf16.mxu1 %v12161_v55  ;;  %v11457_v39 = vld [vmem:[%s15860_s1 + $0x1454] ss:$24 sps:$4 sm:$0xff]   ;;  %v11455_v54 = vld [vmem:[%s15860_s1 + $0x1450] ss:$24 sps:$4 sm:$0xff]  }
 0x306   :  { %8433 = vmatprep.mubr.bf16.mxu0 %v12161_v55  ;;  %v11403_v55 = vld [vmem:[%s15860_s1 + $0x12a4] ss:$24 sps:$4 sm:$0xff]  }
 0x307   :  { %7888 = vmatpush1.bf16.msra.mxu1 %v11386_v6  ;;  %v11460_v6 = vld [vmem:[%s15860_s1 + $0x147c] ss:$24 sps:$4 sm:$0xff]  }
 0x308   :  { %8404 = vmatpush1.bf16.msra.mxu0 %v11389_v56  ;;  %7889 = vmatprep.subr.bf16.mxu1 %v11394_v59  ;;  %v11463_v56 = vld [vmem:[%s15860_s1 + $0x1484] ss:$24 sps:$4 sm:$0xff]   ;;  %v11458_v59 = vld [vmem:[%s15860_s1 + $0x1478] ss:$24 sps:$4 sm:$0xff]  }
 0x309   :  { %8405 = vmatprep.subr.bf16.mxu0 %v11397_v21  ;;  %v11461_v21 = vld [vmem:[%s15860_s1 + $0x1480] ss:$24 sps:$4 sm:$0xff]  }
 0x30b   :  { %7890 = vmatpush1.bf16.msra.mxu1 %v11392_v60  ;;  %v11466_v60 = vld [vmem:[%s15860_s1 + $0x14ac] ss:$24 sps:$4 sm:$0xff]  }
 0x30c   :  { %8406 = vmatpush1.bf16.msra.mxu0 %v11395_v61  ;;  %7891 = vmatprep.subr.bf16.mxu1 %v11400_v8  ;;  %v11469_v61 = vld [vmem:[%s15860_s1 + $0x14b4] ss:$24 sps:$4 sm:$0xff]   ;;  %v11464_v8 = vld [vmem:[%s15860_s1 + $0x14a8] ss:$24 sps:$4 sm:$0xff]  }
 0x30d   :  { %8407 = vmatprep.subr.bf16.mxu0 %v11403_v55  ;;  %v11467_v55 = vld [vmem:[%s15860_s1 + $0x14b0] ss:$24 sps:$4 sm:$0xff]  }
 0x30f   :  { %7892 = vmatpush1.bf16.msra.mxu1 %v11398_v48  ;;  %v11472_v48 = vld [vmem:[%s15860_s1 + $0x14dc] ss:$24 sps:$4 sm:$0xff]  }
 0x310   :  { %8408 = vmatpush1.bf16.msra.mxu0 %v11401_v62  ;;  %7893 = vmatprep.subr.bf16.mxu1 %v11406_v63  ;;  %v11475_v62 = vld [vmem:[%s15860_s1 + $0x14e4] ss:$24 sps:$4 sm:$0xff]   ;;  %v11470_v63 = vld [vmem:[%s15860_s1 + $0x14d8] ss:$24 sps:$4 sm:$0xff]  }
 0x311   :  { %8409 = vmatprep.subr.bf16.mxu0 %v11409_v50  ;;  %v11473_v50 = vld [vmem:[%s15860_s1 + $0x14e0] ss:$24 sps:$4 sm:$0xff]  }
 0x313   :  { %7894 = vmatpush1.bf16.msra.mxu1 %v11404_v0  ;;  %v11478_v0 = vld [vmem:[%s15860_s1 + $0x150c] ss:$24 sps:$4 sm:$0xff]  }
 0x314   :  { %8410 = vmatpush1.bf16.msra.mxu0 %v11407_v1  ;;  %7895 = vmatprep.subr.bf16.mxu1 %v11412_v33  ;;  %v11481_v1 = vld [vmem:[%s15860_s1 + $0x1514] ss:$24 sps:$4 sm:$0xff]   ;;  %v11476_v33 = vld [vmem:[%s15860_s1 + $0x1508] ss:$24 sps:$4 sm:$0xff]  }
 0x315   :  { %8411 = vmatprep.subr.bf16.mxu0 %v11415_v10  ;;  %v11479_v10 = vld [vmem:[%s15860_s1 + $0x1510] ss:$24 sps:$4 sm:$0xff]  }
 0x317   :  { %7896 = vmatpush1.bf16.msra.mxu1 %v11410_v3  ;;  %v11484_v3 = vld [vmem:[%s15860_s1 + $0x153c] ss:$24 sps:$4 sm:$0xff]  }
 0x318   :  { %8412 = vmatpush1.bf16.msra.mxu0 %v11413_v4  ;;  %7897 = vmatprep.subr.bf16.mxu1 %v11418_v5  ;;  %v11487_v4 = vld [vmem:[%s15860_s1 + $0x1544] ss:$24 sps:$4 sm:$0xff]   ;;  %v11482_v5 = vld [vmem:[%s15860_s1 + $0x1538] ss:$24 sps:$4 sm:$0xff]  }
 0x319   :  { %8413 = vmatprep.subr.bf16.mxu0 %v11421_v40  ;;  %v11485_v40 = vld [vmem:[%s15860_s1 + $0x1540] ss:$24 sps:$4 sm:$0xff]  }
 0x31b   :  { %7898 = vmatpush1.bf16.msra.mxu1 %v11416_v47  ;;  %v11490_v47 = vld [vmem:[%s15860_s1 + $0x156c] ss:$24 sps:$4 sm:$0xff]  }
 0x31c   :  { %8414 = vmatpush1.bf16.msra.mxu0 %v11419_v14  ;;  %7899 = vmatprep.subr.bf16.mxu1 %v11424_v16  ;;  %v11488_v14 = vld [vmem:[%s15860_s1 + $0x1568] ss:$24 sps:$4 sm:$0xff]  }
 0x31d   :  { %8415 = vmatprep.subr.bf16.mxu0 %v11427_v17  ;;  %v11491_v16 = vld [vmem:[%s15860_s1 + $0x1570] ss:$24 sps:$4 sm:$0xff]   ;;  %v11496_v17 = vld [vmem:[%s15860_s1 + $0x159c] ss:$24 sps:$4 sm:$0xff]  }
 0x31f   :  { %7900 = vmatpush1.bf16.msra.mxu1 %v11422_v18  ;;  %v11494_v18 = vld [vmem:[%s15860_s1 + $0x1598] ss:$24 sps:$4 sm:$0xff]  }
 0x320   :  { %8416 = vmatpush1.bf16.msra.mxu0 %v11425_v19  ;;  %7901 = vmatprep.subr.bf16.mxu1 %v11430_v24  ;;  %v11497_v19 = vld [vmem:[%s15860_s1 + $0x15a0] ss:$24 sps:$4 sm:$0xff]   ;;  %v11502_v24 = vld [vmem:[%s15860_s1 + $0x15cc] ss:$24 sps:$4 sm:$0xff]  }
 0x321   :  { %8417 = vmatprep.subr.bf16.mxu0 %v11433_v25  ;;  %v11505_v25 = vld [vmem:[%s15860_s1 + $0x15d4] ss:$24 sps:$4 sm:$0xff]  }
 0x323   :  { %7902 = vmatpush1.bf16.msra.mxu1 %v11428_v41  ;;  %v11500_v41 = vld [vmem:[%s15860_s1 + $0x15c8] ss:$24 sps:$4 sm:$0xff]  }
 0x324   :  { %8418 = vmatpush1.bf16.msra.mxu0 %v11431_v28  ;;  %7903 = vmatprep.subr.bf16.mxu1 %v11436_v42  ;;  %v11503_v28 = vld [vmem:[%s15860_s1 + $0x15d0] ss:$24 sps:$4 sm:$0xff]   ;;  %v11508_v42 = vld [vmem:[%s15860_s1 + $0x15fc] ss:$24 sps:$4 sm:$0xff]  }
 0x325   :  { %8419 = vmatprep.subr.bf16.mxu0 %v11439_v44  ;;  %v11511_v44 = vld [vmem:[%s15860_s1 + $0x1604] ss:$24 sps:$4 sm:$0xff]  }
 0x327   :  { %7904 = vmatpush1.bf16.msra.mxu1 %v11434_v45  ;;  %v11506_v45 = vld [vmem:[%s15860_s1 + $0x15f8] ss:$24 sps:$4 sm:$0xff]  }
 0x328   :  { %8420 = vmatpush1.bf16.msra.mxu0 %v11437_v12  ;;  %7905 = vmatprep.subr.bf16.mxu1 %v11442_v26  ;;  %v11509_v12 = vld [vmem:[%s15860_s1 + $0x1600] ss:$24 sps:$4 sm:$0xff]   ;;  %v11514_v26 = vld [vmem:[%s15860_s1 + $0x162c] ss:$24 sps:$4 sm:$0xff]  }
 0x329   :  { %8421 = vmatprep.subr.bf16.mxu0 %v11445_v27  ;;  %v11517_v27 = vld [vmem:[%s15860_s1 + $0x1634] ss:$24 sps:$4 sm:$0xff]  }
 0x32b   :  { %7906 = vmatpush1.bf16.msra.mxu1 %v11440_v20  ;;  %v11512_v20 = vld [vmem:[%s15860_s1 + $0x1628] ss:$24 sps:$4 sm:$0xff]  }
 0x32c   :  { %8422 = vmatpush1.bf16.msra.mxu0 %v11443_v30  ;;  %7907 = vmatprep.subr.bf16.mxu1 %v11448_v31  ;;  %v11515_v30 = vld [vmem:[%s15860_s1 + $0x1630] ss:$24 sps:$4 sm:$0xff]   ;;  %v11520_v31 = vld [vmem:[%s15860_s1 + $0x165c] ss:$24 sps:$4 sm:$0xff]  }
 0x32d   :  { %8423 = vmatprep.subr.bf16.mxu0 %v11451_v36  ;;  %v11523_v36 = vld [vmem:[%s15860_s1 + $0x1664] ss:$24 sps:$4 sm:$0xff]  }
 0x32f   :  { %7908 = vmatpush1.bf16.msra.mxu1 %v11446_v32  ;;  %v11518_v32 = vld [vmem:[%s15860_s1 + $0x1658] ss:$24 sps:$4 sm:$0xff]  }
 0x330   :  { %8424 = vmatpush1.bf16.msra.mxu0 %v11449_v52  ;;  %7909 = vmatprep.subr.bf16.mxu1 %v11454_v38  ;;  %v11521_v52 = vld [vmem:[%s15860_s1 + $0x1660] ss:$24 sps:$4 sm:$0xff]   ;;  %v11526_v38 = vld [vmem:[%s15860_s1 + $0x168c] ss:$24 sps:$4 sm:$0xff]  }
 0x331   :  { %8425 = vmatprep.subr.bf16.mxu0 %v11457_v39  ;;  %v11529_v39 = vld [vmem:[%s15860_s1 + $0x1694] ss:$24 sps:$4 sm:$0xff]  }
 0x333   :  { %7910 = vmatpush1.bf16.msra.mxu1 %v11452_v53  ;;  %v11524_v53 = vld [vmem:[%s15860_s1 + $0x1688] ss:$24 sps:$4 sm:$0xff]  }
 0x334   :  { %8426 = vmatpush1.bf16.msra.mxu0 %v11455_v54  ;;  %7911 = vmatprep.subr.bf16.mxu1 %v11460_v6  ;;  %v11527_v54 = vld [vmem:[%s15860_s1 + $0x1690] ss:$24 sps:$4 sm:$0xff]   ;;  %v11532_v6 = vld [vmem:[%s15860_s1 + $0x16bc] ss:$24 sps:$4 sm:$0xff]  }
 0x335   :  { %8427 = vmatprep.subr.bf16.mxu0 %v11463_v56  ;;  %v11535_v56 = vld [vmem:[%s15860_s1 + $0x16c4] ss:$24 sps:$4 sm:$0xff]  }
 0x337   :  { %7912 = vmatpush1.bf16.msra.mxu1 %v11458_v59  ;;  %v11530_v59 = vld [vmem:[%s15860_s1 + $0x16b8] ss:$24 sps:$4 sm:$0xff]  }
 0x338   :  { %8428 = vmatpush1.bf16.msra.mxu0 %v11461_v21  ;;  %7913 = vmatprep.subr.bf16.mxu1 %v11466_v60  ;;  %v11533_v21 = vld [vmem:[%s15860_s1 + $0x16c0] ss:$24 sps:$4 sm:$0xff]   ;;  %v11538_v60 = vld [vmem:[%s15860_s1 + $0x16ec] ss:$24 sps:$4 sm:$0xff]  }
 0x339   :  { %8429 = vmatprep.subr.bf16.mxu0 %v11469_v61  ;;  %v11541_v61 = vld [vmem:[%s15860_s1 + $0x16f4] ss:$24 sps:$4 sm:$0xff]  }
 0x33b   :  { %7914 = vmatpush1.bf16.msra.mxu1 %v11464_v8  ;;  %v11536_v8 = vld [vmem:[%s15860_s1 + $0x16e8] ss:$24 sps:$4 sm:$0xff]  }
 0x33c   :  { %8430 = vmatpush1.bf16.msra.mxu0 %v11467_v55  ;;  %7915 = vmatprep.subr.bf16.mxu1 %v11472_v48  ;;  %v11539_v55 = vld [vmem:[%s15860_s1 + $0x16f0] ss:$24 sps:$4 sm:$0xff]   ;;  %v11544_v48 = vld [vmem:[%s15860_s1 + $0x171c] ss:$24 sps:$4 sm:$0xff]  }
 0x33d   :  { %8431 = vmatprep.subr.bf16.mxu0 %v11475_v62  ;;  %v11547_v62 = vld [vmem:[%s15860_s1 + $0x1724] ss:$24 sps:$4 sm:$0xff]  }
 0x33f   :  { %7916 = vmatpush1.bf16.msra.mxu1 %v11470_v63  ;;  %v11542_v63 = vld [vmem:[%s15860_s1 + $0x1718] ss:$24 sps:$4 sm:$0xff]  }
 0x340   :  { %8432 = vmatpush1.bf16.msra.mxu0 %v11473_v50  ;;  %7928 = vmatprep.subr.bf16.mxu1 %v11478_v0  ;;  %v11545_v50 = vld [vmem:[%s15860_s1 + $0x1720] ss:$24 sps:$4 sm:$0xff]   ;;  %v11550_v0 = vld [vmem:[%s15860_s1 + $0x174c] ss:$24 sps:$4 sm:$0xff]  }
 0x341   :  { %8444 = vmatprep.subr.bf16.mxu0 %v11481_v1  ;;  %v11553_v1 = vld [vmem:[%s15860_s1 + $0x1754] ss:$24 sps:$4 sm:$0xff]  }
 0x342   :  { %7918 = vmatmul.mubr.bf16.vlgmr.msra.gmra.mrb[4].mxu1 %v12220_v11 }
 0x343   :  { %8434 = vmatmul.mubr.bf16.vlgmr.msra.gmra.mrb[4].mxu0 %v12220_v11  ;;  %7929 = vmatpush1.bf16.msra.mxu1 %v11476_v33  ;;  %v11493_v11 = vld [vmem:[%s15860_s1 + $0x1574] ss:$24 sps:$4 sm:$0xff]   ;;  %v11548_v33 = vld [vmem:[%s15860_s1 + $0x1748] ss:$24 sps:$4 sm:$0xff]  }
 0x344   :  { %8445 = vmatpush1.bf16.msra.mxu0 %v11479_v10  ;;  %7930 = vmatprep.subr.bf16.mxu1 %v11484_v3  ;;  %v11551_v10 = vld [vmem:[%s15860_s1 + $0x1750] ss:$24 sps:$4 sm:$0xff]   ;;  %v11556_v3 = vld [vmem:[%s15860_s1 + $0x177c] ss:$24 sps:$4 sm:$0xff]  }
 0x345   :  { %8446 = vmatprep.subr.bf16.mxu0 %v11487_v4  ;;  %7960 = vmatprep.mubr.bf16.mxu1 %v12329_v43  ;;  %v11559_v4 = vld [vmem:[%s15860_s1 + $0x1784] ss:$24 sps:$4 sm:$0xff]  }
 0x346   :  { %8476 = vmatprep.mubr.bf16.mxu0 %v12329_v43  ;;  %v11499_v43 = vld [vmem:[%s15860_s1 + $0x15a4] ss:$24 sps:$4 sm:$0xff]  }
 0x347   :  { %7931 = vmatpush1.bf16.msra.mxu1 %v11482_v5  ;;  %v11554_v5 = vld [vmem:[%s15860_s1 + $0x1778] ss:$24 sps:$4 sm:$0xff]  }
 0x348   :  { %8447 = vmatpush1.bf16.msra.mxu0 %v11485_v40  ;;  %7932 = vmatprep.subr.bf16.mxu1 %v11490_v47  ;;  %v11557_v40 = vld [vmem:[%s15860_s1 + $0x1780] ss:$24 sps:$4 sm:$0xff]   ;;  %v11562_v47 = vld [vmem:[%s15860_s1 + $0x17ac] ss:$24 sps:$4 sm:$0xff]  }
 0x349   :  { %8448 = vmatprep.subr.bf16.mxu0 %v11493_v11  ;;  %v11565_v11 = vld [vmem:[%s15860_s1 + $0x17b4] ss:$24 sps:$4 sm:$0xff]  }
 0x34b   :  { %7933 = vmatpush1.bf16.msra.mxu1 %v11488_v14  ;;  %v11560_v14 = vld [vmem:[%s15860_s1 + $0x17a8] ss:$24 sps:$4 sm:$0xff]  }
 0x34c   :  { %8449 = vmatpush1.bf16.msra.mxu0 %v11491_v16  ;;  %7934 = vmatprep.subr.bf16.mxu1 %v11496_v17  ;;  %v11563_v16 = vld [vmem:[%s15860_s1 + $0x17b0] ss:$24 sps:$4 sm:$0xff]   ;;  %v11568_v17 = vld [vmem:[%s15860_s1 + $0x17dc] ss:$24 sps:$4 sm:$0xff]  }
 0x34d   :  { %8450 = vmatprep.subr.bf16.mxu0 %v11499_v43  ;;  %v11571_v43 = vld [vmem:[%s15860_s1 + $0x17e4] ss:$24 sps:$4 sm:$0xff]  }
 0x34f   :  { %7935 = vmatpush1.bf16.msra.mxu1 %v11494_v18  ;;  %v11566_v18 = vld [vmem:[%s15860_s1 + $0x17d8] ss:$24 sps:$4 sm:$0xff]  }
 0x350   :  { %8451 = vmatpush1.bf16.msra.mxu0 %v11497_v19  ;;  %7936 = vmatprep.subr.bf16.mxu1 %v11502_v24  ;;  %v11569_v19 = vld [vmem:[%s15860_s1 + $0x17e0] ss:$24 sps:$4 sm:$0xff]   ;;  %v11574_v24 = vld [vmem:[%s15860_s1 + $0x180c] ss:$24 sps:$4 sm:$0xff]  }
 0x351   :  { %8452 = vmatprep.subr.bf16.mxu0 %v11505_v25  ;;  %v11577_v25 = vld [vmem:[%s15860_s1 + $0x1814] ss:$24 sps:$4 sm:$0xff]  }
 0x353   :  { %7937 = vmatpush1.bf16.msra.mxu1 %v11500_v41  ;;  %v11572_v41 = vld [vmem:[%s15860_s1 + $0x1808] ss:$24 sps:$4 sm:$0xff]  }
 0x354   :  { %8453 = vmatpush1.bf16.msra.mxu0 %v11503_v28  ;;  %7938 = vmatprep.subr.bf16.mxu1 %v11508_v42  ;;  %v11575_v28 = vld [vmem:[%s15860_s1 + $0x1810] ss:$24 sps:$4 sm:$0xff]   ;;  %v11580_v42 = vld [vmem:[%s15860_s1 + $0x183c] ss:$24 sps:$4 sm:$0xff]  }
 0x355   :  { %8454 = vmatprep.subr.bf16.mxu0 %v11511_v44  ;;  %v11583_v44 = vld [vmem:[%s15860_s1 + $0x1844] ss:$24 sps:$4 sm:$0xff]  }
 0x357   :  { %7939 = vmatpush1.bf16.msra.mxu1 %v11506_v45  ;;  %v11578_v45 = vld [vmem:[%s15860_s1 + $0x1838] ss:$24 sps:$4 sm:$0xff]  }
 0x358   :  { %8455 = vmatpush1.bf16.msra.mxu0 %v11509_v12  ;;  %7940 = vmatprep.subr.bf16.mxu1 %v11514_v26  ;;  %v11581_v12 = vld [vmem:[%s15860_s1 + $0x1840] ss:$24 sps:$4 sm:$0xff]   ;;  %v11586_v26 = vld [vmem:[%s15860_s1 + $0x186c] ss:$24 sps:$4 sm:$0xff]  }
 0x359   :  { %8456 = vmatprep.subr.bf16.mxu0 %v11517_v27  ;;  %v11584_v27 = vld [vmem:[%s15860_s1 + $0x1868] ss:$24 sps:$4 sm:$0xff]  }
 0x35b   :  { %7941 = vmatpush1.bf16.msra.mxu1 %v11512_v20  ;;  %v11587_v20 = vld [vmem:[%s15860_s1 + $0x1870] ss:$24 sps:$4 sm:$0xff]  }
 0x35c   :  { %8457 = vmatpush1.bf16.msra.mxu0 %v11515_v30  ;;  %7942 = vmatprep.subr.bf16.mxu1 %v11520_v31  ;;  %v11592_v30 = vld [vmem:[%s15860_s1 + $0x189c] ss:$24 sps:$4 sm:$0xff]   ;;  %v11590_v31 = vld [vmem:[%s15860_s1 + $0x1898] ss:$24 sps:$4 sm:$0xff]  }
 0x35d   :  { %8458 = vmatprep.subr.bf16.mxu0 %v11523_v36  ;;  %v11593_v36 = vld [vmem:[%s15860_s1 + $0x18a0] ss:$24 sps:$4 sm:$0xff]  }
 0x35f   :  { %7943 = vmatpush1.bf16.msra.mxu1 %v11518_v32  ;;  %v11598_v32 = vld [vmem:[%s15860_s1 + $0x18cc] ss:$24 sps:$4 sm:$0xff]  }
 0x360   :  { %8459 = vmatpush1.bf16.msra.mxu0 %v11521_v52  ;;  %7944 = vmatprep.subr.bf16.mxu1 %v11526_v38  ;;  %v11601_v52 = vld [vmem:[%s15860_s1 + $0x18d4] ss:$24 sps:$4 sm:$0xff]   ;;  %v11596_v38 = vld [vmem:[%s15860_s1 + $0x18c8] ss:$24 sps:$4 sm:$0xff]  }
 0x361   :  { %8460 = vmatprep.subr.bf16.mxu0 %v11529_v39  ;;  %v11599_v39 = vld [vmem:[%s15860_s1 + $0x18d0] ss:$24 sps:$4 sm:$0xff]  }
 0x363   :  { %7945 = vmatpush1.bf16.msra.mxu1 %v11524_v53  ;;  %v11604_v53 = vld [vmem:[%s15860_s1 + $0x18fc] ss:$24 sps:$4 sm:$0xff]  }
 0x364   :  { %8461 = vmatpush1.bf16.msra.mxu0 %v11527_v54  ;;  %7946 = vmatprep.subr.bf16.mxu1 %v11532_v6  ;;  %v11607_v54 = vld [vmem:[%s15860_s1 + $0x1904] ss:$24 sps:$4 sm:$0xff]   ;;  %v11602_v6 = vld [vmem:[%s15860_s1 + $0x18f8] ss:$24 sps:$4 sm:$0xff]  }
 0x365   :  { %8462 = vmatprep.subr.bf16.mxu0 %v11535_v56  ;;  %v11605_v56 = vld [vmem:[%s15860_s1 + $0x1900] ss:$24 sps:$4 sm:$0xff]  }
 0x367   :  { %7947 = vmatpush1.bf16.msra.mxu1 %v11530_v59  ;;  %v11610_v59 = vld [vmem:[%s15860_s1 + $0x192c] ss:$24 sps:$4 sm:$0xff]  }
 0x368   :  { %8463 = vmatpush1.bf16.msra.mxu0 %v11533_v21  ;;  %7948 = vmatprep.subr.bf16.mxu1 %v11538_v60  ;;  %v11613_v21 = vld [vmem:[%s15860_s1 + $0x1934] ss:$24 sps:$4 sm:$0xff]   ;;  %v11608_v60 = vld [vmem:[%s15860_s1 + $0x1928] ss:$24 sps:$4 sm:$0xff]  }
 0x369   :  { %8464 = vmatprep.subr.bf16.mxu0 %v11541_v61  ;;  %v11611_v61 = vld [vmem:[%s15860_s1 + $0x1930] ss:$24 sps:$4 sm:$0xff]  }
 0x36b   :  { %7949 = vmatpush1.bf16.msra.mxu1 %v11536_v8  ;;  %v11616_v8 = vld [vmem:[%s15860_s1 + $0x195c] ss:$24 sps:$4 sm:$0xff]  }
 0x36c   :  { %8465 = vmatpush1.bf16.msra.mxu0 %v11539_v55  ;;  %7950 = vmatprep.subr.bf16.mxu1 %v11544_v48  ;;  %v11619_v55 = vld [vmem:[%s15860_s1 + $0x1964] ss:$24 sps:$4 sm:$0xff]   ;;  %v11614_v48 = vld [vmem:[%s15860_s1 + $0x1958] ss:$24 sps:$4 sm:$0xff]  }
 0x36d   :  { %8466 = vmatprep.subr.bf16.mxu0 %v11547_v62  ;;  %v11617_v62 = vld [vmem:[%s15860_s1 + $0x1960] ss:$24 sps:$4 sm:$0xff]  }
 0x36f   :  { %7951 = vmatpush1.bf16.msra.mxu1 %v11542_v63  ;;  %v11622_v63 = vld [vmem:[%s15860_s1 + $0x198c] ss:$24 sps:$4 sm:$0xff]  }
 0x370   :  { %8467 = vmatpush1.bf16.msra.mxu0 %v11545_v50  ;;  %7952 = vmatprep.subr.bf16.mxu1 %v11550_v0  ;;  %v11625_v50 = vld [vmem:[%s15860_s1 + $0x1994] ss:$24 sps:$4 sm:$0xff]   ;;  %v11620_v0 = vld [vmem:[%s15860_s1 + $0x1988] ss:$24 sps:$4 sm:$0xff]  }
 0x371   :  { %8468 = vmatprep.subr.bf16.mxu0 %v11553_v1  ;;  %v11623_v1 = vld [vmem:[%s15860_s1 + $0x1990] ss:$24 sps:$4 sm:$0xff]  }
 0x373   :  { %7953 = vmatpush1.bf16.msra.mxu1 %v11548_v33  ;;  %v11628_v33 = vld [vmem:[%s15860_s1 + $0x19bc] ss:$24 sps:$4 sm:$0xff]  }
 0x374   :  { %8469 = vmatpush1.bf16.msra.mxu0 %v11551_v10  ;;  %7954 = vmatprep.subr.bf16.mxu1 %v11556_v3  ;;  %v11631_v10 = vld [vmem:[%s15860_s1 + $0x19c4] ss:$24 sps:$4 sm:$0xff]   ;;  %v11626_v3 = vld [vmem:[%s15860_s1 + $0x19b8] ss:$24 sps:$4 sm:$0xff]  }
 0x375   :  { %8470 = vmatprep.subr.bf16.mxu0 %v11559_v4  ;;  %v11629_v4 = vld [vmem:[%s15860_s1 + $0x19c0] ss:$24 sps:$4 sm:$0xff]  }
 0x377   :  { %7955 = vmatpush1.bf16.msra.mxu1 %v11554_v5  ;;  %v11634_v5 = vld [vmem:[%s15860_s1 + $0x19ec] ss:$24 sps:$4 sm:$0xff]  }
 0x378   :  { %8471 = vmatpush1.bf16.msra.mxu0 %v11557_v40  ;;  %7956 = vmatprep.subr.bf16.mxu1 %v11562_v47  ;;  %v11637_v40 = vld [vmem:[%s15860_s1 + $0x19f4] ss:$24 sps:$4 sm:$0xff]   ;;  %v11632_v47 = vld [vmem:[%s15860_s1 + $0x19e8] ss:$24 sps:$4 sm:$0xff]  }
 0x379   :  { %8472 = vmatprep.subr.bf16.mxu0 %v11565_v11  ;;  %v11635_v11 = vld [vmem:[%s15860_s1 + $0x19f0] ss:$24 sps:$4 sm:$0xff]  }
 0x37b   :  { %7957 = vmatpush1.bf16.msra.mxu1 %v11560_v14  ;;  %v11640_v14 = vld [vmem:[%s15860_s1 + $0x1a1c] ss:$24 sps:$4 sm:$0xff]  }
 0x37c   :  { %8473 = vmatpush1.bf16.msra.mxu0 %v11563_v16  ;;  %7958 = vmatprep.subr.bf16.mxu1 %v11568_v17  ;;  %v11643_v16 = vld [vmem:[%s15860_s1 + $0x1a24] ss:$24 sps:$4 sm:$0xff]   ;;  %v11638_v17 = vld [vmem:[%s15860_s1 + $0x1a18] ss:$24 sps:$4 sm:$0xff]  }
 0x37d   :  { %8474 = vmatprep.subr.bf16.mxu0 %v11571_v43  ;;  %v11641_v43 = vld [vmem:[%s15860_s1 + $0x1a20] ss:$24 sps:$4 sm:$0xff]  }
 0x37f   :  { %7959 = vmatpush1.bf16.msra.mxu1 %v11566_v18  ;;  %v11646_v18 = vld [vmem:[%s15860_s1 + $0x1a4c] ss:$24 sps:$4 sm:$0xff]  }
 0x380   :  { %8475 = vmatpush1.bf16.msra.mxu0 %v11569_v19  ;;  %7971 = vmatprep.subr.bf16.mxu1 %v11574_v24  ;;  %v11649_v19 = vld [vmem:[%s15860_s1 + $0x1a54] ss:$24 sps:$4 sm:$0xff]   ;;  %v11644_v24 = vld [vmem:[%s15860_s1 + $0x1a48] ss:$24 sps:$4 sm:$0xff]  }
 0x381   :  { %8487 = vmatprep.subr.bf16.mxu0 %v11577_v25  ;;  %v11647_v25 = vld [vmem:[%s15860_s1 + $0x1a50] ss:$24 sps:$4 sm:$0xff]  }
 0x382   :  { %7961 = vmatmul.mubr.bf16.vlgmr.msra.gmra.mrb[4].mxu1 %v12449_v22 }
 0x383   :  { %8477 = vmatmul.mubr.bf16.vlgmr.msra.gmra.mrb[4].mxu0 %v12449_v22  ;;  %7972 = vmatpush1.bf16.msra.mxu1 %v11572_v41  ;;  %v11589_v22 = vld [vmem:[%s15860_s1 + $0x1874] ss:$24 sps:$4 sm:$0xff]  }
 0x384   :  { %8488 = vmatpush1.bf16.msra.mxu0 %v11575_v28  ;;  %7973 = vmatprep.subr.bf16.mxu1 %v11580_v42  ;;  %v11652_v41 = vld [vmem:[%s15860_s1 + $0x1a7c] ss:$24 sps:$4 sm:$0xff]   ;;  %v11650_v42 = vld [vmem:[%s15860_s1 + $0x1a78] ss:$24 sps:$4 sm:$0xff]  }
 0x385   :  { %8489 = vmatprep.subr.bf16.mxu0 %v11583_v44  ;;  %8003 = vmatprep.mubr.bf16.mxu1 %v12501_v35  ;;  %v11655_v28 = vld [vmem:[%s15860_s1 + $0x1a84] ss:$24 sps:$4 sm:$0xff]   ;;  %v11653_v44 = vld [vmem:[%s15860_s1 + $0x1a80] ss:$24 sps:$4 sm:$0xff]  }
 0x386   :  { %8519 = vmatprep.mubr.bf16.mxu0 %v12501_v35  ;;  %v11595_v35 = vld [vmem:[%s15860_s1 + $0x18a4] ss:$24 sps:$4 sm:$0xff]  }
 0x387   :  { %7974 = vmatpush1.bf16.msra.mxu1 %v11578_v45  ;;  %v11658_v45 = vld [vmem:[%s15860_s1 + $0x1aac] ss:$24 sps:$4 sm:$0xff]  }
 0x388   :  { %8490 = vmatpush1.bf16.msra.mxu0 %v11581_v12  ;;  %7975 = vmatprep.subr.bf16.mxu1 %v11586_v26  ;;  %v11661_v12 = vld [vmem:[%s15860_s1 + $0x1ab4] ss:$24 sps:$4 sm:$0xff]   ;;  %v11656_v26 = vld [vmem:[%s15860_s1 + $0x1aa8] ss:$24 sps:$4 sm:$0xff]  }
 0x389   :  { %8491 = vmatprep.subr.bf16.mxu0 %v11589_v22  ;;  %v11659_v22 = vld [vmem:[%s15860_s1 + $0x1ab0] ss:$24 sps:$4 sm:$0xff]  }
 0x38b   :  { %7976 = vmatpush1.bf16.msra.mxu1 %v11584_v27  ;;  %v11664_v27 = vld [vmem:[%s15860_s1 + $0x1adc] ss:$24 sps:$4 sm:$0xff]  }
 0x38c   :  { %8492 = vmatpush1.bf16.msra.mxu0 %v11587_v20  ;;  %7977 = vmatprep.subr.bf16.mxu1 %v11592_v30  ;;  %v11667_v20 = vld [vmem:[%s15860_s1 + $0x1ae4] ss:$24 sps:$4 sm:$0xff]   ;;  %v11662_v30 = vld [vmem:[%s15860_s1 + $0x1ad8] ss:$24 sps:$4 sm:$0xff]  }
 0x38d   :  { %8493 = vmatprep.subr.bf16.mxu0 %v11595_v35  ;;  %v11665_v35 = vld [vmem:[%s15860_s1 + $0x1ae0] ss:$24 sps:$4 sm:$0xff]  }
 0x38f   :  { %7978 = vmatpush1.bf16.msra.mxu1 %v11590_v31  ;;  %v11670_v31 = vld [vmem:[%s15860_s1 + $0x1b0c] ss:$24 sps:$4 sm:$0xff]  }
 0x390   :  { %8494 = vmatpush1.bf16.msra.mxu0 %v11593_v36  ;;  %7979 = vmatprep.subr.bf16.mxu1 %v11598_v32  ;;  %v11673_v36 = vld [vmem:[%s15860_s1 + $0x1b14] ss:$24 sps:$4 sm:$0xff]   ;;  %v11668_v32 = vld [vmem:[%s15860_s1 + $0x1b08] ss:$24 sps:$4 sm:$0xff]  }
 0x391   :  { %8495 = vmatprep.subr.bf16.mxu0 %v11601_v52  ;;  %v11671_v52 = vld [vmem:[%s15860_s1 + $0x1b10] ss:$24 sps:$4 sm:$0xff]  }
 0x393   :  { %7980 = vmatpush1.bf16.msra.mxu1 %v11596_v38  ;;  %v11676_v38 = vld [vmem:[%s15860_s1 + $0x1b3c] ss:$24 sps:$4 sm:$0xff]  }
 0x394   :  { %8496 = vmatpush1.bf16.msra.mxu0 %v11599_v39  ;;  %7981 = vmatprep.subr.bf16.mxu1 %v11604_v53  ;;  %v11679_v39 = vld [vmem:[%s15860_s1 + $0x1b44] ss:$24 sps:$4 sm:$0xff]   ;;  %v11674_v53 = vld [vmem:[%s15860_s1 + $0x1b38] ss:$24 sps:$4 sm:$0xff]  }
 0x395   :  { %8497 = vmatprep.subr.bf16.mxu0 %v11607_v54  ;;  %v11677_v54 = vld [vmem:[%s15860_s1 + $0x1b40] ss:$24 sps:$4 sm:$0xff]  }
 0x397   :  { %7982 = vmatpush1.bf16.msra.mxu1 %v11602_v6  ;;  %v11682_v6 = vld [vmem:[%s15860_s1 + $0x1b6c] ss:$24 sps:$4 sm:$0xff]  }
 0x398   :  { %8498 = vmatpush1.bf16.msra.mxu0 %v11605_v56  ;;  %7983 = vmatprep.subr.bf16.mxu1 %v11610_v59  ;;  %v11680_v56 = vld [vmem:[%s15860_s1 + $0x1b68] ss:$24 sps:$4 sm:$0xff]  }
 0x399   :  { %8499 = vmatprep.subr.bf16.mxu0 %v11613_v21  ;;  %v11683_v59 = vld [vmem:[%s15860_s1 + $0x1b70] ss:$24 sps:$4 sm:$0xff]   ;;  %v11688_v21 = vld [vmem:[%s15860_s1 + $0x1b9c] ss:$24 sps:$4 sm:$0xff]  }
 0x39b   :  { %7984 = vmatpush1.bf16.msra.mxu1 %v11608_v60  ;;  %v11686_v60 = vld [vmem:[%s15860_s1 + $0x1b98] ss:$24 sps:$4 sm:$0xff]  }
 0x39c   :  { %8500 = vmatpush1.bf16.msra.mxu0 %v11611_v61  ;;  %7985 = vmatprep.subr.bf16.mxu1 %v11616_v8  ;;  %v11689_v61 = vld [vmem:[%s15860_s1 + $0x1ba0] ss:$24 sps:$4 sm:$0xff]   ;;  %v11694_v8 = vld [vmem:[%s15860_s1 + $0x1bcc] ss:$24 sps:$4 sm:$0xff]  }
 0x39d   :  { %8501 = vmatprep.subr.bf16.mxu0 %v11619_v55  ;;  %v11697_v55 = vld [vmem:[%s15860_s1 + $0x1bd4] ss:$24 sps:$4 sm:$0xff]  }
 0x39f   :  { %7986 = vmatpush1.bf16.msra.mxu1 %v11614_v48  ;;  %v11692_v48 = vld [vmem:[%s15860_s1 + $0x1bc8] ss:$24 sps:$4 sm:$0xff]  }
 0x3a0   :  { %8502 = vmatpush1.bf16.msra.mxu0 %v11617_v62  ;;  %7987 = vmatprep.subr.bf16.mxu1 %v11622_v63  ;;  %v11695_v62 = vld [vmem:[%s15860_s1 + $0x1bd0] ss:$24 sps:$4 sm:$0xff]   ;;  %v11700_v63 = vld [vmem:[%s15860_s1 + $0x1bfc] ss:$24 sps:$4 sm:$0xff]  }
 0x3a1   :  { %8503 = vmatprep.subr.bf16.mxu0 %v11625_v50  ;;  %v11703_v50 = vld [vmem:[%s15860_s1 + $0x1c04] ss:$24 sps:$4 sm:$0xff]  }
 0x3a3   :  { %7988 = vmatpush1.bf16.msra.mxu1 %v11620_v0  ;;  %v11698_v0 = vld [vmem:[%s15860_s1 + $0x1bf8] ss:$24 sps:$4 sm:$0xff]  }
 0x3a4   :  { %8504 = vmatpush1.bf16.msra.mxu0 %v11623_v1  ;;  %7989 = vmatprep.subr.bf16.mxu1 %v11628_v33  ;;  %v11701_v1 = vld [vmem:[%s15860_s1 + $0x1c00] ss:$24 sps:$4 sm:$0xff]   ;;  %v11706_v33 = vld [vmem:[%s15860_s1 + $0x1c2c] ss:$24 sps:$4 sm:$0xff]  }
 0x3a5   :  { %8505 = vmatprep.subr.bf16.mxu0 %v11631_v10  ;;  %v11709_v10 = vld [vmem:[%s15860_s1 + $0x1c34] ss:$24 sps:$4 sm:$0xff]  }
 0x3a7   :  { %7990 = vmatpush1.bf16.msra.mxu1 %v11626_v3  ;;  %v11704_v3 = vld [vmem:[%s15860_s1 + $0x1c28] ss:$24 sps:$4 sm:$0xff]  }
 0x3a8   :  { %8506 = vmatpush1.bf16.msra.mxu0 %v11629_v4  ;;  %7991 = vmatprep.subr.bf16.mxu1 %v11634_v5  ;;  %v11707_v4 = vld [vmem:[%s15860_s1 + $0x1c30] ss:$24 sps:$4 sm:$0xff]   ;;  %v11712_v5 = vld [vmem:[%s15860_s1 + $0x1c5c] ss:$24 sps:$4 sm:$0xff]  }
 0x3a9   :  { %8507 = vmatprep.subr.bf16.mxu0 %v11637_v40  ;;  %v11715_v40 = vld [vmem:[%s15860_s1 + $0x1c64] ss:$24 sps:$4 sm:$0xff]  }
 0x3ab   :  { %7992 = vmatpush1.bf16.msra.mxu1 %v11632_v47  ;;  %v11710_v47 = vld [vmem:[%s15860_s1 + $0x1c58] ss:$24 sps:$4 sm:$0xff]  }
 0x3ac   :  { %8508 = vmatpush1.bf16.msra.mxu0 %v11635_v11  ;;  %7993 = vmatprep.subr.bf16.mxu1 %v11640_v14  ;;  %v11713_v11 = vld [vmem:[%s15860_s1 + $0x1c60] ss:$24 sps:$4 sm:$0xff]   ;;  %v11718_v14 = vld [vmem:[%s15860_s1 + $0x1c8c] ss:$24 sps:$4 sm:$0xff]  }
 0x3ad   :  { %8509 = vmatprep.subr.bf16.mxu0 %v11643_v16  ;;  %v11721_v16 = vld [vmem:[%s15860_s1 + $0x1c94] ss:$24 sps:$4 sm:$0xff]  }
 0x3af   :  { %7994 = vmatpush1.bf16.msra.mxu1 %v11638_v17  ;;  %v11716_v17 = vld [vmem:[%s15860_s1 + $0x1c88] ss:$24 sps:$4 sm:$0xff]  }
 0x3b0   :  { %8510 = vmatpush1.bf16.msra.mxu0 %v11641_v43  ;;  %7995 = vmatprep.subr.bf16.mxu1 %v11646_v18  ;;  %v11719_v43 = vld [vmem:[%s15860_s1 + $0x1c90] ss:$24 sps:$4 sm:$0xff]   ;;  %v11724_v18 = vld [vmem:[%s15860_s1 + $0x1cbc] ss:$24 sps:$4 sm:$0xff]  }
 0x3b1   :  { %8511 = vmatprep.subr.bf16.mxu0 %v11649_v19  ;;  %v11727_v19 = vld [vmem:[%s15860_s1 + $0x1cc4] ss:$24 sps:$4 sm:$0xff]  }
 0x3b3   :  { %7996 = vmatpush1.bf16.msra.mxu1 %v11644_v24  ;;  %v11722_v24 = vld [vmem:[%s15860_s1 + $0x1cb8] ss:$24 sps:$4 sm:$0xff]  }
 0x3b4   :  { %8512 = vmatpush1.bf16.msra.mxu0 %v11647_v25  ;;  %7997 = vmatprep.subr.bf16.mxu1 %v11652_v41  ;;  %v11725_v25 = vld [vmem:[%s15860_s1 + $0x1cc0] ss:$24 sps:$4 sm:$0xff]   ;;  %v11730_v41 = vld [vmem:[%s15860_s1 + $0x1cec] ss:$24 sps:$4 sm:$0xff]  }
 0x3b5   :  { %8513 = vmatprep.subr.bf16.mxu0 %v11655_v28  ;;  %v11733_v28 = vld [vmem:[%s15860_s1 + $0x1cf4] ss:$24 sps:$4 sm:$0xff]  }
 0x3b7   :  { %7998 = vmatpush1.bf16.msra.mxu1 %v11650_v42  ;;  %v11728_v42 = vld [vmem:[%s15860_s1 + $0x1ce8] ss:$24 sps:$4 sm:$0xff]  }
 0x3b8   :  { %8514 = vmatpush1.bf16.msra.mxu0 %v11653_v44  ;;  %7999 = vmatprep.subr.bf16.mxu1 %v11658_v45  ;;  %v11731_v44 = vld [vmem:[%s15860_s1 + $0x1cf0] ss:$24 sps:$4 sm:$0xff]   ;;  %v11736_v45 = vld [vmem:[%s15860_s1 + $0x1d1c] ss:$24 sps:$4 sm:$0xff]  }
 0x3b9   :  { %8515 = vmatprep.subr.bf16.mxu0 %v11661_v12  ;;  %v11739_v12 = vld [vmem:[%s15860_s1 + $0x1d24] ss:$24 sps:$4 sm:$0xff]  }
 0x3bb   :  { %8000 = vmatpush1.bf16.msra.mxu1 %v11656_v26  ;;  %v11734_v26 = vld [vmem:[%s15860_s1 + $0x1d18] ss:$24 sps:$4 sm:$0xff]  }
 0x3bc   :  { %8516 = vmatpush1.bf16.msra.mxu0 %v11659_v22  ;;  %8001 = vmatprep.subr.bf16.mxu1 %v11664_v27  ;;  %v11737_v22 = vld [vmem:[%s15860_s1 + $0x1d20] ss:$24 sps:$4 sm:$0xff]   ;;  %v11742_v27 = vld [vmem:[%s15860_s1 + $0x1d4c] ss:$24 sps:$4 sm:$0xff]  }
 0x3bd   :  { %8517 = vmatprep.subr.bf16.mxu0 %v11667_v20  ;;  %v11745_v20 = vld [vmem:[%s15860_s1 + $0x1d54] ss:$24 sps:$4 sm:$0xff]  }
 0x3bf   :  { %8002 = vmatpush1.bf16.msra.mxu1 %v11662_v30  ;;  %v11740_v30 = vld [vmem:[%s15860_s1 + $0x1d48] ss:$24 sps:$4 sm:$0xff]  }
 0x3c0   :  { %8518 = vmatpush1.bf16.msra.mxu0 %v11665_v35  ;;  %8014 = vmatprep.subr.bf16.mxu1 %v11670_v31  ;;  %v11743_v35 = vld [vmem:[%s15860_s1 + $0x1d50] ss:$24 sps:$4 sm:$0xff]   ;;  %v11748_v31 = vld [vmem:[%s15860_s1 + $0x1d7c] ss:$24 sps:$4 sm:$0xff]  }
 0x3c1   :  { %8530 = vmatprep.subr.bf16.mxu0 %v11673_v36  ;;  %v11751_v36 = vld [vmem:[%s15860_s1 + $0x1d84] ss:$24 sps:$4 sm:$0xff]  }
 0x3c2   :  { %8004 = vmatmul.mubr.bf16.vlgmr.msra.gmra.mrb[4].mxu1 %v12694_v49 }
 0x3c3   :  { %8520 = vmatmul.mubr.bf16.vlgmr.msra.gmra.mrb[4].mxu0 %v12694_v49  ;;  %8015 = vmatpush1.bf16.msra.mxu1 %v11668_v32  ;;  %v11685_v49 = vld [vmem:[%s15860_s1 + $0x1b74] ss:$24 sps:$4 sm:$0xff]   ;;  %v11746_v32 = vld [vmem:[%s15860_s1 + $0x1d78] ss:$24 sps:$4 sm:$0xff]  }
 0x3c4   :  { %8531 = vmatpush1.bf16.msra.mxu0 %v11671_v52  ;;  %8016 = vmatprep.subr.bf16.mxu1 %v11676_v38  ;;  %v11749_v52 = vld [vmem:[%s15860_s1 + $0x1d80] ss:$24 sps:$4 sm:$0xff]   ;;  %v11754_v38 = vld [vmem:[%s15860_s1 + $0x1dac] ss:$24 sps:$4 sm:$0xff]  }
 0x3c5   :  { %8532 = vmatprep.subr.bf16.mxu0 %v11679_v39  ;;  %8046 = vmatprep.mubr.bf16.mxu1 %v12718_v34  ;;  %v11757_v39 = vld [vmem:[%s15860_s1 + $0x1db4] ss:$24 sps:$4 sm:$0xff]  }
 0x3c6   :  { %8562 = vmatprep.mubr.bf16.mxu0 %v12718_v34  ;;  %v11691_v34 = vld [vmem:[%s15860_s1 + $0x1ba4] ss:$24 sps:$4 sm:$0xff]  }
 0x3c7   :  { %8017 = vmatpush1.bf16.msra.mxu1 %v11674_v53  ;;  %v11752_v53 = vld [vmem:[%s15860_s1 + $0x1da8] ss:$24 sps:$4 sm:$0xff]  }
 0x3c8   :  { %8533 = vmatpush1.bf16.msra.mxu0 %v11677_v54  ;;  %8018 = vmatprep.subr.bf16.mxu1 %v11682_v6  ;;  %v11755_v54 = vld [vmem:[%s15860_s1 + $0x1db0] ss:$24 sps:$4 sm:$0xff]   ;;  %v11760_v6 = vld [vmem:[%s15860_s1 + $0x1ddc] ss:$24 sps:$4 sm:$0xff]  }
 0x3c9   :  { %8534 = vmatprep.subr.bf16.mxu0 %v11685_v49  ;;  %v11763_v49 = vld [vmem:[%s15860_s1 + $0x1de4] ss:$24 sps:$4 sm:$0xff]  }
 0x3cb   :  { %8019 = vmatpush1.bf16.msra.mxu1 %v11680_v56  ;;  %v11758_v56 = vld [vmem:[%s15860_s1 + $0x1dd8] ss:$24 sps:$4 sm:$0xff]  }
 0x3cc   :  { %8535 = vmatpush1.bf16.msra.mxu0 %v11683_v59  ;;  %8020 = vmatprep.subr.bf16.mxu1 %v11688_v21  ;;  %v11761_v59 = vld [vmem:[%s15860_s1 + $0x1de0] ss:$24 sps:$4 sm:$0xff]   ;;  %v11766_v21 = vld [vmem:[%s15860_s1 + $0x1e0c] ss:$24 sps:$4 sm:$0xff]  }
 0x3cd   :  { %8536 = vmatprep.subr.bf16.mxu0 %v11691_v34  ;;  %v11769_v34 = vld [vmem:[%s15860_s1 + $0x1e14] ss:$24 sps:$4 sm:$0xff]  }
 0x3cf   :  { %8021 = vmatpush1.bf16.msra.mxu1 %v11686_v60  ;;  %v11764_v60 = vld [vmem:[%s15860_s1 + $0x1e08] ss:$24 sps:$4 sm:$0xff]  }
 0x3d0   :  { %8537 = vmatpush1.bf16.msra.mxu0 %v11689_v61  ;;  %8022 = vmatprep.subr.bf16.mxu1 %v11694_v8  ;;  %v11767_v61 = vld [vmem:[%s15860_s1 + $0x1e10] ss:$24 sps:$4 sm:$0xff]   ;;  %v11772_v8 = vld [vmem:[%s15860_s1 + $0x1e3c] ss:$24 sps:$4 sm:$0xff]  }
 0x3d1   :  { %8538 = vmatprep.subr.bf16.mxu0 %v11697_v55  ;;  %v11775_v55 = vld [vmem:[%s15860_s1 + $0x1e44] ss:$24 sps:$4 sm:$0xff]  }
 0x3d3   :  { %8023 = vmatpush1.bf16.msra.mxu1 %v11692_v48  ;;  %v11770_v48 = vld [vmem:[%s15860_s1 + $0x1e38] ss:$24 sps:$4 sm:$0xff]  }
 0x3d4   :  { %8539 = vmatpush1.bf16.msra.mxu0 %v11695_v62  ;;  %8024 = vmatprep.subr.bf16.mxu1 %v11700_v63  ;;  %v11773_v62 = vld [vmem:[%s15860_s1 + $0x1e40] ss:$24 sps:$4 sm:$0xff]   ;;  %v11778_v63 = vld [vmem:[%s15860_s1 + $0x1e6c] ss:$24 sps:$4 sm:$0xff]  }
 0x3d5   :  { %8540 = vmatprep.subr.bf16.mxu0 %v11703_v50  ;;  %v11776_v50 = vld [vmem:[%s15860_s1 + $0x1e68] ss:$24 sps:$4 sm:$0xff]  }
 0x3d7   :  { %8025 = vmatpush1.bf16.msra.mxu1 %v11698_v0  ;;  %v11779_v0 = vld [vmem:[%s15860_s1 + $0x1e70] ss:$24 sps:$4 sm:$0xff]  }
 0x3d8   :  { %8541 = vmatpush1.bf16.msra.mxu0 %v11701_v1  ;;  %8026 = vmatprep.subr.bf16.mxu1 %v11706_v33  ;;  %v11784_v1 = vld [vmem:[%s15860_s1 + $0x1e9c] ss:$24 sps:$4 sm:$0xff]   ;;  %v11782_v33 = vld [vmem:[%s15860_s1 + $0x1e98] ss:$24 sps:$4 sm:$0xff]  }
 0x3d9   :  { %8542 = vmatprep.subr.bf16.mxu0 %v11709_v10  ;;  %v11785_v10 = vld [vmem:[%s15860_s1 + $0x1ea0] ss:$24 sps:$4 sm:$0xff]  }
 0x3db   :  { %8027 = vmatpush1.bf16.msra.mxu1 %v11704_v3  ;;  %v11790_v3 = vld [vmem:[%s15860_s1 + $0x1ecc] ss:$24 sps:$4 sm:$0xff]  }
 0x3dc   :  { %8543 = vmatpush1.bf16.msra.mxu0 %v11707_v4  ;;  %8028 = vmatprep.subr.bf16.mxu1 %v11712_v5  ;;  %v11793_v4 = vld [vmem:[%s15860_s1 + $0x1ed4] ss:$24 sps:$4 sm:$0xff]   ;;  %v11788_v5 = vld [vmem:[%s15860_s1 + $0x1ec8] ss:$24 sps:$4 sm:$0xff]  }
 0x3dd   :  { %8544 = vmatprep.subr.bf16.mxu0 %v11715_v40  ;;  %v11791_v40 = vld [vmem:[%s15860_s1 + $0x1ed0] ss:$24 sps:$4 sm:$0xff]  }
 0x3df   :  { %8029 = vmatpush1.bf16.msra.mxu1 %v11710_v47  ;;  %v11796_v47 = vld [vmem:[%s15860_s1 + $0x1efc] ss:$24 sps:$4 sm:$0xff]  }
 0x3e0   :  { %8545 = vmatpush1.bf16.msra.mxu0 %v11713_v11  ;;  %8030 = vmatprep.subr.bf16.mxu1 %v11718_v14  ;;  %v11799_v11 = vld [vmem:[%s15860_s1 + $0x1f04] ss:$24 sps:$4 sm:$0xff]   ;;  %v11794_v14 = vld [vmem:[%s15860_s1 + $0x1ef8] ss:$24 sps:$4 sm:$0xff]  }
 0x3e1   :  { %8546 = vmatprep.subr.bf16.mxu0 %v11721_v16  ;;  %v11797_v16 = vld [vmem:[%s15860_s1 + $0x1f00] ss:$24 sps:$4 sm:$0xff]  }
 0x3e3   :  { %8031 = vmatpush1.bf16.msra.mxu1 %v11716_v17  ;;  %v11802_v17 = vld [vmem:[%s15860_s1 + $0x1f2c] ss:$24 sps:$4 sm:$0xff]  }
 0x3e4   :  { %8547 = vmatpush1.bf16.msra.mxu0 %v11719_v43  ;;  %8032 = vmatprep.subr.bf16.mxu1 %v11724_v18  ;;  %v11805_v43 = vld [vmem:[%s15860_s1 + $0x1f34] ss:$24 sps:$4 sm:$0xff]   ;;  %v11800_v18 = vld [vmem:[%s15860_s1 + $0x1f28] ss:$24 sps:$4 sm:$0xff]  }
 0x3e5   :  { %8548 = vmatprep.subr.bf16.mxu0 %v11727_v19  ;;  %v11803_v19 = vld [vmem:[%s15860_s1 + $0x1f30] ss:$24 sps:$4 sm:$0xff]  }
 0x3e7   :  { %8033 = vmatpush1.bf16.msra.mxu1 %v11722_v24  ;;  %v11808_v24 = vld [vmem:[%s15860_s1 + $0x1f5c] ss:$24 sps:$4 sm:$0xff]  }
 0x3e8   :  { %8549 = vmatpush1.bf16.msra.mxu0 %v11725_v25  ;;  %8034 = vmatprep.subr.bf16.mxu1 %v11730_v41  ;;  %v11811_v25 = vld [vmem:[%s15860_s1 + $0x1f64] ss:$24 sps:$4 sm:$0xff]   ;;  %v11806_v41 = vld [vmem:[%s15860_s1 + $0x1f58] ss:$24 sps:$4 sm:$0xff]  }
 0x3e9   :  { %8550 = vmatprep.subr.bf16.mxu0 %v11733_v28  ;;  %v11809_v28 = vld [vmem:[%s15860_s1 + $0x1f60] ss:$24 sps:$4 sm:$0xff]  }
 0x3eb   :  { %8035 = vmatpush1.bf16.msra.mxu1 %v11728_v42  ;;  %v11814_v42 = vld [vmem:[%s15860_s1 + $0x1f8c] ss:$24 sps:$4 sm:$0xff]  }
 0x3ec   :  { %8551 = vmatpush1.bf16.msra.mxu0 %v11731_v44  ;;  %8036 = vmatprep.subr.bf16.mxu1 %v11736_v45  ;;  %v11817_v44 = vld [vmem:[%s15860_s1 + $0x1f94] ss:$24 sps:$4 sm:$0xff]   ;;  %v11812_v45 = vld [vmem:[%s15860_s1 + $0x1f88] ss:$24 sps:$4 sm:$0xff]  }
 0x3ed   :  { %8552 = vmatprep.subr.bf16.mxu0 %v11739_v12  ;;  %v11815_v12 = vld [vmem:[%s15860_s1 + $0x1f90] ss:$24 sps:$4 sm:$0xff]  }
 0x3ef   :  { %8037 = vmatpush1.bf16.msra.mxu1 %v11734_v26  ;;  %v11820_v26 = vld [vmem:[%s15860_s1 + $0x1fbc] ss:$24 sps:$4 sm:$0xff]  }
 0x3f0   :  { %8553 = vmatpush1.bf16.msra.mxu0 %v11737_v22  ;;  %8038 = vmatprep.subr.bf16.mxu1 %v11742_v27  ;;  %v11823_v22 = vld [vmem:[%s15860_s1 + $0x1fc4] ss:$24 sps:$4 sm:$0xff]   ;;  %v11818_v27 = vld [vmem:[%s15860_s1 + $0x1fb8] ss:$24 sps:$4 sm:$0xff]  }
 0x3f1   :  { %8554 = vmatprep.subr.bf16.mxu0 %v11745_v20  ;;  %v11821_v20 = vld [vmem:[%s15860_s1 + $0x1fc0] ss:$24 sps:$4 sm:$0xff]  }
 0x3f3   :  { %8039 = vmatpush1.bf16.msra.mxu1 %v11740_v30  ;;  %v11826_v30 = vld [vmem:[%s15860_s1 + $0x1fec] ss:$24 sps:$4 sm:$0xff]  }
 0x3f4   :  { %8555 = vmatpush1.bf16.msra.mxu0 %v11743_v35  ;;  %8040 = vmatprep.subr.bf16.mxu1 %v11748_v31  ;;  %v11829_v35 = vld [vmem:[%s15860_s1 + $0x1ff4] ss:$24 sps:$4 sm:$0xff]   ;;  %v11824_v31 = vld [vmem:[%s15860_s1 + $0x1fe8] ss:$24 sps:$4 sm:$0xff]  }
 0x3f5   :  { %8556 = vmatprep.subr.bf16.mxu0 %v11751_v36  ;;  %v11827_v36 = vld [vmem:[%s15860_s1 + $0x1ff0] ss:$24 sps:$4 sm:$0xff]  }
 0x3f7   :  { %8041 = vmatpush1.bf16.msra.mxu1 %v11746_v32  ;;  %v11832_v32 = vld [vmem:[%s15860_s1 + $0x201c] ss:$24 sps:$4 sm:$0xff]  }
 0x3f8   :  { %8557 = vmatpush1.bf16.msra.mxu0 %v11749_v52  ;;  %8042 = vmatprep.subr.bf16.mxu1 %v11754_v38  ;;  %v11835_v52 = vld [vmem:[%s15860_s1 + $0x2024] ss:$24 sps:$4 sm:$0xff]   ;;  %v11830_v38 = vld [vmem:[%s15860_s1 + $0x2018] ss:$24 sps:$4 sm:$0xff]  }
 0x3f9   :  { %8558 = vmatprep.subr.bf16.mxu0 %v11757_v39  ;;  %v11833_v39 = vld [vmem:[%s15860_s1 + $0x2020] ss:$24 sps:$4 sm:$0xff]  }
 0x3fb   :  { %8043 = vmatpush1.bf16.msra.mxu1 %v11752_v53  ;;  %v11838_v53 = vld [vmem:[%s15860_s1 + $0x204c] ss:$24 sps:$4 sm:$0xff]  }
 0x3fc   :  { %8559 = vmatpush1.bf16.msra.mxu0 %v11755_v54  ;;  %8044 = vmatprep.subr.bf16.mxu1 %v11760_v6  ;;  %v11841_v54 = vld [vmem:[%s15860_s1 + $0x2054] ss:$24 sps:$4 sm:$0xff]   ;;  %v11836_v6 = vld [vmem:[%s15860_s1 + $0x2048] ss:$24 sps:$4 sm:$0xff]  }
 0x3fd   :  { %8560 = vmatprep.subr.bf16.mxu0 %v11763_v49  ;;  %v11839_v49 = vld [vmem:[%s15860_s1 + $0x2050] ss:$24 sps:$4 sm:$0xff]  }
 0x3ff   :  { %8045 = vmatpush1.bf16.msra.mxu1 %v11758_v56  ;;  %v11844_v56 = vld [vmem:[%s15860_s1 + $0x207c] ss:$24 sps:$4 sm:$0xff]  }
 0x400   :  { %8561 = vmatpush1.bf16.msra.mxu0 %v11761_v59  ;;  %8057 = vmatprep.subr.bf16.mxu1 %v11766_v21  ;;  %v11847_v59 = vld [vmem:[%s15860_s1 + $0x2084] ss:$24 sps:$4 sm:$0xff]   ;;  %v11842_v21 = vld [vmem:[%s15860_s1 + $0x2078] ss:$24 sps:$4 sm:$0xff]  }
 0x401   :  { %8573 = vmatprep.subr.bf16.mxu0 %v11769_v34  ;;  %v11845_v34 = vld [vmem:[%s15860_s1 + $0x2080] ss:$24 sps:$4 sm:$0xff]  }
 0x402   :  { %8047 = vmatmul.mubr.bf16.vlgmr.msra.gmra.mrb[4].mxu1 %v12926_v9 }
 0x403   :  { %8563 = vmatmul.mubr.bf16.vlgmr.msra.gmra.mrb[4].mxu0 %v12926_v9  ;;  %8058 = vmatpush1.bf16.msra.mxu1 %v11764_v60  ;;  %v11781_v9 = vld [vmem:[%s15860_s1 + $0x1e74] ss:$24 sps:$4 sm:$0xff]  }
 0x404   :  { %8574 = vmatpush1.bf16.msra.mxu0 %v11767_v61  ;;  %8059 = vmatprep.subr.bf16.mxu1 %v11772_v8  ;;  %v11850_v60 = vld [vmem:[%s15860_s1 + $0x20ac] ss:$24 sps:$4 sm:$0xff]   ;;  %v11848_v8 = vld [vmem:[%s15860_s1 + $0x20a8] ss:$24 sps:$4 sm:$0xff]  }
 0x405   :  { %8575 = vmatprep.subr.bf16.mxu0 %v11775_v55  ;;  %8089 = vmatprep.mubr.bf16.mxu1 %v12950_v51  ;;  %v11853_v61 = vld [vmem:[%s15860_s1 + $0x20b4] ss:$24 sps:$4 sm:$0xff]   ;;  %v11851_v55 = vld [vmem:[%s15860_s1 + $0x20b0] ss:$24 sps:$4 sm:$0xff]  }
 0x406   :  { %8605 = vmatprep.mubr.bf16.mxu0 %v12950_v51  ;;  %v11787_v51 = vld [vmem:[%s15860_s1 + $0x1ea4] ss:$24 sps:$4 sm:$0xff]  }
 0x407   :  { %8060 = vmatpush1.bf16.msra.mxu1 %v11770_v48  ;;  %v11856_v48 = vld [vmem:[%s15860_s1 + $0x20dc] ss:$24 sps:$4 sm:$0xff]  }
 0x408   :  { %8576 = vmatpush1.bf16.msra.mxu0 %v11773_v62  ;;  %8061 = vmatprep.subr.bf16.mxu1 %v11778_v63  ;;  %v11859_v62 = vld [vmem:[%s15860_s1 + $0x20e4] ss:$24 sps:$4 sm:$0xff]   ;;  %v11854_v63 = vld [vmem:[%s15860_s1 + $0x20d8] ss:$24 sps:$4 sm:$0xff]  }
 0x409   :  { %8577 = vmatprep.subr.bf16.mxu0 %v11781_v9  ;;  %v11857_v9 = vld [vmem:[%s15860_s1 + $0x20e0] ss:$24 sps:$4 sm:$0xff]  }
 0x40b   :  { %8062 = vmatpush1.bf16.msra.mxu1 %v11776_v50  ;;  %v11862_v50 = vld [vmem:[%s15860_s1 + $0x210c] ss:$24 sps:$4 sm:$0xff]  }
 0x40c   :  { %8578 = vmatpush1.bf16.msra.mxu0 %v11779_v0  ;;  %8063 = vmatprep.subr.bf16.mxu1 %v11784_v1  ;;  %v11865_v0 = vld [vmem:[%s15860_s1 + $0x2114] ss:$24 sps:$4 sm:$0xff]   ;;  %v11860_v1 = vld [vmem:[%s15860_s1 + $0x2108] ss:$24 sps:$4 sm:$0xff]  }
 0x40d   :  { %8579 = vmatprep.subr.bf16.mxu0 %v11787_v51  ;;  %v11863_v51 = vld [vmem:[%s15860_s1 + $0x2110] ss:$24 sps:$4 sm:$0xff]  }
 0x40f   :  { %8064 = vmatpush1.bf16.msra.mxu1 %v11782_v33  ;;  %v11868_v33 = vld [vmem:[%s15860_s1 + $0x213c] ss:$24 sps:$4 sm:$0xff]  }
 0x410   :  { %8580 = vmatpush1.bf16.msra.mxu0 %v11785_v10  ;;  %8065 = vmatprep.subr.bf16.mxu1 %v11790_v3  ;;  %v11871_v10 = vld [vmem:[%s15860_s1 + $0x2144] ss:$24 sps:$4 sm:$0xff]   ;;  %v11866_v3 = vld [vmem:[%s15860_s1 + $0x2138] ss:$24 sps:$4 sm:$0xff]  }
 0x411   :  { %8581 = vmatprep.subr.bf16.mxu0 %v11793_v4  ;;  %v11869_v4 = vld [vmem:[%s15860_s1 + $0x2140] ss:$24 sps:$4 sm:$0xff]  }
 0x413   :  { %8066 = vmatpush1.bf16.msra.mxu1 %v11788_v5  ;;  %v11874_v5 = vld [vmem:[%s15860_s1 + $0x216c] ss:$24 sps:$4 sm:$0xff]  }
 0x414   :  { %8582 = vmatpush1.bf16.msra.mxu0 %v11791_v40  ;;  %8067 = vmatprep.subr.bf16.mxu1 %v11796_v47  ;;  %v11872_v40 = vld [vmem:[%s15860_s1 + $0x2168] ss:$24 sps:$4 sm:$0xff]  }
 0x415   :  { %8583 = vmatprep.subr.bf16.mxu0 %v11799_v11  ;;  %v11875_v47 = vld [vmem:[%s15860_s1 + $0x2170] ss:$24 sps:$4 sm:$0xff]   ;;  %v11880_v11 = vld [vmem:[%s15860_s1 + $0x219c] ss:$24 sps:$4 sm:$0xff]  }
 0x417   :  { %8068 = vmatpush1.bf16.msra.mxu1 %v11794_v14  ;;  %v11878_v14 = vld [vmem:[%s15860_s1 + $0x2198] ss:$24 sps:$4 sm:$0xff]  }
 0x418   :  { %8584 = vmatpush1.bf16.msra.mxu0 %v11797_v16  ;;  %8069 = vmatprep.subr.bf16.mxu1 %v11802_v17  ;;  %v11881_v16 = vld [vmem:[%s15860_s1 + $0x21a0] ss:$24 sps:$4 sm:$0xff]   ;;  %v11886_v17 = vld [vmem:[%s15860_s1 + $0x21cc] ss:$24 sps:$4 sm:$0xff]  }
 0x419   :  { %8585 = vmatprep.subr.bf16.mxu0 %v11805_v43  ;;  %v11889_v43 = vld [vmem:[%s15860_s1 + $0x21d4] ss:$24 sps:$4 sm:$0xff]  }
 0x41b   :  { %8070 = vmatpush1.bf16.msra.mxu1 %v11800_v18  ;;  %v11884_v18 = vld [vmem:[%s15860_s1 + $0x21c8] ss:$24 sps:$4 sm:$0xff]  }
 0x41c   :  { %8586 = vmatpush1.bf16.msra.mxu0 %v11803_v19  ;;  %8071 = vmatprep.subr.bf16.mxu1 %v11808_v24  ;;  %v11887_v19 = vld [vmem:[%s15860_s1 + $0x21d0] ss:$24 sps:$4 sm:$0xff]   ;;  %v11892_v24 = vld [vmem:[%s15860_s1 + $0x21fc] ss:$24 sps:$4 sm:$0xff]  }
 0x41d   :  { %8587 = vmatprep.subr.bf16.mxu0 %v11811_v25  ;;  %v11895_v25 = vld [vmem:[%s15860_s1 + $0x2204] ss:$24 sps:$4 sm:$0xff]  }
 0x41f   :  { %8072 = vmatpush1.bf16.msra.mxu1 %v11806_v41  ;;  %v11890_v41 = vld [vmem:[%s15860_s1 + $0x21f8] ss:$24 sps:$4 sm:$0xff]  }
 0x420   :  { %8588 = vmatpush1.bf16.msra.mxu0 %v11809_v28  ;;  %8073 = vmatprep.subr.bf16.mxu1 %v11814_v42  ;;  %v11893_v28 = vld [vmem:[%s15860_s1 + $0x2200] ss:$24 sps:$4 sm:$0xff]   ;;  %v11898_v42 = vld [vmem:[%s15860_s1 + $0x222c] ss:$24 sps:$4 sm:$0xff]  }
 0x421   :  { %8589 = vmatprep.subr.bf16.mxu0 %v11817_v44  ;;  %v11901_v44 = vld [vmem:[%s15860_s1 + $0x2234] ss:$24 sps:$4 sm:$0xff]  }
 0x423   :  { %8074 = vmatpush1.bf16.msra.mxu1 %v11812_v45  ;;  %v11896_v45 = vld [vmem:[%s15860_s1 + $0x2228] ss:$24 sps:$4 sm:$0xff]  }
 0x424   :  { %8590 = vmatpush1.bf16.msra.mxu0 %v11815_v12  ;;  %8075 = vmatprep.subr.bf16.mxu1 %v11820_v26  ;;  %v11899_v12 = vld [vmem:[%s15860_s1 + $0x2230] ss:$24 sps:$4 sm:$0xff]   ;;  %v11904_v26 = vld [vmem:[%s15860_s1 + $0x225c] ss:$24 sps:$4 sm:$0xff]  }
 0x425   :  { %8591 = vmatprep.subr.bf16.mxu0 %v11823_v22  ;;  %v11907_v22 = vld [vmem:[%s15860_s1 + $0x2264] ss:$24 sps:$4 sm:$0xff]  }
 0x427   :  { %8076 = vmatpush1.bf16.msra.mxu1 %v11818_v27  ;;  %v11902_v27 = vld [vmem:[%s15860_s1 + $0x2258] ss:$24 sps:$4 sm:$0xff]  }
 0x428   :  { %8592 = vmatpush1.bf16.msra.mxu0 %v11821_v20  ;;  %8077 = vmatprep.subr.bf16.mxu1 %v11826_v30  ;;  %v11905_v20 = vld [vmem:[%s15860_s1 + $0x2260] ss:$24 sps:$4 sm:$0xff]   ;;  %v11910_v30 = vld [vmem:[%s15860_s1 + $0x228c] ss:$24 sps:$4 sm:$0xff]  }
 0x429   :  { %8593 = vmatprep.subr.bf16.mxu0 %v11829_v35  ;;  %v11913_v35 = vld [vmem:[%s15860_s1 + $0x2294] ss:$24 sps:$4 sm:$0xff]  }
 0x42b   :  { %8078 = vmatpush1.bf16.msra.mxu1 %v11824_v31  ;;  %v11908_v31 = vld [vmem:[%s15860_s1 + $0x2288] ss:$24 sps:$4 sm:$0xff]  }
 0x42c   :  { %8594 = vmatpush1.bf16.msra.mxu0 %v11827_v36  ;;  %8079 = vmatprep.subr.bf16.mxu1 %v11832_v32  ;;  %v11911_v36 = vld [vmem:[%s15860_s1 + $0x2290] ss:$24 sps:$4 sm:$0xff]   ;;  %v11916_v32 = vld [vmem:[%s15860_s1 + $0x22bc] ss:$24 sps:$4 sm:$0xff]  }
 0x42d   :  { %8595 = vmatprep.subr.bf16.mxu0 %v11835_v52  ;;  %v11919_v52 = vld [vmem:[%s15860_s1 + $0x22c4] ss:$24 sps:$4 sm:$0xff]  }
 0x42f   :  { %8080 = vmatpush1.bf16.msra.mxu1 %v11830_v38  ;;  %v11914_v38 = vld [vmem:[%s15860_s1 + $0x22b8] ss:$24 sps:$4 sm:$0xff]  }
 0x430   :  { %8596 = vmatpush1.bf16.msra.mxu0 %v11833_v39  ;;  %8081 = vmatprep.subr.bf16.mxu1 %v11838_v53  ;;  %v11917_v39 = vld [vmem:[%s15860_s1 + $0x22c0] ss:$24 sps:$4 sm:$0xff]   ;;  %v11922_v53 = vld [vmem:[%s15860_s1 + $0x22ec] ss:$24 sps:$4 sm:$0xff]  }
 0x431   :  { %8597 = vmatprep.subr.bf16.mxu0 %v11841_v54  ;;  %v11925_v54 = vld [vmem:[%s15860_s1 + $0x22f4] ss:$24 sps:$4 sm:$0xff]  }
 0x433   :  { %8082 = vmatpush1.bf16.msra.mxu1 %v11836_v6  ;;  %v11920_v6 = vld [vmem:[%s15860_s1 + $0x22e8] ss:$24 sps:$4 sm:$0xff]  }
 0x434   :  { %8598 = vmatpush1.bf16.msra.mxu0 %v11839_v49  ;;  %8083 = vmatprep.subr.bf16.mxu1 %v11844_v56  ;;  %v11923_v49 = vld [vmem:[%s15860_s1 + $0x22f0] ss:$24 sps:$4 sm:$0xff]   ;;  %v11928_v56 = vld [vmem:[%s15860_s1 + $0x231c] ss:$24 sps:$4 sm:$0xff]  }
 0x435   :  { %8599 = vmatprep.subr.bf16.mxu0 %v11847_v59  ;;  %v11931_v59 = vld [vmem:[%s15860_s1 + $0x2324] ss:$24 sps:$4 sm:$0xff]  }
 0x437   :  { %8084 = vmatpush1.bf16.msra.mxu1 %v11842_v21  ;;  %v11926_v21 = vld [vmem:[%s15860_s1 + $0x2318] ss:$24 sps:$4 sm:$0xff]  }
 0x438   :  { %8600 = vmatpush1.bf16.msra.mxu0 %v11845_v34  ;;  %8085 = vmatprep.subr.bf16.mxu1 %v11850_v60  ;;  %v11929_v34 = vld [vmem:[%s15860_s1 + $0x2320] ss:$24 sps:$4 sm:$0xff]   ;;  %v11934_v60 = vld [vmem:[%s15860_s1 + $0x234c] ss:$24 sps:$4 sm:$0xff]  }
 0x439   :  { %8601 = vmatprep.subr.bf16.mxu0 %v11853_v61  ;;  %v11937_v61 = vld [vmem:[%s15860_s1 + $0x2354] ss:$24 sps:$4 sm:$0xff]  }
 0x43b   :  { %8086 = vmatpush1.bf16.msra.mxu1 %v11848_v8  ;;  %v11932_v8 = vld [vmem:[%s15860_s1 + $0x2348] ss:$24 sps:$4 sm:$0xff]  }
 0x43c   :  { %8602 = vmatpush1.bf16.msra.mxu0 %v11851_v55  ;;  %8087 = vmatprep.subr.bf16.mxu1 %v11856_v48  ;;  %v11935_v55 = vld [vmem:[%s15860_s1 + $0x2350] ss:$24 sps:$4 sm:$0xff]   ;;  %v11940_v48 = vld [vmem:[%s15860_s1 + $0x237c] ss:$24 sps:$4 sm:$0xff]  }
 0x43d   :  { %8603 = vmatprep.subr.bf16.mxu0 %v11859_v62  ;;  %v11943_v62 = vld [vmem:[%s15860_s1 + $0x2384] ss:$24 sps:$4 sm:$0xff]  }
 0x43f   :  { %8088 = vmatpush1.bf16.msra.mxu1 %v11854_v63  ;;  %v11938_v63 = vld [vmem:[%s15860_s1 + $0x2378] ss:$24 sps:$4 sm:$0xff]  }
 0x440   :  { %8604 = vmatpush1.bf16.msra.mxu0 %v11857_v9  ;;  %8100 = vmatprep.subr.bf16.mxu1 %v11862_v50  ;;  %v11941_v9 = vld [vmem:[%s15860_s1 + $0x2380] ss:$24 sps:$4 sm:$0xff]   ;;  %v11946_v50 = vld [vmem:[%s15860_s1 + $0x23ac] ss:$24 sps:$4 sm:$0xff]  }
 0x441   :  { %8616 = vmatprep.subr.bf16.mxu0 %v11865_v0  ;;  %v11949_v0 = vld [vmem:[%s15860_s1 + $0x23b4] ss:$24 sps:$4 sm:$0xff]  }
 0x442   :  { %8090 = vmatmul.mubr.bf16.vlgmr.msra.gmra.mrb[4].mxu1 %v13162_v29 }
 0x443   :  { %8606 = vmatmul.mubr.bf16.vlgmr.msra.gmra.mrb[4].mxu0 %v13162_v29  ;;  %8101 = vmatpush1.bf16.msra.mxu1 %v11860_v1  ;;  %v11877_v29 = vld [vmem:[%s15860_s1 + $0x2174] ss:$24 sps:$4 sm:$0xff]   ;;  %v11944_v1 = vld [vmem:[%s15860_s1 + $0x23a8] ss:$24 sps:$4 sm:$0xff]  }
 0x444   :  { %8617 = vmatpush1.bf16.msra.mxu0 %v11863_v51  ;;  %8102 = vmatprep.subr.bf16.mxu1 %v11868_v33  ;;  %v11947_v51 = vld [vmem:[%s15860_s1 + $0x23b0] ss:$24 sps:$4 sm:$0xff]   ;;  %v11952_v33 = vld [vmem:[%s15860_s1 + $0x23dc] ss:$24 sps:$4 sm:$0xff]  }
 0x445   :  { %8618 = vmatprep.subr.bf16.mxu0 %v11871_v10  ;;  %8132 = vmatprep.mubr.bf16.mxu1 %v13182_v13  ;;  %v11955_v10 = vld [vmem:[%s15860_s1 + $0x23e4] ss:$24 sps:$4 sm:$0xff]  }
 0x446   :  { %8648 = vmatprep.mubr.bf16.mxu0 %v13182_v13  ;;  %v11883_v13 = vld [vmem:[%s15860_s1 + $0x21a4] ss:$24 sps:$4 sm:$0xff]  }
 0x447   :  { %8103 = vmatpush1.bf16.msra.mxu1 %v11866_v3  ;;  %v11950_v3 = vld [vmem:[%s15860_s1 + $0x23d8] ss:$24 sps:$4 sm:$0xff]  }
 0x448   :  { %8619 = vmatpush1.bf16.msra.mxu0 %v11869_v4  ;;  %8104 = vmatprep.subr.bf16.mxu1 %v11874_v5  ;;  %v11953_v4 = vld [vmem:[%s15860_s1 + $0x23e0] ss:$24 sps:$4 sm:$0xff]  }
 0x449   :  { %8620 = vmatprep.subr.bf16.mxu0 %v11877_v29  ;;  %v8659_v5 = vld [vmem:[%s15863_s3] sm:$0xff]  ;;  %v8662_v29 = vld [vmem:[%s15863_s3 + $0x18] sm:$0xff] }
 0x44b   :  { %8105 = vmatpush1.bf16.msra.mxu1 %v11872_v40  ;;  %v8665_v40 = vunpack.c.l.bf16 %v8659_v5 }
 0x44c   :  { %8621 = vmatpush1.bf16.msra.mxu0 %v11875_v47  ;;  %8106 = vmatprep.subr.bf16.mxu1 %v11880_v11  ;;  %v15752_v47 = vsub.s32 2, %v14004_v2  ;;  %v8666_v11 = vunpack.c.h.bf16 %v8659_v5 }
 0x44d   :  { %8622 = vmatprep.subr.bf16.mxu0 %v11883_v13  ;;  %v8671_v13 = vunpack.c.l.bf16 %v8662_v29 }
 0x44f   :  { %8107 = vmatpush1.bf16.msra.mxu1 %v11878_v14  ;;  %v8672_v14 = vunpack.c.h.bf16 %v8662_v29 }
 0x450   :  { %8623 = vmatpush1.bf16.msra.mxu0 %v11881_v16  ;;  %8108 = vmatprep.subr.bf16.mxu1 %v11886_v17  ;;  %v15755_v16 = vsub.s32 3, %v14004_v2  ;;  %v8660_v17 = vld [vmem:[%s15863_s3 + $0x8] sm:$0xff] }
 0x451   :  { %8624 = vmatprep.subr.bf16.mxu0 %v11889_v43  ;;  %v8677_v43 = vadd.f32 %v14059_v37, %v8665_v40  ;;  %v8663_v37 = vld [vmem:[%s15863_s3 + $0x20] sm:$0xff] }
 0x453   :  { %8109 = vmatpush1.bf16.msra.mxu1 %v11884_v18  ;;  %v11960_v18 = vld [vmem:[%s15862_s2] sm:$0x3f] }
 0x454   :  { %8625 = vmatpush1.bf16.msra.mxu0 %v11887_v19  ;;  %8110 = vmatprep.subr.bf16.mxu1 %v11892_v24  ;;  %v1212_v19 = vrot.slane %v11960_v18, %v15752_v47  ;;  %v15769_v24 = vsub.s32 5, %v14004_v2 }
 0x455   :  { %8626 = vmatprep.subr.bf16.mxu0 %v11895_v25  ;;  %v8678_v25 = vadd.f32 %v14067_v7, %v8666_v11  ;;  %v8661_v7 = vld [vmem:[%s15863_s3 + $0x10] sm:$0xff] }
 0x457   :  { %8111 = vmatpush1.bf16.msra.mxu1 %v11890_v41  ;;  %v15773_v41 = vadd.f32 %v14069_v57, %v8671_v13  ;;  %v8668_v57 = vunpack.c.h.bf16 %v8660_v17 }
 0x458   :  { %8627 = vmatpush1.bf16.msra.mxu0 %v11893_v28  ;;  %8112 = vmatprep.subr.bf16.mxu1 %v11898_v42  ;;  %v15776_v28 = vadd.f32 %v14071_v58, %v8672_v14  ;;  %v1216_v42 = vrot.slane %v11960_v18, %v15755_v16  ;;  %v1224_v58 = vrot.slane %v11960_v18, %v15769_v24 }
 0x459   :  { %8628 = vmatprep.subr.bf16.mxu0 %v11901_v44  ;;  %v8667_v44 = vunpack.c.l.bf16 %v8660_v17 }
 0x45b   :  { %8113 = vmatpush1.bf16.msra.mxu1 %v11896_v45 }
 0x45c   :  { %8629 = vmatpush1.bf16.msra.mxu0 %v11899_v12  ;;  %8114 = vmatprep.subr.bf16.mxu1 %v11904_v26 }
 0x45d   :  { %8630 = vmatprep.subr.bf16.mxu0 %v11907_v22 }
 0x45f   :  { %8115 = vmatpush1.bf16.msra.mxu1 %v11902_v27 }
 0x460   :  { %8631 = vmatpush1.bf16.msra.mxu0 %v11905_v20  ;;  %8116 = vmatprep.subr.bf16.mxu1 %v11910_v30  ;;  %v8673_v20 = vunpack.c.l.bf16 %v8663_v37  ;;  %v8664_v30 = vld [vmem:[%s15863_s3 + $0x28] sm:$0xff] }
 0x461   :  { %8632 = vmatprep.subr.bf16.mxu0 %v11913_v35  ;;  %v8689_v35 = vadd.f32 %v8678_v25, %v8677_v43 }
 0x463   :  { %8117 = vmatpush1.bf16.msra.mxu1 %v11908_v31  ;;  %v8696_v31 = vadd.f32 %v15776_v28, %v15773_v41 }
 0x464   :  { %8633 = vmatpush1.bf16.msra.mxu0 %v11911_v36  ;;  %8118 = vmatprep.subr.bf16.mxu1 %v11916_v32 }
 0x465   :  { %8634 = vmatprep.subr.bf16.mxu0 %v11919_v52 }
 0x467   :  { %8119 = vmatpush1.bf16.msra.mxu1 %v11914_v38  ;;  %v8674_v38 = vunpack.c.h.bf16 %v8663_v37 }
 0x468   :  { %8635 = vmatpush1.bf16.msra.mxu0 %v11917_v39  ;;  %8120 = vmatprep.subr.bf16.mxu1 %v11922_v53 }
 0x469   :  { %8636 = vmatprep.subr.bf16.mxu0 %v11925_v54  ;;  %v8669_v54 = vunpack.c.l.bf16 %v8661_v7 }
 0x46b   :  { %8121 = vmatpush1.bf16.msra.mxu1 %v11920_v6 }
 0x46c   :  { %8637 = vmatpush1.bf16.msra.mxu0 %v11923_v49  ;;  %8122 = vmatprep.subr.bf16.mxu1 %v11928_v56 }
 0x46d   :  { %8638 = vmatprep.subr.bf16.mxu0 %v11931_v59 }
 0x46f   :  { %8123 = vmatpush1.bf16.msra.mxu1 %v11926_v21  ;;  %v8675_v21 = vunpack.c.l.bf16 %v8664_v30 }
 0x470   :  { %8639 = vmatpush1.bf16.msra.mxu0 %v11929_v34  ;;  %8124 = vmatprep.subr.bf16.mxu1 %v11934_v60  ;;  %v8670_v60 = vunpack.c.h.bf16 %v8661_v7 }
 0x471   :  { %8640 = vmatprep.subr.bf16.mxu0 %v11937_v61 }
 0x473   :  { %8125 = vmatpush1.bf16.msra.mxu1 %v11932_v8 }
 0x474   :  { %8641 = vmatpush1.bf16.msra.mxu0 %v11935_v55  ;;  %8126 = vmatprep.subr.bf16.mxu1 %v11940_v48 }
 0x475   :  { %8642 = vmatprep.subr.bf16.mxu0 %v11943_v62 }
 0x477   :  { %8127 = vmatpush1.bf16.msra.mxu1 %v11938_v63 }
 0x478   :  { %8643 = vmatpush1.bf16.msra.mxu0 %v11941_v9  ;;  %8128 = vmatprep.subr.bf16.mxu1 %v11946_v50 }
 0x479   :  { %8644 = vmatprep.subr.bf16.mxu0 %v11949_v0 }
 0x47b   :  { %8129 = vmatpush1.bf16.msra.mxu1 %v11944_v1  ;;  %v8676_v1 = vunpack.c.h.bf16 %v8664_v30 }
 0x47c   :  { %8645 = vmatpush1.bf16.msra.mxu0 %v11947_v51  ;;  %8130 = vmatprep.subr.bf16.mxu1 %v11952_v33 }
 0x47d   :  { %8646 = vmatprep.subr.bf16.mxu0 %v11955_v10 }
 0x47f   :  { %8131 = vmatpush1.bf16.msra.mxu1 %v11950_v3 }
 0x480   :  { %8647 = vmatpush1.bf16.msra.mxu0 %v11953_v4 }
 0x482   :  { %8133 = vmatmul.mubr.bf16.vlgmr.msra.gmra.mrb[4].mxu1 %v13374_v23 }
 0x483   :  { %8649 = vmatmul.mubr.bf16.vlgmr.msra.gmra.mrb[4].mxu0 %v13374_v23  ;;  %v15758_v23 = vsub.s32 4, %v14004_v2 }
 0x485   :  { %v1220_v45 = vrot.slane %v11960_v18, %v15758_v23 }
 0x555   :  { %v8134_v12 = vpop.f32.mrb[4].mxu1 }
 0x556   :  { %v8650_v2 = vpop.f32.mrb[4].mxu0  ;;  %v10092_v26 = vadd.f32 %v8134_v12, %v1212_v19  ;;  %v8136_v22 = vpop.f32.mrb[5].mxu1 }
 0x557   :  { %v8652_v27 = vpop.f32.mrb[5].mxu0  ;;  %v10093_v36 = vadd.f32 %v8136_v22, %v1216_v42  ;;  %v8138_v32 = vpop.f32.mrb[6].mxu1  ;;  %v10096_v53 = vadd.f32 %v8650_v2, %v1220_v45 }
 0x558   :  { %v8654_v52 = vpop.f32.mrb[6].mxu0  ;;  %v8679_v39 = vadd.f32 %v10092_v26, %v8667_v44  ;;  %v10094_v6 = vadd.f32 %v8138_v32, %v1212_v19  ;;  %v8140_v49 = vpop.f32.mrb[7].mxu1  ;;  %v10097_v8 = vadd.f32 %v8652_v27, %v1224_v58 }
 0x559   :  { %v8656_v56 = vpop.f32.mrb[7].mxu0  ;;  %v8680_v59 = vadd.f32 %v10093_v36, %v8668_v57  ;;  %v10095_v34 = vadd.f32 %v8140_v49, %v1216_v42  ;;  %v10098_v48 = vadd.f32 %v8654_v52, %v1220_v45  ;;  %v8681_v63 = vadd.f32 %v10096_v53, %v8669_v54 }
 0x55a   :  { %v8690_v61 = vadd.f32 %v8689_v35, %v8679_v39  ;;  %v8685_v55 = vadd.f32 %v10094_v6, %v8673_v20  ;;  %v10099_v0 = vadd.f32 %v8656_v56, %v1224_v58  ;;  %v8682_v10 = vadd.f32 %v10097_v8, %v8670_v60 }
 0x55b   :  { %v8686_v62 = vadd.f32 %v10095_v34, %v8674_v38  ;;  %v8687_v51 = vadd.f32 %v10098_v48, %v8675_v21 }
 0x55c   :  { %v8697_v9 = vadd.f32 %v8696_v31, %v8685_v55  ;;  %v8691_v50 = vadd.f32 %v8690_v61, %v8680_v59  ;;  %v8688_v29 = vadd.f32 %v10099_v0, %v8676_v1 }
 0x55e   :  { %v8698_v33 = vadd.f32 %v8697_v9, %v8686_v62  ;;  %v8692_v3 = vadd.f32 %v8691_v50, %v8681_v63 }
 0x560   :  { %v8693_v4 = vadd.f32 %v8692_v3, %v8682_v10  ;;  %v8699_v5 = vadd.f32 %v8698_v33, %v8687_v51 }
 0x562   :  { %8694 = vadd.xlane.f32.xlu0 %v8693_v4  ;;  %v8700_v40 = vadd.f32 %v8699_v5, %v8688_v29 }
 0x566   :  { %8701 = vadd.xlane.f32.xlu0 %v8700_v40 }
 0x5ef   :  { %v8695_v11 = vpop.xlane.xlu0 %8694 }
 0x5f0   :  { %v8704_v13 = vmul.f32 0.0013020834, %v8695_v11 }
 0x5f2   :  { %v8706_v14 = vsub.f32 %v8677_v43, %v8704_v13  ;;  %v8707_v17 = vsub.f32 %v8678_v25, %v8704_v13  ;;  %v8708_v18 = vsub.f32 %v8679_v39, %v8704_v13  ;;  %v8709_v42 = vsub.f32 %v8680_v59, %v8704_v13 }
 0x5f3   :  { %v8702_v19 = vpop.xlane.xlu0 %8701  ;;  %v8710_v12 = vsub.f32 %v8681_v63, %v8704_v13  ;;  %v8711_v58 = vsub.f32 %v8682_v10, %v8704_v13  ;;  %v8806_v63 = vld [vmem:[%s15865_s5] sm:$0x3f] }
 0x5f4   :  { %v8705_v37 = vmul.f32 0.0013020834, %v8702_v19  ;;  %v8718_v44 = vmul.f32 %v8706_v14, %v8706_v14  ;;  %v8719_v45 = vmul.f32 %v8707_v17, %v8707_v17  ;;  %v8720_v2 = vmul.f32 %v8708_v18, %v8708_v18 }
 0x5f5   :  { %v8721_v43 = vmul.f32 %v8709_v42, %v8709_v42  ;;  %v8722_v35 = vmul.f32 %v8710_v12, %v8710_v12  ;;  %v8723_v32 = vmul.f32 %v8711_v58, %v8711_v58  ;;  %v8811_v50 = vrot.slane %v8806_v63, %v14022_v46 }
 0x5f6   :  { %v8730_v7 = vadd.f32 %v8719_v45, %v8718_v44  ;;  %v15793_v57 = vsub.f32 %v15773_v41, %v8705_v37  ;;  %v15796_v26 = vsub.f32 %v15776_v28, %v8705_v37  ;;  %v15798_v22 = vsub.f32 %v8685_v55, %v8705_v37 }
 0x5f7   :  { %v15800_v27 = vsub.f32 %v8686_v62, %v8705_v37  ;;  %v15806_v41 = vsub.f32 %v8687_v51, %v8705_v37  ;;  %v15810_v38 = vsub.f32 %v8688_v29, %v8705_v37  ;;  %v8762_v62 = vld [vmem:[%s15864_s4] sm:$0x3f]  ;;  %v8815_v1 = vrot.slane %v8806_v63, %v14031_v15 }
 0x5f8   :  { %v8731_v25 = vadd.f32 %v8730_v7, %v8720_v2  ;;  %v8724_v20 = vmul.f32 %v15793_v57, %v15793_v57  ;;  %v8725_v30 = vmul.f32 %v15796_v26, %v15796_v26  ;;  %v8726_v28 = vmul.f32 %v15798_v22, %v15798_v22 }
 0x5f9   :  { %v8727_v39 = vmul.f32 %v15800_v27, %v15800_v27  ;;  %v8728_v6 = vmul.f32 %v15806_v41, %v15806_v41  ;;  %v8729_v56 = vmul.f32 %v15810_v38, %v15810_v38  ;;  %v8767_v9 = vrot.slane %v8762_v62, %v14022_v46 }
 0x5fa   :  { %v8732_v31 = vadd.f32 %v8731_v25, %v8721_v43  ;;  %v8737_v36 = vadd.f32 %v8725_v30, %v8724_v20  ;;  %v8771_v0 = vrot.slane %v8762_v62, %v14031_v15  ;;  %v8775_v51 = vrot.slane %v8762_v62, %v15752_v47 }
 0x5fb   :  { %v8779_v33 = vrot.slane %v8762_v62, %v15755_v16  ;;  %v8819_v3 = vrot.slane %v8806_v63, %v15752_v47  ;;  %v8783_v4 = vrot.slane %v8762_v62, %v15758_v23  ;;  %v8823_v5 = vrot.slane %v8806_v63, %v15755_v16 }
 0x5fc   :  { %v8733_v52 = vadd.f32 %v8732_v31, %v8722_v35  ;;  %v8738_v53 = vadd.f32 %v8737_v36, %v8726_v28  ;;  %v8787_v29 = vrot.slane %v8762_v62, %v15769_v24  ;;  %v8827_v19 = vrot.slane %v8806_v63, %v15758_v23 }
 0x5fd   :  { %v8831_v15 = vrot.slane %v8806_v63, %v15769_v24 }
 0x5fe   :  { %v8734_v54 = vadd.f32 %v8733_v52, %v8723_v32  ;;  %v8739_v49 = vadd.f32 %v8738_v53, %v8727_v39 }
 0x600   :  { %8735 = vadd.xlane.f32.xlu1 %v8734_v54  ;;  %v8740_v59 = vadd.f32 %v8739_v49, %v8728_v6 }
 0x602   :  { %v8741_v21 = vadd.f32 %v8740_v59, %v8729_v56 }
 0x604   :  { %8742 = vadd.xlane.f32.xlu1 %v8741_v21 }
 0x68d   :  { %v8736_v34 = vpop.xlane.xlu1 %8735 }
 0x68e   :  { %v8744_v60 = vmul.f32 0.0013020834, %v8736_v34 }
 0x690   :  { %v8746_v61 = vadd.f32 1e-12, %v8744_v60 }
 0x691   :  { %v8743_v8 = vpop.xlane.xlu1 %8742 }
 0x692   :  { %11956 = vrsqrt.f32 %v8746_v61  ;;  %v8745_v55 = vmul.f32 0.0013020834, %v8743_v8 }
 0x694   :  { %v8747_v48 = vadd.f32 1e-12, %v8745_v55 }
 0x696   :  { %11958 = vrsqrt.f32 %v8747_v48 }
 0x69c   :  { %v11957_v10 = vpop.eup %11956 }
 0x69d   :  { %v8750_v40 = vmul.f32 %v11957_v10, %v8706_v14  ;;  %v8751_v11 = vmul.f32 %v11957_v10, %v8707_v17  ;;  %v8752_v46 = vmul.f32 %v11957_v10, %v8708_v18  ;;  %v8753_v13 = vmul.f32 %v11957_v10, %v8709_v42 }
 0x69e   :  { %v8754_v37 = vmul.f32 %v11957_v10, %v8710_v12  ;;  %v8755_v44 = vmul.f32 %v11957_v10, %v8711_v58 }
 0x69f   :  { %v8794_v45 = vmul.f32 %v8767_v9, %v8750_v40  ;;  %v8795_v2 = vmul.f32 %v8771_v0, %v8751_v11  ;;  %v8796_v7 = vmul.f32 %v8775_v51, %v8752_v46  ;;  %v8797_v47 = vmul.f32 %v8779_v33, %v8753_v13 }
 0x6a0   :  { %v11959_v43 = vpop.eup %11958  ;;  %v8798_v25 = vmul.f32 %v8783_v4, %v8754_v37  ;;  %v8799_v20 = vmul.f32 %v8787_v29, %v8755_v44 }
 0x6a1   :  { %v8838_v16 = vadd.f32 %v8811_v50, %v8794_v45  ;;  %v8839_v30 = vadd.f32 %v8815_v1, %v8795_v2  ;;  %v8840_v35 = vadd.f32 %v8819_v3, %v8796_v7  ;;  %v8841_v14 = vadd.f32 %v8823_v5, %v8797_v47 }
 0x6a2   :  { %v8842_v17 = vadd.f32 %v8827_v19, %v8798_v25  ;;  %v8843_v18 = vadd.f32 %v8831_v15, %v8799_v20  ;;  %v8756_v42 = vmul.f32 %v11959_v43, %v15793_v57  ;;  %v8757_v23 = vmul.f32 %v11959_v43, %v15796_v26 }
 0x6a3   :  { %v10078_v24 = vpack.c.bf16 %v8839_v30, %v8838_v16  ;;  %v10079_v12 = vpack.c.bf16 %v8841_v14, %v8840_v35  ;;  %v8758_v58 = vmul.f32 %v11959_v43, %v15798_v22  ;;  %v8759_v31 = vmul.f32 %v11959_v43, %v15800_v27 }
 0x6a4   :  { %v10080_v28 = vpack.c.bf16 %v8843_v18, %v8842_v17  ;;  %v8760_v36 = vmul.f32 %v11959_v43, %v15806_v41  ;;  %v8761_v32 = vmul.f32 %v11959_v43, %v15810_v38  ;;  %v8800_v52 = vmul.f32 %v8767_v9, %v8756_v42 }
 0x6a5   :  { %8886 = vst [vmem:[%s15866_s6] sm:$0xff] %v10078_v24  ;;  %8887 = vst [vmem:[%s15866_s6 + $0x8] sm:$0xff] %v10079_v12  ;;  %v8801_v57 = vmul.f32 %v8771_v0, %v8757_v23  ;;  %v8802_v26 = vmul.f32 %v8775_v51, %v8758_v58  ;;  %v8803_v39 = vmul.f32 %v8779_v33, %v8759_v31 }
 0x6a6   :  { %8888 = vst [vmem:[%s15866_s6 + $0x10] sm:$0xff] %v10080_v28  ;;  %v8804_v22 = vmul.f32 %v8783_v4, %v8760_v36  ;;  %v8805_v27 = vmul.f32 %v8787_v29, %v8761_v32  ;;  %v8844_v41 = vadd.f32 %v8811_v50, %v8800_v52 }
 0x6a7   :  { %v8845_v38 = vadd.f32 %v8815_v1, %v8801_v57  ;;  %v8846_v53 = vadd.f32 %v8819_v3, %v8802_v26  ;;  %v8847_v54 = vadd.f32 %v8823_v5, %v8803_v39 }
 0x6a8   :  { %v8848_v6 = vadd.f32 %v8827_v19, %v8804_v22  ;;  %v8849_v49 = vadd.f32 %v8831_v15, %v8805_v27 }
 0x6a9   :  { %v10081_v56 = vpack.c.bf16 %v8845_v38, %v8844_v41  ;;  %v10082_v59 = vpack.c.bf16 %v8847_v54, %v8846_v53 }
 0x6aa   :  { %v10083_v21 = vpack.c.bf16 %v8849_v49, %v8848_v6 }
 0x6ab   :  { %8889 = vst [vmem:[%s15866_s6 + $0x18] sm:$0xff] %v10081_v56  ;;  %8890 = vst [vmem:[%s15866_s6 + $0x20] sm:$0xff] %v10082_v59 }
 0x6ac   :  { %8891 = vst [vmem:[%s15866_s6 + $0x28] sm:$0xff] %v10083_v21 }

</bundles_post_ra>
